<compile_context>
chip_gen: v6e
topology: v6e:2x2x1
jax: 0.10.0
libtpu: 0.0.40
codegen_flags: <defaults>
</compile_context>

<pallas_src>
import functools

import jax
import jax.numpy as jnp
from jax.experimental import pallas as pl
from jax.experimental.pallas import tpu as pltpu

LATENT_SIZE = 100
OUTPUT_SIZE = 10
LEAKY_SLOPE = 0.01  # nn.LeakyReLU default


def _round_up(x, m):
    return ((x + m - 1) // m) * m


def bn_fold(gamma, beta, mean, var, eps=1e-5):
    scale = gamma / jnp.sqrt(var + eps)
    shift = beta - mean * scale
    return scale, shift


# ----------------------------------------------------------------------------
# Single-K-block GEMM kernel: bf16 A/B on the MXU, f32 epilogue
# (per-channel scale/shift = bias or folded BatchNorm) + LeakyReLU, bf16 store.
# Grid is 1-D over M tiles only (K fits in one block for every conv here).
# ----------------------------------------------------------------------------
def _gemm_kernel(a_ref, b_ref, scale_ref, shift_ref, o_ref, *, slope):
    acc = jnp.dot(a_ref[...], b_ref[...], preferred_element_type=jnp.float32)
    acc = acc * scale_ref[...] + shift_ref[...]
    acc = jnp.where(acc >= 0.0, acc, slope * acc)
    o_ref[...] = acc.astype(o_ref.dtype)


def conv_gemm(a, w_p, scale_p, shift_p, *, tm, slope=LEAKY_SLOPE):
    """a: (M, K) bf16 (unpadded); w_p: (Kp, Np) bf16 (pre-padded weights);
    scale_p/shift_p: (1, Np) f32.  Returns padded (Mp, Np) bf16."""
    M, K = a.shape
    Kp, Np = w_p.shape
    Mp = _round_up(M, tm)
    if Mp != M or Kp != K:
        a = jnp.pad(a, ((0, Mp - M), (0, Kp - K)))

    return pl.pallas_call(
        functools.partial(_gemm_kernel, slope=slope),
        out_shape=jax.ShapeDtypeStruct((Mp, Np), jnp.bfloat16),
        grid=(Mp // tm,),
        in_specs=[
            pl.BlockSpec((tm, Kp), lambda i: (i, 0)),
            pl.BlockSpec((Kp, Np), lambda i: (0, 0)),
            pl.BlockSpec((1, Np), lambda i: (0, 0)),
            pl.BlockSpec((1, Np), lambda i: (0, 0)),
        ],
        out_specs=pl.BlockSpec((tm, Np), lambda i: (i, 0)),
        compiler_params=pltpu.CompilerParams(
            dimension_semantics=("parallel",)),
    )(a, w_p, scale_p, shift_p)


# ----------------------------------------------------------------------------
# Fused tail kernel: conv3 (im2col GEMM), conv4 (16 accumulated per-position
# matmuls), conv5 + BN5, infer_z, infer_joint, final — all chained in VMEM.
# a3 rows are ordered (oh, ow, n_padded) so conv4's spatial reduction is a sum
# of contiguous 8-row blocks of h3 against 128-row blocks of w4 (no reshape).
# ----------------------------------------------------------------------------
def _tail_kernel(a3_ref, z_ref, w3_ref, s3_ref, t3_ref,
                 w4_ref, s4_ref, t4_ref, w5_ref, s5_ref, t5_ref,
                 wz1_ref, wz2_ref, wj1x_ref, wj1z_ref, bj1_ref,
                 wj2_ref, bj2_ref, wf_ref, bf_ref,
                 out_ref, feat_ref, *, slope, apply_sigmoid, batch_pad):
    def lrelu(v):
        return jnp.where(v >= 0.0, v, slope * v)

    def mm(a, w):
        return jnp.dot(a.astype(jnp.bfloat16), w,
                       preferred_element_type=jnp.float32)

    # conv3: (16*BP, 1664) @ (1664, 128) + BN3 + LeakyReLU
    h3 = lrelu(mm(a3_ref[...], w3_ref[...]) * s3_ref[...] + t3_ref[...])

    # conv4 (4x4 window over a 4x4 map -> 1x1 output): sum over 16 positions.
    acc4 = jnp.zeros((batch_pad, 256), jnp.float32)
    for p in range(16):
        acc4 = acc4 + mm(h3[p * batch_pad:(p + 1) * batch_pad, :],
                         w4_ref[pl.ds(p * 128, 128), :])
    h4 = lrelu(acc4 * s4_ref[...] + t4_ref[...])                      # (BP, 256)

    # conv5 (1x1) + BN5 + LeakyReLU  -> infer_x output
    out_x = lrelu(mm(h4, w5_ref[...]) * s5_ref[...] + t5_ref[...])    # (BP, 512)

    # infer_z: two bias-free 1x1 convs + LeakyReLU
    hz = lrelu(mm(z_ref[...], wz1_ref[...]))
    out_z = lrelu(mm(hz, wz2_ref[...]))                               # (BP, 512)

    # infer_joint on concat([out_x, out_z]) expressed as split matmuls
    f = lrelu(mm(out_x, wj1x_ref[...]) + mm(out_z, wj1z_ref[...])
              + bj1_ref[...])                                         # (BP, 1024)
    f = lrelu(mm(f, wj2_ref[...]) + bj2_ref[...])                     # (BP, 1024)

    # final 1x1 conv
    o = mm(f, wf_ref[...]) + bf_ref[...]
    if apply_sigmoid:
        o = jax.nn.sigmoid(o)

    feat_ref[...] = f
    out_ref[...] = o


def tail_fused(params, a3, z_p, *, batch_pad, slope=LEAKY_SLOPE):
    inputs = (a3, z_p,
              params["w3"], params["s3"], params["t3"],
              params["w4"], params["s4"], params["t4"],
              params["w5"], params["s5"], params["t5"],
              params["wz1"], params["wz2"],
              params["wj1x"], params["wj1z"], params["bj1"],
              params["wj2"], params["bj2"], params["wf"], params["bf"])
    in_specs = [pl.BlockSpec(v.shape, lambda i: (0, 0)) for v in inputs]

    kernel = functools.partial(_tail_kernel, slope=slope,
                               apply_sigmoid=(OUTPUT_SIZE == 1),
                               batch_pad=batch_pad)
    out, feat = pl.pallas_call(
        kernel,
        out_shape=(jax.ShapeDtypeStruct((batch_pad, 128), jnp.float32),
                   jax.ShapeDtypeStruct((batch_pad, 1024), jnp.float32)),
        grid=(1,),
        in_specs=in_specs,
        out_specs=(pl.BlockSpec((batch_pad, 128), lambda i: (0, 0)),
                   pl.BlockSpec((batch_pad, 1024), lambda i: (0, 0))),
        compiler_params=pltpu.CompilerParams(vmem_limit_bytes=32 << 20),
    )(*inputs)
    return out, feat


# ----------------------------------------------------------------------------
# im2col (XLA side, bf16), (kh, kw, cin) column ordering.
# ----------------------------------------------------------------------------
def _im2col(x, kh, kw, stride):
    N, H, W, C = x.shape
    oh = (H - kh) // stride + 1
    ow = (W - kw) // stride + 1
    cols = []
    for i in range(kh):
        for j in range(kw):
            cols.append(x[:, i:i + stride * (oh - 1) + 1:stride,
                          j:j + stride * (ow - 1) + 1:stride, :])
    return jnp.concatenate(cols, axis=-1), oh, ow


# ----------------------------------------------------------------------------
# Parameters: synthetic raw weights (PyTorch layout) + one-time kernel layout.
# ----------------------------------------------------------------------------
def init_params(key):
    ks = iter(jax.random.split(key, 40))

    def w(shape, s=0.05):
        return jax.random.normal(next(ks), shape, jnp.float32) * s

    def bn(c):
        gamma = 1.0 + 0.1 * jax.random.normal(next(ks), (c,), jnp.float32)
        beta = 0.1 * jax.random.normal(next(ks), (c,), jnp.float32)
        mean = 0.1 * jax.random.normal(next(ks), (c,), jnp.float32)
        var = jnp.abs(jax.random.normal(next(ks), (c,), jnp.float32)) + 0.5
        return bn_fold(gamma, beta, mean, var)

    p = {}
    p["w1"], p["b1"] = w((32, 1, 5, 5)), w((32,))
    p["w2"], p["bn2"] = w((64, 32, 4, 4)), bn(64)
    p["w3"], p["bn3"] = w((128, 64, 5, 5)), bn(128)
    p["w4"], p["bn4"] = w((256, 128, 4, 4)), bn(256)
    p["w5"], p["bn5"] = w((512, 256, 1, 1)), bn(512)
    p["wz1"] = w((512, LATENT_SIZE, 1, 1))
    p["wz2"] = w((512, 512, 1, 1))
    p["wj1"], p["bj1"] = w((1024, 1024, 1, 1)), w((1024,))
    p["wj2"], p["bj2"] = w((1024, 1024, 1, 1)), w((1024,))
    p["wf"], p["bf"] = w((OUTPUT_SIZE, 1024, 1, 1)), w((OUTPUT_SIZE,))
    return p


def prepare_params(raw):
    """One-time weight re-layout: (Cout,Cin,KH,KW) -> (KH*KW*Cin, Cout) bf16
    with lane padding, folded BN scale/shift as (1, Np) f32, wj1 split."""
    def conv_mat(w, k_pad=None, n_pad=None):
        co, ci, kh, kw = w.shape
        k = kh * kw * ci
        m = jnp.transpose(w, (2, 3, 1, 0)).reshape(k, co)
        kp = k if k_pad is None else k_pad
        npad = co if n_pad is None else n_pad
        return jnp.pad(m, ((0, kp - k), (0, npad - co))).astype(jnp.bfloat16)

    def vec(v, n_pad=None):
        n = v.shape[0]
        npad = n if n_pad is None else n_pad
        return jnp.pad(v.reshape(1, n).astype(jnp.float32),
                       ((0, 0), (0, npad - n)))

    p = {}
    # conv1: bias only (scale=1, shift=b1)
    p["w1"] = conv_mat(raw["w1"], k_pad=128, n_pad=128)          # (128, 128)
    p["s1"] = vec(jnp.ones((32,), jnp.float32), 128)
    p["t1"] = vec(raw["b1"], 128)
    # conv2 + BN2
    s, t = raw["bn2"]
    p["w2"] = conv_mat(raw["w2"], n_pad=128)                     # (512, 128)
    p["s2"], p["t2"] = vec(s, 128), vec(t, 128)
    # conv3 + BN3
    s, t = raw["bn3"]
    p["w3"] = conv_mat(raw["w3"], k_pad=1664)                    # (1664, 128)
    p["s3"], p["t3"] = vec(s), vec(t)
    # conv4 + BN4
    s, t = raw["bn4"]
    p["w4"] = conv_mat(raw["w4"])                                # (2048, 256)
    p["s4"], p["t4"] = vec(s), vec(t)
    # conv5 + BN5
    s, t = raw["bn5"]
    p["w5"] = conv_mat(raw["w5"])                                # (256, 512)
    p["s5"], p["t5"] = vec(s), vec(t)
    # infer_z
    p["wz1"] = conv_mat(raw["wz1"], k_pad=128)                   # (128, 512)
    p["wz2"] = conv_mat(raw["wz2"])                               # (512, 512)
    # infer_joint (split over the concat: rows 0..511 -> out_x, 512..1023 -> out_z)
    wj1 = conv_mat(raw["wj1"])                                    # (1024, 1024)
    p["wj1x"], p["wj1z"] = wj1[:512, :], wj1[512:, :]
    p["bj1"] = vec(raw["bj1"])
    p["wj2"] = conv_mat(raw["wj2"])
    p["bj2"] = vec(raw["bj2"])
    # final
    p["wf"] = conv_mat(raw["wf"], n_pad=128)                      # (1024, 128)
    p["bf"] = vec(raw["bf"], 128)
    return p


# ----------------------------------------------------------------------------
# Forward pass (eval semantics of Discriminator.forward)
# ----------------------------------------------------------------------------
def discriminator_forward(params, x, z):
    N = x.shape[0]
    BP = 8  # batch padded to one full f32 sublane group for the fused tail

    # Single layout change at the boundary; NHWC bf16 afterwards.
    h = jnp.transpose(x, (0, 2, 3, 1)).astype(jnp.bfloat16)

    # conv1 (5x5, stride 1) + bias + LeakyReLU
    p1, oh, ow = _im2col(h, 5, 5, 1)
    a1 = p1.reshape(N * oh * ow, 5 * 5 * 1)
    o1 = conv_gemm(a1, params["w1"], params["s1"], params["t1"], tm=192)
    h = o1[:N * oh * ow, :32].reshape(N, oh, ow, 32)

    # conv2 (4x4, stride 2) + BN2 + LeakyReLU
    p2, oh, ow = _im2col(h, 4, 4, 2)
    a2 = p2.reshape(N * oh * ow, 4 * 4 * 32)
    o2 = conv_gemm(a2, params["w2"], params["s2"], params["t2"], tm=128)
    h = o2[:N * oh * ow, :64].reshape(N, oh, ow, 64)

    # conv3 im2col, rows ordered (oh, ow, n_padded) for the fused tail's conv4
    p3, oh, ow = _im2col(h, 5, 5, 2)
    assert oh == 4 and ow == 4, (oh, ow)          # geometry required by conv4
    p3 = jnp.transpose(p3, (1, 2, 0, 3))          # (4, 4, N, 1600)
    p3 = jnp.pad(p3, ((0, 0), (0, 0), (0, BP - N), (0, 1664 - 1600)))
    a3 = p3.reshape(oh * ow * BP, 1664)           # (128, 1664) bf16

    z_flat = z.reshape(N, -1).astype(jnp.bfloat16)
    z_p = jnp.pad(z_flat, ((0, BP - N), (0, 128 - LATENT_SIZE)))

    # Fused tail: conv3, conv4, conv5+BN5, infer_z, infer_joint, final.
    out, feat = tail_fused(params, a3, z_p, batch_pad=BP)

    # Equivalent to torch's output.squeeze() of the trailing 1x1 spatial dims
    # (kept as (N, OUTPUT_SIZE) to avoid squeezing the batch dim when N == 1).
    return out[:N, :OUTPUT_SIZE], feat[:N, :]


# ----------------------------------------------------------------------------
if __name__ == "__main__":
    key = jax.random.PRNGKey(0)
    kp, kx, kz = jax.random.split(key, 3)

    raw_params = init_params(kp)
    params = prepare_params(raw_params)   # one-time weight re-layout

    # 28x28 required by the conv stack geometry (28 -> 24 -> 11 -> 4 -> 1).
    x = jax.random.normal(kx, (2, 1, 28, 28), jnp.float32)
    z = jax.random.normal(kz, (2, LATENT_SIZE, 1, 1), jnp.float32)

    fwd = jax.jit(discriminator_forward)
    output, features = fwd(params, x, z)
    jax.block_until_ready((output, features))

    assert output.shape == (2, OUTPUT_SIZE), output.shape
    assert features.shape == (2, 1024), features.shape
    assert bool(jnp.all(jnp.isfinite(output)))
    assert bool(jnp.all(jnp.isfinite(features)))
    print("KERNEL_OK")
</pallas_src>

<mosaic_0001>
module attributes {stable_mosaic.version = 11 : i64} {
  func.func @_gemm_kernel(%arg0: i32, %arg1: memref<192x128xbf16, #tpu.memory_space<vmem>>, %arg2: memref<128x128xbf16, #tpu.memory_space<vmem>>, %arg3: memref<1x128xf32, #tpu.memory_space<vmem>>, %arg4: memref<1x128xf32, #tpu.memory_space<vmem>>, %arg5: memref<192x128xbf16, #tpu.memory_space<vmem>>) attributes {dimension_semantics = [#tpu.dimension_semantics<parallel>], iteration_bounds = array<i64: 6>, scalar_prefetch = 0 : i64, scratch_operands = 0 : i64, tpu.core_type = #tpu.core_type<tc>, window_params = [{transform_indices = @transform_0, window_bounds = array<i64: 192, 128>}, {pipeline_mode = #tpu.pipeline_mode<synchronous>, transform_indices = @transform_1, window_bounds = array<i64: 128, 128>}, {pipeline_mode = #tpu.pipeline_mode<synchronous>, transform_indices = @transform_2, window_bounds = array<i64: 1, 128>}, {pipeline_mode = #tpu.pipeline_mode<synchronous>, transform_indices = @transform_3, window_bounds = array<i64: 1, 128>}, {transform_indices = @transform_4, window_bounds = array<i64: 192, 128>}]} {
    %c0 = arith.constant 0 : index
    %c0_0 = arith.constant 0 : index
    %0 = vector.load %arg1[%c0, %c0_0] : memref<192x128xbf16, #tpu.memory_space<vmem>>, vector<192x128xbf16>
    %c0_1 = arith.constant 0 : index
    %c0_2 = arith.constant 0 : index
    %1 = vector.load %arg2[%c0_1, %c0_2] : memref<128x128xbf16, #tpu.memory_space<vmem>>, vector<128x128xbf16>
    %cst = arith.constant dense<0.000000e+00> : vector<192x128xf32>
    %2 = tpu.matmul %0, %1, %cst {dimension_numbers = #tpu.dot_dimension_numbers<[1], [0], [0], [1], [0, 0, 1, 1], [], []>} : vector<192x128xbf16>, vector<128x128xbf16>, vector<192x128xf32> -> vector<192x128xf32>
    %c0_3 = arith.constant 0 : index
    %c0_4 = arith.constant 0 : index
    %3 = vector.load %arg3[%c0_3, %c0_4] : memref<1x128xf32, #tpu.memory_space<vmem>>, vector<1x128xf32>
    %4 = vector.broadcast %3 : vector<1x128xf32> to vector<192x128xf32>
    %5 = arith.mulf %2, %4 : vector<192x128xf32>
    %c0_5 = arith.constant 0 : index
    %c0_6 = arith.constant 0 : index
    %6 = vector.load %arg4[%c0_5, %c0_6] : memref<1x128xf32, #tpu.memory_space<vmem>>, vector<1x128xf32>
    %7 = vector.broadcast %6 : vector<1x128xf32> to vector<192x128xf32>
    %8 = arith.addf %5, %7 : vector<192x128xf32>
    %cst_7 = arith.constant 0.000000e+00 : f32
    %9 = vector.broadcast %cst_7 : f32 to vector<192x128xf32>
    %10 = arith.cmpf oge, %8, %9 : vector<192x128xf32>
    %cst_8 = arith.constant 0.00999999977 : f32
    %11 = vector.broadcast %cst_8 : f32 to vector<192x128xf32>
    %12 = arith.mulf %11, %8 : vector<192x128xf32>
    %13 = arith.select %10, %8, %12 : vector<192x128xi1>, vector<192x128xf32>
    %14 = arith.truncf %13 : vector<192x128xf32> to vector<192x128xbf16>
    %c0_9 = arith.constant 0 : index
    %c0_10 = arith.constant 0 : index
    %15 = vector.load %arg5[%c0_9, %c0_10] : memref<192x128xbf16, #tpu.memory_space<vmem>>, vector<192x128xbf16>
    tpu.vector_store %arg5[%c0_9, %c0_10], %14 {strides = array<i32>} : memref<192x128xbf16, #tpu.memory_space<vmem>>, vector<192x128xbf16>,
    return
  }
  func.func @transform_0(%arg0: i32) -> (i32, i32) {
    %c0_i32 = arith.constant 0 : i32
    %c0_i32_0 = arith.constant 0 : i32
    return %arg0, %c0_i32 : i32, i32
  }
  func.func @transform_1(%arg0: i32) -> (i32, i32) {
    %c0_i32 = arith.constant 0 : i32
    %c0_i32_0 = arith.constant 0 : i32
    %c0_i32_1 = arith.constant 0 : i32
    return %c0_i32, %c0_i32_0 : i32, i32
  }
  func.func @transform_2(%arg0: i32) -> (i32, i32) {
    %c0_i32 = arith.constant 0 : i32
    %c0_i32_0 = arith.constant 0 : i32
    %c0_i32_1 = arith.constant 0 : i32
    return %c0_i32, %c0_i32_0 : i32, i32
  }
  func.func @transform_3(%arg0: i32) -> (i32, i32) {
    %c0_i32 = arith.constant 0 : i32
    %c0_i32_0 = arith.constant 0 : i32
    %c0_i32_1 = arith.constant 0 : i32
    return %c0_i32, %c0_i32_0 : i32, i32
  }
  func.func @transform_4(%arg0: i32) -> (i32, i32) {
    %c0_i32 = arith.constant 0 : i32
    %c0_i32_0 = arith.constant 0 : i32
    return %arg0, %c0_i32 : i32, i32
  }
}

module attributes {stable_mosaic.version = 11 : i64} {
  func.func @_gemm_kernel(%arg0: i32, %arg1: memref<128x512xbf16, #tpu.memory_space<vmem>>, %arg2: memref<512x128xbf16, #tpu.memory_space<vmem>>, %arg3: memref<1x128xf32, #tpu.memory_space<vmem>>, %arg4: memref<1x128xf32, #tpu.memory_space<vmem>>, %arg5: memref<128x128xbf16, #tpu.memory_space<vmem>>) attributes {dimension_semantics = [#tpu.dimension_semantics<parallel>], iteration_bounds = array<i64: 2>, scalar_prefetch = 0 : i64, scratch_operands = 0 : i64, tpu.core_type = #tpu.core_type<tc>, window_params = [{transform_indices = @transform_0, window_bounds = array<i64: 128, 512>}, {pipeline_mode = #tpu.pipeline_mode<synchronous>, transform_indices = @transform_1, window_bounds = array<i64: 512, 128>}, {pipeline_mode = #tpu.pipeline_mode<synchronous>, transform_indices = @transform_2, window_bounds = array<i64: 1, 128>}, {pipeline_mode = #tpu.pipeline_mode<synchronous>, transform_indices = @transform_3, window_bounds = array<i64: 1, 128>}, {transform_indices = @transform_4, window_bounds = array<i64: 128, 128>}]} {
    %c0 = arith.constant 0 : index
    %c0_0 = arith.constant 0 : index
    %0 = vector.load %arg1[%c0, %c0_0] : memref<128x512xbf16, #tpu.memory_space<vmem>>, vector<128x512xbf16>
    %c0_1 = arith.constant 0 : index
    %c0_2 = arith.constant 0 : index
    %1 = vector.load %arg2[%c0_1, %c0_2] : memref<512x128xbf16, #tpu.memory_space<vmem>>, vector<512x128xbf16>
    %cst = arith.constant dense<0.000000e+00> : vector<128x128xf32>
    %2 = tpu.matmul %0, %1, %cst {dimension_numbers = #tpu.dot_dimension_numbers<[1], [0], [0], [1], [0, 0, 1, 1], [], []>} : vector<128x512xbf16>, vector<512x128xbf16>, vector<128x128xf32> -> vector<128x128xf32>
    %c0_3 = arith.constant 0 : index
    %c0_4 = arith.constant 0 : index
    %3 = vector.load %arg3[%c0_3, %c0_4] : memref<1x128xf32, #tpu.memory_space<vmem>>, vector<1x128xf32>
    %4 = vector.broadcast %3 : vector<1x128xf32> to vector<128x128xf32>
    %5 = arith.mulf %2, %4 : vector<128x128xf32>
    %c0_5 = arith.constant 0 : index
    %c0_6 = arith.constant 0 : index
    %6 = vector.load %arg4[%c0_5, %c0_6] : memref<1x128xf32, #tpu.memory_space<vmem>>, vector<1x128xf32>
    %7 = vector.broadcast %6 : vector<1x128xf32> to vector<128x128xf32>
    %8 = arith.addf %5, %7 : vector<128x128xf32>
    %cst_7 = arith.constant 0.000000e+00 : f32
    %9 = vector.broadcast %cst_7 : f32 to vector<128x128xf32>
    %10 = arith.cmpf oge, %8, %9 : vector<128x128xf32>
    %cst_8 = arith.constant 0.00999999977 : f32
    %11 = vector.broadcast %cst_8 : f32 to vector<128x128xf32>
    %12 = arith.mulf %11, %8 : vector<128x128xf32>
    %13 = arith.select %10, %8, %12 : vector<128x128xi1>, vector<128x128xf32>
    %14 = arith.truncf %13 : vector<128x128xf32> to vector<128x128xbf16>
    %c0_9 = arith.constant 0 : index
    %c0_10 = arith.constant 0 : index
    %15 = vector.load %arg5[%c0_9, %c0_10] : memref<128x128xbf16, #tpu.memory_space<vmem>>, vector<128x128xbf16>
    tpu.vector_store %arg5[%c0_9, %c0_10], %14 {strides = array<i32>} : memref<128x128xbf16, #tpu.memory_space<vmem>>, vector<128x128xbf16>,
    return
  }
  func.func @transform_0(%arg0: i32) -> (i32, i32) {
    %c0_i32 = arith.constant 0 : i32
    %c0_i32_0 = arith.constant 0 : i32
    return %arg0, %c0_i32 : i32, i32
  }
  func.func @transform_1(%arg0: i32) -> (i32, i32) {
    %c0_i32 = arith.constant 0 : i32
    %c0_i32_0 = arith.constant 0 : i32
    %c0_i32_1 = arith.constant 0 : i32
    return %c0_i32, %c0_i32_0 : i32, i32
  }
  func.func @transform_2(%arg0: i32) -> (i32, i32) {
    %c0_i32 = arith.constant 0 : i32
    %c0_i32_0 = arith.constant 0 : i32
    %c0_i32_1 = arith.constant 0 : i32
    return %c0_i32, %c0_i32_0 : i32, i32
  }
  func.func @transform_3(%arg0: i32) -> (i32, i32) {
    %c0_i32 = arith.constant 0 : i32
    %c0_i32_0 = arith.constant 0 : i32
    %c0_i32_1 = arith.constant 0 : i32
    return %c0_i32, %c0_i32_0 : i32, i32
  }
  func.func @transform_4(%arg0: i32) -> (i32, i32) {
    %c0_i32 = arith.constant 0 : i32
    %c0_i32_0 = arith.constant 0 : i32
    return %arg0, %c0_i32 : i32, i32
  }
}

module attributes {stable_mosaic.version = 11 : i64} {
  func.func @_tail_kernel(%arg0: i32, %arg1: memref<128x1664xbf16, #tpu.memory_space<vmem>>, %arg2: memref<8x128xbf16, #tpu.memory_space<vmem>>, %arg3: memref<1664x128xbf16, #tpu.memory_space<vmem>>, %arg4: memref<1x128xf32, #tpu.memory_space<vmem>>, %arg5: memref<1x128xf32, #tpu.memory_space<vmem>>, %arg6: memref<2048x256xbf16, #tpu.memory_space<vmem>>, %arg7: memref<1x256xf32, #tpu.memory_space<vmem>>, %arg8: memref<1x256xf32, #tpu.memory_space<vmem>>, %arg9: memref<256x512xbf16, #tpu.memory_space<vmem>>, %arg10: memref<1x512xf32, #tpu.memory_space<vmem>>, %arg11: memref<1x512xf32, #tpu.memory_space<vmem>>, %arg12: memref<128x512xbf16, #tpu.memory_space<vmem>>, %arg13: memref<512x512xbf16, #tpu.memory_space<vmem>>, %arg14: memref<512x1024xbf16, #tpu.memory_space<vmem>>, %arg15: memref<512x1024xbf16, #tpu.memory_space<vmem>>, %arg16: memref<1x1024xf32, #tpu.memory_space<vmem>>, %arg17: memref<1024x1024xbf16, #tpu.memory_space<vmem>>, %arg18: memref<1x1024xf32, #tpu.memory_space<vmem>>, %arg19: memref<1024x128xbf16, #tpu.memory_space<vmem>>, %arg20: memref<1x128xf32, #tpu.memory_space<vmem>>, %arg21: memref<8x128xf32, #tpu.memory_space<vmem>>, %arg22: memref<8x1024xf32, #tpu.memory_space<vmem>>) attributes {dimension_semantics = [#tpu.dimension_semantics<arbitrary>], iteration_bounds = array<i64: 1>, scalar_prefetch = 0 : i64, scratch_operands = 0 : i64, tpu.core_type = #tpu.core_type<tc>, window_params = [{pipeline_mode = #tpu.pipeline_mode<synchronous>, transform_indices = @transform_0, window_bounds = array<i64: 128, 1664>}, {pipeline_mode = #tpu.pipeline_mode<synchronous>, transform_indices = @transform_1, window_bounds = array<i64: 8, 128>}, {pipeline_mode = #tpu.pipeline_mode<synchronous>, transform_indices = @transform_2, window_bounds = array<i64: 1664, 128>}, {pipeline_mode = #tpu.pipeline_mode<synchronous>, transform_indices = @transform_3, window_bounds = array<i64: 1, 128>}, {pipeline_mode = #tpu.pipeline_mode<synchronous>, transform_indices = @transform_4, window_bounds = array<i64: 1, 128>}, {pipeline_mode = #tpu.pipeline_mode<synchronous>, transform_indices = @transform_5, window_bounds = array<i64: 2048, 256>}, {pipeline_mode = #tpu.pipeline_mode<synchronous>, transform_indices = @transform_6, window_bounds = array<i64: 1, 256>}, {pipeline_mode = #tpu.pipeline_mode<synchronous>, transform_indices = @transform_7, window_bounds = array<i64: 1, 256>}, {pipeline_mode = #tpu.pipeline_mode<synchronous>, transform_indices = @transform_8, window_bounds = array<i64: 256, 512>}, {pipeline_mode = #tpu.pipeline_mode<synchronous>, transform_indices = @transform_9, window_bounds = array<i64: 1, 512>}, {pipeline_mode = #tpu.pipeline_mode<synchronous>, transform_indices = @transform_10, window_bounds = array<i64: 1, 512>}, {pipeline_mode = #tpu.pipeline_mode<synchronous>, transform_indices = @transform_11, window_bounds = array<i64: 128, 512>}, {pipeline_mode = #tpu.pipeline_mode<synchronous>, transform_indices = @transform_12, window_bounds = array<i64: 512, 512>}, {pipeline_mode = #tpu.pipeline_mode<synchronous>, transform_indices = @transform_13, window_bounds = array<i64: 512, 1024>}, {pipeline_mode = #tpu.pipeline_mode<synchronous>, transform_indices = @transform_14, window_bounds = array<i64: 512, 1024>}, {pipeline_mode = #tpu.pipeline_mode<synchronous>, transform_indices = @transform_15, window_bounds = array<i64: 1, 1024>}, {pipeline_mode = #tpu.pipeline_mode<synchronous>, transform_indices = @transform_16, window_bounds = array<i64: 1024, 1024>}, {pipeline_mode = #tpu.pipeline_mode<synchronous>, transform_indices = @transform_17, window_bounds = array<i64: 1, 1024>}, {pipeline_mode = #tpu.pipeline_mode<synchronous>, transform_indices = @transform_18, window_bounds = array<i64: 1024, 128>}, {pipeline_mode = #tpu.pipeline_mode<synchronous>, transform_indices = @transform_19, window_bounds = array<i64: 1, 128>}, {pipeline_mode = #tpu.pipeline_mode<synchronous>, transform_indices = @transform_20, window_bounds = array<i64: 8, 128>}, {pipeline_mode = #tpu.pipeline_mode<synchronous>, transform_indices = @transform_21, window_bounds = array<i64: 8, 1024>}]} {
    %c0 = arith.constant 0 : index
    %c0_0 = arith.constant 0 : index
    %0 = vector.load %arg1[%c0, %c0_0] : memref<128x1664xbf16, #tpu.memory_space<vmem>>, vector<128x1664xbf16>
    %c0_1 = arith.constant 0 : index
    %c0_2 = arith.constant 0 : index
    %1 = vector.load %arg3[%c0_1, %c0_2] : memref<1664x128xbf16, #tpu.memory_space<vmem>>, vector<1664x128xbf16>
    %cst = arith.constant dense<0.000000e+00> : vector<128x128xf32>
    %2 = tpu.matmul %0, %1, %cst {dimension_numbers = #tpu.dot_dimension_numbers<[1], [0], [0], [1], [0, 0, 1, 1], [], []>} : vector<128x1664xbf16>, vector<1664x128xbf16>, vector<128x128xf32> -> vector<128x128xf32>
    %c0_3 = arith.constant 0 : index
    %c0_4 = arith.constant 0 : index
    %3 = vector.load %arg4[%c0_3, %c0_4] : memref<1x128xf32, #tpu.memory_space<vmem>>, vector<1x128xf32>
    %4 = vector.broadcast %3 : vector<1x128xf32> to vector<128x128xf32>
    %5 = arith.mulf %2, %4 : vector<128x128xf32>
    %c0_5 = arith.constant 0 : index
    %c0_6 = arith.constant 0 : index
    %6 = vector.load %arg5[%c0_5, %c0_6] : memref<1x128xf32, #tpu.memory_space<vmem>>, vector<1x128xf32>
    %7 = vector.broadcast %6 : vector<1x128xf32> to vector<128x128xf32>
    %8 = arith.addf %5, %7 : vector<128x128xf32>
    %cst_7 = arith.constant 0.000000e+00 : f32
    %9 = vector.broadcast %cst_7 : f32 to vector<128x128xf32>
    %10 = arith.cmpf oge, %8, %9 : vector<128x128xf32>
    %cst_8 = arith.constant 0.00999999977 : f32
    %11 = vector.broadcast %cst_8 : f32 to vector<128x128xf32>
    %12 = arith.mulf %11, %8 : vector<128x128xf32>
    %13 = arith.select %10, %8, %12 : vector<128x128xi1>, vector<128x128xf32>
    %cst_9 = arith.constant 0.000000e+00 : f32
    %14 = vector.broadcast %cst_9 : f32 to vector<8x256xf32>
    %15 = vector.extract_strided_slice %13 {offsets = [0, 0], sizes = [8, 128], strides = [1, 1]} : vector<128x128xf32> to vector<8x128xf32>
    %c0_10 = arith.constant 0 : index
    %c0_11 = arith.constant 0 : index
    %16 = vector.load %arg6[%c0_10, %c0_11] : memref<2048x256xbf16, #tpu.memory_space<vmem>>, vector<128x256xbf16>
    %17 = arith.truncf %15 : vector<8x128xf32> to vector<8x128xbf16>
    %cst_12 = arith.constant dense<0.000000e+00> : vector<8x256xf32>
    %18 = tpu.matmul %17, %16, %cst_12 {dimension_numbers = #tpu.dot_dimension_numbers<[1], [0], [0], [1], [0, 0, 1, 1], [], []>} : vector<8x128xbf16>, vector<128x256xbf16>, vector<8x256xf32> -> vector<8x256xf32>
    %19 = arith.addf %14, %18 : vector<8x256xf32>
    %20 = vector.extract_strided_slice %13 {offsets = [8, 0], sizes = [8, 128], strides = [1, 1]} : vector<128x128xf32> to vector<8x128xf32>
    %c128 = arith.constant 128 : index
    %c0_13 = arith.constant 0 : index
    %21 = vector.load %arg6[%c128, %c0_13] : memref<2048x256xbf16, #tpu.memory_space<vmem>>, vector<128x256xbf16>
    %22 = arith.truncf %20 : vector<8x128xf32> to vector<8x128xbf16>
    %cst_14 = arith.constant dense<0.000000e+00> : vector<8x256xf32>
    %23 = tpu.matmul %22, %21, %cst_14 {dimension_numbers = #tpu.dot_dimension_numbers<[1], [0], [0], [1], [0, 0, 1, 1], [], []>} : vector<8x128xbf16>, vector<128x256xbf16>, vector<8x256xf32> -> vector<8x256xf32>
    %24 = arith.addf %19, %23 : vector<8x256xf32>
    %25 = vector.extract_strided_slice %13 {offsets = [16, 0], sizes = [8, 128], strides = [1, 1]} : vector<128x128xf32> to vector<8x128xf32>
    %c256 = arith.constant 256 : index
    %c0_15 = arith.constant 0 : index
    %26 = vector.load %arg6[%c256, %c0_15] : memref<2048x256xbf16, #tpu.memory_space<vmem>>, vector<128x256xbf16>
    %27 = arith.truncf %25 : vector<8x128xf32> to vector<8x128xbf16>
    %cst_16 = arith.constant dense<0.000000e+00> : vector<8x256xf32>
    %28 = tpu.matmul %27, %26, %cst_16 {dimension_numbers = #tpu.dot_dimension_numbers<[1], [0], [0], [1], [0, 0, 1, 1], [], []>} : vector<8x128xbf16>, vector<128x256xbf16>, vector<8x256xf32> -> vector<8x256xf32>
    %29 = arith.addf %24, %28 : vector<8x256xf32>
    %30 = vector.extract_strided_slice %13 {offsets = [24, 0], sizes = [8, 128], strides = [1, 1]} : vector<128x128xf32> to vector<8x128xf32>
    %c384 = arith.constant 384 : index
    %c0_17 = arith.constant 0 : index
    %31 = vector.load %arg6[%c384, %c0_17] : memref<2048x256xbf16, #tpu.memory_space<vmem>>, vector<128x256xbf16>
    %32 = arith.truncf %30 : vector<8x128xf32> to vector<8x128xbf16>
    %cst_18 = arith.constant dense<0.000000e+00> : vector<8x256xf32>
    %33 = tpu.matmul %32, %31, %cst_18 {dimension_numbers = #tpu.dot_dimension_numbers<[1], [0], [0], [1], [0, 0, 1, 1], [], []>} : vector<8x128xbf16>, vector<128x256xbf16>, vector<8x256xf32> -> vector<8x256xf32>
    %34 = arith.addf %29, %33 : vector<8x256xf32>
    %35 = vector.extract_strided_slice %13 {offsets = [32, 0], sizes = [8, 128], strides = [1, 1]} : vector<128x128xf32> to vector<8x128xf32>
    %c512 = arith.constant 512 : index
    %c0_19 = arith.constant 0 : index
    %36 = vector.load %arg6[%c512, %c0_19] : memref<2048x256xbf16, #tpu.memory_space<vmem>>, vector<128x256xbf16>
    %37 = arith.truncf %35 : vector<8x128xf32> to vector<8x128xbf16>
    %cst_20 = arith.constant dense<0.000000e+00> : vector<8x256xf32>
    %38 = tpu.matmul %37, %36, %cst_20 {dimension_numbers = #tpu.dot_dimension_numbers<[1], [0], [0], [1], [0, 0, 1, 1], [], []>} : vector<8x128xbf16>, vector<128x256xbf16>, vector<8x256xf32> -> vector<8x256xf32>
    %39 = arith.addf %34, %38 : vector<8x256xf32>
    %40 = vector.extract_strided_slice %13 {offsets = [40, 0], sizes = [8, 128], strides = [1, 1]} : vector<128x128xf32> to vector<8x128xf32>
    %c640 = arith.constant 640 : index
    %c0_21 = arith.constant 0 : index
    %41 = vector.load %arg6[%c640, %c0_21] : memref<2048x256xbf16, #tpu.memory_space<vmem>>, vector<128x256xbf16>
    %42 = arith.truncf %40 : vector<8x128xf32> to vector<8x128xbf16>
    %cst_22 = arith.constant dense<0.000000e+00> : vector<8x256xf32>
    %43 = tpu.matmul %42, %41, %cst_22 {dimension_numbers = #tpu.dot_dimension_numbers<[1], [0], [0], [1], [0, 0, 1, 1], [], []>} : vector<8x128xbf16>, vector<128x256xbf16>, vector<8x256xf32> -> vector<8x256xf32>
    %44 = arith.addf %39, %43 : vector<8x256xf32>
    %45 = vector.extract_strided_slice %13 {offsets = [48, 0], sizes = [8, 128], strides = [1, 1]} : vector<128x128xf32> to vector<8x128xf32>
    %c768 = arith.constant 768 : index
    %c0_23 = arith.constant 0 : index
    %46 = vector.load %arg6[%c768, %c0_23] : memref<2048x256xbf16, #tpu.memory_space<vmem>>, vector<128x256xbf16>
    %47 = arith.truncf %45 : vector<8x128xf32> to vector<8x128xbf16>
    %cst_24 = arith.constant dense<0.000000e+00> : vector<8x256xf32>
    %48 = tpu.matmul %47, %46, %cst_24 {dimension_numbers = #tpu.dot_dimension_numbers<[1], [0], [0], [1], [0, 0, 1, 1], [], []>} : vector<8x128xbf16>, vector<128x256xbf16>, vector<8x256xf32> -> vector<8x256xf32>
    %49 = arith.addf %44, %48 : vector<8x256xf32>
    %50 = vector.extract_strided_slice %13 {offsets = [56, 0], sizes = [8, 128], strides = [1, 1]} : vector<128x128xf32> to vector<8x128xf32>
    %c896 = arith.constant 896 : index
    %c0_25 = arith.constant 0 : index
    %51 = vector.load %arg6[%c896, %c0_25] : memref<2048x256xbf16, #tpu.memory_space<vmem>>, vector<128x256xbf16>
    %52 = arith.truncf %50 : vector<8x128xf32> to vector<8x128xbf16>
    %cst_26 = arith.constant dense<0.000000e+00> : vector<8x256xf32>
    %53 = tpu.matmul %52, %51, %cst_26 {dimension_numbers = #tpu.dot_dimension_numbers<[1], [0], [0], [1], [0, 0, 1, 1], [], []>} : vector<8x128xbf16>, vector<128x256xbf16>, vector<8x256xf32> -> vector<8x256xf32>
    %54 = arith.addf %49, %53 : vector<8x256xf32>
    %55 = vector.extract_strided_slice %13 {offsets = [64, 0], sizes = [8, 128], strides = [1, 1]} : vector<128x128xf32> to vector<8x128xf32>
    %c1024 = arith.constant 1024 : index
    %c0_27 = arith.constant 0 : index
    %56 = vector.load %arg6[%c1024, %c0_27] : memref<2048x256xbf16, #tpu.memory_space<vmem>>, vector<128x256xbf16>
    %57 = arith.truncf %55 : vector<8x128xf32> to vector<8x128xbf16>
    %cst_28 = arith.constant dense<0.000000e+00> : vector<8x256xf32>
    %58 = tpu.matmul %57, %56, %cst_28 {dimension_numbers = #tpu.dot_dimension_numbers<[1], [0], [0], [1], [0, 0, 1, 1], [], []>} : vector<8x128xbf16>, vector<128x256xbf16>, vector<8x256xf32> -> vector<8x256xf32>
    %59 = arith.addf %54, %58 : vector<8x256xf32>
    %60 = vector.extract_strided_slice %13 {offsets = [72, 0], sizes = [8, 128], strides = [1, 1]} : vector<128x128xf32> to vector<8x128xf32>
    %c1152 = arith.constant 1152 : index
    %c0_29 = arith.constant 0 : index
    %61 = vector.load %arg6[%c1152, %c0_29] : memref<2048x256xbf16, #tpu.memory_space<vmem>>, vector<128x256xbf16>
    %62 = arith.truncf %60 : vector<8x128xf32> to vector<8x128xbf16>
    %cst_30 = arith.constant dense<0.000000e+00> : vector<8x256xf32>
    %63 = tpu.matmul %62, %61, %cst_30 {dimension_numbers = #tpu.dot_dimension_numbers<[1], [0], [0], [1], [0, 0, 1, 1], [], []>} : vector<8x128xbf16>, vector<128x256xbf16>, vector<8x256xf32> -> vector<8x256xf32>
    %64 = arith.addf %59, %63 : vector<8x256xf32>
    %65 = vector.extract_strided_slice %13 {offsets = [80, 0], sizes = [8, 128], strides = [1, 1]} : vector<128x128xf32> to vector<8x128xf32>
    %c1280 = arith.constant 1280 : index
    %c0_31 = arith.constant 0 : index
    %66 = vector.load %arg6[%c1280, %c0_31] : memref<2048x256xbf16, #tpu.memory_space<vmem>>, vector<128x256xbf16>
    %67 = arith.truncf %65 : vector<8x128xf32> to vector<8x128xbf16>
    %cst_32 = arith.constant dense<0.000000e+00> : vector<8x256xf32>
    %68 = tpu.matmul %67, %66, %cst_32 {dimension_numbers = #tpu.dot_dimension_numbers<[1], [0], [0], [1], [0, 0, 1, 1], [], []>} : vector<8x128xbf16>, vector<128x256xbf16>, vector<8x256xf32> -> vector<8x256xf32>
    %69 = arith.addf %64, %68 : vector<8x256xf32>
    %70 = vector.extract_strided_slice %13 {offsets = [88, 0], sizes = [8, 128], strides = [1, 1]} : vector<128x128xf32> to vector<8x128xf32>
    %c1408 = arith.constant 1408 : index
    %c0_33 = arith.constant 0 : index
    %71 = vector.load %arg6[%c1408, %c0_33] : memref<2048x256xbf16, #tpu.memory_space<vmem>>, vector<128x256xbf16>
    %72 = arith.truncf %70 : vector<8x128xf32> to vector<8x128xbf16>
    %cst_34 = arith.constant dense<0.000000e+00> : vector<8x256xf32>
    %73 = tpu.matmul %72, %71, %cst_34 {dimension_numbers = #tpu.dot_dimension_numbers<[1], [0], [0], [1], [0, 0, 1, 1], [], []>} : vector<8x128xbf16>, vector<128x256xbf16>, vector<8x256xf32> -> vector<8x256xf32>
    %74 = arith.addf %69, %73 : vector<8x256xf32>
    %75 = vector.extract_strided_slice %13 {offsets = [96, 0], sizes = [8, 128], strides = [1, 1]} : vector<128x128xf32> to vector<8x128xf32>
    %c1536 = arith.constant 1536 : index
    %c0_35 = arith.constant 0 : index
    %76 = vector.load %arg6[%c1536, %c0_35] : memref<2048x256xbf16, #tpu.memory_space<vmem>>, vector<128x256xbf16>
    %77 = arith.truncf %75 : vector<8x128xf32> to vector<8x128xbf16>
    %cst_36 = arith.constant dense<0.000000e+00> : vector<8x256xf32>
    %78 = tpu.matmul %77, %76, %cst_36 {dimension_numbers = #tpu.dot_dimension_numbers<[1], [0], [0], [1], [0, 0, 1, 1], [], []>} : vector<8x128xbf16>, vector<128x256xbf16>, vector<8x256xf32> -> vector<8x256xf32>
    %79 = arith.addf %74, %78 : vector<8x256xf32>
    %80 = vector.extract_strided_slice %13 {offsets = [104, 0], sizes = [8, 128], strides = [1, 1]} : vector<128x128xf32> to vector<8x128xf32>
    %c1664 = arith.constant 1664 : index
    %c0_37 = arith.constant 0 : index
    %81 = vector.load %arg6[%c1664, %c0_37] : memref<2048x256xbf16, #tpu.memory_space<vmem>>, vector<128x256xbf16>
    %82 = arith.truncf %80 : vector<8x128xf32> to vector<8x128xbf16>
    %cst_38 = arith.constant dense<0.000000e+00> : vector<8x256xf32>
    %83 = tpu.matmul %82, %81, %cst_38 {dimension_numbers = #tpu.dot_dimension_numbers<[1], [0], [0], [1], [0, 0, 1, 1], [], []>} : vector<8x128xbf16>, vector<128x256xbf16>, vector<8x256xf32> -> vector<8x256xf32>
    %84 = arith.addf %79, %83 : vector<8x256xf32>
    %85 = vector.extract_strided_slice %13 {offsets = [112, 0], sizes = [8, 128], strides = [1, 1]} : vector<128x128xf32> to vector<8x128xf32>
    %c1792 = arith.constant 1792 : index
    %c0_39 = arith.constant 0 : index
    %86 = vector.load %arg6[%c1792, %c0_39] : memref<2048x256xbf16, #tpu.memory_space<vmem>>, vector<128x256xbf16>
    %87 = arith.truncf %85 : vector<8x128xf32> to vector<8x128xbf16>
    %cst_40 = arith.constant dense<0.000000e+00> : vector<8x256xf32>
    %88 = tpu.matmul %87, %86, %cst_40 {dimension_numbers = #tpu.dot_dimension_numbers<[1], [0], [0], [1], [0, 0, 1, 1], [], []>} : vector<8x128xbf16>, vector<128x256xbf16>, vector<8x256xf32> -> vector<8x256xf32>
    %89 = arith.addf %84, %88 : vector<8x256xf32>
    %90 = vector.extract_strided_slice %13 {offsets = [120, 0], sizes = [8, 128], strides = [1, 1]} : vector<128x128xf32> to vector<8x128xf32>
    %c1920 = arith.constant 1920 : index
    %c0_41 = arith.constant 0 : index
    %91 = vector.load %arg6[%c1920, %c0_41] : memref<2048x256xbf16, #tpu.memory_space<vmem>>, vector<128x256xbf16>
    %92 = arith.truncf %90 : vector<8x128xf32> to vector<8x128xbf16>
    %cst_42 = arith.constant dense<0.000000e+00> : vector<8x256xf32>
    %93 = tpu.matmul %92, %91, %cst_42 {dimension_numbers = #tpu.dot_dimension_numbers<[1], [0], [0], [1], [0, 0, 1, 1], [], []>} : vector<8x128xbf16>, vector<128x256xbf16>, vector<8x256xf32> -> vector<8x256xf32>
    %94 = arith.addf %89, %93 : vector<8x256xf32>
    %c0_43 = arith.constant 0 : index
    %c0_44 = arith.constant 0 : index
    %95 = vector.load %arg7[%c0_43, %c0_44] : memref<1x256xf32, #tpu.memory_space<vmem>>, vector<1x256xf32>
    %96 = vector.broadcast %95 : vector<1x256xf32> to vector<8x256xf32>
    %97 = arith.mulf %94, %96 : vector<8x256xf32>
    %c0_45 = arith.constant 0 : index
    %c0_46 = arith.constant 0 : index
    %98 = vector.load %arg8[%c0_45, %c0_46] : memref<1x256xf32, #tpu.memory_space<vmem>>, vector<1x256xf32>
    %99 = vector.broadcast %98 : vector<1x256xf32> to vector<8x256xf32>
    %100 = arith.addf %97, %99 : vector<8x256xf32>
    %cst_47 = arith.constant 0.000000e+00 : f32
    %101 = vector.broadcast %cst_47 : f32 to vector<8x256xf32>
    %102 = arith.cmpf oge, %100, %101 : vector<8x256xf32>
    %cst_48 = arith.constant 0.00999999977 : f32
    %103 = vector.broadcast %cst_48 : f32 to vector<8x256xf32>
    %104 = arith.mulf %103, %100 : vector<8x256xf32>
    %105 = arith.select %102, %100, %104 : vector<8x256xi1>, vector<8x256xf32>
    %c0_49 = arith.constant 0 : index
    %c0_50 = arith.constant 0 : index
    %106 = vector.load %arg9[%c0_49, %c0_50] : memref<256x512xbf16, #tpu.memory_space<vmem>>, vector<256x512xbf16>
    %107 = arith.truncf %105 : vector<8x256xf32> to vector<8x256xbf16>
    %cst_51 = arith.constant dense<0.000000e+00> : vector<8x512xf32>
    %108 = tpu.matmul %107, %106, %cst_51 {dimension_numbers = #tpu.dot_dimension_numbers<[1], [0], [0], [1], [0, 0, 1, 1], [], []>} : vector<8x256xbf16>, vector<256x512xbf16>, vector<8x512xf32> -> vector<8x512xf32>
    %c0_52 = arith.constant 0 : index
    %c0_53 = arith.constant 0 : index
    %109 = vector.load %arg10[%c0_52, %c0_53] : memref<1x512xf32, #tpu.memory_space<vmem>>, vector<1x512xf32>
    %110 = vector.broadcast %109 : vector<1x512xf32> to vector<8x512xf32>
    %111 = arith.mulf %108, %110 : vector<8x512xf32>
    %c0_54 = arith.constant 0 : index
    %c0_55 = arith.constant 0 : index
    %112 = vector.load %arg11[%c0_54, %c0_55] : memref<1x512xf32, #tpu.memory_space<vmem>>, vector<1x512xf32>
    %113 = vector.broadcast %112 : vector<1x512xf32> to vector<8x512xf32>
    %114 = arith.addf %111, %113 : vector<8x512xf32>
    %cst_56 = arith.constant 0.000000e+00 : f32
    %115 = vector.broadcast %cst_56 : f32 to vector<8x512xf32>
    %116 = arith.cmpf oge, %114, %115 : vector<8x512xf32>
    %cst_57 = arith.constant 0.00999999977 : f32
    %117 = vector.broadcast %cst_57 : f32 to vector<8x512xf32>
    %118 = arith.mulf %117, %114 : vector<8x512xf32>
    %119 = arith.select %116, %114, %118 : vector<8x512xi1>, vector<8x512xf32>
    %c0_58 = arith.constant 0 : index
    %c0_59 = arith.constant 0 : index
    %120 = vector.load %arg2[%c0_58, %c0_59] : memref<8x128xbf16, #tpu.memory_space<vmem>>, vector<8x128xbf16>
    %c0_60 = arith.constant 0 : index
    %c0_61 = arith.constant 0 : index
    %121 = vector.load %arg12[%c0_60, %c0_61] : memref<128x512xbf16, #tpu.memory_space<vmem>>, vector<128x512xbf16>
    %cst_62 = arith.constant dense<0.000000e+00> : vector<8x512xf32>
    %122 = tpu.matmul %120, %121, %cst_62 {dimension_numbers = #tpu.dot_dimension_numbers<[1], [0], [0], [1], [0, 0, 1, 1], [], []>} : vector<8x128xbf16>, vector<128x512xbf16>, vector<8x512xf32> -> vector<8x512xf32>
    %cst_63 = arith.constant 0.000000e+00 : f32
    %123 = vector.broadcast %cst_63 : f32 to vector<8x512xf32>
    %124 = arith.cmpf oge, %122, %123 : vector<8x512xf32>
    %cst_64 = arith.constant 0.00999999977 : f32
    %125 = vector.broadcast %cst_64 : f32 to vector<8x512xf32>
    %126 = arith.mulf %125, %122 : vector<8x512xf32>
    %127 = arith.select %124, %122, %126 : vector<8x512xi1>, vector<8x512xf32>
    %c0_65 = arith.constant 0 : index
    %c0_66 = arith.constant 0 : index
    %128 = vector.load %arg13[%c0_65, %c0_66] : memref<512x512xbf16, #tpu.memory_space<vmem>>, vector<512x512xbf16>
    %129 = arith.truncf %127 : vector<8x512xf32> to vector<8x512xbf16>
    %cst_67 = arith.constant dense<0.000000e+00> : vector<8x512xf32>
    %130 = tpu.matmul %129, %128, %cst_67 {dimension_numbers = #tpu.dot_dimension_numbers<[1], [0], [0], [1], [0, 0, 1, 1], [], []>} : vector<8x512xbf16>, vector<512x512xbf16>, vector<8x512xf32> -> vector<8x512xf32>
    %cst_68 = arith.constant 0.000000e+00 : f32
    %131 = vector.broadcast %cst_68 : f32 to vector<8x512xf32>
    %132 = arith.cmpf oge, %130, %131 : vector<8x512xf32>
    %cst_69 = arith.constant 0.00999999977 : f32
    %133 = vector.broadcast %cst_69 : f32 to vector<8x512xf32>
    %134 = arith.mulf %133, %130 : vector<8x512xf32>
    %135 = arith.select %132, %130, %134 : vector<8x512xi1>, vector<8x512xf32>
    %c0_70 = arith.constant 0 : index
    %c0_71 = arith.constant 0 : index
    %136 = vector.load %arg14[%c0_70, %c0_71] : memref<512x1024xbf16, #tpu.memory_space<vmem>>, vector<512x1024xbf16>
    %137 = arith.truncf %119 : vector<8x512xf32> to vector<8x512xbf16>
    %cst_72 = arith.constant dense<0.000000e+00> : vector<8x1024xf32>
    %138 = tpu.matmul %137, %136, %cst_72 {dimension_numbers = #tpu.dot_dimension_numbers<[1], [0], [0], [1], [0, 0, 1, 1], [], []>} : vector<8x512xbf16>, vector<512x1024xbf16>, vector<8x1024xf32> -> vector<8x1024xf32>
    %c0_73 = arith.constant 0 : index
    %c0_74 = arith.constant 0 : index
    %139 = vector.load %arg15[%c0_73, %c0_74] : memref<512x1024xbf16, #tpu.memory_space<vmem>>, vector<512x1024xbf16>
    %140 = arith.truncf %135 : vector<8x512xf32> to vector<8x512xbf16>
    %cst_75 = arith.constant dense<0.000000e+00> : vector<8x1024xf32>
    %141 = tpu.matmul %140, %139, %cst_75 {dimension_numbers = #tpu.dot_dimension_numbers<[1], [0], [0], [1], [0, 0, 1, 1], [], []>} : vector<8x512xbf16>, vector<512x1024xbf16>, vector<8x1024xf32> -> vector<8x1024xf32>
    %142 = arith.addf %138, %141 : vector<8x1024xf32>
    %c0_76 = arith.constant 0 : index
    %c0_77 = arith.constant 0 : index
    %143 = vector.load %arg16[%c0_76, %c0_77] : memref<1x1024xf32, #tpu.memory_space<vmem>>, vector<1x1024xf32>
    %144 = vector.broadcast %143 : vector<1x1024xf32> to vector<8x1024xf32>
    %145 = arith.addf %142, %144 : vector<8x1024xf32>
    %cst_78 = arith.constant 0.000000e+00 : f32
    %146 = vector.broadcast %cst_78 : f32 to vector<8x1024xf32>
    %147 = arith.cmpf oge, %145, %146 : vector<8x1024xf32>
    %cst_79 = arith.constant 0.00999999977 : f32
    %148 = vector.broadcast %cst_79 : f32 to vector<8x1024xf32>
    %149 = arith.mulf %148, %145 : vector<8x1024xf32>
    %150 = arith.select %147, %145, %149 : vector<8x1024xi1>, vector<8x1024xf32>
    %c0_80 = arith.constant 0 : index
    %c0_81 = arith.constant 0 : index
    %151 = vector.load %arg17[%c0_80, %c0_81] : memref<1024x1024xbf16, #tpu.memory_space<vmem>>, vector<1024x1024xbf16>
    %152 = arith.truncf %150 : vector<8x1024xf32> to vector<8x1024xbf16>
    %cst_82 = arith.constant dense<0.000000e+00> : vector<8x1024xf32>
    %153 = tpu.matmul %152, %151, %cst_82 {dimension_numbers = #tpu.dot_dimension_numbers<[1], [0], [0], [1], [0, 0, 1, 1], [], []>} : vector<8x1024xbf16>, vector<1024x1024xbf16>, vector<8x1024xf32> -> vector<8x1024xf32>
    %c0_83 = arith.constant 0 : index
    %c0_84 = arith.constant 0 : index
    %154 = vector.load %arg18[%c0_83, %c0_84] : memref<1x1024xf32, #tpu.memory_space<vmem>>, vector<1x1024xf32>
    %155 = vector.broadcast %154 : vector<1x1024xf32> to vector<8x1024xf32>
    %156 = arith.addf %153, %155 : vector<8x1024xf32>
    %cst_85 = arith.constant 0.000000e+00 : f32
    %157 = vector.broadcast %cst_85 : f32 to vector<8x1024xf32>
    %158 = arith.cmpf oge, %156, %157 : vector<8x1024xf32>
    %cst_86 = arith.constant 0.00999999977 : f32
    %159 = vector.broadcast %cst_86 : f32 to vector<8x1024xf32>
    %160 = arith.mulf %159, %156 : vector<8x1024xf32>
    %161 = arith.select %158, %156, %160 : vector<8x1024xi1>, vector<8x1024xf32>
    %c0_87 = arith.constant 0 : index
    %c0_88 = arith.constant 0 : index
    %162 = vector.load %arg19[%c0_87, %c0_88] : memref<1024x128xbf16, #tpu.memory_space<vmem>>, vector<1024x128xbf16>
    %163 = arith.truncf %161 : vector<8x1024xf32> to vector<8x1024xbf16>
    %cst_89 = arith.constant dense<0.000000e+00> : vector<8x128xf32>
    %164 = tpu.matmul %163, %162, %cst_89 {dimension_numbers = #tpu.dot_dimension_numbers<[1], [0], [0], [1], [0, 0, 1, 1], [], []>} : vector<8x1024xbf16>, vector<1024x128xbf16>, vector<8x128xf32> -> vector<8x128xf32>
    %c0_90 = arith.constant 0 : index
    %c0_91 = arith.constant 0 : index
    %165 = vector.load %arg20[%c0_90, %c0_91] : memref<1x128xf32, #tpu.memory_space<vmem>>, vector<1x128xf32>
    %166 = vector.broadcast %165 : vector<1x128xf32> to vector<8x128xf32>
    %167 = arith.addf %164, %166 : vector<8x128xf32>
    %c0_92 = arith.constant 0 : index
    %c0_93 = arith.constant 0 : index
    %168 = vector.load %arg22[%c0_92, %c0_93] : memref<8x1024xf32, #tpu.memory_space<vmem>>, vector<8x1024xf32>
    tpu.vector_store %arg22[%c0_92, %c0_93], %161 {strides = array<i32>} : memref<8x1024xf32, #tpu.memory_space<vmem>>, vector<8x1024xf32>,
    %c0_94 = arith.constant 0 : index
    %c0_95 = arith.constant 0 : index
    %169 = vector.load %arg21[%c0_94, %c0_95] : memref<8x128xf32, #tpu.memory_space<vmem>>, vector<8x128xf32>
    tpu.vector_store %arg21[%c0_94, %c0_95], %167 {strides = array<i32>} : memref<8x128xf32, #tpu.memory_space<vmem>>, vector<8x128xf32>,
    return
  }
  func.func @transform_0(%arg0: i32) -> (i32, i32) {
    %c0_i32 = arith.constant 0 : i32
    %c0_i32_0 = arith.constant 0 : i32
    %c0_i32_1 = arith.constant 0 : i32
    return %c0_i32, %c0_i32_0 : i32, i32
  }
  func.func @transform_1(%arg0: i32) -> (i32, i32) {
    %c0_i32 = arith.constant 0 : i32
    %c0_i32_0 = arith.constant 0 : i32
    %c0_i32_1 = arith.constant 0 : i32
    return %c0_i32, %c0_i32_0 : i32, i32
  }
  func.func @transform_2(%arg0: i32) -> (i32, i32) {
    %c0_i32 = arith.constant 0 : i32
    %c0_i32_0 = arith.constant 0 : i32
    %c0_i32_1 = arith.constant 0 : i32
    return %c0_i32, %c0_i32_0 : i32, i32
  }
  func.func @transform_3(%arg0: i32) -> (i32, i32) {
    %c0_i32 = arith.constant 0 : i32
    %c0_i32_0 = arith.constant 0 : i32
    %c0_i32_1 = arith.constant 0 : i32
    return %c0_i32, %c0_i32_0 : i32, i32
  }
  func.func @transform_4(%arg0: i32) -> (i32, i32) {
    %c0_i32 = arith.constant 0 : i32
    %c0_i32_0 = arith.constant 0 : i32
    %c0_i32_1 = arith.constant 0 : i32
    return %c0_i32, %c0_i32_0 : i32, i32
  }
  func.func @transform_5(%arg0: i32) -> (i32, i32) {
    %c0_i32 = arith.constant 0 : i32
    %c0_i32_0 = arith.constant 0 : i32
    %c0_i32_1 = arith.constant 0 : i32
    return %c0_i32, %c0_i32_0 : i32, i32
  }
  func.func @transform_6(%arg0: i32) -> (i32, i32) {
    %c0_i32 = arith.constant 0 : i32
    %c0_i32_0 = arith.constant 0 : i32
    %c0_i32_1 = arith.constant 0 : i32
    return %c0_i32, %c0_i32_0 : i32, i32
  }
  func.func @transform_7(%arg0: i32) -> (i32, i32) {
    %c0_i32 = arith.constant 0 : i32
    %c0_i32_0 = arith.constant 0 : i32
    %c0_i32_1 = arith.constant 0 : i32
    return %c0_i32, %c0_i32_0 : i32, i32
  }
  func.func @transform_8(%arg0: i32) -> (i32, i32) {
    %c0_i32 = arith.constant 0 : i32
    %c0_i32_0 = arith.constant 0 : i32
    %c0_i32_1 = arith.constant 0 : i32
    return %c0_i32, %c0_i32_0 : i32, i32
  }
  func.func @transform_9(%arg0: i32) -> (i32, i32) {
    %c0_i32 = arith.constant 0 : i32
    %c0_i32_0 = arith.constant 0 : i32
    %c0_i32_1 = arith.constant 0 : i32
    return %c0_i32, %c0_i32_0 : i32, i32
  }
  func.func @transform_10(%arg0: i32) -> (i32, i32) {
    %c0_i32 = arith.constant 0 : i32
    %c0_i32_0 = arith.constant 0 : i32
    %c0_i32_1 = arith.constant 0 : i32
    return %c0_i32, %c0_i32_0 : i32, i32
  }
  func.func @transform_11(%arg0: i32) -> (i32, i32) {
    %c0_i32 = arith.constant 0 : i32
    %c0_i32_0 = arith.constant 0 : i32
    %c0_i32_1 = arith.constant 0 : i32
    return %c0_i32, %c0_i32_0 : i32, i32
  }
  func.func @transform_12(%arg0: i32) -> (i32, i32) {
    %c0_i32 = arith.constant 0 : i32
    %c0_i32_0 = arith.constant 0 : i32
    %c0_i32_1 = arith.constant 0 : i32
    return %c0_i32, %c0_i32_0 : i32, i32
  }
  func.func @transform_13(%arg0: i32) -> (i32, i32) {
    %c0_i32 = arith.constant 0 : i32
    %c0_i32_0 = arith.constant 0 : i32
    %c0_i32_1 = arith.constant 0 : i32
    return %c0_i32, %c0_i32_0 : i32, i32
  }
  func.func @transform_14(%arg0: i32) -> (i32, i32) {
    %c0_i32 = arith.constant 0 : i32
    %c0_i32_0 = arith.constant 0 : i32
    %c0_i32_1 = arith.constant 0 : i32
    return %c0_i32, %c0_i32_0 : i32, i32
  }
  func.func @transform_15(%arg0: i32) -> (i32, i32) {
    %c0_i32 = arith.constant 0 : i32
    %c0_i32_0 = arith.constant 0 : i32
    %c0_i32_1 = arith.constant 0 : i32
    return %c0_i32, %c0_i32_0 : i32, i32
  }
  func.func @transform_16(%arg0: i32) -> (i32, i32) {
    %c0_i32 = arith.constant 0 : i32
    %c0_i32_0 = arith.constant 0 : i32
    %c0_i32_1 = arith.constant 0 : i32
    return %c0_i32, %c0_i32_0 : i32, i32
  }
  func.func @transform_17(%arg0: i32) -> (i32, i32) {
    %c0_i32 = arith.constant 0 : i32
    %c0_i32_0 = arith.constant 0 : i32
    %c0_i32_1 = arith.constant 0 : i32
    return %c0_i32, %c0_i32_0 : i32, i32
  }
  func.func @transform_18(%arg0: i32) -> (i32, i32) {
    %c0_i32 = arith.constant 0 : i32
    %c0_i32_0 = arith.constant 0 : i32
    %c0_i32_1 = arith.constant 0 : i32
    return %c0_i32, %c0_i32_0 : i32, i32
  }
  func.func @transform_19(%arg0: i32) -> (i32, i32) {
    %c0_i32 = arith.constant 0 : i32
    %c0_i32_0 = arith.constant 0 : i32
    %c0_i32_1 = arith.constant 0 : i32
    return %c0_i32, %c0_i32_0 : i32, i32
  }
  func.func @transform_20(%arg0: i32) -> (i32, i32) {
    %c0_i32 = arith.constant 0 : i32
    %c0_i32_0 = arith.constant 0 : i32
    %c0_i32_1 = arith.constant 0 : i32
    return %c0_i32, %c0_i32_0 : i32, i32
  }
  func.func @transform_21(%arg0: i32) -> (i32, i32) {
    %c0_i32 = arith.constant 0 : i32
    %c0_i32_0 = arith.constant 0 : i32
    %c0_i32_1 = arith.constant 0 : i32
    return %c0_i32, %c0_i32_0 : i32, i32
  }
}

</mosaic_0001>

<bundles_post_ra>
// kernel: discriminator_forward.3
= control target key start
LH: loop header
LB: loop body
LE: loop exit
PB: predicated region body
PF: predicated region fallthrough
CT: control target
= control target key end

     0   :  { %9 = vsyncpa [#allocation3], 0  ;;  %s1458_s0 = inlined_call_operand.vmem [shape: bf16[1152,128], index: 0, kind: input, shape index: {}]   ;;  %s1459_s1 = inlined_call_operand.hbm [shape: bf16[128,128], index: 1, kind: input, shape index: {}]   ;;  %s1460_s2 = inlined_call_operand.hbm [shape: f32[1,128], index: 2, kind: input, shape index: {}]   ;;  %s1461_s3 = inlined_call_operand.hbm [shape: f32[1,128], index: 3, kind: input, shape index: {}]   ;;  %s1462_s4 = inlined_call_operand.vmem [shape: bf16[1152,128], index: 4, kind: output, shape index: {}]  }
   0x1   :  { %10 = vsyncpa [#allocation5], 0  ;;  %s1289_s15 = smov 0  }
   0x2 LB: > { %s1259_s16 = smov [#allocation4]   ;;  %s872_s18 = sadd.s32 4294967295, %s1257_s15   ;;  %s1257_s15 = sphi %s1289_s15, %s16_s15  }
   0x3   : > { %s162_s17 = sshll.u32 %s1259_s16, 4  ;;  %p874_p0 = scmp.ge.s32.totalorder %s1257_s15, 1  ;;  %s163_s17 = int_to_ptr.vmem [resolvable:$true] %s162_s17 }
   0x4   : > { %p136_p1 = scmp.lt.s32.totalorder %s1257_s15, 7  ;;  %p1299_p2 = scmp.eq.s32.totalorder %s872_s18, 0 }
   0x5   : > { %s1260_s21 = smov [#allocation2]   ;;  %s1261_s24 = smov [#allocation6]  }
   0x6   : > { %s1466_s19 = scalar_select %p1299_p2, 1, 0 }
   0x7   : > { %p1303_p3 = pnand %p874_p0, %p136_p1  ;;  %s148_s22 = sshll.u32 %s1260_s21, 4  ;;  %s149_s22 = int_to_ptr.vmem [resolvable:$true] %s148_s22 }
   0x8   : > { %s173_s25 = sshll.u32 %s1261_s24, 4  ;;  %s1176_s26 = scalar_lea.vmem %s163_s17, 16  ;;  %s1315_s25 = int_to_ptr.vmem [resolvable:$true] %s173_s25 }
   0x9   : > { %s1467_s20 = scalar_select %p1303_p3, 1, 0 }
   0xa   : > { %p1116_p4 = pneg %p1303_p3  ;;  %p1177_p7 = scmp.ne.s32.totalorder %s163_s17, %s1176_s26 }
   0xb   : > { %s1183_s27 = scalar_lea.vmem %s163_s17, 32  ;;  %p1184_p10 = scmp.lt.s32.totalorder %s163_s17, %s163_s17 }
   0xc   : > { %p1311_p5 = pnand %p1299_p2, %p1116_p4  ;;  %p1185_p11 = scmp.lt.s32.totalorder %s1183_s27, %s1176_s26 }
   0xe   : > { %p1167_p6 = pneg %p1311_p5  ;;  %p1186_p12 = por %p1185_p11, %p1184_p10 }
  0x10   : > { %p1179_p8 = pnand %p1177_p7, %p1167_p6 }
  0x12   : > { %p1180_p9 = pneg %p1179_p8 }
  0x14   : > { %p1187_p13 = pnand %p1186_p12, %p1180_p9 }
  0x16   : > { %1190 = shalt.err (!%p1187_p13)
}
  0x17   : > { %1122 = dma.hbm_to_vmem [thread:$0]  (!%p1311_p5), %s1460_s2, 16, %s163_s17, [#allocation5]  }
  0x18   : > { %s1202_s30 = scalar_lea.vmem %s149_s22, 1024  ;;  %p1210_p7 = scmp.lt.s32.totalorder %s149_s22, %s149_s22 }
  0x19   : > { %p1203_p0 = scmp.ne.s32.totalorder %s149_s22, %s1202_s30  ;;  %p1211_p8 = scmp.lt.s32.totalorder %s1202_s30, %s1202_s30 }
  0x1b   : > { %p1205_p1 = pnand %p1203_p0, %p1167_p6  ;;  %p1212_p2 = por %p1211_p8, %p1210_p7 }
  0x1d   : > { %p1206_p4 = pneg %p1205_p1 }
  0x1f   : > { %p1213_p3 = pnand %p1212_p2, %p1206_p4 }
  0x21   : > { %1216 = shalt.err (!%p1213_p3)
}
  0x22   : > { %s1262_s5 = smov 64   ;;  %s1263_s6 = smov 4  }
  0x23   : > { %1119 = dma.hbm_to_vmem [thread:$0]  (!%p1311_p5), %s1459_s1, 1024, %s149_s22, [#allocation3], %s1262_s5, %s1262_s5, %s1263_s6  }
  0x24   : > { %s1228_s9 = scalar_lea.vmem %s1315_s25, 16  ;;  %s1235_s10 = scalar_lea.vmem %s1315_s25, 32 }
  0x25   : > { %p1229_p9 = scmp.ne.s32.totalorder %s1315_s25, %s1228_s9  ;;  %p1236_p3 = scmp.lt.s32.totalorder %s1315_s25, %s1315_s25 }
  0x26   : > { %p1237_p11 = scmp.lt.s32.totalorder %s1235_s10, %s1228_s9 }
  0x27   : > { %p1231_p10 = pnand %p1229_p9, %p1167_p6 }
  0x28   : > { %p1238_p12 = por %p1237_p11, %p1236_p3 }
  0x29   : > { %p1232_p2 = pneg %p1231_p10 }
  0x2b   : > { %p1239_p13 = pnand %p1238_p12, %p1232_p2 }
  0x2d   : > { %1242 = shalt.err (!%p1239_p13)
}
  0x2e   : > { %1125 = dma.hbm_to_vmem [thread:$0]  (!%p1311_p5), %s1461_s3, 16, %s1315_s25, [#allocation5]  }
  0x2f   : > { %p1469_p0 = scmp.ne.s32.totalorder %s1467_s20, 0 }
  0x30   : > { %p1470_p6 = scmp.ne.s32.totalorder (!%p1469_p0), %s1466_s19, 0 }
  0x31   : > { %195 = sbr.rel (%p1469_p0) target bundleno = 323 (0x143), region = 36 }
  0x36   : > { %1248 = dma.done.wait (%p1470_p6), [#allocation3], 1024  }
  0x37   : > { %1250 = vsyncadd (%p1470_p6), [#allocation3], 4294966272 }
  0x38   : > { %1252 = dma.done.wait (%p1470_p6), [#allocation5], 32  }
  0x39   : > { %1254 = vsyncadd (%p1470_p6), [#allocation5], 4294967264  ;;  %s229_s13 = smul.u32 24, %s872_s18  ;;  %v1145_v0 = vld [vmem:[#allocation2 + $0x38] sm:$0xff]   ;;  %v1146_v1 = vld [vmem:[#allocation2 + $0x30] sm:$0xff]  }
  0x3a   : > { %1048 = vmatprep.subr.bf16.mxu0 %v1145_v0  ;;  %1088 = vmatprep.subr.bf16.mxu1 %v1145_v0  ;;  %v1147_v2 = vld [vmem:[#allocation2 + $0x28] sm:$0xff]   ;;  %v1148_v3 = vld [vmem:[#allocation2 + $0x20] sm:$0xff]   ;;  %v1149_v6 = vld [vmem:[#allocation2 + $0x18] sm:$0xff]  }
  0x3b   : > { %p230_p1 = scmp.lt.s32.totalorder %s229_s13, 143  ;;  %1049 = vmatpush3.bf16.msra.mxu0 %v1145_v0  ;;  %1096 = vmatpush3.bf16.msra.mxu1 %v1145_v0  ;;  %v1150_v7 = vld [vmem:[#allocation2 + $0x10] sm:$0xff]   ;;  %v1151_v8 = vld [vmem:[#allocation2 + $0x8] sm:$0xff]   ;;  %v1152_v9 = vld [vmem:[#allocation2] sm:$0xff]  }
  0x3c   : > { %1050 = vmatprep.subr.bf16.mxu0 %v1146_v1  ;;  %1089 = vmatprep.subr.bf16.mxu1 %v1146_v1  ;;  %v1383_v20 = vld [vmem:[#allocation4] ss:$0 sm:$0xff]  ;;  %v1385_v22 = vld [vmem:[#allocation6] ss:$0 sm:$0xff] }
  0x3d   : > { %s1472_s13 = smov (!%p230_p1, %s229_s13), 143 }
  0x3e   : > { %s883_s14 = sshll.u32 %s1472_s13, 2 }
  0x3f   : > { %s1369_s18 = scalar_lea.vmem %s1458_s0, %s883_s14  ;;  %1051 = vmatpush3.bf16.msra.mxu0 %v1146_v1  ;;  %1097 = vmatpush3.bf16.msra.mxu1 %v1146_v1  ;;  %s1410_s21 = scalar_lea.vmem %s1462_s4, %s883_s14 }
  0x40   : > { %1052 = vmatprep.subr.bf16.mxu0 %v1147_v2  ;;  %1090 = vmatprep.subr.bf16.mxu1 %v1147_v2  ;;  %v1153_v4 = vld [vmem:[%s1369_s18] sm:$0xff]   ;;  %v1154_v5 = vld [vmem:[%s1369_s18 + $0x30] sm:$0xff]   ;;  %v1155_v10 = vld [vmem:[%s1369_s18 + $0x8] sm:$0xff]  }
  0x41   : > { %1064 = vmatprep.mubr.bf16.mxu0 %v1153_v4  ;;  %1076 = vmatprep.mubr.bf16.mxu1 %v1154_v5  ;;  %v1156_v11 = vld [vmem:[%s1369_s18 + $0x38] sm:$0xff]   ;;  %v1157_v12 = vld [vmem:[%s1369_s18 + $0x10] sm:$0xff]   ;;  %v1158_v13 = vld [vmem:[%s1369_s18 + $0x40] sm:$0xff]  }
  0x42   : > { %v1159_v14 = vld [vmem:[%s1369_s18 + $0x18] sm:$0xff]   ;;  %v1160_v15 = vld [vmem:[%s1369_s18 + $0x48] sm:$0xff]   ;;  %v1161_v16 = vld [vmem:[%s1369_s18 + $0x20] sm:$0xff]  }
  0x43   : > { %1053 = vmatpush3.bf16.msra.mxu0 %v1147_v2  ;;  %1098 = vmatpush3.bf16.msra.mxu1 %v1147_v2  ;;  %v1162_v17 = vld [vmem:[%s1369_s18 + $0x50] sm:$0xff]   ;;  %v1163_v18 = vld [vmem:[%s1369_s18 + $0x28] sm:$0xff]   ;;  %v1164_v19 = vld [vmem:[%s1369_s18 + $0x58] sm:$0xff]  }
  0x44   : > { %1054 = vmatprep.subr.bf16.mxu0 %v1148_v3  ;;  %1091 = vmatprep.subr.bf16.mxu1 %v1148_v3 }
  0x47   : > { %1055 = vmatpush3.bf16.msra.mxu0 %v1148_v3  ;;  %1099 = vmatpush3.bf16.msra.mxu1 %v1148_v3 }
  0x48   : > { %1056 = vmatprep.subr.bf16.mxu0 %v1149_v6  ;;  %1092 = vmatprep.subr.bf16.mxu1 %v1149_v6 }
  0x4b   : > { %1057 = vmatpush3.bf16.msra.mxu0 %v1149_v6  ;;  %1100 = vmatpush3.bf16.msra.mxu1 %v1149_v6 }
  0x4c   : > { %1058 = vmatprep.subr.bf16.mxu0 %v1150_v7  ;;  %1093 = vmatprep.subr.bf16.mxu1 %v1150_v7 }
  0x4f   : > { %1059 = vmatpush3.bf16.msra.mxu0 %v1150_v7  ;;  %1101 = vmatpush3.bf16.msra.mxu1 %v1150_v7 }
  0x50   : > { %1060 = vmatprep.subr.bf16.mxu0 %v1151_v8  ;;  %1094 = vmatprep.subr.bf16.mxu1 %v1151_v8 }
  0x53   : > { %1061 = vmatpush3.bf16.msra.mxu0 %v1151_v8  ;;  %1102 = vmatpush3.bf16.msra.mxu1 %v1151_v8 }
  0x54   : > { %1062 = vmatprep.subr.bf16.mxu0 %v1152_v9  ;;  %1095 = vmatprep.subr.bf16.mxu1 %v1152_v9 }
  0x57   : > { %1063 = vmatpush3.bf16.msra.mxu0 %v1152_v9  ;;  %1103 = vmatpush3.bf16.msra.mxu1 %v1152_v9 }
  0x5a   : > { %1065 = vmatmul.mubr.bf16.vlgmr.msra.gmra.mxu0 %v1155_v10  ;;  %1077 = vmatmul.mubr.bf16.vlgmr.msra.gmra.mxu1 %v1156_v11 }
  0x5b   : > { %1068 = vmatprep.mubr.bf16.mxu0 %v1157_v12  ;;  %1080 = vmatprep.mubr.bf16.mxu1 %v1158_v13 }
  0x62   : > { %1069 = vmatmul.mubr.bf16.gmra.mxu0 %v1159_v14  ;;  %1081 = vmatmul.mubr.bf16.gmra.mxu1 %v1160_v15 }
  0x63   : > { %1072 = vmatprep.mubr.bf16.mxu0 %v1161_v16  ;;  %1084 = vmatprep.mubr.bf16.mxu1 %v1162_v17 }
  0x6a   : > { %1073 = vmatmul.mubr.bf16.gmra.mxu0 %v1163_v18  ;;  %1085 = vmatmul.mubr.bf16.gmra.mxu1 %v1164_v19 }
 0x11a   : > { %v1066_v21 = vpop.f32.mrf.mxu0  ;;  %v1078_v23 = vpop.f32.mrf.mxu1 }
 0x11b   : > { %v540_v24 = vmul.f32 %v1066_v21, %v1383_v20  ;;  %v552_v25 = vmul.f32 %v1078_v23, %v1383_v20 }
 0x11c   : > { %v436_v26 = vpop.f32.mrf.mxu0  ;;  %v484_v27 = vpop.f32.mrf.mxu1 }
 0x11d   : > { %v571_v28 = vadd.f32 %v1385_v22, %v540_v24  ;;  %v583_v29 = vadd.f32 %v1385_v22, %v552_v25  ;;  %v538_v30 = vmul.f32 %v1383_v20, %v436_v26  ;;  %v550_v31 = vmul.f32 %v1383_v20, %v484_v27 }
 0x11e   : > { %v1067_v32 = vpop.f32.mrf.mxu0  ;;  %v1079_v33 = vpop.f32.mrf.mxu1 }
 0x11f   : > { %vm595_vm0 = vcmp.ge.f32.partialorder %v571_v28, 0.0  ;;  %v619_v34 = vmul.f32 0.01, %v571_v28  ;;  %vm607_vm1 = vcmp.ge.f32.partialorder %v583_v29, 0.0  ;;  %v631_v35 = vmul.f32 0.01, %v583_v29 }
 0x120   : > { %v569_v36 = vadd.f32 %v1385_v22, %v538_v30  ;;  %v581_v37 = vadd.f32 %v1385_v22, %v550_v31  ;;  %v541_v38 = vmul.f32 %v1067_v32, %v1383_v20  ;;  %v553_v39 = vmul.f32 %v1079_v33, %v1383_v20  ;;  %v439_v40 = vpop.f32.mrf.mxu0  ;;  %v487_v41 = vpop.f32.mrf.mxu1 }
 0x121   : > { %v643_v42 = vsel %vm595_vm0, %v571_v28, %v619_v34  ;;  %v655_v43 = vsel %vm607_vm1, %v583_v29, %v631_v35  ;;  %v539_v44 = vmul.f32 %v1383_v20, %v439_v40  ;;  %v551_v45 = vmul.f32 %v1383_v20, %v487_v41 }
 0x122   : > { %vm593_vm2 = vcmp.ge.f32.partialorder %v569_v36, 0.0  ;;  %v617_v46 = vmul.f32 0.01, %v569_v36  ;;  %vm605_vm3 = vcmp.ge.f32.partialorder %v581_v37, 0.0  ;;  %v629_v47 = vmul.f32 0.01, %v581_v37  ;;  %v1070_v48 = vpop.f32.mrf.mxu0  ;;  %v1082_v49 = vpop.f32.mrf.mxu1 }
 0x123   : > { %v572_v50 = vadd.f32 %v1385_v22, %v541_v38  ;;  %v584_v51 = vadd.f32 %v1385_v22, %v553_v39  ;;  %v570_v52 = vadd.f32 %v1385_v22, %v539_v44  ;;  %v582_v53 = vadd.f32 %v1385_v22, %v551_v45 }
 0x124   : > { %v641_v54 = vsel %vm593_vm2, %v569_v36, %v617_v46  ;;  %v653_v55 = vsel %vm605_vm3, %v581_v37, %v629_v47  ;;  %v544_v56 = vmul.f32 %v1070_v48, %v1383_v20  ;;  %v556_v57 = vmul.f32 %v1082_v49, %v1383_v20  ;;  %v452_v58 = vpop.f32.mrf.mxu0  ;;  %v500_v59 = vpop.f32.mrf.mxu1 }
 0x125   : > { %vm596_vm4 = vcmp.ge.f32.partialorder %v572_v50, 0.0  ;;  %v620_v60 = vmul.f32 0.01, %v572_v50  ;;  %vm608_vm5 = vcmp.ge.f32.partialorder %v584_v51, 0.0  ;;  %v632_v61 = vmul.f32 0.01, %v584_v51 }
 0x126   : > { %vm594_vm6 = vcmp.ge.f32.partialorder %v570_v52, 0.0  ;;  %v618_v62 = vmul.f32 0.01, %v570_v52  ;;  %vm606_vm7 = vcmp.ge.f32.partialorder %v582_v53, 0.0  ;;  %v630_v63 = vmul.f32 0.01, %v582_v53  ;;  %v1071_v0 = vpop.f32.mrf.mxu0  ;;  %v1083_v1 = vpop.f32.mrf.mxu1 }
 0x127   : > { %v644_v2 = vsel %vm596_vm4, %v572_v50, %v620_v60  ;;  %v656_v3 = vsel %vm608_vm5, %v584_v51, %v632_v61  ;;  %v575_v4 = vadd.f32 %v1385_v22, %v544_v56  ;;  %v587_v5 = vadd.f32 %v1385_v22, %v556_v57 }
 0x128   : > { %v965_v6 = vpack.c.bf16 %v644_v2, %v643_v42  ;;  %v995_v7 = vpack.c.bf16 %v656_v3, %v655_v43  ;;  %v642_v8 = vsel %vm594_vm6, %v570_v52, %v618_v62  ;;  %v654_v9 = vsel %vm606_vm7, %v582_v53, %v630_v63  ;;  %v455_v10 = vpop.f32.mrf.mxu0  ;;  %v503_v11 = vpop.f32.mrf.mxu1 }
 0x129   : > { %v960_v12 = vpack.c.bf16 %v642_v8, %v641_v54  ;;  %v990_v13 = vpack.c.bf16 %v654_v9, %v653_v55  ;;  %vm599_vm8 = vcmp.ge.f32.partialorder %v575_v4, 0.0  ;;  %v623_v14 = vmul.f32 0.01, %v575_v4 }
 0x12a   : > { %1017 = vst [vmem:[%s1410_s21 + $0x8] sm:$0xff] %v965_v6   ;;  %1023 = vst [vmem:[%s1410_s21 + $0x38] sm:$0xff] %v995_v7   ;;  %v635_v15 = vmul.f32 0.01, %v587_v5  ;;  %v542_v16 = vmul.f32 %v1383_v20, %v452_v58  ;;  %v554_v17 = vmul.f32 %v1383_v20, %v500_v59  ;;  %v1074_v18 = vpop.f32.mrf.mxu0  ;;  %v1086_v19 = vpop.f32.mrf.mxu1  ;;  %vm611_vm9 = vcmp.ge.f32.partialorder %v587_v5, 0.0 }
 0x12b   : > { %961 = vst [vmem:[%s1410_s21] sm:$0xff] %v960_v12   ;;  %1022 = vst [vmem:[%s1410_s21 + $0x30] sm:$0xff] %v990_v13   ;;  %v545_v21 = vmul.f32 %v1071_v0, %v1383_v20  ;;  %v557_v23 = vmul.f32 %v1083_v1, %v1383_v20  ;;  %v543_v24 = vmul.f32 %v1383_v20, %v455_v10 }
 0x12c   : > { %v647_v25 = vsel %vm599_vm8, %v575_v4, %v623_v14  ;;  %v573_v26 = vadd.f32 %v1385_v22, %v542_v16  ;;  %v585_v27 = vadd.f32 %v1385_v22, %v554_v17  ;;  %v555_v28 = vmul.f32 %v1383_v20, %v503_v11  ;;  %v468_v29 = vpop.f32.mrf.mxu0  ;;  %v516_v34 = vpop.f32.mrf.mxu1 }
 0x12d   : > { %v576_v30 = vadd.f32 %v1385_v22, %v545_v21  ;;  %v588_v31 = vadd.f32 %v1385_v22, %v557_v23  ;;  %v574_v32 = vadd.f32 %v1385_v22, %v543_v24  ;;  %v548_v33 = vmul.f32 %v1074_v18, %v1383_v20 }
 0x12e   : > { %v659_v35 = vsel %vm611_vm9, %v587_v5, %v635_v15  ;;  %vm597_vm10 = vcmp.ge.f32.partialorder %v573_v26, 0.0  ;;  %v621_v36 = vmul.f32 0.01, %v573_v26  ;;  %v633_v37 = vmul.f32 0.01, %v585_v27  ;;  %v1075_v38 = vpop.f32.mrf.mxu0  ;;  %v1087_v47 = vpop.f32.mrf.mxu1 }
 0x12f   : > { %vm600_vm11 = vcmp.ge.f32.partialorder %v576_v30, 0.0  ;;  %v624_v39 = vmul.f32 0.01, %v576_v30  ;;  %vm612_vm12 = vcmp.ge.f32.partialorder %v588_v31, 0.0  ;;  %v636_v40 = vmul.f32 0.01, %v588_v31 }
 0x130   : > { %v645_v41 = vsel %vm597_vm10, %v573_v26, %v621_v36  ;;  %vm609_vm13 = vcmp.ge.f32.partialorder %v585_v27, 0.0  ;;  %vm598_vm14 = vcmp.ge.f32.partialorder %v574_v32, 0.0  ;;  %v622_v42 = vmul.f32 0.01, %v574_v32  ;;  %v471_v52 = vpop.f32.mrf.mxu0  ;;  %v519_v0 = vpop.f32.mrf.mxu1 }
 0x131   : > { %v648_v43 = vsel %vm600_vm11, %v576_v30, %v624_v39  ;;  %v660_v44 = vsel %vm612_vm12, %v588_v31, %v636_v40  ;;  %v586_v45 = vadd.f32 %v1385_v22, %v555_v28  ;;  %v579_v46 = vadd.f32 %v1385_v22, %v548_v33 }
 0x132   : > { %v975_v48 = vpack.c.bf16 %v648_v43, %v647_v25  ;;  %v1005_v49 = vpack.c.bf16 %v660_v44, %v659_v35  ;;  %v646_v50 = vsel %vm598_vm14, %v574_v32, %v622_v42  ;;  %v560_v51 = vmul.f32 %v1086_v19, %v1383_v20 }
 0x133   : > { %v657_v53 = vsel %vm609_vm13, %v585_v27, %v633_v37  ;;  %v970_v54 = vpack.c.bf16 %v646_v50, %v645_v41  ;;  %vm610_vm15 = vcmp.ge.f32.partialorder %v586_v45, 0.0  ;;  %v634_v55 = vmul.f32 0.01, %v586_v45 }
 0x134   : > { %1019 = vst [vmem:[%s1410_s21 + $0x18] sm:$0xff] %v975_v48   ;;  %1025 = vst [vmem:[%s1410_s21 + $0x48] sm:$0xff] %v1005_v49   ;;  %v627_v56 = vmul.f32 0.01, %v579_v46  ;;  %v591_v57 = vadd.f32 %v1385_v22, %v560_v51  ;;  %v546_v58 = vmul.f32 %v1383_v20, %v468_v29  ;;  %v558_v59 = vmul.f32 %v1383_v20, %v516_v34 }
 0x135   : > { %1018 = vst [vmem:[%s1410_s21 + $0x10] sm:$0xff] %v970_v54   ;;  %v658_v60 = vsel %vm610_vm15, %v586_v45, %v634_v55  ;;  %v549_v61 = vmul.f32 %v1075_v38, %v1383_v20  ;;  %v561_v62 = vmul.f32 %v1087_v47, %v1383_v20  ;;  %v547_v63 = vmul.f32 %v1383_v20, %v471_v52 }
 0x136   : > { %v1000_v1 = vpack.c.bf16 %v658_v60, %v657_v53  ;;  %vm603_vm0 = vcmp.ge.f32.partialorder %v579_v46, 0.0  ;;  %v639_v2 = vmul.f32 0.01, %v591_v57  ;;  %v577_v3 = vadd.f32 %v1385_v22, %v546_v58 }
 0x137   : > { %v589_v4 = vadd.f32 %v1385_v22, %v558_v59  ;;  %v580_v5 = vadd.f32 %v1385_v22, %v549_v61  ;;  %v592_v6 = vadd.f32 %v1385_v22, %v561_v62  ;;  %vm615_vm1 = vcmp.ge.f32.partialorder %v591_v57, 0.0 }
 0x138   : > { %1024 = vst [vmem:[%s1410_s21 + $0x40] sm:$0xff] %v1000_v1   ;;  %v578_v7 = vadd.f32 %v1385_v22, %v547_v63  ;;  %v559_v8 = vmul.f32 %v1383_v20, %v519_v0  ;;  %v651_v9 = vsel %vm603_vm0, %v579_v46, %v627_v56  ;;  %vm601_vm2 = vcmp.ge.f32.partialorder %v577_v3, 0.0 }
 0x139   : > { %v625_v10 = vmul.f32 0.01, %v577_v3  ;;  %vm604_vm3 = vcmp.ge.f32.partialorder %v580_v5, 0.0  ;;  %v628_v11 = vmul.f32 0.01, %v580_v5  ;;  %vm616_vm4 = vcmp.ge.f32.partialorder %v592_v6, 0.0 }
 0x13a   : > { %v640_v12 = vmul.f32 0.01, %v592_v6  ;;  %v663_v13 = vsel %vm615_vm1, %v591_v57, %v639_v2  ;;  %vm613_vm5 = vcmp.ge.f32.partialorder %v589_v4, 0.0  ;;  %vm602_vm6 = vcmp.ge.f32.partialorder %v578_v7, 0.0 }
 0x13b   : > { %v626_v14 = vmul.f32 0.01, %v578_v7  ;;  %v637_v15 = vmul.f32 0.01, %v589_v4  ;;  %v652_v16 = vsel %vm604_vm3, %v580_v5, %v628_v11  ;;  %v590_v20 = vadd.f32 %v1385_v22, %v559_v8 }
 0x13c   : > { %v664_v17 = vsel %vm616_vm4, %v592_v6, %v640_v12  ;;  %v649_v18 = vsel %vm601_vm2, %v577_v3, %v625_v10  ;;  %v985_v19 = vpack.c.bf16 %v652_v16, %v651_v9 }
 0x13d   : > { %v1015_v21 = vpack.c.bf16 %v664_v17, %v663_v13  ;;  %v650_v23 = vsel %vm602_vm6, %v578_v7, %v626_v14  ;;  %vm614_vm7 = vcmp.ge.f32.partialorder %v590_v20, 0.0  ;;  %v638_v25 = vmul.f32 0.01, %v590_v20 }
 0x13e   : > { %v980_v24 = vpack.c.bf16 %v650_v23, %v649_v18  ;;  %1021 = vst [vmem:[%s1410_s21 + $0x28] sm:$0xff] %v985_v19   ;;  %v661_v26 = vsel %vm613_vm5, %v589_v4, %v637_v15 }
 0x13f   : > { %1027 = vst [vmem:[%s1410_s21 + $0x58] sm:$0xff] %v1015_v21   ;;  %v662_v27 = vsel %vm614_vm7, %v590_v20, %v638_v25 }
 0x140   : > { %1020 = vst [vmem:[%s1410_s21 + $0x20] sm:$0xff] %v980_v24   ;;  %v1010_v28 = vpack.c.bf16 %v662_v27, %v661_v26 }
 0x142   : > { %1026 = vst [vmem:[%s1410_s21 + $0x50] sm:$0xff] %v1010_v28  }
 0x143 PF: > { %s16_s15 = sadd.s32 1, %s1257_s15  }
 0x144   : > { %p13_p5 = scmp.ge.s32.totalorder %s16_s15, 8  }
 0x146   :  { %15 = sbr.rel (!%p13_p5) target bundleno = 2 (0x2), region = 79 }
 0x14b   :  { %807 = vsyncpa [#allocation3], 1 }
 0x14c   :  { %809 = vsyncpa [#allocation3 + $0x1], 1 }
 0x14d   :  { %810 = vsyncpa [#allocation5], 1 }

// kernel: discriminator_forward.4
= control target key start
LH: loop header
LB: loop body
LE: loop exit
PB: predicated region body
PF: predicated region fallthrough
CT: control target
= control target key end

     0   :  { %s1484_s15 = smov 0   ;;  %s1689_s0 = inlined_call_operand.vmem [shape: bf16[256,512], index: 0, kind: input, shape index: {}]   ;;  %s1690_s1 = inlined_call_operand.vmem [shape: bf16[512,128], index: 1, kind: input, shape index: {}]   ;;  %s1691_s2 = inlined_call_operand.vmem [shape: f32[1,128], index: 2, kind: input, shape index: {}]   ;;  %s1692_s3 = inlined_call_operand.vmem [shape: f32[1,128], index: 3, kind: input, shape index: {}]   ;;  %s1693_s4 = inlined_call_operand.vmem [shape: bf16[256,128], index: 4, kind: output, shape index: {}]  }
   0x1 LB: > { %s1077_s16 = sadd.s32 4294967295, %s1457_s15   ;;  %p1081_p0 = scmp.ge.s32.totalorder %s1457_s15, 1  ;;  %s1457_s15 = sphi %s1484_s15, %s14_s15  }
   0x2   : > { %p164_p1 = scmp.lt.s32.totalorder %s1457_s15, 3 }
   0x4   : > { %p165_p2 = pnand %p1081_p0, %p164_p1 }
   0x5   : > { %s1082_s25 = sshll.u32 (!%p165_p2), %s1077_s16, 4 }
   0x6   : > { %168 = sbr.rel (%p165_p2) target bundleno = 315 (0x13b), region = 36  ;;  %p192_p3 = scmp.lt.s32.totalorder (!%p165_p2), %s1082_s25, 31 }
   0xb   : > { %v1371_v0 = vld [vmem:[%s1690_s1 + $0x78] sm:$0xff]   ;;  %v1375_v4 = vld [vmem:[%s1690_s1 + $0x70] sm:$0xff]   ;;  %v1379_v8 = vld [vmem:[%s1690_s1 + $0x68] sm:$0xff]   ;;  %s1695_s25 = smov (!%p192_p3, %s1082_s25), 31 }
   0xc   : > { %v1372_v1 = vld [vmem:[%s1690_s1 + $0xf8] sm:$0xff]   ;;  %1235 = vmatprep.subr.bf16.mxu0 %v1371_v0  ;;  %v1376_v5 = vld [vmem:[%s1690_s1 + $0xf0] sm:$0xff]   ;;  %v1380_v9 = vld [vmem:[%s1690_s1 + $0xe8] sm:$0xff]   ;;  %s1171_s23 = sshll.u32 %s1695_s25, 4  ;;  %s1086_s17 = sshll.u32 %s1695_s25, 2 }
   0xd   : > { %v1373_v2 = vld [vmem:[%s1690_s1 + $0x38] sm:$0xff]   ;;  %1299 = vmatprep.subr.bf16.mxu1 %v1372_v1  ;;  %v1377_v6 = vld [vmem:[%s1690_s1 + $0x30] sm:$0xff]   ;;  %v1381_v10 = vld [vmem:[%s1690_s1 + $0x28] sm:$0xff]   ;;  %s1590_s7 = scalar_lea.vmem %s1689_s0, %s1171_s23  ;;  %s1649_s20 = scalar_lea.vmem %s1693_s4, %s1086_s17 }
   0xe   : > { %v1374_v3 = vld [vmem:[%s1690_s1 + $0xb8] sm:$0xff]   ;;  %1236 = vmatpush3.bf16.msra.mxu0 %v1373_v2  ;;  %v1378_v7 = vld [vmem:[%s1690_s1 + $0xb0] sm:$0xff]   ;;  %v1382_v11 = vld [vmem:[%s1690_s1 + $0xa8] sm:$0xff]  }
   0xf   : > { %1300 = vmatpush3.bf16.msra.mxu1 %v1374_v3  ;;  %1237 = vmatprep.subr.bf16.mxu0 %v1375_v4  ;;  %v1383_v12 = vld [vmem:[%s1690_s1 + $0x60] sm:$0xff]   ;;  %v1387_v16 = vld [vmem:[%s1690_s1 + $0x58] sm:$0xff]   ;;  %v1391_v20 = vld [vmem:[%s1690_s1 + $0x50] sm:$0xff]  }
  0x10   : > { %1301 = vmatprep.subr.bf16.mxu1 %v1376_v5  ;;  %v1384_v13 = vld [vmem:[%s1690_s1 + $0xe0] sm:$0xff]   ;;  %v1388_v17 = vld [vmem:[%s1690_s1 + $0xd8] sm:$0xff]   ;;  %v1392_v21 = vld [vmem:[%s1690_s1 + $0xd0] sm:$0xff]  }
  0x11   : > { %v1385_v14 = vld [vmem:[%s1690_s1 + $0x20] sm:$0xff]   ;;  %v1389_v18 = vld [vmem:[%s1690_s1 + $0x18] sm:$0xff]   ;;  %v1393_v22 = vld [vmem:[%s1690_s1 + $0x10] sm:$0xff]  }
  0x12   : > { %1238 = vmatpush3.bf16.msra.mxu0 %v1377_v6  ;;  %v1386_v15 = vld [vmem:[%s1690_s1 + $0xa0] sm:$0xff]   ;;  %v1390_v19 = vld [vmem:[%s1690_s1 + $0x98] sm:$0xff]   ;;  %v1394_v23 = vld [vmem:[%s1690_s1 + $0x90] sm:$0xff]  }
  0x13   : > { %1302 = vmatpush3.bf16.msra.mxu1 %v1378_v7  ;;  %1239 = vmatprep.subr.bf16.mxu0 %v1379_v8  ;;  %v1395_v24 = vld [vmem:[%s1690_s1 + $0x48] sm:$0xff]   ;;  %v1399_v28 = vld [vmem:[%s1690_s1 + $0x40] sm:$0xff]  }
  0x14   : > { %1303 = vmatprep.subr.bf16.mxu1 %v1380_v9  ;;  %v1396_v25 = vld [vmem:[%s1690_s1 + $0xc8] sm:$0xff]   ;;  %v1400_v29 = vld [vmem:[%s1690_s1 + $0xc0] sm:$0xff]  }
  0x15   : > { %v1397_v26 = vld [vmem:[%s1690_s1 + $0x8] sm:$0xff]   ;;  %v1401_v30 = vld [vmem:[%s1690_s1] sm:$0xff]  }
  0x16   : > { %1240 = vmatpush3.bf16.msra.mxu0 %v1381_v10  ;;  %v1398_v27 = vld [vmem:[%s1690_s1 + $0x88] sm:$0xff]   ;;  %v1402_v31 = vld [vmem:[%s1690_s1 + $0x80] sm:$0xff]  }
  0x17   : > { %1304 = vmatpush3.bf16.msra.mxu1 %v1382_v11  ;;  %1241 = vmatprep.subr.bf16.mxu0 %v1383_v12  ;;  %v1403_v32 = vld [vmem:[%s1590_s7] ss:$16 sps:$4 sm:$0xff]   ;;  %v1405_v33 = vld [vmem:[%s1590_s7 + $0x4] ss:$16 sps:$4 sm:$0xff]   ;;  %v1406_v34 = vld [vmem:[%s1590_s7 + $0x8] ss:$16 sps:$4 sm:$0xff]  }
  0x18   : > { %1305 = vmatprep.subr.bf16.mxu1 %v1384_v13  ;;  %v1408_v35 = vld [vmem:[%s1590_s7 + $0xc] ss:$16 sps:$4 sm:$0xff]   ;;  %685 = vmatprep.mubr.bf16.mxu0 %v1405_v33  ;;  %v1409_v36 = vld [vmem:[%s1590_s7 + $0x24] ss:$16 sps:$4 sm:$0xff]   ;;  %v1413_v38 = vld [vmem:[%s1590_s7 + $0x20] ss:$16 sps:$4 sm:$0xff]  }
  0x19   : > { %782 = vmatprep.mubr.bf16.mxu1 %v1408_v35  ;;  %v1411_v37 = vld [vmem:[%s1590_s7 + $0x2c] ss:$16 sps:$4 sm:$0xff]   ;;  %v1414_v39 = vld [vmem:[%s1590_s7 + $0x28] ss:$16 sps:$4 sm:$0xff]   ;;  %v1415_v40 = vld [vmem:[%s1590_s7 + $0x44] ss:$16 sps:$4 sm:$0xff]  }
  0x1a   : > { %1242 = vmatpush3.bf16.msra.mxu0 %v1385_v14  ;;  %v1417_v41 = vld [vmem:[%s1590_s7 + $0x4c] ss:$16 sps:$4 sm:$0xff]   ;;  %v1419_v42 = vld [vmem:[%s1590_s7 + $0x40] ss:$16 sps:$4 sm:$0xff]   ;;  %v1420_v43 = vld [vmem:[%s1590_s7 + $0x48] ss:$16 sps:$4 sm:$0xff]  }
  0x1b   : > { %1306 = vmatpush3.bf16.msra.mxu1 %v1386_v15  ;;  %1243 = vmatprep.subr.bf16.mxu0 %v1387_v16  ;;  %v1421_v44 = vld [vmem:[%s1590_s7 + $0x64] ss:$16 sps:$4 sm:$0xff]   ;;  %v1423_v45 = vld [vmem:[%s1590_s7 + $0x6c] ss:$16 sps:$4 sm:$0xff]   ;;  %v1425_v46 = vld [vmem:[%s1590_s7 + $0x60] ss:$16 sps:$4 sm:$0xff]  }
  0x1c   : > { %1307 = vmatprep.subr.bf16.mxu1 %v1388_v17  ;;  %v1426_v47 = vld [vmem:[%s1590_s7 + $0x68] ss:$16 sps:$4 sm:$0xff]   ;;  %v1427_v48 = vld [vmem:[%s1590_s7 + $0x84] ss:$16 sps:$4 sm:$0xff]   ;;  %v1429_v49 = vld [vmem:[%s1590_s7 + $0x8c] ss:$16 sps:$4 sm:$0xff]  }
  0x1d   : > { %v1431_v50 = vld [vmem:[%s1590_s7 + $0x80] ss:$16 sps:$4 sm:$0xff]   ;;  %v1432_v51 = vld [vmem:[%s1590_s7 + $0x88] ss:$16 sps:$4 sm:$0xff]   ;;  %v1433_v52 = vld [vmem:[%s1590_s7 + $0xa4] ss:$16 sps:$4 sm:$0xff]  }
  0x1e   : > { %1244 = vmatpush3.bf16.msra.mxu0 %v1389_v18  ;;  %v1435_v53 = vld [vmem:[%s1590_s7 + $0xac] ss:$16 sps:$4 sm:$0xff]   ;;  %v1437_v54 = vld [vmem:[%s1590_s7 + $0xa0] ss:$16 sps:$4 sm:$0xff]   ;;  %v1438_v55 = vld [vmem:[%s1590_s7 + $0xa8] ss:$16 sps:$4 sm:$0xff]  }
  0x1f   : > { %1308 = vmatpush3.bf16.msra.mxu1 %v1390_v19  ;;  %1245 = vmatprep.subr.bf16.mxu0 %v1391_v20  ;;  %v1439_v56 = vld [vmem:[%s1590_s7 + $0xc4] ss:$16 sps:$4 sm:$0xff]   ;;  %v1441_v57 = vld [vmem:[%s1590_s7 + $0xcc] ss:$16 sps:$4 sm:$0xff]   ;;  %v1443_v58 = vld [vmem:[%s1590_s7 + $0xc0] ss:$16 sps:$4 sm:$0xff]  }
  0x20   : > { %1309 = vmatprep.subr.bf16.mxu1 %v1392_v21  ;;  %v1444_v59 = vld [vmem:[%s1590_s7 + $0xc8] ss:$16 sps:$4 sm:$0xff]   ;;  %v1445_v60 = vld [vmem:[%s1590_s7 + $0xe4] ss:$16 sps:$4 sm:$0xff]   ;;  %v1447_v61 = vld [vmem:[%s1590_s7 + $0xec] ss:$16 sps:$4 sm:$0xff]  }
  0x21   : > { %v1449_v62 = vld [vmem:[%s1590_s7 + $0xe0] ss:$16 sps:$4 sm:$0xff]   ;;  %v1450_v63 = vld [vmem:[%s1590_s7 + $0xe8] ss:$16 sps:$4 sm:$0xff]  }
  0x22   : > { %1246 = vmatpush3.bf16.msra.mxu0 %v1393_v22  ;;  %v1633_v7 = vld [vmem:[%s1691_s2] ss:$0 sm:$0xff] }
  0x23   : > { %1310 = vmatpush3.bf16.msra.mxu1 %v1394_v23  ;;  %1247 = vmatprep.subr.bf16.mxu0 %v1395_v24  ;;  %v1638_v11 = vld [vmem:[%s1692_s3] ss:$0 sm:$0xff] }
  0x24   : > { %1311 = vmatprep.subr.bf16.mxu1 %v1396_v25 }
  0x26   : > { %1248 = vmatpush3.bf16.msra.mxu0 %v1397_v26 }
  0x27   : > { %1312 = vmatpush3.bf16.msra.mxu1 %v1398_v27  ;;  %1249 = vmatprep.subr.bf16.mxu0 %v1399_v28 }
  0x28   : > { %1313 = vmatprep.subr.bf16.mxu1 %v1400_v29 }
  0x2a   : > { %1250 = vmatpush3.bf16.msra.mxu0 %v1401_v30 }
  0x2b   : > { %1314 = vmatpush3.bf16.msra.mxu1 %v1402_v31 }
  0x2d   : > { %686 = vmatmul.mubr.bf16.vlgmr.msra.gmra.mxu0 %v1403_v32 }
  0x2e   : > { %783 = vmatmul.mubr.bf16.vlgmr.msra.gmra.mxu1 %v1406_v34  ;;  %693 = vmatprep.mubr.bf16.mxu0 %v1409_v36 }
  0x2f   : > { %790 = vmatprep.mubr.bf16.mxu1 %v1411_v37 }
  0x35   : > { %694 = vmatmul.mubr.bf16.gmra.mxu0 %v1413_v38 }
  0x36   : > { %791 = vmatmul.mubr.bf16.gmra.mxu1 %v1414_v39  ;;  %701 = vmatprep.mubr.bf16.mxu0 %v1415_v40 }
  0x37   : > { %798 = vmatprep.mubr.bf16.mxu1 %v1417_v41 }
  0x3d   : > { %702 = vmatmul.mubr.bf16.gmra.mxu0 %v1419_v42 }
  0x3e   : > { %799 = vmatmul.mubr.bf16.gmra.mxu1 %v1420_v43  ;;  %709 = vmatprep.mubr.bf16.mxu0 %v1421_v44 }
  0x3f   : > { %806 = vmatprep.mubr.bf16.mxu1 %v1423_v45 }
  0x45   : > { %710 = vmatmul.mubr.bf16.gmra.mxu0 %v1425_v46 }
  0x46   : > { %807 = vmatmul.mubr.bf16.gmra.mxu1 %v1426_v47  ;;  %717 = vmatprep.mubr.bf16.mxu0 %v1427_v48 }
  0x47   : > { %814 = vmatprep.mubr.bf16.mxu1 %v1429_v49 }
  0x4d   : > { %718 = vmatmul.mubr.bf16.gmra.mxu0 %v1431_v50 }
  0x4e   : > { %815 = vmatmul.mubr.bf16.gmra.mxu1 %v1432_v51  ;;  %725 = vmatprep.mubr.bf16.mxu0 %v1433_v52 }
  0x4f   : > { %822 = vmatprep.mubr.bf16.mxu1 %v1435_v53 }
  0x55   : > { %726 = vmatmul.mubr.bf16.gmra.mxu0 %v1437_v54 }
  0x56   : > { %823 = vmatmul.mubr.bf16.gmra.mxu1 %v1438_v55  ;;  %733 = vmatprep.mubr.bf16.mxu0 %v1439_v56 }
  0x57   : > { %830 = vmatprep.mubr.bf16.mxu1 %v1441_v57 }
  0x5d   : > { %734 = vmatmul.mubr.bf16.gmra.mxu0 %v1443_v58 }
  0x5e   : > { %831 = vmatmul.mubr.bf16.gmra.mxu1 %v1444_v59  ;;  %741 = vmatprep.mubr.bf16.mxu0 %v1445_v60 }
  0x5f   : > { %838 = vmatprep.mubr.bf16.mxu1 %v1447_v61 }
  0x65   : > { %742 = vmatmul.mubr.bf16.gmra.mxu0 %v1449_v62 }
  0x66   : > { %839 = vmatmul.mubr.bf16.gmra.mxu1 %v1450_v63 }
  0xed   : > { %v1251_v0 = vpop.f32.mrf.mxu0 }
  0xee   : > { %v1315_v1 = vpop.f32.mrf.mxu1 }
  0xef   : > { %v1252_v2 = vpop.f32.mrf.mxu0 }
  0xf0   : > { %v1253_v3 = vadd.f32 %v1252_v2, %v1251_v0  ;;  %v1316_v4 = vpop.f32.mrf.mxu1 }
  0xf1   : > { %v1317_v5 = vadd.f32 %v1316_v4, %v1315_v1  ;;  %v1254_v6 = vpop.f32.mrf.mxu0 }
  0xf2   : > { %v1318_v8 = vpop.f32.mrf.mxu1 }
  0xf3   : > { %v785_v9 = vadd.f32 %v1317_v5, %v1253_v3  ;;  %v1255_v10 = vpop.f32.mrf.mxu0 }
  0xf4   : > { %v1256_v12 = vadd.f32 %v1255_v10, %v1254_v6  ;;  %v1319_v13 = vpop.f32.mrf.mxu1 }
  0xf5   : > { %v854_v14 = vmul.f32 %v1633_v7, %v785_v9  ;;  %v1320_v15 = vadd.f32 %v1319_v13, %v1318_v8  ;;  %v1257_v16 = vpop.f32.mrf.mxu0 }
  0xf6   : > { %v1321_v17 = vpop.f32.mrf.mxu1 }
  0xf7   : > { %v877_v18 = vadd.f32 %v1638_v11, %v854_v14  ;;  %v788_v19 = vadd.f32 %v1320_v15, %v1256_v12  ;;  %v1258_v20 = vpop.f32.mrf.mxu0 }
  0xf8   : > { %v1259_v21 = vadd.f32 %v1258_v20, %v1257_v16  ;;  %v1322_v22 = vpop.f32.mrf.mxu1 }
  0xf9   : > { %v855_v23 = vmul.f32 %v1633_v7, %v788_v19  ;;  %v1323_v24 = vadd.f32 %v1322_v22, %v1321_v17  ;;  %v1260_v25 = vpop.f32.mrf.mxu0  ;;  %v909_v27 = vmul.f32 0.01, %v877_v18  ;;  %vm893_vm0 = vcmp.ge.f32.partialorder %v877_v18, 0.0 }
  0xfa   : > { %v1324_v26 = vpop.f32.mrf.mxu1 }
  0xfb   : > { %v878_v28 = vadd.f32 %v1638_v11, %v855_v23  ;;  %v793_v29 = vadd.f32 %v1323_v24, %v1259_v21  ;;  %v1261_v30 = vpop.f32.mrf.mxu0  ;;  %v925_v38 = vsel %vm893_vm0, %v877_v18, %v909_v27 }
  0xfc   : > { %v1262_v31 = vadd.f32 %v1261_v30, %v1260_v25  ;;  %v1325_v32 = vpop.f32.mrf.mxu1 }
  0xfd   : > { %vm894_vm1 = vcmp.ge.f32.partialorder %v878_v28, 0.0  ;;  %v910_v33 = vmul.f32 0.01, %v878_v28  ;;  %v856_v34 = vmul.f32 %v1633_v7, %v793_v29  ;;  %v1326_v35 = vadd.f32 %v1325_v32, %v1324_v26  ;;  %v1263_v36 = vpop.f32.mrf.mxu0 }
  0xfe   : > { %v1327_v37 = vpop.f32.mrf.mxu1 }
  0xff   : > { %v926_v39 = vsel %vm894_vm1, %v878_v28, %v910_v33  ;;  %v879_v40 = vadd.f32 %v1638_v11, %v856_v34  ;;  %v796_v41 = vadd.f32 %v1326_v35, %v1262_v31  ;;  %v1264_v42 = vpop.f32.mrf.mxu0 }
 0x100   : > { %v1191_v43 = vpack.c.bf16 %v926_v39, %v925_v38  ;;  %v1265_v44 = vadd.f32 %v1264_v42, %v1263_v36  ;;  %v1328_v45 = vpop.f32.mrf.mxu1 }
 0x101   : > { %v857_v46 = vmul.f32 %v1633_v7, %v796_v41  ;;  %v1329_v47 = vadd.f32 %v1328_v45, %v1327_v37  ;;  %v1266_v48 = vpop.f32.mrf.mxu0  ;;  %v911_v50 = vmul.f32 0.01, %v879_v40  ;;  %vm895_vm2 = vcmp.ge.f32.partialorder %v879_v40, 0.0 }
 0x102   : > { %1192 = vst [vmem:[%s1649_s20] sm:$0xff] %v1191_v43   ;;  %v1330_v49 = vpop.f32.mrf.mxu1 }
 0x103   : > { %v880_v51 = vadd.f32 %v1638_v11, %v857_v46  ;;  %v801_v52 = vadd.f32 %v1329_v47, %v1265_v44  ;;  %v1267_v53 = vpop.f32.mrf.mxu0  ;;  %v927_v61 = vsel %vm895_vm2, %v879_v40, %v911_v50 }
 0x104   : > { %v1268_v54 = vadd.f32 %v1267_v53, %v1266_v48  ;;  %v1331_v55 = vpop.f32.mrf.mxu1 }
 0x105   : > { %vm896_vm3 = vcmp.ge.f32.partialorder %v880_v51, 0.0  ;;  %v912_v56 = vmul.f32 0.01, %v880_v51  ;;  %v858_v57 = vmul.f32 %v1633_v7, %v801_v52  ;;  %v1332_v58 = vadd.f32 %v1331_v55, %v1330_v49  ;;  %v1269_v59 = vpop.f32.mrf.mxu0 }
 0x106   : > { %v1333_v60 = vpop.f32.mrf.mxu1 }
 0x107   : > { %v928_v62 = vsel %vm896_vm3, %v880_v51, %v912_v56  ;;  %v881_v63 = vadd.f32 %v1638_v11, %v858_v57  ;;  %v804_v0 = vadd.f32 %v1332_v58, %v1268_v54  ;;  %v1270_v1 = vpop.f32.mrf.mxu0 }
 0x108   : > { %v1196_v2 = vpack.c.bf16 %v928_v62, %v927_v61  ;;  %v1271_v3 = vadd.f32 %v1270_v1, %v1269_v59  ;;  %v1334_v4 = vpop.f32.mrf.mxu1 }
 0x109   : > { %v859_v5 = vmul.f32 %v1633_v7, %v804_v0  ;;  %v1335_v6 = vadd.f32 %v1334_v4, %v1333_v60  ;;  %v1272_v8 = vpop.f32.mrf.mxu0  ;;  %v913_v10 = vmul.f32 0.01, %v881_v63  ;;  %vm897_vm4 = vcmp.ge.f32.partialorder %v881_v63, 0.0 }
 0x10a   : > { %1228 = vst [vmem:[%s1649_s20 + $0x8] sm:$0xff] %v1196_v2   ;;  %v1336_v9 = vpop.f32.mrf.mxu1 }
 0x10b   : > { %v882_v12 = vadd.f32 %v1638_v11, %v859_v5  ;;  %v809_v13 = vadd.f32 %v1335_v6, %v1271_v3  ;;  %v1273_v14 = vpop.f32.mrf.mxu0  ;;  %v929_v22 = vsel %vm897_vm4, %v881_v63, %v913_v10 }
 0x10c   : > { %v1274_v15 = vadd.f32 %v1273_v14, %v1272_v8  ;;  %v1337_v16 = vpop.f32.mrf.mxu1 }
 0x10d   : > { %vm898_vm5 = vcmp.ge.f32.partialorder %v882_v12, 0.0  ;;  %v914_v17 = vmul.f32 0.01, %v882_v12  ;;  %v860_v18 = vmul.f32 %v1633_v7, %v809_v13  ;;  %v1338_v19 = vadd.f32 %v1337_v16, %v1336_v9  ;;  %v1275_v20 = vpop.f32.mrf.mxu0 }
 0x10e   : > { %v1339_v21 = vpop.f32.mrf.mxu1 }
 0x10f   : > { %v930_v23 = vsel %vm898_vm5, %v882_v12, %v914_v17  ;;  %v883_v24 = vadd.f32 %v1638_v11, %v860_v18  ;;  %v812_v25 = vadd.f32 %v1338_v19, %v1274_v15  ;;  %v1276_v26 = vpop.f32.mrf.mxu0 }
 0x110   : > { %v1201_v27 = vpack.c.bf16 %v930_v23, %v929_v22  ;;  %v1277_v28 = vadd.f32 %v1276_v26, %v1275_v20  ;;  %v1340_v29 = vpop.f32.mrf.mxu1 }
 0x111   : > { %v861_v30 = vmul.f32 %v1633_v7, %v812_v25  ;;  %v1341_v31 = vadd.f32 %v1340_v29, %v1339_v21  ;;  %v1278_v32 = vpop.f32.mrf.mxu0  ;;  %v915_v34 = vmul.f32 0.01, %v883_v24  ;;  %vm899_vm6 = vcmp.ge.f32.partialorder %v883_v24, 0.0 }
 0x112   : > { %1229 = vst [vmem:[%s1649_s20 + $0x10] sm:$0xff] %v1201_v27   ;;  %v1342_v33 = vpop.f32.mrf.mxu1 }
 0x113   : > { %v884_v35 = vadd.f32 %v1638_v11, %v861_v30  ;;  %v817_v36 = vadd.f32 %v1341_v31, %v1277_v28  ;;  %v1279_v37 = vpop.f32.mrf.mxu0  ;;  %v931_v45 = vsel %vm899_vm6, %v883_v24, %v915_v34 }
 0x114   : > { %v1280_v38 = vadd.f32 %v1279_v37, %v1278_v32  ;;  %v1343_v39 = vpop.f32.mrf.mxu1 }
 0x115   : > { %vm900_vm7 = vcmp.ge.f32.partialorder %v884_v35, 0.0  ;;  %v916_v40 = vmul.f32 0.01, %v884_v35  ;;  %v862_v41 = vmul.f32 %v1633_v7, %v817_v36  ;;  %v1344_v42 = vadd.f32 %v1343_v39, %v1342_v33  ;;  %v1281_v43 = vpop.f32.mrf.mxu0 }
 0x116   : > { %v1345_v44 = vpop.f32.mrf.mxu1 }
 0x117   : > { %v932_v46 = vsel %vm900_vm7, %v884_v35, %v916_v40  ;;  %v885_v47 = vadd.f32 %v1638_v11, %v862_v41  ;;  %v820_v48 = vadd.f32 %v1344_v42, %v1280_v38  ;;  %v1282_v49 = vpop.f32.mrf.mxu0 }
 0x118   : > { %v1206_v50 = vpack.c.bf16 %v932_v46, %v931_v45  ;;  %v1283_v51 = vadd.f32 %v1282_v49, %v1281_v43  ;;  %v1346_v52 = vpop.f32.mrf.mxu1 }
 0x119   : > { %v863_v53 = vmul.f32 %v1633_v7, %v820_v48  ;;  %v1347_v54 = vadd.f32 %v1346_v52, %v1345_v44  ;;  %v1284_v55 = vpop.f32.mrf.mxu0  ;;  %v917_v57 = vmul.f32 0.01, %v885_v47  ;;  %vm901_vm8 = vcmp.ge.f32.partialorder %v885_v47, 0.0 }
 0x11a   : > { %1230 = vst [vmem:[%s1649_s20 + $0x18] sm:$0xff] %v1206_v50   ;;  %v1348_v56 = vpop.f32.mrf.mxu1 }
 0x11b   : > { %v886_v58 = vadd.f32 %v1638_v11, %v863_v53  ;;  %v825_v59 = vadd.f32 %v1347_v54, %v1283_v51  ;;  %v1285_v60 = vpop.f32.mrf.mxu0  ;;  %v933_v4 = vsel %vm901_vm8, %v885_v47, %v917_v57 }
 0x11c   : > { %v1286_v61 = vadd.f32 %v1285_v60, %v1284_v55  ;;  %v1349_v62 = vpop.f32.mrf.mxu1 }
 0x11d   : > { %vm902_vm9 = vcmp.ge.f32.partialorder %v886_v58, 0.0  ;;  %v918_v63 = vmul.f32 0.01, %v886_v58  ;;  %v864_v0 = vmul.f32 %v1633_v7, %v825_v59  ;;  %v1350_v1 = vadd.f32 %v1349_v62, %v1348_v56  ;;  %v1287_v2 = vpop.f32.mrf.mxu0 }
 0x11e   : > { %v1351_v3 = vpop.f32.mrf.mxu1 }
 0x11f   : > { %v934_v5 = vsel %vm902_vm9, %v886_v58, %v918_v63  ;;  %v887_v6 = vadd.f32 %v1638_v11, %v864_v0  ;;  %v828_v8 = vadd.f32 %v1350_v1, %v1286_v61  ;;  %v1288_v9 = vpop.f32.mrf.mxu0 }
 0x120   : > { %v1211_v10 = vpack.c.bf16 %v934_v5, %v933_v4  ;;  %v1289_v12 = vadd.f32 %v1288_v9, %v1287_v2  ;;  %v1352_v13 = vpop.f32.mrf.mxu1 }
 0x121   : > { %v865_v14 = vmul.f32 %v1633_v7, %v828_v8  ;;  %v1353_v15 = vadd.f32 %v1352_v13, %v1351_v3  ;;  %v1290_v16 = vpop.f32.mrf.mxu0  ;;  %v919_v18 = vmul.f32 0.01, %v887_v6  ;;  %vm903_vm10 = vcmp.ge.f32.partialorder %v887_v6, 0.0 }
 0x122   : > { %1231 = vst [vmem:[%s1649_s20 + $0x20] sm:$0xff] %v1211_v10   ;;  %v1354_v17 = vpop.f32.mrf.mxu1 }
 0x123   : > { %v888_v19 = vadd.f32 %v1638_v11, %v865_v14  ;;  %v833_v20 = vadd.f32 %v1353_v15, %v1289_v12  ;;  %v1291_v21 = vpop.f32.mrf.mxu0  ;;  %v935_v29 = vsel %vm903_vm10, %v887_v6, %v919_v18 }
 0x124   : > { %v1292_v22 = vadd.f32 %v1291_v21, %v1290_v16  ;;  %v1355_v23 = vpop.f32.mrf.mxu1 }
 0x125   : > { %vm904_vm11 = vcmp.ge.f32.partialorder %v888_v19, 0.0  ;;  %v920_v24 = vmul.f32 0.01, %v888_v19  ;;  %v866_v25 = vmul.f32 %v1633_v7, %v833_v20  ;;  %v1356_v26 = vadd.f32 %v1355_v23, %v1354_v17  ;;  %v1293_v27 = vpop.f32.mrf.mxu0 }
 0x126   : > { %v1357_v28 = vpop.f32.mrf.mxu1 }
 0x127   : > { %v936_v30 = vsel %vm904_vm11, %v888_v19, %v920_v24  ;;  %v889_v31 = vadd.f32 %v1638_v11, %v866_v25  ;;  %v836_v32 = vadd.f32 %v1356_v26, %v1292_v22  ;;  %v1294_v33 = vpop.f32.mrf.mxu0 }
 0x128   : > { %v1216_v34 = vpack.c.bf16 %v936_v30, %v935_v29  ;;  %v1295_v35 = vadd.f32 %v1294_v33, %v1293_v27  ;;  %v1358_v36 = vpop.f32.mrf.mxu1 }
 0x129   : > { %v867_v37 = vmul.f32 %v1633_v7, %v836_v32  ;;  %v1359_v38 = vadd.f32 %v1358_v36, %v1357_v28  ;;  %v1296_v39 = vpop.f32.mrf.mxu0  ;;  %v921_v41 = vmul.f32 0.01, %v889_v31  ;;  %vm905_vm12 = vcmp.ge.f32.partialorder %v889_v31, 0.0 }
 0x12a   : > { %1232 = vst [vmem:[%s1649_s20 + $0x28] sm:$0xff] %v1216_v34   ;;  %v1360_v40 = vpop.f32.mrf.mxu1 }
 0x12b   : > { %v890_v42 = vadd.f32 %v1638_v11, %v867_v37  ;;  %v841_v43 = vadd.f32 %v1359_v38, %v1295_v35  ;;  %v1297_v44 = vpop.f32.mrf.mxu0  ;;  %v937_v50 = vsel %vm905_vm12, %v889_v31, %v921_v41 }
 0x12c   : > { %v1298_v45 = vadd.f32 %v1297_v44, %v1296_v39  ;;  %v1361_v46 = vpop.f32.mrf.mxu1 }
 0x12d   : > { %vm906_vm13 = vcmp.ge.f32.partialorder %v890_v42, 0.0  ;;  %v922_v47 = vmul.f32 0.01, %v890_v42  ;;  %v868_v48 = vmul.f32 %v1633_v7, %v841_v43  ;;  %v1362_v49 = vadd.f32 %v1361_v46, %v1360_v40 }
 0x12f   : > { %v938_v51 = vsel %vm906_vm13, %v890_v42, %v922_v47  ;;  %v891_v52 = vadd.f32 %v1638_v11, %v868_v48  ;;  %v844_v53 = vadd.f32 %v1362_v49, %v1298_v45 }
 0x130   : > { %v1221_v54 = vpack.c.bf16 %v938_v51, %v937_v50 }
 0x131   : > { %v869_v55 = vmul.f32 %v1633_v7, %v844_v53  ;;  %v923_v56 = vmul.f32 0.01, %v891_v52  ;;  %vm907_vm14 = vcmp.ge.f32.partialorder %v891_v52, 0.0 }
 0x132   : > { %1233 = vst [vmem:[%s1649_s20 + $0x30] sm:$0xff] %v1221_v54  }
 0x133   : > { %v892_v57 = vadd.f32 %v1638_v11, %v869_v55  ;;  %v939_v59 = vsel %vm907_vm14, %v891_v52, %v923_v56 }
 0x135   : > { %vm908_vm15 = vcmp.ge.f32.partialorder %v892_v57, 0.0  ;;  %v924_v58 = vmul.f32 0.01, %v892_v57 }
 0x137   : > { %v940_v60 = vsel %vm908_vm15, %v892_v57, %v924_v58 }
 0x138   : > { %v1226_v61 = vpack.c.bf16 %v940_v60, %v939_v59 }
 0x13a   : > { %1234 = vst [vmem:[%s1649_s20 + $0x38] sm:$0xff] %v1226_v61  }
 0x13b PF: > { %s14_s15 = sadd.s32 1, %s1457_s15  }
 0x13c   : > { %p11_p4 = scmp.ge.s32.totalorder %s14_s15, 4  }
 0x13e   :  { %13 = sbr.rel (!%p11_p4) target bundleno = 1 (0x1), region = 66 }

// kernel: discriminator_forward.5
= control target key start
LH: loop header
LB: loop body
LE: loop exit
PB: predicated region body
PF: predicated region fallthrough
CT: control target
= control target key end

     0   :  { %s24293_s2 = inlined_call_operand.vmem [shape: bf16[1664,128], index: 2, kind: input, shape index: {}]   ;;  %s24294_s0 = inlined_call_operand.vmem [shape: bf16[128,1664], index: 0, kind: input, shape index: {}]   ;;  %s24295_s5 = inlined_call_operand.vmem [shape: bf16[2048,256], index: 5, kind: input, shape index: {}]   ;;  %s24296_s3 = inlined_call_operand.vmem [shape: f32[1,128], index: 3, kind: input, shape index: {}]   ;;  %s24297_s4 = inlined_call_operand.vmem [shape: f32[1,128], index: 4, kind: input, shape index: {}]   ;;  %s24298_s8 = inlined_call_operand.vmem [shape: bf16[256,512], index: 8, kind: input, shape index: {}]   ;;  %s24299_s11 = inlined_call_operand.vmem [shape: bf16[128,512], index: 11, kind: input, shape index: {}]   ;;  %s24300_s12 = inlined_call_operand.vmem [shape: bf16[512,512], index: 12, kind: input, shape index: {}]   ;;  %s24301_s6 = inlined_call_operand.vmem [shape: f32[1,256], index: 6, kind: input, shape index: {}]   ;;  %s24302_s7 = inlined_call_operand.vmem [shape: f32[1,256], index: 7, kind: input, shape index: {}]   ;;  %s24303_s1 = inlined_call_operand.vmem [shape: bf16[8,128], index: 1, kind: input, shape index: {}]   ;;  %s24304_s9 = inlined_call_operand.vmem [shape: f32[1,512], index: 9, kind: input, shape index: {}]   ;;  %s24305_s10 = inlined_call_operand.vmem [shape: f32[1,512], index: 10, kind: input, shape index: {}]   ;;  %s24306_s14 = inlined_call_operand.vmem [shape: bf16[512,1024], index: 14, kind: input, shape index: {}]   ;;  %s24307_s13 = inlined_call_operand.vmem [shape: bf16[512,1024], index: 13, kind: input, shape index: {}]   ;;  %s24308_s16 = inlined_call_operand.vmem [shape: bf16[1024,1024], index: 16, kind: input, shape index: {}]   ;;  %s24309_s15 = inlined_call_operand.vmem [shape: f32[1,1024], index: 15, kind: input, shape index: {}]   ;;  %s24310_s17 = inlined_call_operand.vmem [shape: f32[1,1024], index: 17, kind: input, shape index: {}]   ;;  %s24311_s18 = inlined_call_operand.vmem [shape: bf16[1024,128], index: 18, kind: input, shape index: {}]   ;;  %s24312_s21 = inlined_call_operand.vmem [shape: f32[8,1024], index: 21, kind: output, shape index: {1}]   ;;  %s24313_s19 = inlined_call_operand.vmem [shape: f32[1,128], index: 19, kind: input, shape index: {}]   ;;  %s24314_s20 = inlined_call_operand.vmem [shape: f32[8,128], index: 20, kind: output, shape index: {0}]  }
   0x1   :  { %24319 = sst [smem:[#allocation2_spill]] %s24293_s2 }
   0x2   :  { %24320 = sst [smem:[#allocation3_spill]] %s24294_s0 }
   0x3   :  { %24321 = sst [smem:[#allocation4_spill]] %s24295_s5 }
   0x4   :  { %24322 = sst [smem:[#allocation5_spill]] %s24296_s3 }
   0x5   :  { %24323 = sst [smem:[#allocation6_spill]] %s24297_s4 }
   0x6   :  { %24324 = sst [smem:[#allocation7_spill]] %s24298_s8 }
   0x7   :  { %s24325_s26 = sld [smem:[#allocation2_spill]] }
   0x8   :  { %s24326_s22 = sld [smem:[#allocation3_spill]] }
   0x9   :  { %s24327_s30 = sld [smem:[#allocation4_spill]] }
   0xa   :  { %s24328_s2 = sld [smem:[#allocation5_spill]] }
   0xb   :  { %s24329_s23 = sld [smem:[#allocation6_spill]] }
   0xc   :  { %s24330_s4 = sld [smem:[#allocation7_spill]] }
   0xd   :  { %v16966_v0 = vld [vmem:[%s24325_s26 + $0x78] sm:$0xff]   ;;  %v16970_v4 = vld [vmem:[%s24325_s26 + $0x70] sm:$0xff]   ;;  %v16974_v8 = vld [vmem:[%s24325_s26 + $0x68] sm:$0xff]  }
   0xe   :  { %v16967_v1 = vld [vmem:[%s24325_s26 + $0xf8] sm:$0xff]   ;;  %16445 = vmatprep.subr.bf16.mxu0 %v16966_v0  ;;  %v16971_v5 = vld [vmem:[%s24325_s26 + $0xf0] sm:$0xff]   ;;  %v16975_v9 = vld [vmem:[%s24325_s26 + $0xe8] sm:$0xff]  }
   0xf   :  { %v16968_v2 = vld [vmem:[%s24325_s26 + $0x38] sm:$0xff]   ;;  %16509 = vmatprep.subr.bf16.mxu1 %v16967_v1  ;;  %v16972_v6 = vld [vmem:[%s24325_s26 + $0x30] sm:$0xff]   ;;  %v16976_v10 = vld [vmem:[%s24325_s26 + $0x28] sm:$0xff]  }
  0x10   :  { %v16969_v3 = vld [vmem:[%s24325_s26 + $0xb8] sm:$0xff]   ;;  %16446 = vmatpush3.bf16.msra.mxu0 %v16968_v2  ;;  %v16973_v7 = vld [vmem:[%s24325_s26 + $0xb0] sm:$0xff]   ;;  %v16977_v11 = vld [vmem:[%s24325_s26 + $0xa8] sm:$0xff]  }
  0x11   :  { %16510 = vmatpush3.bf16.msra.mxu1 %v16969_v3  ;;  %16447 = vmatprep.subr.bf16.mxu0 %v16970_v4  ;;  %v16978_v12 = vld [vmem:[%s24325_s26 + $0x60] sm:$0xff]   ;;  %v16982_v16 = vld [vmem:[%s24325_s26 + $0x58] sm:$0xff]   ;;  %v16986_v20 = vld [vmem:[%s24325_s26 + $0x50] sm:$0xff]  }
  0x12   :  { %16511 = vmatprep.subr.bf16.mxu1 %v16971_v5  ;;  %v16979_v13 = vld [vmem:[%s24325_s26 + $0xe0] sm:$0xff]   ;;  %v16983_v17 = vld [vmem:[%s24325_s26 + $0xd8] sm:$0xff]   ;;  %v16987_v21 = vld [vmem:[%s24325_s26 + $0xd0] sm:$0xff]  }
  0x13   :  { %v16980_v14 = vld [vmem:[%s24325_s26 + $0x20] sm:$0xff]   ;;  %v16984_v18 = vld [vmem:[%s24325_s26 + $0x18] sm:$0xff]   ;;  %v16988_v22 = vld [vmem:[%s24325_s26 + $0x10] sm:$0xff]  }
  0x14   :  { %16448 = vmatpush3.bf16.msra.mxu0 %v16972_v6  ;;  %v16981_v15 = vld [vmem:[%s24325_s26 + $0xa0] sm:$0xff]   ;;  %v16985_v19 = vld [vmem:[%s24325_s26 + $0x98] sm:$0xff]   ;;  %v16989_v23 = vld [vmem:[%s24325_s26 + $0x90] sm:$0xff]  }
  0x15   :  { %16512 = vmatpush3.bf16.msra.mxu1 %v16973_v7  ;;  %16449 = vmatprep.subr.bf16.mxu0 %v16974_v8  ;;  %v16990_v24 = vld [vmem:[%s24325_s26 + $0x48] sm:$0xff]   ;;  %v16994_v28 = vld [vmem:[%s24325_s26 + $0x40] sm:$0xff]   ;;  %v17004_v36 = vld [vmem:[%s24325_s26 + $0x178] sm:$0xff]  }
  0x16   :  { %16513 = vmatprep.subr.bf16.mxu1 %v16975_v9  ;;  %v16991_v25 = vld [vmem:[%s24325_s26 + $0xc8] sm:$0xff]   ;;  %v16995_v29 = vld [vmem:[%s24325_s26 + $0xc0] sm:$0xff]   ;;  %v17005_v37 = vld [vmem:[%s24325_s26 + $0x138] sm:$0xff]  }
  0x17   :  { %v16992_v26 = vld [vmem:[%s24325_s26 + $0x8] sm:$0xff]   ;;  %v16996_v30 = vld [vmem:[%s24325_s26] sm:$0xff]   ;;  %v17012_v42 = vld [vmem:[%s24325_s26 + $0x170] sm:$0xff]  }
  0x18   :  { %16450 = vmatpush3.bf16.msra.mxu0 %v16976_v10  ;;  %v16993_v27 = vld [vmem:[%s24325_s26 + $0x88] sm:$0xff]   ;;  %v16997_v31 = vld [vmem:[%s24325_s26 + $0x80] sm:$0xff]   ;;  %v17013_v43 = vld [vmem:[%s24325_s26 + $0x130] sm:$0xff]  }
  0x19   :  { %16514 = vmatpush3.bf16.msra.mxu1 %v16977_v11  ;;  %16451 = vmatprep.subr.bf16.mxu0 %v16978_v12  ;;  %v16998_v32 = vld [vmem:[%s24326_s22] ss:$52 sps:$4 sm:$0xff]   ;;  %v17000_v33 = vld [vmem:[%s24326_s22 + $0x4] ss:$52 sps:$4 sm:$0xff]   ;;  %v17001_v34 = vld [vmem:[%s24326_s22 + $0x8] ss:$52 sps:$4 sm:$0xff]  }
  0x1a   :  { %16515 = vmatprep.subr.bf16.mxu1 %v16979_v13  ;;  %v17003_v35 = vld [vmem:[%s24326_s22 + $0xc] ss:$52 sps:$4 sm:$0xff]   ;;  %1572 = vmatprep.mubr.bf16.mxu0 %v17000_v33  ;;  %v17008_v39 = vld [vmem:[%s24326_s22 + $0x74] ss:$52 sps:$4 sm:$0xff]   ;;  %v17011_v41 = vld [vmem:[%s24326_s22 + $0x70] ss:$52 sps:$4 sm:$0xff]  }
  0x1b   :  { %1669 = vmatprep.mubr.bf16.mxu1 %v17003_v35  ;;  %v17006_v38 = vld [vmem:[%s24326_s22 + $0x6c] ss:$52 sps:$4 sm:$0xff]   ;;  %v17010_v40 = vld [vmem:[%s24326_s22 + $0x68] ss:$52 sps:$4 sm:$0xff]   ;;  %v17018_v48 = vld [vmem:[%s24326_s22 + $0xd0] ss:$52 sps:$4 sm:$0xff]  }
  0x1c   :  { %16452 = vmatpush3.bf16.msra.mxu0 %v16980_v14  ;;  %v17014_v44 = vld [vmem:[%s24326_s22 + $0xd4] ss:$52 sps:$4 sm:$0xff]   ;;  %v17016_v45 = vld [vmem:[%s24326_s22 + $0xdc] ss:$52 sps:$4 sm:$0xff]   ;;  %v17019_v49 = vld [vmem:[%s24326_s22 + $0xd8] ss:$52 sps:$4 sm:$0xff]  }
  0x1d   :  { %16516 = vmatpush3.bf16.msra.mxu1 %v16981_v15  ;;  %16453 = vmatprep.subr.bf16.mxu0 %v16982_v16  ;;  %v17020_v46 = vld [vmem:[%s24325_s26 + $0x168] sm:$0xff]   ;;  %v17022_v50 = vld [vmem:[%s24326_s22 + $0x13c] ss:$52 sps:$4 sm:$0xff]   ;;  %v17024_v51 = vld [vmem:[%s24326_s22 + $0x144] ss:$52 sps:$4 sm:$0xff]  }
  0x1e   :  { %16517 = vmatprep.subr.bf16.mxu1 %v16983_v17  ;;  %v17021_v47 = vld [vmem:[%s24325_s26 + $0x128] sm:$0xff]   ;;  %v17028_v52 = vld [vmem:[%s24325_s26 + $0x160] sm:$0xff]   ;;  %v17036_v55 = vld [vmem:[%s24325_s26 + $0x158] sm:$0xff]  }
  0x1f   :  { %v17029_v53 = vld [vmem:[%s24325_s26 + $0x120] sm:$0xff]   ;;  %v17026_v54 = vld [vmem:[%s24326_s22 + $0x138] ss:$52 sps:$4 sm:$0xff]   ;;  %v17040_v62 = vld [vmem:[%s24325_s26 + $0x1f0] sm:$0xff]  }
  0x20   :  { %16454 = vmatpush3.bf16.msra.mxu0 %v16984_v18  ;;  %v17027_v56 = vld [vmem:[%s24326_s22 + $0x140] ss:$52 sps:$4 sm:$0xff]   ;;  %v17030_v57 = vld [vmem:[%s24326_s22 + $0x1a4] ss:$52 sps:$4 sm:$0xff]   ;;  %v17035_v2 = vld [vmem:[%s24326_s22 + $0x1a8] ss:$52 sps:$4 sm:$0xff]  }
  0x21   :  { %16518 = vmatpush3.bf16.msra.mxu1 %v16985_v19  ;;  %16455 = vmatprep.subr.bf16.mxu0 %v16986_v20  ;;  %v17037_v58 = vld [vmem:[%s24325_s26 + $0x118] sm:$0xff]   ;;  %v17032_v59 = vld [vmem:[%s24326_s22 + $0x1ac] ss:$52 sps:$4 sm:$0xff]   ;;  %v17045_v63 = vld [vmem:[%s24325_s26 + $0x1b0] sm:$0xff]  }
  0x22   :  { %16519 = vmatprep.subr.bf16.mxu1 %v16987_v21  ;;  %v17038_v60 = vld [vmem:[%s24325_s26 + $0x1f8] sm:$0xff]   ;;  %v17034_v0 = vld [vmem:[%s24326_s22 + $0x1a0] ss:$52 sps:$4 sm:$0xff]   ;;  %v17050_v6 = vld [vmem:[%s24325_s26 + $0x1e8] sm:$0xff]  }
  0x23   :  { %v17039_v61 = vld [vmem:[%s24325_s26 + $0x1b8] sm:$0xff]   ;;  %v17048_v1 = vld [vmem:[%s24325_s26 + $0x150] sm:$0xff]   ;;  %v17041_v3 = vld [vmem:[%s24326_s22 + $0x20c] ss:$52 sps:$4 sm:$0xff]  }
  0x24   :  { %16456 = vmatpush3.bf16.msra.mxu0 %v16988_v22  ;;  %v17049_v4 = vld [vmem:[%s24325_s26 + $0x110] sm:$0xff]   ;;  %v17051_v7 = vld [vmem:[%s24325_s26 + $0x1a8] sm:$0xff]   ;;  %v17052_v8 = vld [vmem:[%s24325_s26 + $0x1e0] sm:$0xff]  }
  0x25   :  { %16520 = vmatpush3.bf16.msra.mxu1 %v16989_v23  ;;  %16457 = vmatprep.subr.bf16.mxu0 %v16990_v24  ;;  %v17043_v5 = vld [vmem:[%s24326_s22 + $0x214] ss:$52 sps:$4 sm:$0xff]   ;;  %v17057_v9 = vld [vmem:[%s24325_s26 + $0x1a0] sm:$0xff]   ;;  %v17055_v14 = vld [vmem:[%s24326_s22 + $0x27c] ss:$52 sps:$4 sm:$0xff]  }
  0x26   :  { %16521 = vmatprep.subr.bf16.mxu1 %v16991_v25  ;;  %v17046_v10 = vld [vmem:[%s24326_s22 + $0x208] ss:$52 sps:$4 sm:$0xff]   ;;  %v17047_v11 = vld [vmem:[%s24326_s22 + $0x210] ss:$52 sps:$4 sm:$0xff]   ;;  %v17059_v21 = vld [vmem:[%s24326_s22 + $0x278] ss:$52 sps:$4 sm:$0xff]  }
  0x27   :  { %v17053_v12 = vld [vmem:[%s24326_s22 + $0x274] ss:$52 sps:$4 sm:$0xff]   ;;  %v17062_v16 = vld [vmem:[%s24325_s26 + $0x1d8] sm:$0xff]   ;;  %v17058_v19 = vld [vmem:[%s24326_s22 + $0x270] ss:$52 sps:$4 sm:$0xff]  }
  0x28   :  { %16458 = vmatpush3.bf16.msra.mxu0 %v16992_v26  ;;  %v17060_v13 = vld [vmem:[%s24325_s26 + $0x148] sm:$0xff]   ;;  %v17063_v17 = vld [vmem:[%s24325_s26 + $0x198] sm:$0xff]   ;;  %v17064_v18 = vld [vmem:[%s24325_s26 + $0x1d0] sm:$0xff]  }
  0x29   :  { %16522 = vmatpush3.bf16.msra.mxu1 %v16993_v27  ;;  %16459 = vmatprep.subr.bf16.mxu0 %v16994_v28  ;;  %v17061_v15 = vld [vmem:[%s24325_s26 + $0x108] sm:$0xff]   ;;  %v17069_v20 = vld [vmem:[%s24325_s26 + $0x190] sm:$0xff]   ;;  %v17067_v23 = vld [vmem:[%s24326_s22 + $0x2e4] ss:$52 sps:$4 sm:$0xff]  }
  0x2a   :  { %16523 = vmatprep.subr.bf16.mxu1 %v16995_v29  ;;  %v17065_v22 = vld [vmem:[%s24326_s22 + $0x2dc] ss:$52 sps:$4 sm:$0xff]   ;;  %v17072_v24 = vld [vmem:[%s24325_s26 + $0x140] sm:$0xff]   ;;  %v17074_v26 = vld [vmem:[%s24325_s26 + $0x1c8] sm:$0xff]  }
  0x2b   :  { %v17073_v25 = vld [vmem:[%s24325_s26 + $0x100] sm:$0xff]   ;;  %v17075_v27 = vld [vmem:[%s24325_s26 + $0x188] sm:$0xff]  }
  0x2c   :  { %16460 = vmatpush3.bf16.msra.mxu0 %v16996_v30  ;;  %v17076_v28 = vld [vmem:[%s24325_s26 + $0x1c0] sm:$0xff]   ;;  %v17081_v30 = vld [vmem:[%s24325_s26 + $0x278] sm:$0xff]   ;;  %v17079_v33 = vld [vmem:[%s24326_s22 + $0x14] ss:$52 sps:$4 sm:$0xff]  }
  0x2d   :  { %16524 = vmatpush3.bf16.msra.mxu1 %v16997_v31  ;;  %16573 = vmatprep.subr.bf16.mxu0 %v17004_v36  ;;  %v17080_v29 = vld [vmem:[%s24325_s26 + $0x180] sm:$0xff]   ;;  %v17070_v31 = vld [vmem:[%s24326_s22 + $0x2d8] ss:$52 sps:$4 sm:$0xff]  }
  0x2e   :  { %16637 = vmatprep.subr.bf16.mxu1 %v17038_v60  ;;  %v17077_v35 = vld [vmem:[%s24326_s22 + $0x10] ss:$52 sps:$4 sm:$0xff]   ;;  %v17082_v36 = vld [vmem:[%s24326_s22 + $0x18] ss:$52 sps:$4 sm:$0xff]  }
  0x2f   :  { %1573 = vmatmul.mubr.bf16.vlgmr.msra.gmra.mxu0 %v16998_v32  ;;  %v17071_v32 = vld [vmem:[%s24326_s22 + $0x2e0] ss:$52 sps:$4 sm:$0xff]  }
  0x30   :  { %1670 = vmatmul.mubr.bf16.vlgmr.msra.gmra.mxu1 %v17001_v34  ;;  %16574 = vmatpush3.bf16.msra.mxu0 %v17005_v37  ;;  %v17084_v34 = vld [vmem:[%s24326_s22 + $0x1c] ss:$52 sps:$4 sm:$0xff]  }
  0x31   :  { %1580 = vmatprep.mubr.bf16.mxu0 %v17006_v38  ;;  %1677 = vmatprep.mubr.bf16.mxu1 %v17008_v39  ;;  %v17085_v37 = vld [vmem:[%s24325_s26 + $0x238] sm:$0xff]   ;;  %v17089_v39 = vld [vmem:[%s24325_s26 + $0x270] sm:$0xff]  }
  0x32   :  { %16575 = vmatprep.subr.bf16.mxu0 %v17012_v42  ;;  %16638 = vmatpush3.bf16.msra.mxu1 %v17039_v61  ;;  %v17086_v38 = vld [vmem:[%s24326_s22 + $0x7c] ss:$52 sps:$4 sm:$0xff]   ;;  %v17097_v42 = vld [vmem:[%s24325_s26 + $0x268] sm:$0xff]  }
  0x33   :  { %16639 = vmatprep.subr.bf16.mxu1 %v17040_v62  ;;  %v17125_v60 = vld [vmem:[%s24325_s26 + $0x250] sm:$0xff]   ;;  %v17104_v62 = vld [vmem:[%s24326_s22 + $0x148] ss:$52 sps:$4 sm:$0xff]  }
  0x34   :  { %16576 = vmatpush3.bf16.msra.mxu0 %v17013_v43  ;;  %v17088_v43 = vld [vmem:[%s24326_s22 + $0x78] ss:$52 sps:$4 sm:$0xff]   ;;  %v17128_v61 = vld [vmem:[%s24325_s26 + $0x210] sm:$0xff]  }
  0x35   :  { %16577 = vmatprep.subr.bf16.mxu0 %v17020_v46  ;;  %v17098_v46 = vld [vmem:[%s24326_s22 + $0xec] ss:$52 sps:$4 sm:$0xff]  }
  0x36   :  { %16640 = vmatpush3.bf16.msra.mxu1 %v17045_v63  ;;  %v17130_v63 = vld [vmem:[%s24325_s26 + $0x2e8] sm:$0xff]  }
  0x37   :  { %1581 = vmatmul.mubr.bf16.gmra.mxu0 %v17010_v40  ;;  %16641 = vmatprep.subr.bf16.mxu1 %v17050_v6  ;;  %v17090_v40 = vld [vmem:[%s24326_s22 + $0x84] ss:$52 sps:$4 sm:$0xff]   ;;  %v17137_v6 = vld [vmem:[%s24325_s26 + $0x248] sm:$0xff]  }
  0x38   :  { %1678 = vmatmul.mubr.bf16.gmra.mxu1 %v17011_v41  ;;  %1588 = vmatprep.mubr.bf16.mxu0 %v17014_v44  ;;  %v17092_v41 = vld [vmem:[%s24325_s26 + $0x230] sm:$0xff]  }
  0x39   :  { %1685 = vmatprep.mubr.bf16.mxu1 %v17016_v45  ;;  %16578 = vmatpush3.bf16.msra.mxu0 %v17021_v47  ;;  %v17093_v44 = vld [vmem:[%s24326_s22 + $0x80] ss:$52 sps:$4 sm:$0xff]   ;;  %v17094_v45 = vld [vmem:[%s24326_s22 + $0xe4] ss:$52 sps:$4 sm:$0xff]   ;;  %v17100_v47 = vld [vmem:[%s24325_s26 + $0x228] sm:$0xff]  }
  0x3a   :  { %16579 = vmatprep.subr.bf16.mxu0 %v17028_v52  ;;  %16642 = vmatpush3.bf16.msra.mxu1 %v17051_v7  ;;  %v17096_v52 = vld [vmem:[%s24326_s22 + $0xe0] ss:$52 sps:$4 sm:$0xff]   ;;  %v17140_v7 = vld [vmem:[%s24325_s26 + $0x208] sm:$0xff]  }
  0x3b   :  { %16643 = vmatprep.subr.bf16.mxu1 %v17052_v8  ;;  %v17112_v8 = vld [vmem:[%s24326_s22 + $0x1b0] ss:$52 sps:$4 sm:$0xff]  }
  0x3d   :  { %16580 = vmatpush3.bf16.msra.mxu0 %v17029_v53  ;;  %v17119_v53 = vld [vmem:[%s24325_s26 + $0x2b8] sm:$0xff]  }
  0x3e   :  { %16581 = vmatprep.subr.bf16.mxu0 %v17036_v55  ;;  %16644 = vmatpush3.bf16.msra.mxu1 %v17057_v9  ;;  %v17120_v55 = vld [vmem:[%s24325_s26 + $0x2f0] sm:$0xff]   ;;  %v17142_v9 = vld [vmem:[%s24325_s26 + $0x2d8] sm:$0xff]  }
  0x3f   :  { %1589 = vmatmul.mubr.bf16.gmra.mxu0 %v17018_v48  ;;  %16645 = vmatprep.subr.bf16.mxu1 %v17062_v16  ;;  %v17105_v48 = vld [vmem:[%s24325_s26 + $0x260] sm:$0xff]  }
  0x40   :  { %1686 = vmatmul.mubr.bf16.gmra.mxu1 %v17019_v49  ;;  %1596 = vmatprep.mubr.bf16.mxu0 %v17022_v50  ;;  %v17108_v49 = vld [vmem:[%s24325_s26 + $0x220] sm:$0xff]   ;;  %v17113_v50 = vld [vmem:[%s24325_s26 + $0x258] sm:$0xff]  }
  0x41   :  { %1693 = vmatprep.mubr.bf16.mxu1 %v17024_v51  ;;  %16582 = vmatpush3.bf16.msra.mxu0 %v17037_v58  ;;  %v17118_v51 = vld [vmem:[%s24325_s26 + $0x2f8] sm:$0xff]   ;;  %v17123_v58 = vld [vmem:[%s24325_s26 + $0x2b0] sm:$0xff]   ;;  %v17149_v16 = vld [vmem:[%s24325_s26 + $0x240] sm:$0xff]  }
  0x42   :  { %16583 = vmatprep.subr.bf16.mxu0 %v17048_v1  ;;  %16646 = vmatpush3.bf16.msra.mxu1 %v17063_v17  ;;  %v17131_v1 = vld [vmem:[%s24325_s26 + $0x2a8] sm:$0xff]  }
  0x43   :  { %16647 = vmatprep.subr.bf16.mxu1 %v17064_v18  ;;  %v17124_v17 = vld [vmem:[%s24326_s22 + $0x218] ss:$52 sps:$4 sm:$0xff]   ;;  %v17152_v18 = vld [vmem:[%s24325_s26 + $0x200] sm:$0xff]  }
  0x45   :  { %16584 = vmatpush3.bf16.msra.mxu0 %v17049_v4  ;;  %v17114_v4 = vld [vmem:[%s24326_s22 + $0x1bc] ss:$52 sps:$4 sm:$0xff]  }
  0x46   :  { %16585 = vmatprep.subr.bf16.mxu0 %v17060_v13  ;;  %16648 = vmatpush3.bf16.msra.mxu1 %v17069_v20  ;;  %v17144_v13 = vld [vmem:[%s24325_s26 + $0x2d0] sm:$0xff]   ;;  %v17133_v20 = vld [vmem:[%s24326_s22 + $0x284] ss:$52 sps:$4 sm:$0xff]  }
  0x47   :  { %1597 = vmatmul.mubr.bf16.gmra.mxu0 %v17026_v54  ;;  %16649 = vmatprep.subr.bf16.mxu1 %v17074_v26  ;;  %v17101_v54 = vld [vmem:[%s24326_s22 + $0xe8] ss:$52 sps:$4 sm:$0xff]  }
  0x48   :  { %1694 = vmatmul.mubr.bf16.gmra.mxu1 %v17027_v56  ;;  %1604 = vmatprep.mubr.bf16.mxu0 %v17030_v57  ;;  %v17102_v56 = vld [vmem:[%s24326_s22 + $0x14c] ss:$52 sps:$4 sm:$0xff]   ;;  %v17106_v57 = vld [vmem:[%s24326_s22 + $0x154] ss:$52 sps:$4 sm:$0xff]   ;;  %v17161_v26 = vld [vmem:[%s24325_s26 + $0x338] sm:$0xff]  }
  0x49   :  { %1701 = vmatprep.mubr.bf16.mxu1 %v17032_v59  ;;  %16586 = vmatpush3.bf16.msra.mxu0 %v17061_v15  ;;  %v17116_v59 = vld [vmem:[%s24325_s26 + $0x218] sm:$0xff]   ;;  %v17147_v15 = vld [vmem:[%s24325_s26 + $0x290] sm:$0xff]  }
  0x4a   :  { %16587 = vmatprep.subr.bf16.mxu0 %v17072_v24  ;;  %16650 = vmatpush3.bf16.msra.mxu1 %v17075_v27  ;;  %v17138_v24 = vld [vmem:[%s24326_s22 + $0x28c] ss:$52 sps:$4 sm:$0xff]  }
  0x4b   :  { %16651 = vmatprep.subr.bf16.mxu1 %v17076_v28  ;;  %v17136_v27 = vld [vmem:[%s24326_s22 + $0x280] ss:$52 sps:$4 sm:$0xff]   ;;  %v17141_v28 = vld [vmem:[%s24326_s22 + $0x288] ss:$52 sps:$4 sm:$0xff]  }
  0x4d   :  { %16588 = vmatpush3.bf16.msra.mxu0 %v17073_v25  ;;  %v17160_v25 = vld [vmem:[%s24325_s26 + $0x280] sm:$0xff]  }
  0x4e   :  { %16701 = vmatprep.subr.bf16.mxu0 %v17081_v30  ;;  %16652 = vmatpush3.bf16.msra.mxu1 %v17080_v29  ;;  %v17145_v29 = vld [vmem:[%s24326_s22 + $0x2ec] ss:$52 sps:$4 sm:$0xff]   ;;  %v17150_v30 = vld [vmem:[%s24326_s22 + $0x2f4] ss:$52 sps:$4 sm:$0xff]  }
  0x4f   :  { %1605 = vmatmul.mubr.bf16.gmra.mxu0 %v17034_v0  ;;  %16765 = vmatprep.subr.bf16.mxu1 %v17118_v51  ;;  %v17109_v0 = vld [vmem:[%s24326_s22 + $0x150] ss:$52 sps:$4 sm:$0xff]  }
  0x50   :  { %1702 = vmatmul.mubr.bf16.gmra.mxu1 %v17035_v2  ;;  %1612 = vmatprep.mubr.bf16.mxu0 %v17041_v3  ;;  %v17132_v2 = vld [vmem:[%s24325_s26 + $0x2e0] sm:$0xff]   ;;  %v17110_v3 = vld [vmem:[%s24326_s22 + $0x1b4] ss:$52 sps:$4 sm:$0xff]  }
  0x51   :  { %1709 = vmatprep.mubr.bf16.mxu1 %v17043_v5  ;;  %v17135_v5 = vld [vmem:[%s24325_s26 + $0x2a0] sm:$0xff]   ;;  %v17196_v51 = vld [vmem:[%s24325_s26 + $0x310] sm:$0xff]  }
  0x57   :  { %1613 = vmatmul.mubr.bf16.gmra.mxu0 %v17046_v10  ;;  %v17117_v10 = vld [vmem:[%s24326_s22 + $0x1b8] ss:$52 sps:$4 sm:$0xff]  }
  0x58   :  { %1710 = vmatmul.mubr.bf16.gmra.mxu1 %v17047_v11  ;;  %1620 = vmatprep.mubr.bf16.mxu0 %v17053_v12  ;;  %v17121_v11 = vld [vmem:[%s24326_s22 + $0x21c] ss:$52 sps:$4 sm:$0xff]  }
  0x59   :  { %1717 = vmatprep.mubr.bf16.mxu1 %v17055_v14  ;;  %v17143_v12 = vld [vmem:[%s24325_s26 + $0x298] sm:$0xff]  }
  0x5a   :  { %v17126_v14 = vld [vmem:[%s24326_s22 + $0x224] ss:$52 sps:$4 sm:$0xff]  }
  0x5f   :  { %1621 = vmatmul.mubr.bf16.gmra.mxu0 %v17058_v19  ;;  %v17129_v19 = vld [vmem:[%s24326_s22 + $0x220] ss:$52 sps:$4 sm:$0xff]  }
  0x60   :  { %1718 = vmatmul.mubr.bf16.gmra.mxu1 %v17059_v21  ;;  %1628 = vmatprep.mubr.bf16.mxu0 %v17065_v22  ;;  %v17154_v21 = vld [vmem:[%s24325_s26 + $0x2c8] sm:$0xff]  }
  0x61   :  { %1725 = vmatprep.mubr.bf16.mxu1 %v17067_v23  ;;  %v17155_v22 = vld [vmem:[%s24325_s26 + $0x288] sm:$0xff]   ;;  %v17156_v23 = vld [vmem:[%s24325_s26 + $0x2c0] sm:$0xff]  }
  0x67   :  { %1629 = vmatmul.mubr.bf16.gmra.mxu0 %v17070_v31  ;;  %v17148_v31 = vld [vmem:[%s24326_s22 + $0x2e8] ss:$52 sps:$4 sm:$0xff]  }
  0x68   :  { %1726 = vmatmul.mubr.bf16.gmra.mxu1 %v17071_v32  ;;  %1766 = vmatprep.mubr.bf16.mxu0 %v17079_v33  ;;  %v17153_v32 = vld [vmem:[%s24326_s22 + $0x2f0] ss:$52 sps:$4 sm:$0xff]  }
  0x69   :  { %1863 = vmatprep.mubr.bf16.mxu1 %v17084_v34  ;;  %v17159_v33 = vld [vmem:[%s24326_s22 + $0x24] ss:$52 sps:$4 sm:$0xff]   ;;  %v17164_v34 = vld [vmem:[%s24326_s22 + $0x2c] ss:$52 sps:$4 sm:$0xff]  }
  0x6f   :  { %1767 = vmatmul.mubr.bf16.vlgmr.msra.gmra.mxu0 %v17077_v35  ;;  %v17157_v35 = vld [vmem:[%s24326_s22 + $0x20] ss:$52 sps:$4 sm:$0xff]  }
  0x70   :  { %16702 = vmatpush3.bf16.msra.mxu0 %v17085_v37  ;;  %1864 = vmatmul.mubr.bf16.vlgmr.msra.gmra.mxu1 %v17082_v36  ;;  %v17162_v36 = vld [vmem:[%s24326_s22 + $0x28] ss:$52 sps:$4 sm:$0xff]   ;;  %v17165_v37 = vld [vmem:[%s24326_s22 + $0x8c] ss:$52 sps:$4 sm:$0xff]  }
  0x71   :  { %1774 = vmatprep.mubr.bf16.mxu0 %v17086_v38  ;;  %16703 = vmatprep.subr.bf16.mxu0 %v17089_v39  ;;  %v17168_v38 = vld [vmem:[%s24325_s26 + $0x330] sm:$0xff]  }
  0x72   :  { %1871 = vmatprep.mubr.bf16.mxu1 %v17090_v40  ;;  %16766 = vmatpush3.bf16.msra.mxu1 %v17119_v53  ;;  %v17169_v39 = vld [vmem:[%s24326_s22 + $0x94] ss:$52 sps:$4 sm:$0xff]   ;;  %v17181_v53 = vld [vmem:[%s24326_s22 + $0x158] ss:$52 sps:$4 sm:$0xff]  }
  0x73   :  { %16767 = vmatprep.subr.bf16.mxu1 %v17120_v55  ;;  %v17175_v40 = vld [vmem:[%s24325_s26 + $0x328] sm:$0xff]   ;;  %v17186_v55 = vld [vmem:[%s24326_s22 + $0x1c4] ss:$52 sps:$4 sm:$0xff]  }
  0x74   :  { %16704 = vmatpush3.bf16.msra.mxu0 %v17092_v41  ;;  %v17167_v41 = vld [vmem:[%s24326_s22 + $0x88] ss:$52 sps:$4 sm:$0xff]  }
  0x75   :  { %16705 = vmatprep.subr.bf16.mxu0 %v17097_v42  ;;  %v17171_v42 = vld [vmem:[%s24326_s22 + $0x90] ss:$52 sps:$4 sm:$0xff]  }
  0x76   :  { %16768 = vmatpush3.bf16.msra.mxu1 %v17123_v58  ;;  %v17188_v58 = vld [vmem:[%s24326_s22 + $0x1c0] ss:$52 sps:$4 sm:$0xff]  }
  0x77   :  { %1775 = vmatmul.mubr.bf16.gmra.mxu0 %v17088_v43  ;;  %16769 = vmatprep.subr.bf16.mxu1 %v17130_v63  ;;  %v17172_v43 = vld [vmem:[%s24326_s22 + $0xf4] ss:$52 sps:$4 sm:$0xff]   ;;  %v17199_v63 = vld [vmem:[%s24326_s22 + $0x230] ss:$52 sps:$4 sm:$0xff]  }
  0x78   :  { %1872 = vmatmul.mubr.bf16.gmra.mxu1 %v17093_v44  ;;  %1782 = vmatprep.mubr.bf16.mxu0 %v17094_v45  ;;  %v17176_v44 = vld [vmem:[%s24326_s22 + $0xfc] ss:$52 sps:$4 sm:$0xff]   ;;  %v17182_v45 = vld [vmem:[%s24325_s26 + $0x320] sm:$0xff]  }
  0x79   :  { %1879 = vmatprep.mubr.bf16.mxu1 %v17098_v46  ;;  %16706 = vmatpush3.bf16.msra.mxu0 %v17100_v47  ;;  %v17189_v46 = vld [vmem:[%s24325_s26 + $0x318] sm:$0xff]   ;;  %v17174_v47 = vld [vmem:[%s24326_s22 + $0xf0] ss:$52 sps:$4 sm:$0xff]  }
  0x7a   :  { %16707 = vmatprep.subr.bf16.mxu0 %v17105_v48  ;;  %16770 = vmatpush3.bf16.msra.mxu1 %v17131_v1  ;;  %v17178_v48 = vld [vmem:[%s24326_s22 + $0xf8] ss:$52 sps:$4 sm:$0xff]   ;;  %v17204_v1 = vld [vmem:[%s24326_s22 + $0x29c] ss:$52 sps:$4 sm:$0xff]  }
  0x7b   :  { %16771 = vmatprep.subr.bf16.mxu1 %v17132_v2  ;;  %v17202_v2 = vld [vmem:[%s24326_s22 + $0x290] ss:$52 sps:$4 sm:$0xff]  }
  0x7d   :  { %16708 = vmatpush3.bf16.msra.mxu0 %v17108_v49  ;;  %v17179_v49 = vld [vmem:[%s24326_s22 + $0x15c] ss:$52 sps:$4 sm:$0xff]  }
  0x7e   :  { %16709 = vmatprep.subr.bf16.mxu0 %v17113_v50  ;;  %16772 = vmatpush3.bf16.msra.mxu1 %v17135_v5  ;;  %v17183_v50 = vld [vmem:[%s24326_s22 + $0x164] ss:$52 sps:$4 sm:$0xff]  }
  0x7f   :  { %1783 = vmatmul.mubr.bf16.gmra.mxu0 %v17096_v52  ;;  %16773 = vmatprep.subr.bf16.mxu1 %v17142_v9  ;;  %v17203_v52 = vld [vmem:[%s24325_s26 + $0x308] sm:$0xff]   ;;  %v17211_v5 = vld [vmem:[%s24326_s22 + $0x304] ss:$52 sps:$4 sm:$0xff]  }
  0x80   :  { %1880 = vmatmul.mubr.bf16.gmra.mxu1 %v17101_v54  ;;  %1790 = vmatprep.mubr.bf16.mxu0 %v17102_v56  ;;  %v17185_v54 = vld [vmem:[%s24326_s22 + $0x160] ss:$52 sps:$4 sm:$0xff]   ;;  %v17215_v9 = vld [vmem:[%s24326_s22 + $0x98] ss:$52 sps:$4 sm:$0xff]  }
  0x81   :  { %1887 = vmatprep.mubr.bf16.mxu1 %v17106_v57  ;;  %16710 = vmatpush3.bf16.msra.mxu0 %v17116_v59  ;;  %v17190_v56 = vld [vmem:[%s24326_s22 + $0x1cc] ss:$52 sps:$4 sm:$0xff]   ;;  %v17192_v59 = vld [vmem:[%s24326_s22 + $0x1c8] ss:$52 sps:$4 sm:$0xff]  }
  0x82   :  { %16711 = vmatprep.subr.bf16.mxu0 %v17125_v60  ;;  %16774 = vmatpush3.bf16.msra.mxu1 %v17143_v12  ;;  %v17210_v57 = vld [vmem:[%s24325_s26 + $0x300] sm:$0xff]  }
  0x83   :  { %16775 = vmatprep.subr.bf16.mxu1 %v17144_v13  ;;  %v17193_v60 = vld [vmem:[%s24326_s22 + $0x22c] ss:$52 sps:$4 sm:$0xff]  }
  0x85   :  { %16712 = vmatpush3.bf16.msra.mxu0 %v17128_v61  ;;  %v17197_v61 = vld [vmem:[%s24326_s22 + $0x234] ss:$52 sps:$4 sm:$0xff]  }
  0x86   :  { %16713 = vmatprep.subr.bf16.mxu0 %v17137_v6  ;;  %16776 = vmatpush3.bf16.msra.mxu1 %v17147_v15  ;;  %v17209_v6 = vld [vmem:[%s24326_s22 + $0x2f8] ss:$52 sps:$4 sm:$0xff]  }
  0x87   :  { %1791 = vmatmul.mubr.bf16.gmra.mxu0 %v17104_v62  ;;  %16777 = vmatprep.subr.bf16.mxu1 %v17154_v21  ;;  %v17195_v62 = vld [vmem:[%s24326_s22 + $0x228] ss:$52 sps:$4 sm:$0xff]  }
  0x88   :  { %1888 = vmatmul.mubr.bf16.gmra.mxu1 %v17109_v0  ;;  %1798 = vmatprep.mubr.bf16.mxu0 %v17110_v3  ;;  %v17200_v0 = vld [vmem:[%s24326_s22 + $0x294] ss:$52 sps:$4 sm:$0xff]   ;;  %v17206_v3 = vld [vmem:[%s24326_s22 + $0x298] ss:$52 sps:$4 sm:$0xff]  }
  0x89   :  { %1895 = vmatprep.mubr.bf16.mxu1 %v17114_v4  ;;  %16714 = vmatpush3.bf16.msra.mxu0 %v17140_v7  ;;  %v17207_v4 = vld [vmem:[%s24326_s22 + $0x2fc] ss:$52 sps:$4 sm:$0xff]   ;;  %v17213_v7 = vld [vmem:[%s24326_s22 + $0x300] ss:$52 sps:$4 sm:$0xff]  }
  0x8a   :  { %16715 = vmatprep.subr.bf16.mxu0 %v17149_v16  ;;  %16778 = vmatpush3.bf16.msra.mxu1 %v17155_v22 }
  0x8b   :  { %16779 = vmatprep.subr.bf16.mxu1 %v17156_v23 }
  0x8d   :  { %16716 = vmatpush3.bf16.msra.mxu0 %v17152_v18  ;;  %v17217_v18 = vld [vmem:[%s24326_s22 + $0x168] ss:$52 sps:$4 sm:$0xff]  }
  0x8e   :  { %16780 = vmatpush3.bf16.msra.mxu1 %v17160_v25  ;;  %16933 = vmatprep.subr.bf16.mxu0 %v17161_v26 }
  0x8f   :  { %1799 = vmatmul.mubr.bf16.gmra.mxu0 %v17112_v8  ;;  %v17214_v8 = vld [vmem:[%s24326_s22 + $0x30] ss:$52 sps:$4 sm:$0xff]  }
  0x90   :  { %1896 = vmatmul.mubr.bf16.gmra.mxu1 %v17117_v10  ;;  %1806 = vmatprep.mubr.bf16.mxu0 %v17121_v11  ;;  %v17216_v10 = vld [vmem:[%s24326_s22 + $0x100] ss:$52 sps:$4 sm:$0xff]  }
  0x91   :  { %1903 = vmatprep.mubr.bf16.mxu1 %v17126_v14 }
  0x97   :  { %1807 = vmatmul.mubr.bf16.gmra.mxu0 %v17124_v17 }
  0x98   :  { %1904 = vmatmul.mubr.bf16.gmra.mxu1 %v17129_v19  ;;  %1814 = vmatprep.mubr.bf16.mxu0 %v17133_v20  ;;  %v17218_v20 = vld [vmem:[%s24326_s22 + $0x1d0] ss:$52 sps:$4 sm:$0xff]  }
  0x99   :  { %1911 = vmatprep.mubr.bf16.mxu1 %v17138_v24 }
  0x9f   :  { %1815 = vmatmul.mubr.bf16.gmra.mxu0 %v17136_v27 }
  0xa0   :  { %1912 = vmatmul.mubr.bf16.gmra.mxu1 %v17141_v28  ;;  %1822 = vmatprep.mubr.bf16.mxu0 %v17145_v29 }
  0xa1   :  { %1919 = vmatprep.mubr.bf16.mxu1 %v17150_v30 }
  0xa7   :  { %1823 = vmatmul.mubr.bf16.gmra.mxu0 %v17148_v31 }
  0xa8   :  { %1920 = vmatmul.mubr.bf16.gmra.mxu1 %v17153_v32  ;;  %1960 = vmatprep.mubr.bf16.mxu0 %v17159_v33 }
  0xa9   :  { %2057 = vmatprep.mubr.bf16.mxu1 %v17164_v34  ;;  %v17219_v34 = vld [vmem:[%s24326_s22 + $0x238] ss:$52 sps:$4 sm:$0xff]  }
  0xaf   :  { %1961 = vmatmul.mubr.bf16.vlgmr.msra.gmra.mxu0 %v17157_v35 }
  0xb0   :  { %16934 = vmatpush3.bf16.msra.mxu0 %v17161_v26  ;;  %2058 = vmatmul.mubr.bf16.vlgmr.msra.gmra.mxu1 %v17162_v36  ;;  %v17220_v36 = vld [vmem:[%s24326_s22 + $0x2a0] ss:$52 sps:$4 sm:$0xff]  }
  0xb1   :  { %1968 = vmatprep.mubr.bf16.mxu0 %v17165_v37  ;;  %16935 = vmatprep.subr.bf16.mxu0 %v17168_v38 }
  0xb2   :  { %2065 = vmatprep.mubr.bf16.mxu1 %v17169_v39 }
  0xb4   :  { %16936 = vmatpush3.bf16.msra.mxu0 %v17168_v38 }
  0xb5   :  { %16937 = vmatprep.subr.bf16.mxu0 %v17175_v40 }
  0xb7   :  { %1969 = vmatmul.mubr.bf16.gmra.mxu0 %v17167_v41 }
  0xb8   :  { %2066 = vmatmul.mubr.bf16.gmra.mxu1 %v17171_v42  ;;  %1976 = vmatprep.mubr.bf16.mxu0 %v17172_v43 }
  0xb9   :  { %2073 = vmatprep.mubr.bf16.mxu1 %v17176_v44  ;;  %16938 = vmatpush3.bf16.msra.mxu0 %v17175_v40 }
  0xba   :  { %16939 = vmatprep.subr.bf16.mxu0 %v17182_v45 }
  0xbd   :  { %16940 = vmatpush3.bf16.msra.mxu0 %v17182_v45 }
  0xbe   :  { %16941 = vmatprep.subr.bf16.mxu0 %v17189_v46 }
  0xbf   :  { %1977 = vmatmul.mubr.bf16.gmra.mxu0 %v17174_v47 }
  0xc0   :  { %2074 = vmatmul.mubr.bf16.gmra.mxu1 %v17178_v48  ;;  %1984 = vmatprep.mubr.bf16.mxu0 %v17179_v49 }
  0xc1   :  { %2081 = vmatprep.mubr.bf16.mxu1 %v17183_v50  ;;  %16942 = vmatpush3.bf16.msra.mxu0 %v17189_v46  ;;  %v17221_v50 = vld [vmem:[%s24326_s22 + $0x308] ss:$52 sps:$4 sm:$0xff]  }
  0xc2   :  { %16943 = vmatprep.subr.bf16.mxu0 %v17196_v51 }
  0xc5   :  { %16944 = vmatpush3.bf16.msra.mxu0 %v17196_v51 }
  0xc6   :  { %16945 = vmatprep.subr.bf16.mxu0 %v17203_v52 }
  0xc7   :  { %1985 = vmatmul.mubr.bf16.gmra.mxu0 %v17181_v53 }
  0xc8   :  { %2082 = vmatmul.mubr.bf16.gmra.mxu1 %v17185_v54  ;;  %1992 = vmatprep.mubr.bf16.mxu0 %v17186_v55  ;;  %v17222_v54 = vld [vmem:[%s24327_s30 + $0xf0] ss:$8 sps:$4 sm:$0xff]  }
  0xc9   :  { %2089 = vmatprep.mubr.bf16.mxu1 %v17190_v56  ;;  %16946 = vmatpush3.bf16.msra.mxu0 %v17203_v52 }
  0xca   :  { %16947 = vmatprep.subr.bf16.mxu0 %v17210_v57 }
  0xcd   :  { %16948 = vmatpush3.bf16.msra.mxu0 %v17210_v57  ;;  %v17224_v57 = vld [vmem:[%s24327_s30 + $0xf4] ss:$8 sps:$4 sm:$0xff]  }
  0xce   :  { %2427 = vmatprep.subr.bf16.mxu1 %v17224_v57 }
  0xcf   :  { %1993 = vmatmul.mubr.bf16.gmra.mxu0 %v17188_v58  ;;  %2428 = vmatpush1.bf16.msra.mxu1 %v17222_v54 }
  0xd0   :  { %2090 = vmatmul.mubr.bf16.gmra.mxu1 %v17192_v59  ;;  %2000 = vmatprep.mubr.bf16.mxu0 %v17193_v60 }
  0xd1   :  { %2097 = vmatprep.mubr.bf16.mxu1 %v17197_v61 }
  0xd7   :  { %2001 = vmatmul.mubr.bf16.gmra.mxu0 %v17195_v62 }
  0xd8   :  { %2098 = vmatmul.mubr.bf16.gmra.mxu1 %v17199_v63  ;;  %2008 = vmatprep.mubr.bf16.mxu0 %v17200_v0 }
  0xd9   :  { %2105 = vmatprep.mubr.bf16.mxu1 %v17204_v1 }
  0xdf   :  { %2009 = vmatmul.mubr.bf16.gmra.mxu0 %v17202_v2 }
  0xe0   :  { %2106 = vmatmul.mubr.bf16.gmra.mxu1 %v17206_v3  ;;  %2016 = vmatprep.mubr.bf16.mxu0 %v17207_v4  ;;  %v17225_v4 = vld [vmem:[%s24327_s30 + $0xe0] ss:$8 sps:$4 sm:$0xff]  }
  0xe1   :  { %2113 = vmatprep.mubr.bf16.mxu1 %v17211_v5  ;;  %v17227_v5 = vld [vmem:[%s24327_s30 + $0xe4] ss:$8 sps:$4 sm:$0xff]  }
  0xe2   :  { %2429 = vmatprep.subr.bf16.mxu1 %v17227_v5 }
  0xe3   :  { %2430 = vmatpush1.bf16.msra.mxu1 %v17225_v4 }
  0xe7   :  { %2017 = vmatmul.mubr.bf16.gmra.mxu0 %v17209_v6 }
  0xe8   :  { %2114 = vmatmul.mubr.bf16.gmra.mxu1 %v17213_v7  ;;  %16949 = vmatprep.mubr.bf16.mxu0 %v17214_v8 }
  0xef   :  { %v16461_v11 = vpop.f32.mrf.mxu0  ;;  %16950 = vmatmul.mubr.bf16.vlgmr.msra.gmra.mxu0 %v17215_v9 }
  0xf0   :  { %v16525_v12 = vpop.f32.mrf.mxu1  ;;  %16953 = vmatprep.mubr.bf16.mxu0 %v17216_v10 }
  0xf1   :  { %v16462_v13 = vpop.f32.mrf.mxu0 }
  0xf2   :  { %v16463_v14 = vadd.f32 %v16462_v13, %v16461_v11  ;;  %v16526_v15 = vpop.f32.mrf.mxu1 }
  0xf3   :  { %v16527_v16 = vadd.f32 %v16526_v15, %v16525_v12  ;;  %v16464_v17 = vpop.f32.mrf.mxu0 }
  0xf4   :  { %v16528_v19 = vpop.f32.mrf.mxu1 }
  0xf5   :  { %v18736_v21 = vadd.f32 %v16527_v16, %v16463_v14  ;;  %v16465_v22 = vpop.f32.mrf.mxu0 }
  0xf6   :  { %v16466_v23 = vadd.f32 %v16465_v22, %v16464_v17  ;;  %v16529_v24 = vpop.f32.mrf.mxu1  ;;  %v17230_v22 = vld [vmem:[%s24327_s30 + $0xd4] ss:$8 sps:$4 sm:$0xff]  }
  0xf7   :  { %v16530_v25 = vadd.f32 %v16529_v24, %v16528_v19  ;;  %v16467_v26 = vpop.f32.mrf.mxu0  ;;  %16954 = vmatmul.mubr.bf16.gmra.mxu0 %v17217_v18  ;;  %2431 = vmatprep.subr.bf16.mxu1 %v17230_v22  ;;  %v17249_v22 = vld [vmem:[%s24327_s30 + $0xa0] ss:$8 sps:$4 sm:$0xff]  }
  0xf8   :  { %v16531_v27 = vpop.f32.mrf.mxu1  ;;  %16957 = vmatprep.mubr.bf16.mxu0 %v17218_v20  ;;  %v17228_v20 = vld [vmem:[%s24327_s30 + $0xd0] ss:$8 sps:$4 sm:$0xff]  }
  0xf9   :  { %v18738_v28 = vadd.f32 %v16530_v25, %v16466_v23  ;;  %v16468_v29 = vpop.f32.mrf.mxu0  ;;  %2432 = vmatpush1.bf16.msra.mxu1 %v17228_v20 }
  0xfa   :  { %v16469_v30 = vadd.f32 %v16468_v29, %v16467_v26  ;;  %v16532_v31 = vpop.f32.mrf.mxu1 }
  0xfb   :  { %v16533_v32 = vadd.f32 %v16532_v31, %v16531_v27  ;;  %v16470_v33 = vpop.f32.mrf.mxu0 }
  0xfc   :  { %v16534_v35 = vpop.f32.mrf.mxu1 }
  0xfd   :  { %v18746_v37 = vadd.f32 %v16533_v32, %v16469_v30  ;;  %v16471_v38 = vpop.f32.mrf.mxu0 }
  0xfe   :  { %v16472_v39 = vadd.f32 %v16471_v38, %v16470_v33  ;;  %v16535_v40 = vpop.f32.mrf.mxu1  ;;  %v17236_v38 = vld [vmem:[%s24327_s30 + $0x74] ss:$8 sps:$4 sm:$0xff]  }
  0xff   :  { %v16536_v41 = vadd.f32 %v16535_v40, %v16534_v35  ;;  %v16473_v42 = vpop.f32.mrf.mxu0  ;;  %16958 = vmatmul.mubr.bf16.gmra.mxu0 %v17219_v34  ;;  %v17231_v40 = vld [vmem:[%s24327_s30 + $0xc0] ss:$8 sps:$4 sm:$0xff]   ;;  %2548 = vmatprep.subr.bf16.mxu0 %v17236_v38 }
 0x100   :  { %v16537_v43 = vpop.f32.mrf.mxu1  ;;  %16961 = vmatprep.mubr.bf16.mxu0 %v17220_v36 }
 0x101   :  { %v18748_v44 = vadd.f32 %v16536_v41, %v16472_v39  ;;  %v16474_v45 = vpop.f32.mrf.mxu0  ;;  %v17233_v41 = vld [vmem:[%s24327_s30 + $0xc4] ss:$8 sps:$4 sm:$0xff]  }
 0x102   :  { %v16475_v46 = vadd.f32 %v16474_v45, %v16473_v42  ;;  %v16538_v47 = vpop.f32.mrf.mxu1  ;;  %v17234_v42 = vld [vmem:[%s24327_s30 + $0x70] ss:$8 sps:$4 sm:$0xff]   ;;  %2433 = vmatprep.subr.bf16.mxu1 %v17233_v41 }
 0x103   :  { %v16539_v48 = vadd.f32 %v16538_v47, %v16537_v43  ;;  %v16476_v49 = vpop.f32.mrf.mxu0  ;;  %2549 = vmatpush1.bf16.msra.mxu0 %v17234_v42  ;;  %2434 = vmatpush1.bf16.msra.mxu1 %v17231_v40 }
 0x104   :  { %v16540_v51 = vpop.f32.mrf.mxu1 }
 0x105   :  { %v18753_v52 = vadd.f32 %v16539_v48, %v16475_v46  ;;  %v16477_v53 = vpop.f32.mrf.mxu0 }
 0x106   :  { %v16478_v55 = vadd.f32 %v16477_v53, %v16476_v49  ;;  %v16541_v56 = vpop.f32.mrf.mxu1  ;;  %v17237_v53 = vld [vmem:[%s24327_s30 + $0x60] ss:$8 sps:$4 sm:$0xff]  }
 0x107   :  { %v16542_v58 = vadd.f32 %v16541_v56, %v16540_v51  ;;  %v16479_v59 = vpop.f32.mrf.mxu0  ;;  %16962 = vmatmul.mubr.bf16.gmra.mxu0 %v17221_v50  ;;  %v17239_v50 = vld [vmem:[%s24327_s30 + $0x64] ss:$8 sps:$4 sm:$0xff]  }
 0x108   :  { %v16543_v60 = vpop.f32.mrf.mxu1  ;;  %2550 = vmatprep.subr.bf16.mxu0 %v17239_v50 }
 0x109   :  { %v18761_v61 = vadd.f32 %v16542_v58, %v16478_v55  ;;  %v16480_v62 = vpop.f32.mrf.mxu0  ;;  %2551 = vmatpush1.bf16.msra.mxu0 %v17237_v53 }
 0x10a   :  { %v16481_v63 = vadd.f32 %v16480_v62, %v16479_v59  ;;  %v16544_v0 = vpop.f32.mrf.mxu1 }
 0x10b   :  { %v16545_v1 = vadd.f32 %v16544_v0, %v16543_v60  ;;  %v16482_v2 = vpop.f32.mrf.mxu0  ;;  %v17245_v60 = vld [vmem:[%s24327_s30 + $0x54] ss:$8 sps:$4 sm:$0xff]  }
 0x10c   :  { %v16546_v3 = vpop.f32.mrf.mxu1  ;;  %v17242_v0 = vld [vmem:[%s24327_s30 + $0xb4] ss:$8 sps:$4 sm:$0xff]   ;;  %2552 = vmatprep.subr.bf16.mxu0 %v17245_v60 }
 0x10d   :  { %v18769_v6 = vadd.f32 %v16545_v1, %v16481_v63  ;;  %v16483_v7 = vpop.f32.mrf.mxu0  ;;  %v17240_v63 = vld [vmem:[%s24327_s30 + $0xb0] ss:$8 sps:$4 sm:$0xff]   ;;  %2435 = vmatprep.subr.bf16.mxu1 %v17242_v0 }
 0x10e   :  { %v16484_v8 = vadd.f32 %v16483_v7, %v16482_v2  ;;  %v16547_v9 = vpop.f32.mrf.mxu1  ;;  %v17243_v1 = vld [vmem:[%s24327_s30 + $0x50] ss:$8 sps:$4 sm:$0xff]   ;;  %2436 = vmatpush1.bf16.msra.mxu1 %v17240_v63 }
 0x10f   :  { %v16548_v10 = vadd.f32 %v16547_v9, %v16546_v3  ;;  %v16485_v11 = vpop.f32.mrf.mxu0  ;;  %2553 = vmatpush1.bf16.msra.mxu0 %v17243_v1  ;;  %v17248_v9 = vld [vmem:[%s24327_s30 + $0x44] ss:$8 sps:$4 sm:$0xff]  }
 0x110   :  { %v16549_v12 = vpop.f32.mrf.mxu1  ;;  %2554 = vmatprep.subr.bf16.mxu0 %v17248_v9  ;;  %v18010_v9 = vmov 0  }
 0x111   :  { %v18771_v13 = vadd.f32 %v16548_v10, %v16484_v8  ;;  %v16486_v14 = vpop.f32.mrf.mxu0  ;;  %2580 = vmatprep.mubr.bf16.mxu0 %v18010_v9  ;;  %2459 = vmatprep.mubr.bf16.mxu1 %v18010_v9 }
 0x112   :  { %v16487_v15 = vadd.f32 %v16486_v14, %v16485_v11  ;;  %v16550_v16 = vpop.f32.mrf.mxu1  ;;  %v17246_v11 = vld [vmem:[%s24327_s30 + $0x40] ss:$8 sps:$4 sm:$0xff]  }
 0x113   :  { %v16551_v17 = vadd.f32 %v16550_v16, %v16549_v12  ;;  %v16488_v18 = vpop.f32.mrf.mxu0  ;;  %2555 = vmatpush1.bf16.msra.mxu0 %v17246_v11 }
 0x114   :  { %v16552_v19 = vpop.f32.mrf.mxu1 }
 0x115   :  { %v18779_v23 = vadd.f32 %v16551_v17, %v16487_v15  ;;  %v16489_v24 = vpop.f32.mrf.mxu0 }
 0x116   :  { %v16490_v25 = vadd.f32 %v16489_v24, %v16488_v18  ;;  %v16553_v26 = vpop.f32.mrf.mxu1  ;;  %v17251_v24 = vld [vmem:[%s24327_s30 + $0xa4] ss:$8 sps:$4 sm:$0xff]  }
 0x117   :  { %v16554_v27 = vadd.f32 %v16553_v26, %v16552_v19  ;;  %v16491_v29 = vpop.f32.mrf.mxu0  ;;  %v17254_v19 = vld [vmem:[%s24327_s30 + $0x34] ss:$8 sps:$4 sm:$0xff]   ;;  %2437 = vmatprep.subr.bf16.mxu1 %v17251_v24 }
 0x118   :  { %v16555_v30 = vpop.f32.mrf.mxu1  ;;  %2556 = vmatprep.subr.bf16.mxu0 %v17254_v19  ;;  %2438 = vmatpush1.bf16.msra.mxu1 %v17249_v22 }
 0x119   :  { %v18781_v31 = vadd.f32 %v16554_v27, %v16490_v25  ;;  %v16492_v32 = vpop.f32.mrf.mxu0  ;;  %v17252_v25 = vld [vmem:[%s24327_s30 + $0x30] ss:$8 sps:$4 sm:$0xff]  }
 0x11a   :  { %v16493_v33 = vadd.f32 %v16492_v32, %v16491_v29  ;;  %v16556_v34 = vpop.f32.mrf.mxu1  ;;  %2557 = vmatpush1.bf16.msra.mxu0 %v17252_v25 }
 0x11b   :  { %v16557_v35 = vadd.f32 %v16556_v34, %v16555_v30  ;;  %v16494_v36 = vpop.f32.mrf.mxu0  ;;  %v17257_v34 = vld [vmem:[%s24327_s30 + $0x24] ss:$8 sps:$4 sm:$0xff]  }
 0x11c   :  { %v16558_v39 = vpop.f32.mrf.mxu1  ;;  %2558 = vmatprep.subr.bf16.mxu0 %v17257_v34 }
 0x11d   :  { %v18795_v43 = vadd.f32 %v16557_v35, %v16493_v33  ;;  %v16495_v45 = vpop.f32.mrf.mxu0 }
 0x11e   :  { %v16496_v46 = vadd.f32 %v16495_v45, %v16494_v36  ;;  %v16559_v47 = vpop.f32.mrf.mxu1  ;;  %v17255_v36 = vld [vmem:[%s24327_s30 + $0x20] ss:$8 sps:$4 sm:$0xff]   ;;  %v17263_v45 = vld [vmem:[%s24327_s30 + $0x14] ss:$8 sps:$4 sm:$0xff]  }
 0x11f   :  { %v16560_v48 = vadd.f32 %v16559_v47, %v16558_v39  ;;  %v16497_v49 = vpop.f32.mrf.mxu0  ;;  %2559 = vmatpush1.bf16.msra.mxu0 %v17255_v36 }
 0x120   :  { %v16561_v51 = vpop.f32.mrf.mxu1  ;;  %2560 = vmatprep.subr.bf16.mxu0 %v17263_v45 }
 0x121   :  { %v18803_v54 = vadd.f32 %v16560_v48, %v16496_v46  ;;  %v16498_v55 = vpop.f32.mrf.mxu0  ;;  %v17261_v48 = vld [vmem:[%s24327_s30 + $0x10] ss:$8 sps:$4 sm:$0xff]  }
 0x122   :  { %v16499_v56 = vadd.f32 %v16498_v55, %v16497_v49  ;;  %v16562_v57 = vpop.f32.mrf.mxu1  ;;  %v17260_v55 = vld [vmem:[%s24327_s30 + $0x94] ss:$8 sps:$4 sm:$0xff]  }
 0x123   :  { %v16563_v58 = vadd.f32 %v16562_v57, %v16561_v51  ;;  %v16500_v59 = vpop.f32.mrf.mxu0  ;;  %2561 = vmatpush1.bf16.msra.mxu0 %v17261_v48  ;;  %2439 = vmatprep.subr.bf16.mxu1 %v17260_v55 }
 0x124   :  { %v16564_v62 = vpop.f32.mrf.mxu1 }
 0x125   :  { %v18817_v2 = vadd.f32 %v16563_v58, %v16499_v56  ;;  %v16501_v3 = vpop.f32.mrf.mxu0  ;;  %v17258_v58 = vld [vmem:[%s24327_s30 + $0x90] ss:$8 sps:$4 sm:$0xff]  }
 0x126   :  { %v16502_v4 = vadd.f32 %v16501_v3, %v16500_v59  ;;  %v16565_v5 = vpop.f32.mrf.mxu1  ;;  %v17264_v59 = vld [vmem:[%s24327_s30] ss:$8 sps:$4 sm:$0xff]   ;;  %2440 = vmatpush1.bf16.msra.mxu1 %v17258_v58  ;;  %v17272_v3 = vld [vmem:[%s24327_s30 + $0x1f4] ss:$8 sps:$4 sm:$0xff]  }
 0x127   :  { %v16566_v7 = vadd.f32 %v16565_v5, %v16564_v62  ;;  %v16503_v8 = vpop.f32.mrf.mxu0 }
 0x128   :  { %v16567_v10 = vpop.f32.mrf.mxu1 }
 0x129   :  { %v18825_v12 = vadd.f32 %v16566_v7, %v16502_v4  ;;  %v16504_v14 = vpop.f32.mrf.mxu0  ;;  %v17267_v7 = vld [vmem:[%s24327_s30 + $0x80] ss:$8 sps:$4 sm:$0xff]  }
 0x12a   :  { %v16505_v15 = vadd.f32 %v16504_v14, %v16503_v8  ;;  %v16568_v16 = vpop.f32.mrf.mxu1 }
 0x12b   :  { %v16569_v17 = vadd.f32 %v16568_v16, %v16567_v10  ;;  %v16506_v18 = vpop.f32.mrf.mxu0 }
 0x12c   :  { %v16570_v20 = vpop.f32.mrf.mxu1 }
 0x12d   :  { %v18839_v26 = vadd.f32 %v16569_v17, %v16505_v15  ;;  %v16507_v27 = vpop.f32.mrf.mxu0 }
 0x12e   :  { %v16508_v29 = vadd.f32 %v16507_v27, %v16506_v18  ;;  %v16571_v30 = vpop.f32.mrf.mxu1 }
 0x12f   :  { %v16572_v32 = vadd.f32 %v16571_v30, %v16570_v20  ;;  %v16589_v33 = vpop.f32.mrf.mxu0 }
 0x130   :  { %v18844_v35 = vpop.f32.mrf.mxu1 }
 0x131   :  { %v18849_v38 = vadd.f32 %v16572_v32, %v16508_v29  ;;  %v16590_v39 = vpop.f32.mrf.mxu0 }
 0x132   :  { %v16591_v40 = vadd.f32 %v16590_v39, %v16589_v33  ;;  %v18851_v41 = vpop.f32.mrf.mxu1 }
 0x133   :  { %v16592_v42 = vpop.f32.mrf.mxu0 }
 0x134   :  { %v18857_v46 = vadd.f32 %v16591_v40, %v18736_v21  ;;  %v18859_v47 = vpop.f32.mrf.mxu1  ;;  %v17266_v21 = vld [vmem:[%s24327_s30 + $0x4] ss:$8 sps:$4 sm:$0xff]  }
 0x135   :  { %v16593_v49 = vpop.f32.mrf.mxu0  ;;  %2562 = vmatprep.subr.bf16.mxu0 %v17266_v21 }
 0x136   :  { %v16594_v50 = vadd.f32 %v16593_v49, %v16592_v42  ;;  %v18864_v51 = vpop.f32.mrf.mxu1  ;;  %2563 = vmatpush1.bf16.msra.mxu0 %v17264_v59 }
 0x137   :  { %v16595_v53 = vpop.f32.mrf.mxu0  ;;  %2826 = vmatprep.subr.bf16.mxu0 %v17272_v3 }
 0x138   :  { %v18873_v56 = vadd.f32 %v16594_v50, %v18738_v28  ;;  %v16659_v57 = vpop.f32.mrf.mxu1  ;;  %v17269_v28 = vld [vmem:[%s24327_s30 + $0x84] ss:$8 sps:$4 sm:$0xff]  }
 0x139   :  { %v16596_v60 = vpop.f32.mrf.mxu0  ;;  %2441 = vmatprep.subr.bf16.mxu1 %v17269_v28 }
 0x13a   :  { %v16597_v62 = vadd.f32 %v16596_v60, %v16595_v53  ;;  %v16660_v63 = vpop.f32.mrf.mxu1  ;;  %2442 = vmatpush1.bf16.msra.mxu1 %v17267_v7 }
 0x13b   :  { %v16598_v0 = vpop.f32.mrf.mxu0  ;;  %v16661_v1 = vadd.f32 %v16660_v63, %v16659_v57 }
 0x13c   :  { %v1777_v4 = vadd.f32 %v16597_v62, %v18746_v37  ;;  %v16662_v5 = vpop.f32.mrf.mxu1  ;;  %v17275_v37 = vld [vmem:[%s24327_s30 + $0x174] ss:$8 sps:$4 sm:$0xff]  }
 0x13d   :  { %v16599_v8 = vpop.f32.mrf.mxu0  ;;  %2686 = vmatprep.subr.bf16.mxu1 %v17275_v37 }
 0x13e   :  { %v18892_v10 = vadd.f32 %v16661_v1, %v1777_v4  ;;  %v16600_v11 = vadd.f32 %v16599_v8, %v16598_v0  ;;  %v16663_v14 = vpop.f32.mrf.mxu1 }
 0x13f   :  { %v16601_v15 = vpop.f32.mrf.mxu0  ;;  %v16664_v16 = vadd.f32 %v16663_v14, %v16662_v5 }
 0x140   :  { %v1780_v17 = vadd.f32 %v16600_v11, %v18748_v44  ;;  %v16665_v18 = vpop.f32.mrf.mxu1 }
 0x141   :  { %v16602_v19 = vpop.f32.mrf.mxu0 }
 0x142   :  { %v18899_v20 = vadd.f32 %v16664_v16, %v1780_v17  ;;  %v16603_v22 = vadd.f32 %v16602_v19, %v16601_v15  ;;  %v16666_v24 = vpop.f32.mrf.mxu1 }
 0x143   :  { %v16604_v25 = vpop.f32.mrf.mxu0  ;;  %v16667_v27 = vadd.f32 %v16666_v24, %v16665_v18 }
 0x144   :  { %v1785_v29 = vadd.f32 %v16603_v22, %v18753_v52  ;;  %v16668_v30 = vpop.f32.mrf.mxu1 }
 0x145   :  { %v16605_v32 = vpop.f32.mrf.mxu0 }
 0x146   :  { %v18902_v33 = vadd.f32 %v16667_v27, %v1785_v29  ;;  %v16606_v34 = vadd.f32 %v16605_v32, %v16604_v25  ;;  %v16669_v36 = vpop.f32.mrf.mxu1 }
 0x147   :  { %v16607_v39 = vpop.f32.mrf.mxu0  ;;  %v16670_v40 = vadd.f32 %v16669_v36, %v16668_v30 }
 0x148   :  { %v1788_v44 = vadd.f32 %v16606_v34, %v18761_v61  ;;  %v16671_v42 = vpop.f32.mrf.mxu1 }
 0x149   :  { %v16608_v45 = vpop.f32.mrf.mxu0 }
 0x14a   :  { %v18905_v48 = vadd.f32 %v16670_v40, %v1788_v44  ;;  %v16609_v49 = vadd.f32 %v16608_v45, %v16607_v39  ;;  %v16672_v50 = vpop.f32.mrf.mxu1 }
 0x14b   :  { %v16610_v53 = vpop.f32.mrf.mxu0  ;;  %v16673_v55 = vadd.f32 %v16672_v50, %v16671_v42 }
 0x14c   :  { %v1793_v52 = vadd.f32 %v16609_v49, %v18769_v6  ;;  %v16674_v21 = vpop.f32.mrf.mxu1 }
 0x14d   :  { %v16611_v57 = vpop.f32.mrf.mxu0 }
 0x14e   :  { %v18908_v58 = vadd.f32 %v16673_v55, %v1793_v52  ;;  %v16612_v59 = vadd.f32 %v16611_v57, %v16610_v53  ;;  %v16675_v60 = vpop.f32.mrf.mxu1 }
 0x14f   :  { %v16613_v62 = vpop.f32.mrf.mxu0  ;;  %v16676_v63 = vadd.f32 %v16675_v60, %v16674_v21 }
 0x150   :  { %v1796_v61 = vadd.f32 %v16612_v59, %v18771_v13  ;;  %v16677_v0 = vpop.f32.mrf.mxu1 }
 0x151   :  { %v16614_v1 = vpop.f32.mrf.mxu0 }
 0x152   :  { %v18911_v28 = vadd.f32 %v16676_v63, %v1796_v61  ;;  %v16615_v3 = vadd.f32 %v16614_v1, %v16613_v62  ;;  %v16678_v4 = vpop.f32.mrf.mxu1 }
 0x153   :  { %v16616_v5 = vpop.f32.mrf.mxu0  ;;  %v16679_v7 = vadd.f32 %v16678_v4, %v16677_v0 }
 0x154   :  { %v1801_v6 = vadd.f32 %v16615_v3, %v18779_v23  ;;  %v16680_v8 = vpop.f32.mrf.mxu1 }
 0x155   :  { %v16617_v11 = vpop.f32.mrf.mxu0 }
 0x156   :  { %v18914_v14 = vadd.f32 %v16679_v7, %v1801_v6  ;;  %v16618_v15 = vadd.f32 %v16617_v11, %v16616_v5  ;;  %v16681_v16 = vpop.f32.mrf.mxu1 }
 0x157   :  { %v16619_v37 = vpop.f32.mrf.mxu0  ;;  %v16682_v17 = vadd.f32 %v16681_v16, %v16680_v8 }
 0x158   :  { %v1804_v13 = vadd.f32 %v16618_v15, %v18781_v31  ;;  %v16683_v18 = vpop.f32.mrf.mxu1 }
 0x159   :  { %v16620_v19 = vpop.f32.mrf.mxu0 }
 0x15a   :  { %v18917_v22 = vadd.f32 %v16682_v17, %v1804_v13  ;;  %v16621_v24 = vadd.f32 %v16620_v19, %v16619_v37  ;;  %v16684_v25 = vpop.f32.mrf.mxu1 }
 0x15b   :  { %v16622_v27 = vpop.f32.mrf.mxu0  ;;  %v16685_v29 = vadd.f32 %v16684_v25, %v16683_v18 }
 0x15c   :  { %v1809_v23 = vadd.f32 %v16621_v24, %v18795_v43  ;;  %v16686_v30 = vpop.f32.mrf.mxu1 }
 0x15d   :  { %v16623_v32 = vpop.f32.mrf.mxu0 }
 0x15e   :  { %v18920_v34 = vadd.f32 %v16685_v29, %v1809_v23  ;;  %v16624_v36 = vadd.f32 %v16623_v32, %v16622_v27  ;;  %v16687_v39 = vpop.f32.mrf.mxu1 }
 0x15f   :  { %v16625_v40 = vpop.f32.mrf.mxu0  ;;  %v16688_v44 = vadd.f32 %v16687_v39, %v16686_v30 }
 0x160   :  { %v1812_v31 = vadd.f32 %v16624_v36, %v18803_v54  ;;  %v16689_v42 = vpop.f32.mrf.mxu1 }
 0x161   :  { %v16626_v45 = vpop.f32.mrf.mxu0 }
 0x162   :  { %v18923_v49 = vadd.f32 %v16688_v44, %v1812_v31  ;;  %v16627_v50 = vadd.f32 %v16626_v45, %v16625_v40  ;;  %v16690_v53 = vpop.f32.mrf.mxu1 }
 0x163   :  { %v16628_v55 = vpop.f32.mrf.mxu0  ;;  %v16691_v52 = vadd.f32 %v16690_v53, %v16689_v42 }
 0x164   :  { %v1817_v43 = vadd.f32 %v16627_v50, %v18817_v2  ;;  %v16692_v21 = vpop.f32.mrf.mxu1 }
 0x165   :  { %v16629_v57 = vpop.f32.mrf.mxu0 }
 0x166   :  { %v18926_v59 = vadd.f32 %v16691_v52, %v1817_v43  ;;  %v16630_v60 = vadd.f32 %v16629_v57, %v16628_v55  ;;  %v16693_v62 = vpop.f32.mrf.mxu1 }
 0x167   :  { %v16631_v63 = vpop.f32.mrf.mxu0  ;;  %v16694_v61 = vadd.f32 %v16693_v62, %v16692_v21 }
 0x168   :  { %v1820_v54 = vadd.f32 %v16630_v60, %v18825_v12  ;;  %v16695_v0 = vpop.f32.mrf.mxu1 }
 0x169   :  { %v16632_v1 = vpop.f32.mrf.mxu0 }
 0x16a   :  { %v18929_v3 = vadd.f32 %v16694_v61, %v1820_v54  ;;  %v16633_v4 = vadd.f32 %v16632_v1, %v16631_v63  ;;  %v16696_v5 = vpop.f32.mrf.mxu1 }
 0x16b   :  { %v16634_v7 = vpop.f32.mrf.mxu0  ;;  %v16697_v6 = vadd.f32 %v16696_v5, %v16695_v0 }
 0x16c   :  { %v1825_v2 = vadd.f32 %v16633_v4, %v18839_v26  ;;  %v16698_v8 = vpop.f32.mrf.mxu1 }
 0x16d   :  { %v16635_v11 = vpop.f32.mrf.mxu0 }
 0x16e   :  { %v18932_v15 = vadd.f32 %v16697_v6, %v1825_v2  ;;  %v16636_v16 = vadd.f32 %v16635_v11, %v16634_v7  ;;  %v16699_v37 = vpop.f32.mrf.mxu1 }
 0x16f   :  { %v16700_v17 = vadd.f32 %v16699_v37, %v16698_v8  ;;  %v18934_v13 = vpop.f32.mrf.mxu0 }
 0x170   :  { %v1828_v12 = vadd.f32 %v16636_v16, %v18849_v38  ;;  %v18937_v18 = vpop.f32.mrf.mxu1 }
 0x171   :  { %v18939_v19 = vpop.f32.mrf.mxu0 }
 0x172   :  { %v18941_v24 = vadd.f32 %v16700_v17, %v1828_v12  ;;  %v18943_v25 = vpop.f32.mrf.mxu1 }
 0x173   :  { %v18945_v26 = vpop.f32.mrf.mxu0 }
 0x174   :  { %v18947_v27 = vpop.f32.mrf.mxu1 }
 0x175   :  { %v18949_v29 = vpop.f32.mrf.mxu0 }
 0x176   :  { %v18951_v23 = vpop.f32.mrf.mxu1 }
 0x177   :  { %v16723_v30 = vpop.f32.mrf.mxu0 }
 0x178   :  { %v18953_v32 = vpop.f32.mrf.mxu1 }
 0x179   :  { %v16724_v38 = vpop.f32.mrf.mxu0 }
 0x17a   :  { %v16725_v36 = vadd.f32 %v16724_v38, %v16723_v30  ;;  %v18955_v39 = vpop.f32.mrf.mxu1 }
 0x17b   :  { %v16726_v40 = vpop.f32.mrf.mxu0 }
 0x17c   :  { %v18958_v44 = vadd.f32 %v16725_v36, %v18892_v10  ;;  %v18960_v31 = vpop.f32.mrf.mxu1 }
 0x17d   :  { %v16727_v42 = vpop.f32.mrf.mxu0 }
 0x17e   :  { %v16728_v45 = vadd.f32 %v16727_v42, %v16726_v40  ;;  %v18962_v50 = vpop.f32.mrf.mxu1 }
 0x17f   :  { %v16729_v53 = vpop.f32.mrf.mxu0 }
 0x180   :  { %v18965_v55 = vadd.f32 %v16728_v45, %v18899_v20  ;;  %v18967_v52 = vpop.f32.mrf.mxu1 }
 0x181   :  { %v16730_v43 = vpop.f32.mrf.mxu0 }
 0x182   :  { %v16731_v21 = vadd.f32 %v16730_v43, %v16729_v53  ;;  %v18969_v57 = vpop.f32.mrf.mxu1 }
 0x183   :  { %v16732_v60 = vpop.f32.mrf.mxu0 }
 0x184   :  { %v18972_v10 = vadd.f32 %v16731_v21, %v18902_v33  ;;  %v18974_v62 = vpop.f32.mrf.mxu1 }
 0x185   :  { %v16733_v63 = vpop.f32.mrf.mxu0 }
 0x186   :  { %v16734_v61 = vadd.f32 %v16733_v63, %v16732_v60  ;;  %v18976_v54 = vpop.f32.mrf.mxu1 }
 0x187   :  { %v16735_v0 = vpop.f32.mrf.mxu0 }
 0x188   :  { %v18979_v20 = vadd.f32 %v16734_v61, %v18905_v48  ;;  %v18981_v1 = vpop.f32.mrf.mxu1 }
 0x189   :  { %v16736_v4 = vpop.f32.mrf.mxu0 }
 0x18a   :  { %v16737_v5 = vadd.f32 %v16736_v4, %v16735_v0  ;;  %v18983_v7 = vpop.f32.mrf.mxu1 }
 0x18b   :  { %v16738_v6 = vpop.f32.mrf.mxu0 }
 0x18c   :  { %v18986_v33 = vadd.f32 %v16737_v5, %v18908_v58  ;;  %v18988_v2 = vpop.f32.mrf.mxu1 }
 0x18d   :  { %v16739_v8 = vpop.f32.mrf.mxu0 }
 0x18e   :  { %v16740_v11 = vadd.f32 %v16739_v8, %v16738_v6  ;;  %v18990_v16 = vpop.f32.mrf.mxu1 }
 0x18f   :  { %v16741_v37 = vpop.f32.mrf.mxu0 }
 0x190   :  { %v18993_v48 = vadd.f32 %v16740_v11, %v18911_v28  ;;  %v18995_v17 = vpop.f32.mrf.mxu1 }
 0x191   :  { %v16742_v12 = vpop.f32.mrf.mxu0 }
 0x192   :  { %v16743_v30 = vadd.f32 %v16742_v12, %v16741_v37  ;;  %v18997_v38 = vpop.f32.mrf.mxu1 }
 0x193   :  { %v16744_v36 = vpop.f32.mrf.mxu0 }
 0x194   :  { %v19000_v58 = vadd.f32 %v16743_v30, %v18914_v14  ;;  %v19002_v40 = vpop.f32.mrf.mxu1 }
 0x195   :  { %v16745_v42 = vpop.f32.mrf.mxu0 }
 0x196   :  { %v16746_v45 = vadd.f32 %v16745_v42, %v16744_v36  ;;  %v19004_v53 = vpop.f32.mrf.mxu1  ;;  %v16655_v42 = vadd.f32 %v18851_v41, %v18844_v35  ;;  %v16783_v35 = vadd.f32 %v18943_v25, %v18937_v18 }
 0x197   :  { %v16747_v43 = vpop.f32.mrf.mxu0 }
 0x198   :  { %v19007_v28 = vadd.f32 %v16746_v45, %v18917_v22  ;;  %v19009_v21 = vpop.f32.mrf.mxu1 }
 0x199   :  { %v16748_v60 = vpop.f32.mrf.mxu0 }
 0x19a   :  { %v16749_v63 = vadd.f32 %v16748_v60, %v16747_v43  ;;  %v19014_v14 = vpop.f32.mrf.mxu1 }
 0x19b   :  { %v16750_v61 = vpop.f32.mrf.mxu0 }
 0x19c   :  { %v19012_v0 = vadd.f32 %v16749_v63, %v18920_v34  ;;  %v19019_v11 = vpop.f32.mrf.mxu1 }
 0x19d   :  { %v16751_v4 = vpop.f32.mrf.mxu0 }
 0x19e   :  { %v16752_v5 = vadd.f32 %v16751_v4, %v16750_v61  ;;  %v19021_v30 = vpop.f32.mrf.mxu1  ;;  %v1866_v4 = vadd.f32 %v16655_v42, %v18857_v46 }
 0x19f   :  { %v16753_v6 = vpop.f32.mrf.mxu0 }
 0x1a0   :  { %v19017_v8 = vadd.f32 %v16752_v5, %v18923_v49  ;;  %v16719_v49 = vadd.f32 %v18939_v19, %v18934_v13  ;;  %v19030_v60 = vpop.f32.mrf.mxu1 }
 0x1a1   :  { %v16754_v22 = vpop.f32.mrf.mxu0 }
 0x1a2   :  { %v16755_v37 = vadd.f32 %v16754_v22, %v16753_v6  ;;  %v1963_v22 = vadd.f32 %v16719_v49, %v1866_v4  ;;  %v19040_v41 = vpop.f32.mrf.mxu1 }
 0x1a3   :  { %v16756_v12 = vpop.f32.mrf.mxu0 }
 0x1a4   :  { %v19024_v36 = vadd.f32 %v16755_v37, %v18926_v59  ;;  %v16658_v59 = vadd.f32 %v18864_v51, %v18859_v47  ;;  %v19050_v47 = vpop.f32.mrf.mxu1  ;;  %v2060_v18 = vadd.f32 %v16783_v35, %v1963_v22 }
 0x1a5   :  { %v16757_v34 = vpop.f32.mrf.mxu0 }
 0x1a6   :  { %v16758_v45 = vadd.f32 %v16757_v34, %v16756_v12  ;;  %v1869_v46 = vadd.f32 %v16658_v59, %v18873_v56  ;;  %v19062_v56 = vld [vmem:[%s24328_s2] ss:$0 sm:$0xff]  ;;  %v16798_v59 = vadd.f32 %v18976_v54, %v18974_v62  ;;  %v17270_v62 = vld [vmem:[%s24327_s30 + $0x1f0] ss:$8 sps:$4 sm:$0xff]  }
 0x1a7   :  { %v16759_v43 = vpop.f32.mrf.mxu0 }
 0x1a8   :  { %v19033_v63 = vadd.f32 %v16758_v45, %v18929_v3  ;;  %v16722_v3 = vadd.f32 %v18949_v29, %v18945_v26  ;;  %v16801_v26 = vadd.f32 %v18983_v7, %v18981_v1  ;;  %v19066_v45 = vpop.f32.mrf.mxu1  ;;  %v16804_v7 = vadd.f32 %v18990_v16, %v18988_v2 }
 0x1a9   :  { %v16760_v61 = vpop.f32.mrf.mxu0  ;;  %v16813_v2 = vadd.f32 %v19014_v14, %v19009_v21 }
 0x1aa   :  { %v16761_v5 = vadd.f32 %v16760_v61, %v16759_v43  ;;  %v1966_v25 = vadd.f32 %v16722_v3, %v1869_v46  ;;  %v16795_v43 = vadd.f32 %v18969_v57, %v18967_v52  ;;  %v2084_v61 = vadd.f32 %v16801_v26, %v18986_v33  ;;  %v16823_v52 = vpop.f32.mrf.mxu1 }
 0x1ab   :  { %v16762_v6 = vpop.f32.mrf.mxu0 }
 0x1ac   :  { %v19043_v13 = vadd.f32 %v16761_v5, %v18932_v15  ;;  %v16786_v15 = vadd.f32 %v18951_v23, %v18947_v27  ;;  %v19074_v27 = vld [vmem:[%s24329_s23] ss:$0 sm:$0xff]  ;;  %v2076_v35 = vadd.f32 %v16795_v43, %v18972_v10  ;;  %v17278_v10 = vld [vmem:[%s24327_s30 + $0x1e4] ss:$8 sps:$4 sm:$0xff]  }
 0x1ad   :  { %v16763_v19 = vpop.f32.mrf.mxu0 }
 0x1ae   :  { %v16764_v37 = vadd.f32 %v16763_v19, %v16762_v6  ;;  %v2063_v23 = vadd.f32 %v16786_v15, %v1966_v25  ;;  %v2087_v19 = vadd.f32 %v16804_v7, %v18993_v48  ;;  %v16824_v25 = vpop.f32.mrf.mxu1  ;;  %v2079_v48 = vadd.f32 %v16798_v59, %v18979_v20 }
 0x1af   :  { %v19048_v12 = vpop.f32.mrf.mxu0  ;;  %v16807_v15 = vadd.f32 %v18997_v38, %v18995_v17  ;;  %v16810_v20 = vadd.f32 %v19004_v53, %v19002_v40  ;;  %v16816_v17 = vadd.f32 %v19021_v30, %v19019_v11  ;;  %v17281_v30 = vld [vmem:[%s24327_s30 + $0x164] ss:$8 sps:$4 sm:$0xff]   ;;  %v16792_v59 = vadd.f32 %v18962_v50, %v18960_v31  ;;  %v17279_v50 = vld [vmem:[%s24327_s30 + $0x160] ss:$8 sps:$4 sm:$0xff]  }
 0x1b0   :  { %v19053_v51 = vadd.f32 %v16764_v37, %v18941_v24 }
 0x1b1   :  { %v2156_v34 = vpop.f32.mrf.mxu0 }
 0x1b2   :  { %v2157_v29 = vadd.f32 %v2156_v34, %v2060_v18 }
 0x1b3   :  { %v19064_v42 = vpop.f32.mrf.mxu0 }
 0x1b4   :  { %v2226_v24 = vmul.f32 %v19062_v56, %v2157_v29 }
 0x1b5   :  { %v2159_v1 = vpop.f32.mrf.mxu0 }
 0x1b6   :  { %v2249_v49 = vadd.f32 %v19074_v27, %v2226_v24  ;;  %v2160_v4 = vadd.f32 %v2159_v1, %v2063_v23  ;;  %v2100_v23 = vadd.f32 %v16813_v2, %v19012_v0  ;;  %v17276_v1 = vld [vmem:[%s24327_s30 + $0x1e0] ss:$8 sps:$4 sm:$0xff]   ;;  %v17273_v0 = vld [vmem:[%s24327_s30 + $0x170] ss:$8 sps:$4 sm:$0xff]  }
 0x1b7   :  { %v16955_v5 = vpop.f32.mrf.mxu0  ;;  %v17282_v2 = vld [vmem:[%s24327_s30 + $0x1d0] ss:$8 sps:$4 sm:$0xff]  }
 0x1b8   :  { %vm2265_vm0 = vcmp.ge.f32.partialorder %v2249_v49, 0.0  ;;  %v2281_v57 = vmul.f32 0.01, %v2249_v49  ;;  %v2181_v6 = vadd.f32 %v16955_v5, %v2084_v61  ;;  %v2227_v22 = vmul.f32 %v19062_v56, %v2160_v4  ;;  %v17284_v61 = vld [vmem:[%s24327_s30 + $0x1d4] ss:$8 sps:$4 sm:$0xff]   ;;  %v16826_v4 = vpop.f32.mrf.mxu1 }
 0x1b9   :  { %v2172_v3 = vpop.f32.mrf.mxu0 }
 0x1ba   :  { %v2297_v16 = vsel %vm2265_vm0, %v2249_v49, %v2281_v57  ;;  %v2232_v33 = vmul.f32 %v19062_v56, %v2181_v6  ;;  %v2250_v37 = vadd.f32 %v19074_v27, %v2227_v22  ;;  %v2173_v46 = vadd.f32 %v2172_v3, %v2076_v35 }
 0x1bb   :  { %v2329_v54 = vpack.c.bf16 %v2297_v16, %v2297_v16  ;;  %v16956_v18 = vpop.f32.mrf.mxu0  ;;  %v2092_v57 = vadd.f32 %v16807_v15, %v19000_v58  ;;  %v16825_v22 = vadd.f32 %v16824_v25, %v16823_v52  ;;  %v17290_v58 = vld [vmem:[%s24327_s30 + $0x1c4] ss:$8 sps:$4 sm:$0xff]   ;;  %v16819_v52 = vadd.f32 %v19040_v41, %v19030_v60 }
 0x1bc   :  { %v19096_v21 = vadd.f32 %v19074_v27, %v2232_v33  ;;  %v2184_v14 = vadd.f32 %v16956_v18, %v2087_v19  ;;  %vm2266_vm1 = vcmp.ge.f32.partialorder %v2250_v37, 0.0  ;;  %v2282_v34 = vmul.f32 0.01, %v2250_v37  ;;  %v16827_v19 = vpop.f32.mrf.mxu1 }
 0x1bd   :  { %v2230_v26 = vmul.f32 %v19062_v56, %v2173_v46  ;;  %v2175_v29 = vpop.f32.mrf.mxu0  ;;  %2581 = vmatmul.mubr.bf16.vlgmr.msra.gmra.mxu0 %v2329_v54  ;;  %v2103_v33 = vadd.f32 %v16816_v17, %v19017_v8  ;;  %v2095_v8 = vadd.f32 %v16810_v20, %v19007_v28  ;;  %v17287_v54 = vld [vmem:[%s24327_s30 + $0x154] ss:$8 sps:$4 sm:$0xff]   ;;  %v16789_v60 = vadd.f32 %v18955_v39, %v18953_v32  ;;  %v17288_v28 = vld [vmem:[%s24327_s30 + $0x1c0] ss:$8 sps:$4 sm:$0xff]   ;;  %v17285_v32 = vld [vmem:[%s24327_s30 + $0x150] ss:$8 sps:$4 sm:$0xff]  }
 0x1be   :  { %v2233_v24 = vmul.f32 %v19062_v56, %v2184_v14  ;;  %v2176_v43 = vadd.f32 %v2175_v29, %v2079_v48  ;;  %2827 = vmatpush1.bf16.msra.mxu0 %v17270_v62  ;;  %2858 = vmatprep.mubr.bf16.mxu0 %v18010_v9  ;;  %v2298_v38 = vsel %vm2266_vm1, %v2250_v37, %v2282_v34  ;;  %v17296_v39 = vld [vmem:[%s24327_s30 + $0x1b4] ss:$8 sps:$4 sm:$0xff]   ;;  %vm2271_vm7 = vcmp.ge.f32.partialorder %v19096_v21, 0.0 }
 0x1bf   :  { %v19113_v7 = vadd.f32 %v19074_v27, %v2230_v26  ;;  %v16959_v49 = vpop.f32.mrf.mxu0  ;;  %2828 = vmatprep.subr.bf16.mxu0 %v17278_v10  ;;  %v2346_v5 = vpack.c.bf16 %v2298_v38, %v2298_v38  ;;  %v2071_v41 = vadd.f32 %v16792_v59, %v18965_v55  ;;  %v2116_v25 = vadd.f32 %v16825_v22, %v19043_v13  ;;  %v17300_v59 = vld [vmem:[%s24327_s30 + $0x1a0] ss:$8 sps:$4 sm:$0xff]  }
 0x1c0   :  { %v19122_v40 = vadd.f32 %v19074_v27, %v2233_v24  ;;  %v2231_v53 = vmul.f32 %v19062_v56, %v2176_v43  ;;  %v2197_v11 = vadd.f32 %v16959_v49, %v2100_v23  ;;  %v16828_v14 = vadd.f32 %v16827_v19, %v16826_v4  ;;  %v17293_v24 = vld [vmem:[%s24327_s30 + $0x144] ss:$8 sps:$4 sm:$0xff]   ;;  %v17291_v49 = vld [vmem:[%s24327_s30 + $0x140] ss:$8 sps:$4 sm:$0xff]   ;;  %v17299_v4 = vld [vmem:[%s24327_s30 + $0x134] ss:$8 sps:$4 sm:$0xff]  }
 0x1c1   :  { %v2188_v6 = vpop.f32.mrf.mxu0  ;;  %2460 = vmatmul.mubr.bf16.vlgmr.msra.gmra.mxu1 %v2346_v5  ;;  %v2168_v55 = vadd.f32 %v19064_v42, %v2071_v41  ;;  %v2108_v29 = vadd.f32 %v16819_v52, %v19024_v36  ;;  %v16822_v43 = vadd.f32 %v19066_v45, %v19050_v47  ;;  %v17294_v36 = vld [vmem:[%s24327_s30 + $0x1b0] ss:$8 sps:$4 sm:$0xff]   ;;  %v2068_v38 = vadd.f32 %v16789_v60, %v18958_v44  ;;  %v17302_v44 = vld [vmem:[%s24327_s30 + $0x1a4] ss:$8 sps:$4 sm:$0xff]  }
 0x1c2   :  { %v19132_v35 = vadd.f32 %v19074_v27, %v2231_v53  ;;  %v2236_v3 = vmul.f32 %v19062_v56, %v2197_v11  ;;  %2829 = vmatpush1.bf16.msra.mxu0 %v17276_v1  ;;  %v2189_v16 = vadd.f32 %v2188_v6, %v2092_v57  ;;  %2687 = vmatpush1.bf16.msra.mxu1 %v17273_v0  ;;  %v17314_v52 = vld [vmem:[%s24327_s30 + $0x184] ss:$8 sps:$4 sm:$0xff]   ;;  %vm2269_vm5 = vcmp.ge.f32.partialorder %v19113_v7, 0.0 }
 0x1c3   :  { %v16960_v31 = vpop.f32.mrf.mxu0  ;;  %2830 = vmatprep.subr.bf16.mxu0 %v17284_v61  ;;  %2688 = vmatprep.subr.bf16.mxu1 %v17281_v30  ;;  %v2119_v47 = vadd.f32 %v16828_v14, %v19053_v51  ;;  %v2229_v0 = vmul.f32 %v19062_v56, %v2168_v55  ;;  %v2165_v51 = vadd.f32 %v19048_v12, %v2068_v38  ;;  %v17297_v12 = vld [vmem:[%s24327_s30 + $0x130] ss:$8 sps:$4 sm:$0xff]   ;;  %v17326_v14 = vld [vmem:[%s24327_s30 + $0x2e4] ss:$8 sps:$4 sm:$0xff]   ;;  %v17332_v55 = vld [vmem:[%s24327_s30 + $0x2d4] ss:$8 sps:$4 sm:$0xff]  }
 0x1c4   :  { %v19148_v62 = vadd.f32 %v19074_v27, %v2236_v3  ;;  %2718 = vmatprep.mubr.bf16.mxu1 %v18010_v9  ;;  %v2234_v37 = vmul.f32 %v19062_v56, %v2189_v16  ;;  %v2200_v46 = vadd.f32 %v16960_v31, %v2103_v33  ;;  %v2111_v11 = vadd.f32 %v16822_v43, %v19033_v63  ;;  %v17308_v63 = vld [vmem:[%s24327_s30 + $0x194] ss:$8 sps:$4 sm:$0xff]   ;;  %v17338_v43 = vld [vmem:[%s24327_s30 + $0x2c4] ss:$8 sps:$4 sm:$0xff]  }
 0x1c5   :  { %v2191_v18 = vpop.f32.mrf.mxu0  ;;  %v2252_v3 = vadd.f32 %v19074_v27, %v2229_v0  ;;  %v2228_v16 = vmul.f32 %v19062_v56, %v2165_v51  ;;  %v17341_v38 = vld [vmem:[%s24327_s30 + $0x244] ss:$8 sps:$4 sm:$0xff]   ;;  %v17347_v0 = vld [vmem:[%s24327_s30 + $0x234] ss:$8 sps:$4 sm:$0xff]   ;;  %vm2270_vm4 = vcmp.ge.f32.partialorder %v19132_v35, 0.0  ;;  %vm2272_vm6 = vcmp.ge.f32.partialorder %v19122_v40, 0.0 }
 0x1c6   :  { %v2192_v10 = vadd.f32 %v2191_v18, %v2095_v8  ;;  %2831 = vmatpush1.bf16.msra.mxu0 %v17282_v2  ;;  %v19164_v48 = vadd.f32 %v19074_v27, %v2234_v37  ;;  %v2237_v15 = vmul.f32 %v19062_v56, %v2200_v46  ;;  %2689 = vmatpush1.bf16.msra.mxu1 %v17279_v50  ;;  %v17305_v2 = vld [vmem:[%s24327_s30 + $0x124] ss:$8 sps:$4 sm:$0xff]   ;;  %v17306_v50 = vld [vmem:[%s24327_s30 + $0x190] ss:$8 sps:$4 sm:$0xff]   ;;  %v17312_v37 = vld [vmem:[%s24327_s30 + $0x180] ss:$8 sps:$4 sm:$0xff]  }
 0x1c7   :  { %v16963_v34 = vpop.f32.mrf.mxu0  ;;  %2832 = vmatprep.subr.bf16.mxu0 %v17290_v58  ;;  %2690 = vmatprep.subr.bf16.mxu1 %v17287_v54  ;;  %v17303_v58 = vld [vmem:[%s24327_s30 + $0x120] ss:$8 sps:$4 sm:$0xff]   ;;  %v2284_v19 = vmul.f32 0.01, %v2252_v3  ;;  %v2251_v54 = vadd.f32 %v19074_v27, %v2228_v16  ;;  %vm2268_vm2 = vcmp.ge.f32.partialorder %v2252_v3, 0.0  ;;  %vm2275_vm11 = vcmp.ge.f32.partialorder %v19148_v62, 0.0 }
 0x1c8   :  { %v2235_v13 = vmul.f32 %v19062_v56, %v2192_v10  ;;  %v2213_v26 = vadd.f32 %v16963_v34, %v2116_v25  ;;  %v19182_v23 = vadd.f32 %v19074_v27, %v2237_v15  ;;  %v17309_v46 = vld [vmem:[%s24327_s30 + $0x110] ss:$8 sps:$4 sm:$0xff]   ;;  %v17320_v18 = vld [vmem:[%s24327_s30 + $0x2f4] ss:$8 sps:$4 sm:$0xff]   ;;  %v2285_v16 = vmul.f32 0.01, %v19113_v7 }
 0x1c9   :  { %v2204_v1 = vpop.f32.mrf.mxu0  ;;  %v2300_v60 = vsel %vm2268_vm2, %v2252_v3, %v2284_v19  ;;  %v2283_v41 = vmul.f32 0.01, %v2251_v54  ;;  %vm2267_vm3 = vcmp.ge.f32.partialorder %v2251_v54, 0.0  ;;  %v17318_v10 = vld [vmem:[%s24327_s30 + $0x2f0] ss:$8 sps:$4 sm:$0xff]   ;;  %vm2273_vm9 = vcmp.ge.f32.partialorder %v19164_v48, 0.0 }
 0x1ca   :  { %v19185_v20 = vadd.f32 %v19074_v27, %v2235_v13  ;;  %v2240_v42 = vmul.f32 %v19062_v56, %v2213_v26  ;;  %v2205_v17 = vadd.f32 %v2204_v1, %v2108_v29  ;;  %2833 = vmatpush1.bf16.msra.mxu0 %v17288_v28  ;;  %2691 = vmatpush1.bf16.msra.mxu1 %v17285_v32  ;;  %v17315_v28 = vld [vmem:[%s24327_s30 + $0x100] ss:$8 sps:$4 sm:$0xff]   ;;  %v17323_v15 = vld [vmem:[%s24327_s30 + $0x274] ss:$8 sps:$4 sm:$0xff]   ;;  %v17329_v26 = vld [vmem:[%s24327_s30 + $0x264] ss:$8 sps:$4 sm:$0xff]  }
 0x1cb   :  { %v16964_v45 = vpop.f32.mrf.mxu0  ;;  %2834 = vmatprep.subr.bf16.mxu0 %v17296_v39  ;;  %2692 = vmatprep.subr.bf16.mxu1 %v17293_v24  ;;  %v2745_v25 = vpack.c.bf16 %v2300_v60, %v2300_v60  ;;  %v2299_v34 = vsel %vm2267_vm3, %v2251_v54, %v2283_v41  ;;  %v17324_v32 = vld [vmem:[%s24327_s30 + $0x2e0] ss:$8 sps:$4 sm:$0xff]   ;;  %v17321_v39 = vld [vmem:[%s24327_s30 + $0x270] ss:$8 sps:$4 sm:$0xff]   ;;  %v17335_v1 = vld [vmem:[%s24327_s30 + $0x254] ss:$8 sps:$4 sm:$0xff]   ;;  %v2301_v19 = vsel %vm2269_vm5, %v19113_v7, %v2285_v16 }
 0x1cc   :  { %v19198_v61 = vadd.f32 %v19074_v27, %v2240_v42  ;;  %v2238_v5 = vmul.f32 %v19062_v56, %v2205_v17  ;;  %v2216_v53 = vadd.f32 %v16964_v45, %v2119_v47  ;;  %v2605_v13 = vpack.c.bf16 %v2299_v34, %v2299_v34  ;;  %v17330_v29 = vld [vmem:[%s24327_s30 + $0x2d0] ss:$8 sps:$4 sm:$0xff]   ;;  %v17327_v24 = vld [vmem:[%s24327_s30 + $0x260] ss:$8 sps:$4 sm:$0xff]   ;;  %v17356_v51 = vld [vmem:[%s24327_s30 + $0x294] ss:$8 sps:$4 sm:$0xff]  }
 0x1cd   :  { %v2207_v30 = vpop.f32.mrf.mxu0  ;;  %v17336_v42 = vld [vmem:[%s24327_s30 + $0x2c0] ss:$8 sps:$4 sm:$0xff]   ;;  %v17333_v17 = vld [vmem:[%s24327_s30 + $0x250] ss:$8 sps:$4 sm:$0xff]   ;;  %v17377_v7 = vld [vmem:[%s24327_s30 + $0x364] ss:$8 sps:$4 sm:$0xff]  }
 0x1ce   :  { %2835 = vmatpush1.bf16.msra.mxu0 %v17294_v36  ;;  %v19213_v57 = vadd.f32 %v19074_v27, %v2238_v5  ;;  %v2241_v6 = vmul.f32 %v19062_v56, %v2216_v53  ;;  %v2208_v22 = vadd.f32 %v2207_v30, %v2111_v11  ;;  %2693 = vmatpush1.bf16.msra.mxu1 %v17291_v49  ;;  %v17344_v36 = vld [vmem:[%s24327_s30 + $0x2b4] ss:$8 sps:$4 sm:$0xff]   ;;  %v17342_v47 = vld [vmem:[%s24327_s30 + $0x2b0] ss:$8 sps:$4 sm:$0xff]   ;;  %v17339_v45 = vld [vmem:[%s24327_s30 + $0x240] ss:$8 sps:$4 sm:$0xff]  }
 0x1cf   :  { %2694 = vmatprep.subr.bf16.mxu1 %v17299_v4  ;;  %2836 = vmatprep.subr.bf16.mxu0 %v17302_v44  ;;  %v17350_v49 = vld [vmem:[%s24327_s30 + $0x2a4] ss:$8 sps:$4 sm:$0xff]   ;;  %v17348_v4 = vld [vmem:[%s24327_s30 + $0x2a0] ss:$8 sps:$4 sm:$0xff]   ;;  %v17345_v44 = vld [vmem:[%s24327_s30 + $0x230] ss:$8 sps:$4 sm:$0xff]  }
 0x1d0   :  { %v19228_v33 = vadd.f32 %v19074_v27, %v2241_v6  ;;  %v2239_v31 = vmul.f32 %v19062_v56, %v2208_v22  ;;  %v17311_v56 = vld [vmem:[%s24327_s30 + $0x114] ss:$8 sps:$4 sm:$0xff]   ;;  %v17353_v5 = vld [vmem:[%s24327_s30 + $0x224] ss:$8 sps:$4 sm:$0xff]   ;;  %v17354_v53 = vld [vmem:[%s24327_s30 + $0x290] ss:$8 sps:$4 sm:$0xff]  }
 0x1d1   :  { %v17351_v11 = vld [vmem:[%s24327_s30 + $0x220] ss:$8 sps:$4 sm:$0xff]   ;;  %v17362_v30 = vld [vmem:[%s24327_s30 + $0x284] ss:$8 sps:$4 sm:$0xff]   ;;  %v17359_v6 = vld [vmem:[%s24327_s30 + $0x214] ss:$8 sps:$4 sm:$0xff]  }
 0x1d2   :  { %2837 = vmatpush1.bf16.msra.mxu0 %v17300_v59  ;;  %2695 = vmatpush1.bf16.msra.mxu1 %v17297_v12  ;;  %v19241_v8 = vadd.f32 %v19074_v27, %v2239_v31  ;;  %v17317_v27 = vld [vmem:[%s24327_s30 + $0x104] ss:$8 sps:$4 sm:$0xff]   ;;  %v2286_v59 = vmul.f32 0.01, %v19132_v35  ;;  %v17360_v22 = vld [vmem:[%s24327_s30 + $0x280] ss:$8 sps:$4 sm:$0xff]  }
 0x1d3   :  { %2838 = vmatprep.subr.bf16.mxu0 %v17308_v63  ;;  %2696 = vmatprep.subr.bf16.mxu1 %v17305_v2  ;;  %v17357_v12 = vld [vmem:[%s24327_s30 + $0x210] ss:$8 sps:$4 sm:$0xff]   ;;  %v17368_v63 = vld [vmem:[%s24327_s30 + $0x3f4] ss:$8 sps:$4 sm:$0xff]   ;;  %v17365_v2 = vld [vmem:[%s24327_s30 + $0x204] ss:$8 sps:$4 sm:$0xff]  }
 0x1d4   :  { %v2302_v3 = vsel %vm2270_vm4, %v19132_v35, %v2286_v59  ;;  %v17366_v31 = vld [vmem:[%s24327_s30 + $0x3f0] ss:$8 sps:$4 sm:$0xff]   ;;  %v17363_v35 = vld [vmem:[%s24327_s30 + $0x200] ss:$8 sps:$4 sm:$0xff]   ;;  %v17383_v41 = vld [vmem:[%s24327_s30 + $0x354] ss:$8 sps:$4 sm:$0xff]  }
 0x1d5   :  { %v17369_v54 = vld [vmem:[%s24327_s30 + $0x370] ss:$8 sps:$4 sm:$0xff]   ;;  %v17375_v60 = vld [vmem:[%s24327_s30 + $0x360] ss:$8 sps:$4 sm:$0xff]   ;;  %v17428_v59 = vld [vmem:[%s24327_s30 + $0x4d4] ss:$8 sps:$4 sm:$0xff]  }
 0x1d6   :  { %2839 = vmatpush1.bf16.msra.mxu0 %v17306_v50  ;;  %2697 = vmatpush1.bf16.msra.mxu1 %v17303_v58  ;;  %v3025_v50 = vpack.c.bf16 %v2302_v3, %v2302_v3  ;;  %v17374_v58 = vld [vmem:[%s24327_s30 + $0x3e4] ss:$8 sps:$4 sm:$0xff]   ;;  %v17387_v34 = vld [vmem:[%s24327_s30 + $0x340] ss:$8 sps:$4 sm:$0xff]   ;;  %v17431_v3 = vld [vmem:[%s24327_s30 + $0x454] ss:$8 sps:$4 sm:$0xff]  }
 0x1d7   :  { %2840 = vmatprep.subr.bf16.mxu0 %v17314_v52  ;;  %2698 = vmatprep.subr.bf16.mxu1 %v17311_v56  ;;  %v17371_v52 = vld [vmem:[%s24327_s30 + $0x374] ss:$8 sps:$4 sm:$0xff]   ;;  %v17372_v56 = vld [vmem:[%s24327_s30 + $0x3e0] ss:$8 sps:$4 sm:$0xff]   ;;  %v17429_v16 = vld [vmem:[%s24327_s30 + $0x450] ss:$8 sps:$4 sm:$0xff]  }
 0x1d8   :  { %vm2274_vm8 = vcmp.ge.f32.partialorder %v19185_v20, 0.0  ;;  %vm2276_vm10 = vcmp.ge.f32.partialorder %v19182_v23, 0.0  ;;  %vm2278_vm12 = vcmp.ge.f32.partialorder %v19241_v8, 0.0  ;;  %vm2277_vm13 = vcmp.ge.f32.partialorder %v19213_v57, 0.0 }
 0x1d9   :  { %vm2280_vm14 = vcmp.ge.f32.partialorder %v19228_v33, 0.0  ;;  %vm2279_vm15 = vcmp.ge.f32.partialorder %v19198_v61, 0.0 }
 0x1da   :  { %2841 = vmatpush1.bf16.msra.mxu0 %v17312_v37  ;;  %2699 = vmatpush1.bf16.msra.mxu1 %v17309_v46  ;;  %v17380_v37 = vld [vmem:[%s24327_s30 + $0x3d4] ss:$8 sps:$4 sm:$0xff]   ;;  %v2885_v46 = vpack.c.bf16 %v2301_v19, %v2301_v19 }
 0x1db   :  { %3106 = vmatprep.subr.bf16.mxu0 %v17320_v18  ;;  %2700 = vmatprep.subr.bf16.mxu1 %v17317_v27  ;;  %v17378_v18 = vld [vmem:[%s24327_s30 + $0x3d0] ss:$8 sps:$4 sm:$0xff]   ;;  %v17386_v27 = vld [vmem:[%s24327_s30 + $0x3c4] ss:$8 sps:$4 sm:$0xff]   ;;  %v17443_v19 = vld [vmem:[%s24327_s30 + $0x434] ss:$8 sps:$4 sm:$0xff]  }
 0x1dd   :  { %2859 = vmatmul.mubr.bf16.vlgmr.msra.gmra.mxu0 %v2745_v25  ;;  %v17381_v25 = vld [vmem:[%s24327_s30 + $0x350] ss:$8 sps:$4 sm:$0xff]  }
 0x1de   :  { %3107 = vmatpush1.bf16.msra.mxu0 %v17318_v10  ;;  %3138 = vmatprep.mubr.bf16.mxu0 %v18010_v9  ;;  %v17384_v10 = vld [vmem:[%s24327_s30 + $0x3c0] ss:$8 sps:$4 sm:$0xff]  }
 0x1df   :  { %2701 = vmatpush1.bf16.msra.mxu1 %v17315_v28  ;;  %3108 = vmatprep.subr.bf16.mxu0 %v17326_v14  ;;  %v17392_v28 = vld [vmem:[%s24327_s30 + $0x3b4] ss:$8 sps:$4 sm:$0xff]   ;;  %v17389_v14 = vld [vmem:[%s24327_s30 + $0x344] ss:$8 sps:$4 sm:$0xff]  }
 0x1e0   :  { %2966 = vmatprep.subr.bf16.mxu1 %v17323_v15  ;;  %v17390_v15 = vld [vmem:[%s24327_s30 + $0x3b0] ss:$8 sps:$4 sm:$0xff]  }
 0x1e2   :  { %2719 = vmatmul.mubr.bf16.vlgmr.msra.gmra.mxu1 %v2605_v13  ;;  %3109 = vmatpush1.bf16.msra.mxu0 %v17324_v32  ;;  %v17398_v32 = vld [vmem:[%s24327_s30 + $0x3a4] ss:$8 sps:$4 sm:$0xff]   ;;  %v17393_v13 = vld [vmem:[%s24327_s30 + $0x330] ss:$8 sps:$4 sm:$0xff]  }
 0x1e3   :  { %2967 = vmatpush1.bf16.msra.mxu1 %v17321_v39  ;;  %3110 = vmatprep.subr.bf16.mxu0 %v17332_v55  ;;  %v17395_v39 = vld [vmem:[%s24327_s30 + $0x334] ss:$8 sps:$4 sm:$0xff]   ;;  %v17396_v55 = vld [vmem:[%s24327_s30 + $0x3a0] ss:$8 sps:$4 sm:$0xff]  }
 0x1e4   :  { %2968 = vmatprep.subr.bf16.mxu1 %v17329_v26  ;;  %2998 = vmatprep.mubr.bf16.mxu1 %v18010_v9  ;;  %v17404_v26 = vld [vmem:[%s24327_s30 + $0x394] ss:$8 sps:$4 sm:$0xff]  }
 0x1e6   :  { %3111 = vmatpush1.bf16.msra.mxu0 %v17330_v29  ;;  %v17401_v29 = vld [vmem:[%s24327_s30 + $0x324] ss:$8 sps:$4 sm:$0xff]  }
 0x1e7   :  { %2969 = vmatpush1.bf16.msra.mxu1 %v17327_v24  ;;  %3112 = vmatprep.subr.bf16.mxu0 %v17338_v43  ;;  %v17402_v24 = vld [vmem:[%s24327_s30 + $0x390] ss:$8 sps:$4 sm:$0xff]   ;;  %v17399_v43 = vld [vmem:[%s24327_s30 + $0x320] ss:$8 sps:$4 sm:$0xff]  }
 0x1e8   :  { %2970 = vmatprep.subr.bf16.mxu1 %v17335_v1  ;;  %v17410_v1 = vld [vmem:[%s24327_s30 + $0x384] ss:$8 sps:$4 sm:$0xff]  }
 0x1ea   :  { %3113 = vmatpush1.bf16.msra.mxu0 %v17336_v42  ;;  %v2288_v42 = vmul.f32 0.01, %v19122_v40 }
 0x1eb   :  { %2971 = vmatpush1.bf16.msra.mxu1 %v17333_v17  ;;  %3114 = vmatprep.subr.bf16.mxu0 %v17344_v36  ;;  %v17407_v17 = vld [vmem:[%s24327_s30 + $0x314] ss:$8 sps:$4 sm:$0xff]   ;;  %v17408_v36 = vld [vmem:[%s24327_s30 + $0x380] ss:$8 sps:$4 sm:$0xff]  }
 0x1ec   :  { %2972 = vmatprep.subr.bf16.mxu1 %v17341_v38  ;;  %v17405_v38 = vld [vmem:[%s24327_s30 + $0x310] ss:$8 sps:$4 sm:$0xff]  }
 0x1ee   :  { %3115 = vmatpush1.bf16.msra.mxu0 %v17342_v47  ;;  %v17416_v47 = vld [vmem:[%s24327_s30 + $0x4f4] ss:$8 sps:$4 sm:$0xff]  }
 0x1ef   :  { %2973 = vmatpush1.bf16.msra.mxu1 %v17339_v45  ;;  %3116 = vmatprep.subr.bf16.mxu0 %v17350_v49  ;;  %v2304_v45 = vsel %vm2272_vm6, %v19122_v40, %v2288_v42  ;;  %v17413_v49 = vld [vmem:[%s24327_s30 + $0x304] ss:$8 sps:$4 sm:$0xff]   ;;  %v17411_v40 = vld [vmem:[%s24327_s30 + $0x300] ss:$8 sps:$4 sm:$0xff]   ;;  %v17474_v42 = vld [vmem:[%s24327_s30 + $0x5d0] ss:$8 sps:$4 sm:$0xff]  }
 0x1f0   :  { %2974 = vmatprep.subr.bf16.mxu1 %v17347_v0  ;;  %v2287_v0 = vmul.f32 0.01, %v19096_v21 }
 0x1f2   :  { %3117 = vmatpush1.bf16.msra.mxu0 %v17348_v4  ;;  %v17414_v4 = vld [vmem:[%s24327_s30 + $0x4f0] ss:$8 sps:$4 sm:$0xff]  }
 0x1f3   :  { %2975 = vmatpush1.bf16.msra.mxu1 %v17345_v44  ;;  %3118 = vmatprep.subr.bf16.mxu0 %v17356_v51  ;;  %v3305_v44 = vpack.c.bf16 %v2304_v45, %v2304_v45  ;;  %v17422_v51 = vld [vmem:[%s24327_s30 + $0x4e4] ss:$8 sps:$4 sm:$0xff]   ;;  %v17477_v45 = vld [vmem:[%s24327_s30 + $0x550] ss:$8 sps:$4 sm:$0xff]  }
 0x1f4   :  { %2976 = vmatprep.subr.bf16.mxu1 %v17353_v5  ;;  %v17419_v5 = vld [vmem:[%s24327_s30 + $0x474] ss:$8 sps:$4 sm:$0xff]  }
 0x1f6   :  { %3119 = vmatpush1.bf16.msra.mxu0 %v17354_v53  ;;  %v2303_v53 = vsel %vm2271_vm7, %v19096_v21, %v2287_v0  ;;  %v17425_v21 = vld [vmem:[%s24327_s30 + $0x464] ss:$8 sps:$4 sm:$0xff]  }
 0x1f7   :  { %2977 = vmatpush1.bf16.msra.mxu1 %v17351_v11  ;;  %3120 = vmatprep.subr.bf16.mxu0 %v17362_v30  ;;  %v17420_v11 = vld [vmem:[%s24327_s30 + $0x4e0] ss:$8 sps:$4 sm:$0xff]   ;;  %v17417_v30 = vld [vmem:[%s24327_s30 + $0x470] ss:$8 sps:$4 sm:$0xff]   ;;  %v17485_v0 = vld [vmem:[%s24327_s30 + $0x544] ss:$8 sps:$4 sm:$0xff]  }
 0x1f8   :  { %2978 = vmatprep.subr.bf16.mxu1 %v17359_v6  ;;  %v3165_v6 = vpack.c.bf16 %v2303_v53, %v2303_v53  ;;  %v17489_v53 = vld [vmem:[%s24327_s30 + $0x530] ss:$8 sps:$4 sm:$0xff]  }
 0x1fa   :  { %3121 = vmatpush1.bf16.msra.mxu0 %v17360_v22  ;;  %v17426_v22 = vld [vmem:[%s24327_s30 + $0x4d0] ss:$8 sps:$4 sm:$0xff]  }
 0x1fb   :  { %2979 = vmatpush1.bf16.msra.mxu1 %v17357_v12  ;;  %3386 = vmatprep.subr.bf16.mxu0 %v17368_v63  ;;  %v17423_v12 = vld [vmem:[%s24327_s30 + $0x460] ss:$8 sps:$4 sm:$0xff]   ;;  %v17434_v63 = vld [vmem:[%s24327_s30 + $0x4c4] ss:$8 sps:$4 sm:$0xff]  }
 0x1fc   :  { %2980 = vmatprep.subr.bf16.mxu1 %v17365_v2  ;;  %v17432_v2 = vld [vmem:[%s24327_s30 + $0x4c0] ss:$8 sps:$4 sm:$0xff]  }
 0x1fd   :  { %3139 = vmatmul.mubr.bf16.vlgmr.msra.gmra.mxu0 %v3025_v50  ;;  %v17437_v50 = vld [vmem:[%s24327_s30 + $0x444] ss:$8 sps:$4 sm:$0xff]  }
 0x1fe   :  { %3387 = vmatpush1.bf16.msra.mxu0 %v17366_v31  ;;  %3418 = vmatprep.mubr.bf16.mxu0 %v18010_v9  ;;  %v17440_v31 = vld [vmem:[%s24327_s30 + $0x4b4] ss:$8 sps:$4 sm:$0xff]  }
 0x1ff   :  { %2981 = vmatpush1.bf16.msra.mxu1 %v17363_v35  ;;  %3388 = vmatprep.subr.bf16.mxu0 %v17374_v58  ;;  %v17438_v35 = vld [vmem:[%s24327_s30 + $0x4b0] ss:$8 sps:$4 sm:$0xff]   ;;  %v17435_v58 = vld [vmem:[%s24327_s30 + $0x440] ss:$8 sps:$4 sm:$0xff]  }
 0x200   :  { %3246 = vmatprep.subr.bf16.mxu1 %v17371_v52  ;;  %v17446_v52 = vld [vmem:[%s24327_s30 + $0x4a4] ss:$8 sps:$4 sm:$0xff]  }
 0x202   :  { %2999 = vmatmul.mubr.bf16.vlgmr.msra.gmra.mxu1 %v2885_v46  ;;  %3389 = vmatpush1.bf16.msra.mxu0 %v17372_v56  ;;  %v17444_v56 = vld [vmem:[%s24327_s30 + $0x4a0] ss:$8 sps:$4 sm:$0xff]   ;;  %v17449_v46 = vld [vmem:[%s24327_s30 + $0x424] ss:$8 sps:$4 sm:$0xff]  }
 0x203   :  { %3247 = vmatpush1.bf16.msra.mxu1 %v17369_v54  ;;  %3390 = vmatprep.subr.bf16.mxu0 %v17380_v37  ;;  %v17441_v54 = vld [vmem:[%s24327_s30 + $0x430] ss:$8 sps:$4 sm:$0xff]   ;;  %v17452_v37 = vld [vmem:[%s24327_s30 + $0x494] ss:$8 sps:$4 sm:$0xff]  }
 0x204   :  { %3248 = vmatprep.subr.bf16.mxu1 %v17377_v7  ;;  %3278 = vmatprep.mubr.bf16.mxu1 %v18010_v9  ;;  %v17450_v7 = vld [vmem:[%s24327_s30 + $0x490] ss:$8 sps:$4 sm:$0xff]  }
 0x206   :  { %3391 = vmatpush1.bf16.msra.mxu0 %v17378_v18  ;;  %v17447_v18 = vld [vmem:[%s24327_s30 + $0x420] ss:$8 sps:$4 sm:$0xff]  }
 0x207   :  { %3249 = vmatpush1.bf16.msra.mxu1 %v17375_v60  ;;  %3392 = vmatprep.subr.bf16.mxu0 %v17386_v27  ;;  %v17458_v60 = vld [vmem:[%s24327_s30 + $0x484] ss:$8 sps:$4 sm:$0xff]   ;;  %v2290_v27 = vmul.f32 0.01, %v19185_v20 }
 0x208   :  { %3250 = vmatprep.subr.bf16.mxu1 %v17383_v41  ;;  %v17455_v41 = vld [vmem:[%s24327_s30 + $0x414] ss:$8 sps:$4 sm:$0xff]  }
 0x20a   :  { %3393 = vmatpush1.bf16.msra.mxu0 %v17384_v10  ;;  %v17456_v10 = vld [vmem:[%s24327_s30 + $0x480] ss:$8 sps:$4 sm:$0xff]  }
 0x20b   :  { %3251 = vmatpush1.bf16.msra.mxu1 %v17381_v25  ;;  %3394 = vmatprep.subr.bf16.mxu0 %v17392_v28  ;;  %v17453_v25 = vld [vmem:[%s24327_s30 + $0x410] ss:$8 sps:$4 sm:$0xff]   ;;  %v17464_v28 = vld [vmem:[%s24327_s30 + $0x5f4] ss:$8 sps:$4 sm:$0xff]  }
 0x20c   :  { %3252 = vmatprep.subr.bf16.mxu1 %v17389_v14  ;;  %v2306_v14 = vsel %vm2274_vm8, %v19185_v20, %v2290_v27  ;;  %v17459_v20 = vld [vmem:[%s24327_s30 + $0x400] ss:$8 sps:$4 sm:$0xff]   ;;  %v17530_v27 = vld [vmem:[%s24327_s30 + $0x6c4] ss:$8 sps:$4 sm:$0xff]  }
 0x20e   :  { %3395 = vmatpush1.bf16.msra.mxu0 %v17390_v15  ;;  %v17461_v15 = vld [vmem:[%s24327_s30 + $0x404] ss:$8 sps:$4 sm:$0xff]  }
 0x20f   :  { %3253 = vmatpush1.bf16.msra.mxu1 %v17387_v34  ;;  %3396 = vmatprep.subr.bf16.mxu0 %v17398_v32  ;;  %v2289_v34 = vmul.f32 0.01, %v19164_v48  ;;  %v17462_v32 = vld [vmem:[%s24327_s30 + $0x5f0] ss:$8 sps:$4 sm:$0xff]  }
 0x210   :  { %3254 = vmatprep.subr.bf16.mxu1 %v17395_v39  ;;  %v3585_v39 = vpack.c.bf16 %v2306_v14, %v2306_v14  ;;  %v17533_v14 = vld [vmem:[%s24327_s30 + $0x644] ss:$8 sps:$4 sm:$0xff]  }
 0x212   :  { %3397 = vmatpush1.bf16.msra.mxu0 %v17396_v55  ;;  %v17470_v55 = vld [vmem:[%s24327_s30 + $0x5e4] ss:$8 sps:$4 sm:$0xff]  }
 0x213   :  { %3255 = vmatpush1.bf16.msra.mxu1 %v17393_v13  ;;  %3398 = vmatprep.subr.bf16.mxu0 %v17404_v26  ;;  %v17467_v13 = vld [vmem:[%s24327_s30 + $0x574] ss:$8 sps:$4 sm:$0xff]   ;;  %v2305_v26 = vsel %vm2273_vm9, %v19164_v48, %v2289_v34  ;;  %v17473_v48 = vld [vmem:[%s24327_s30 + $0x564] ss:$8 sps:$4 sm:$0xff]   ;;  %v17531_v34 = vld [vmem:[%s24327_s30 + $0x640] ss:$8 sps:$4 sm:$0xff]  }
 0x214   :  { %3256 = vmatprep.subr.bf16.mxu1 %v17401_v29  ;;  %v17468_v29 = vld [vmem:[%s24327_s30 + $0x5e0] ss:$8 sps:$4 sm:$0xff]  }
 0x216   :  { %3399 = vmatpush1.bf16.msra.mxu0 %v17402_v24  ;;  %v17465_v24 = vld [vmem:[%s24327_s30 + $0x570] ss:$8 sps:$4 sm:$0xff]  }
 0x217   :  { %3257 = vmatpush1.bf16.msra.mxu1 %v17399_v43  ;;  %3400 = vmatprep.subr.bf16.mxu0 %v17410_v1  ;;  %v17476_v43 = vld [vmem:[%s24327_s30 + $0x5d4] ss:$8 sps:$4 sm:$0xff]   ;;  %v3445_v1 = vpack.c.bf16 %v2305_v26, %v2305_v26  ;;  %v17545_v26 = vld [vmem:[%s24327_s30 + $0x624] ss:$8 sps:$4 sm:$0xff]  }
 0x218   :  { %3258 = vmatprep.subr.bf16.mxu1 %v17407_v17  ;;  %v17471_v17 = vld [vmem:[%s24327_s30 + $0x560] ss:$8 sps:$4 sm:$0xff]  }
 0x21a   :  { %3401 = vmatpush1.bf16.msra.mxu0 %v17408_v36  ;;  %v17482_v36 = vld [vmem:[%s24327_s30 + $0x5c4] ss:$8 sps:$4 sm:$0xff]  }
 0x21b   :  { %3259 = vmatpush1.bf16.msra.mxu1 %v17405_v38  ;;  %3666 = vmatprep.subr.bf16.mxu0 %v17416_v47  ;;  %v17479_v38 = vld [vmem:[%s24327_s30 + $0x554] ss:$8 sps:$4 sm:$0xff]   ;;  %v17480_v47 = vld [vmem:[%s24327_s30 + $0x5c0] ss:$8 sps:$4 sm:$0xff]  }
 0x21c   :  { %3260 = vmatprep.subr.bf16.mxu1 %v17413_v49  ;;  %v17488_v49 = vld [vmem:[%s24327_s30 + $0x5b4] ss:$8 sps:$4 sm:$0xff]  }
 0x21d   :  { %3419 = vmatmul.mubr.bf16.vlgmr.msra.gmra.mxu0 %v3305_v44  ;;  %v17483_v44 = vld [vmem:[%s24327_s30 + $0x540] ss:$8 sps:$4 sm:$0xff]  }
 0x21e   :  { %3667 = vmatpush1.bf16.msra.mxu0 %v17414_v4  ;;  %3698 = vmatprep.mubr.bf16.mxu0 %v18010_v9  ;;  %v17486_v4 = vld [vmem:[%s24327_s30 + $0x5b0] ss:$8 sps:$4 sm:$0xff]  }
 0x21f   :  { %3261 = vmatpush1.bf16.msra.mxu1 %v17411_v40  ;;  %3668 = vmatprep.subr.bf16.mxu0 %v17422_v51  ;;  %v17494_v40 = vld [vmem:[%s24327_s30 + $0x5a4] ss:$8 sps:$4 sm:$0xff]   ;;  %v17491_v51 = vld [vmem:[%s24327_s30 + $0x534] ss:$8 sps:$4 sm:$0xff]  }
 0x220   :  { %3526 = vmatprep.subr.bf16.mxu1 %v17419_v5  ;;  %v17492_v5 = vld [vmem:[%s24327_s30 + $0x5a0] ss:$8 sps:$4 sm:$0xff]  }
 0x222   :  { %3279 = vmatmul.mubr.bf16.vlgmr.msra.gmra.mxu1 %v3165_v6  ;;  %3669 = vmatpush1.bf16.msra.mxu0 %v17420_v11  ;;  %v17500_v11 = vld [vmem:[%s24327_s30 + $0x594] ss:$8 sps:$4 sm:$0xff]   ;;  %v17495_v6 = vld [vmem:[%s24327_s30 + $0x520] ss:$8 sps:$4 sm:$0xff]  }
 0x223   :  { %3527 = vmatpush1.bf16.msra.mxu1 %v17417_v30  ;;  %3670 = vmatprep.subr.bf16.mxu0 %v17428_v59  ;;  %v17497_v30 = vld [vmem:[%s24327_s30 + $0x524] ss:$8 sps:$4 sm:$0xff]   ;;  %v17498_v59 = vld [vmem:[%s24327_s30 + $0x590] ss:$8 sps:$4 sm:$0xff]  }
 0x224   :  { %3528 = vmatprep.subr.bf16.mxu1 %v17425_v21  ;;  %3558 = vmatprep.mubr.bf16.mxu1 %v18010_v9  ;;  %v17506_v21 = vld [vmem:[%s24327_s30 + $0x584] ss:$8 sps:$4 sm:$0xff]  }
 0x226   :  { %3671 = vmatpush1.bf16.msra.mxu0 %v17426_v22  ;;  %v2292_v22 = vmul.f32 0.01, %v19182_v23 }
 0x227   :  { %3529 = vmatpush1.bf16.msra.mxu1 %v17423_v12  ;;  %3672 = vmatprep.subr.bf16.mxu0 %v17434_v63  ;;  %v17503_v12 = vld [vmem:[%s24327_s30 + $0x514] ss:$8 sps:$4 sm:$0xff]   ;;  %v17504_v63 = vld [vmem:[%s24327_s30 + $0x580] ss:$8 sps:$4 sm:$0xff]  }
 0x228   :  { %3530 = vmatprep.subr.bf16.mxu1 %v17431_v3  ;;  %v17501_v3 = vld [vmem:[%s24327_s30 + $0x510] ss:$8 sps:$4 sm:$0xff]  }
 0x22a   :  { %3673 = vmatpush1.bf16.msra.mxu0 %v17432_v2  ;;  %v17512_v2 = vld [vmem:[%s24327_s30 + $0x6f4] ss:$8 sps:$4 sm:$0xff]  }
 0x22b   :  { %3531 = vmatpush1.bf16.msra.mxu1 %v17429_v16  ;;  %3674 = vmatprep.subr.bf16.mxu0 %v17440_v31  ;;  %v2308_v16 = vsel %vm2276_vm10, %v19182_v23, %v2292_v22  ;;  %v17509_v31 = vld [vmem:[%s24327_s30 + $0x504] ss:$8 sps:$4 sm:$0xff]   ;;  %v17507_v23 = vld [vmem:[%s24327_s30 + $0x500] ss:$8 sps:$4 sm:$0xff]   ;;  %v17570_v22 = vld [vmem:[%s24327_s30 + $0x7d0] ss:$8 sps:$4 sm:$0xff]  }
 0x22c   :  { %3532 = vmatprep.subr.bf16.mxu1 %v17437_v50  ;;  %v2291_v50 = vmul.f32 0.01, %v19148_v62 }
 0x22e   :  { %3675 = vmatpush1.bf16.msra.mxu0 %v17438_v35  ;;  %v17510_v35 = vld [vmem:[%s24327_s30 + $0x6f0] ss:$8 sps:$4 sm:$0xff]  }
 0x22f   :  { %3533 = vmatpush1.bf16.msra.mxu1 %v17435_v58  ;;  %3676 = vmatprep.subr.bf16.mxu0 %v17446_v52  ;;  %v3865_v58 = vpack.c.bf16 %v2308_v16, %v2308_v16  ;;  %v17518_v52 = vld [vmem:[%s24327_s30 + $0x6e4] ss:$8 sps:$4 sm:$0xff]  }
 0x230   :  { %3534 = vmatprep.subr.bf16.mxu1 %v17443_v19  ;;  %v17515_v19 = vld [vmem:[%s24327_s30 + $0x674] ss:$8 sps:$4 sm:$0xff]  }
 0x232   :  { %3677 = vmatpush1.bf16.msra.mxu0 %v17444_v56  ;;  %v2307_v56 = vsel %vm2275_vm11, %v19148_v62, %v2291_v50  ;;  %v17521_v62 = vld [vmem:[%s24327_s30 + $0x664] ss:$8 sps:$4 sm:$0xff]  }
 0x233   :  { %3535 = vmatpush1.bf16.msra.mxu1 %v17441_v54  ;;  %3678 = vmatprep.subr.bf16.mxu0 %v17452_v37  ;;  %v17516_v54 = vld [vmem:[%s24327_s30 + $0x6e0] ss:$8 sps:$4 sm:$0xff]   ;;  %v17513_v37 = vld [vmem:[%s24327_s30 + $0x670] ss:$8 sps:$4 sm:$0xff]  }
 0x234   :  { %3536 = vmatprep.subr.bf16.mxu1 %v17449_v46  ;;  %v17524_v46 = vld [vmem:[%s24327_s30 + $0x6d4] ss:$8 sps:$4 sm:$0xff]  }
 0x236   :  { %3679 = vmatpush1.bf16.msra.mxu0 %v17450_v7  ;;  %v3725_v7 = vpack.c.bf16 %v2307_v56, %v2307_v56  ;;  %v17581_v56 = vld [vmem:[%s24327_s30 + $0x744] ss:$8 sps:$4 sm:$0xff]  }
 0x237   :  { %3537 = vmatpush1.bf16.msra.mxu1 %v17447_v18  ;;  %3680 = vmatprep.subr.bf16.mxu0 %v17458_v60  ;;  %v17522_v18 = vld [vmem:[%s24327_s30 + $0x6d0] ss:$8 sps:$4 sm:$0xff]   ;;  %v17519_v60 = vld [vmem:[%s24327_s30 + $0x660] ss:$8 sps:$4 sm:$0xff]  }
 0x238   :  { %3538 = vmatprep.subr.bf16.mxu1 %v17455_v41  ;;  %v17527_v41 = vld [vmem:[%s24327_s30 + $0x654] ss:$8 sps:$4 sm:$0xff]  }
 0x23a   :  { %3681 = vmatpush1.bf16.msra.mxu0 %v17456_v10  ;;  %v17528_v10 = vld [vmem:[%s24327_s30 + $0x6c0] ss:$8 sps:$4 sm:$0xff]  }
 0x23b   :  { %3539 = vmatpush1.bf16.msra.mxu1 %v17453_v25  ;;  %3946 = vmatprep.subr.bf16.mxu0 %v17464_v28  ;;  %v17525_v25 = vld [vmem:[%s24327_s30 + $0x650] ss:$8 sps:$4 sm:$0xff]   ;;  %v17536_v28 = vld [vmem:[%s24327_s30 + $0x6b4] ss:$8 sps:$4 sm:$0xff]  }
 0x23c   :  { %3540 = vmatprep.subr.bf16.mxu1 %v17461_v15  ;;  %v17534_v15 = vld [vmem:[%s24327_s30 + $0x6b0] ss:$8 sps:$4 sm:$0xff]  }
 0x23d   :  { %3699 = vmatmul.mubr.bf16.vlgmr.msra.gmra.mxu0 %v3585_v39  ;;  %v17539_v39 = vld [vmem:[%s24327_s30 + $0x634] ss:$8 sps:$4 sm:$0xff]  }
 0x23e   :  { %3947 = vmatpush1.bf16.msra.mxu0 %v17462_v32  ;;  %3978 = vmatprep.mubr.bf16.mxu0 %v18010_v9  ;;  %v17542_v32 = vld [vmem:[%s24327_s30 + $0x6a4] ss:$8 sps:$4 sm:$0xff]  }
 0x23f   :  { %3541 = vmatpush1.bf16.msra.mxu1 %v17459_v20  ;;  %3948 = vmatprep.subr.bf16.mxu0 %v17470_v55  ;;  %v17540_v20 = vld [vmem:[%s24327_s30 + $0x6a0] ss:$8 sps:$4 sm:$0xff]   ;;  %v17537_v55 = vld [vmem:[%s24327_s30 + $0x630] ss:$8 sps:$4 sm:$0xff]  }
 0x240   :  { %3806 = vmatprep.subr.bf16.mxu1 %v17467_v13  ;;  %v17548_v13 = vld [vmem:[%s24327_s30 + $0x694] ss:$8 sps:$4 sm:$0xff]  }
 0x242   :  { %3559 = vmatmul.mubr.bf16.vlgmr.msra.gmra.mxu1 %v3445_v1  ;;  %3949 = vmatpush1.bf16.msra.mxu0 %v17468_v29  ;;  %v17546_v29 = vld [vmem:[%s24327_s30 + $0x690] ss:$8 sps:$4 sm:$0xff]   ;;  %v2294_v1 = vmul.f32 0.01, %v19241_v8 }
 0x243   :  { %3807 = vmatpush1.bf16.msra.mxu1 %v17465_v24  ;;  %3950 = vmatprep.subr.bf16.mxu0 %v17476_v43  ;;  %v17543_v24 = vld [vmem:[%s24327_s30 + $0x620] ss:$8 sps:$4 sm:$0xff]   ;;  %v17554_v43 = vld [vmem:[%s24327_s30 + $0x684] ss:$8 sps:$4 sm:$0xff]  }
 0x244   :  { %3808 = vmatprep.subr.bf16.mxu1 %v17473_v48  ;;  %3838 = vmatprep.mubr.bf16.mxu1 %v18010_v9  ;;  %v17551_v48 = vld [vmem:[%s24327_s30 + $0x614] ss:$8 sps:$4 sm:$0xff]  }
 0x246   :  { %3951 = vmatpush1.bf16.msra.mxu0 %v17474_v42  ;;  %v17552_v42 = vld [vmem:[%s24327_s30 + $0x680] ss:$8 sps:$4 sm:$0xff]  }
 0x247   :  { %3809 = vmatpush1.bf16.msra.mxu1 %v17471_v17  ;;  %3952 = vmatprep.subr.bf16.mxu0 %v17482_v36  ;;  %v17549_v17 = vld [vmem:[%s24327_s30 + $0x610] ss:$8 sps:$4 sm:$0xff]   ;;  %v17560_v36 = vld [vmem:[%s24327_s30 + $0x7f4] ss:$8 sps:$4 sm:$0xff]  }
 0x248   :  { %3810 = vmatprep.subr.bf16.mxu1 %v17479_v38  ;;  %v2310_v38 = vsel %vm2278_vm12, %v19241_v8, %v2294_v1  ;;  %v17555_v8 = vld [vmem:[%s24327_s30 + $0x600] ss:$8 sps:$4 sm:$0xff]  }
 0x24a   :  { %3953 = vmatpush1.bf16.msra.mxu0 %v17480_v47  ;;  %v17557_v47 = vld [vmem:[%s24327_s30 + $0x604] ss:$8 sps:$4 sm:$0xff]  }
 0x24b   :  { %3811 = vmatpush1.bf16.msra.mxu1 %v17477_v45  ;;  %3954 = vmatprep.subr.bf16.mxu0 %v17488_v49  ;;  %v2293_v45 = vmul.f32 0.01, %v19213_v57  ;;  %v17558_v49 = vld [vmem:[%s24327_s30 + $0x7f0] ss:$8 sps:$4 sm:$0xff]  }
 0x24c   :  { %3812 = vmatprep.subr.bf16.mxu1 %v17485_v0  ;;  %v4145_v0 = vpack.c.bf16 %v2310_v38, %v2310_v38 }
 0x24e   :  { %3955 = vmatpush1.bf16.msra.mxu0 %v17486_v4  ;;  %v17566_v4 = vld [vmem:[%s24327_s30 + $0x7e4] ss:$8 sps:$4 sm:$0xff]  }
 0x24f   :  { %3813 = vmatpush1.bf16.msra.mxu1 %v17483_v44  ;;  %3956 = vmatprep.subr.bf16.mxu0 %v17494_v40  ;;  %v17563_v44 = vld [vmem:[%s24327_s30 + $0x774] ss:$8 sps:$4 sm:$0xff]   ;;  %v2309_v40 = vsel %vm2277_vm13, %v19213_v57, %v2293_v45 }
 0x250   :  { %3814 = vmatprep.subr.bf16.mxu1 %v17491_v51  ;;  %v17572_v57 = vld [vmem:[%s24327_s30 + $0x7d4] ss:$8 sps:$4 sm:$0xff]  }
 0x252   :  { %3957 = vmatpush1.bf16.msra.mxu0 %v17492_v5  ;;  %v17564_v5 = vld [vmem:[%s24327_s30 + $0x7e0] ss:$8 sps:$4 sm:$0xff]  }
 0x253   :  { %3815 = vmatpush1.bf16.msra.mxu1 %v17489_v53  ;;  %3958 = vmatprep.subr.bf16.mxu0 %v17500_v11  ;;  %v17561_v11 = vld [vmem:[%s24327_s30 + $0x770] ss:$8 sps:$4 sm:$0xff]  }
 0x254   :  { %3816 = vmatprep.subr.bf16.mxu1 %v17497_v30  ;;  %v4005_v30 = vpack.c.bf16 %v2309_v40, %v2309_v40  ;;  %v17614_v40 = vld [vmem:[%s24330_s4 + $0xc4] ss:$16 sps:$4 sm:$0xff]  }
 0x256   :  { %3959 = vmatpush1.bf16.msra.mxu0 %v17498_v59  ;;  %v17569_v59 = vld [vmem:[%s24327_s30 + $0x764] ss:$8 sps:$4 sm:$0xff]  }
 0x257   :  { %3817 = vmatpush1.bf16.msra.mxu1 %v17495_v6  ;;  %3960 = vmatprep.subr.bf16.mxu0 %v17506_v21 }
 0x258   :  { %3818 = vmatprep.subr.bf16.mxu1 %v17503_v12 }
 0x25a   :  { %3961 = vmatpush1.bf16.msra.mxu0 %v17504_v63 }
 0x25b   :  { %3819 = vmatpush1.bf16.msra.mxu1 %v17501_v3  ;;  %4226 = vmatprep.subr.bf16.mxu0 %v17512_v2  ;;  %v17567_v3 = vld [vmem:[%s24327_s30 + $0x760] ss:$8 sps:$4 sm:$0xff]   ;;  %v17578_v2 = vld [vmem:[%s24327_s30 + $0x7c4] ss:$8 sps:$4 sm:$0xff]  }
 0x25c   :  { %3820 = vmatprep.subr.bf16.mxu1 %v17509_v31  ;;  %v17575_v31 = vld [vmem:[%s24327_s30 + $0x754] ss:$8 sps:$4 sm:$0xff]  }
 0x25d   :  { %3979 = vmatmul.mubr.bf16.vlgmr.msra.gmra.mxu0 %v3865_v58  ;;  %v17576_v58 = vld [vmem:[%s24327_s30 + $0x7c0] ss:$8 sps:$4 sm:$0xff]  }
 0x25e   :  { %4227 = vmatpush1.bf16.msra.mxu0 %v17510_v35  ;;  %4258 = vmatprep.mubr.bf16.mxu0 %v18010_v9 }
 0x25f   :  { %3821 = vmatpush1.bf16.msra.mxu1 %v17507_v23  ;;  %4228 = vmatprep.subr.bf16.mxu0 %v17518_v52  ;;  %v17573_v23 = vld [vmem:[%s24327_s30 + $0x750] ss:$8 sps:$4 sm:$0xff]   ;;  %v17584_v52 = vld [vmem:[%s24327_s30 + $0x7b4] ss:$8 sps:$4 sm:$0xff]  }
 0x260   :  { %4086 = vmatprep.subr.bf16.mxu1 %v17515_v19 }
 0x262   :  { %3839 = vmatmul.mubr.bf16.vlgmr.msra.gmra.mxu1 %v3725_v7  ;;  %4229 = vmatpush1.bf16.msra.mxu0 %v17516_v54  ;;  %v17582_v54 = vld [vmem:[%s24327_s30 + $0x7b0] ss:$8 sps:$4 sm:$0xff]   ;;  %v17587_v7 = vld [vmem:[%s24327_s30 + $0x734] ss:$8 sps:$4 sm:$0xff]  }
 0x263   :  { %4087 = vmatpush1.bf16.msra.mxu1 %v17513_v37  ;;  %4230 = vmatprep.subr.bf16.mxu0 %v17524_v46  ;;  %v17579_v37 = vld [vmem:[%s24327_s30 + $0x740] ss:$8 sps:$4 sm:$0xff]   ;;  %v17590_v46 = vld [vmem:[%s24327_s30 + $0x7a4] ss:$8 sps:$4 sm:$0xff]  }
 0x264   :  { %4088 = vmatprep.subr.bf16.mxu1 %v17521_v62  ;;  %4118 = vmatprep.mubr.bf16.mxu1 %v18010_v9  ;;  %v17588_v62 = vld [vmem:[%s24327_s30 + $0x7a0] ss:$8 sps:$4 sm:$0xff]  }
 0x266   :  { %4231 = vmatpush1.bf16.msra.mxu0 %v17522_v18  ;;  %v17585_v18 = vld [vmem:[%s24327_s30 + $0x730] ss:$8 sps:$4 sm:$0xff]  }
 0x267   :  { %4089 = vmatpush1.bf16.msra.mxu1 %v17519_v60  ;;  %4232 = vmatprep.subr.bf16.mxu0 %v17530_v27  ;;  %v17596_v60 = vld [vmem:[%s24327_s30 + $0x794] ss:$8 sps:$4 sm:$0xff]   ;;  %v17593_v27 = vld [vmem:[%s24327_s30 + $0x724] ss:$8 sps:$4 sm:$0xff]  }
 0x268   :  { %4090 = vmatprep.subr.bf16.mxu1 %v17527_v41  ;;  %v17594_v41 = vld [vmem:[%s24327_s30 + $0x790] ss:$8 sps:$4 sm:$0xff]  }
 0x26a   :  { %4233 = vmatpush1.bf16.msra.mxu0 %v17528_v10  ;;  %v17591_v10 = vld [vmem:[%s24327_s30 + $0x720] ss:$8 sps:$4 sm:$0xff]  }
 0x26b   :  { %4091 = vmatpush1.bf16.msra.mxu1 %v17525_v25  ;;  %4234 = vmatprep.subr.bf16.mxu0 %v17536_v28  ;;  %v17602_v25 = vld [vmem:[%s24327_s30 + $0x784] ss:$8 sps:$4 sm:$0xff]   ;;  %v2296_v28 = vmul.f32 0.01, %v19228_v33 }
 0x26c   :  { %4092 = vmatprep.subr.bf16.mxu1 %v17533_v14  ;;  %v17599_v14 = vld [vmem:[%s24327_s30 + $0x714] ss:$8 sps:$4 sm:$0xff]  }
 0x26e   :  { %4235 = vmatpush1.bf16.msra.mxu0 %v17534_v15  ;;  %v17600_v15 = vld [vmem:[%s24327_s30 + $0x780] ss:$8 sps:$4 sm:$0xff]  }
 0x26f   :  { %4093 = vmatpush1.bf16.msra.mxu1 %v17531_v34  ;;  %4236 = vmatprep.subr.bf16.mxu0 %v17542_v32  ;;  %v17597_v34 = vld [vmem:[%s24327_s30 + $0x710] ss:$8 sps:$4 sm:$0xff]   ;;  %v2312_v32 = vsel %vm2280_vm14, %v19228_v33, %v2296_v28  ;;  %v17650_v28 = vld [vmem:[%s24330_s4 + $0x4] ss:$16 sps:$4 sm:$0xff]  }
 0x270   :  { %4094 = vmatprep.subr.bf16.mxu1 %v17539_v39  ;;  %v17605_v39 = vld [vmem:[%s24327_s30 + $0x704] ss:$8 sps:$4 sm:$0xff]  }
 0x272   :  { %4237 = vmatpush1.bf16.msra.mxu0 %v17540_v20  ;;  %v2295_v20 = vmul.f32 0.01, %v19198_v61 }
 0x273   :  { %4095 = vmatpush1.bf16.msra.mxu1 %v17537_v55  ;;  %4238 = vmatprep.subr.bf16.mxu0 %v17548_v13  ;;  %v4425_v55 = vpack.c.bf16 %v2312_v32, %v2312_v32  ;;  %v17603_v13 = vld [vmem:[%s24327_s30 + $0x700] ss:$8 sps:$4 sm:$0xff]   ;;  %v17656_v32 = vld [vmem:[%s24330_s4 + $0x1e4] ss:$16 sps:$4 sm:$0xff]  }
 0x274   :  { %4096 = vmatprep.subr.bf16.mxu1 %v17545_v26  ;;  %v2311_v26 = vsel %vm2279_vm15, %v19198_v61, %v2295_v20  ;;  %v17606_v61 = vld [vmem:[%s24330_s4 + $0xe0] ss:$16 sps:$4 sm:$0xff]  }
 0x275   :  { %v17654_v20 = vld [vmem:[%s24330_s4 + $0x1e0] ss:$16 sps:$4 sm:$0xff]  }
 0x276   :  { %4239 = vmatpush1.bf16.msra.mxu0 %v17546_v29 }
 0x277   :  { %4097 = vmatpush1.bf16.msra.mxu1 %v17543_v24  ;;  %4240 = vmatprep.subr.bf16.mxu0 %v17554_v43  ;;  %v4285_v24 = vpack.c.bf16 %v2311_v26, %v2311_v26  ;;  %v17665_v26 = vld [vmem:[%s24330_s4 + $0x1cc] ss:$16 sps:$4 sm:$0xff]  }
 0x278   :  { %4098 = vmatprep.subr.bf16.mxu1 %v17551_v48 }
 0x27a   :  { %4241 = vmatpush1.bf16.msra.mxu0 %v17552_v42 }
 0x27b   :  { %4099 = vmatpush1.bf16.msra.mxu1 %v17549_v17  ;;  %4506 = vmatprep.subr.bf16.mxu0 %v17560_v36 }
 0x27c   :  { %4100 = vmatprep.subr.bf16.mxu1 %v17557_v47 }
 0x27d   :  { %4259 = vmatmul.mubr.bf16.vlgmr.msra.gmra.mxu0 %v4145_v0  ;;  %v2582_v51 = vpop.f32.mrf.mxu0  ;;  %v17608_v0 = vld [vmem:[%s24330_s4 + $0xe4] ss:$16 sps:$4 sm:$0xff]  }
 0x27e   :  { %4507 = vmatpush1.bf16.msra.mxu0 %v17558_v49  ;;  %4538 = vmatprep.mubr.bf16.mxu0 %v18010_v9 }
 0x27f   :  { %4101 = vmatpush1.bf16.msra.mxu1 %v17555_v8  ;;  %v2584_v53 = vpop.f32.mrf.mxu0  ;;  %4508 = vmatprep.subr.bf16.mxu0 %v17566_v4  ;;  %v17609_v8 = vld [vmem:[%s24330_s4 + $0xe8] ss:$16 sps:$4 sm:$0xff]   ;;  %v17611_v4 = vld [vmem:[%s24330_s4 + $0xec] ss:$16 sps:$4 sm:$0xff]  }
 0x280   :  { %4366 = vmatprep.subr.bf16.mxu1 %v17563_v44  ;;  %v17612_v44 = vld [vmem:[%s24330_s4 + $0xc0] ss:$16 sps:$4 sm:$0xff]  }
 0x281   :  { %v2586_v6 = vpop.f32.mrf.mxu0  ;;  %v2461_v21 = vpop.f32.mrf.mxu1 }
 0x282   :  { %4119 = vmatmul.mubr.bf16.vlgmr.msra.gmra.mxu1 %v4005_v30  ;;  %4509 = vmatpush1.bf16.msra.mxu0 %v17564_v5  ;;  %v19807_v12 = vadd.f32 %v2582_v51, %v2461_v21  ;;  %v17615_v51 = vld [vmem:[%s24330_s4 + $0xc8] ss:$16 sps:$4 sm:$0xff]   ;;  %v17617_v5 = vld [vmem:[%s24330_s4 + $0xcc] ss:$16 sps:$4 sm:$0xff]  }
 0x283   :  { %4367 = vmatpush1.bf16.msra.mxu1 %v17561_v11  ;;  %v2587_v63 = vpop.f32.mrf.mxu0  ;;  %4510 = vmatprep.subr.bf16.mxu0 %v17572_v57  ;;  %v2463_v16 = vpop.f32.mrf.mxu1  ;;  %v17620_v11 = vld [vmem:[%s24330_s4 + $0xa4] ss:$16 sps:$4 sm:$0xff]   ;;  %v17621_v57 = vld [vmem:[%s24330_s4 + $0xa8] ss:$16 sps:$4 sm:$0xff]   ;;  %v17623_v30 = vld [vmem:[%s24330_s4 + $0xac] ss:$16 sps:$4 sm:$0xff]  }
 0x284   :  { %4368 = vmatprep.subr.bf16.mxu1 %v17569_v59  ;;  %4398 = vmatprep.mubr.bf16.mxu1 %v18010_v9  ;;  %v19819_v50 = vadd.f32 %v2584_v53, %v2463_v16  ;;  %v17618_v53 = vld [vmem:[%s24330_s4 + $0xa0] ss:$16 sps:$4 sm:$0xff]   ;;  %v17626_v59 = vld [vmem:[%s24330_s4 + $0x84] ss:$16 sps:$4 sm:$0xff]   ;;  %v17629_v6 = vld [vmem:[%s24330_s4 + $0x8c] ss:$16 sps:$4 sm:$0xff]  }
 0x285   :  { %v2465_v35 = vpop.f32.mrf.mxu1 }
 0x286   :  { %4511 = vmatpush1.bf16.msra.mxu0 %v17570_v22  ;;  %v17624_v22 = vld [vmem:[%s24330_s4 + $0x80] ss:$16 sps:$4 sm:$0xff]  }
 0x287   :  { %4369 = vmatpush1.bf16.msra.mxu1 %v17567_v3  ;;  %4512 = vmatprep.subr.bf16.mxu0 %v17578_v2  ;;  %v2466_v19 = vpop.f32.mrf.mxu1  ;;  %v17632_v3 = vld [vmem:[%s24330_s4 + $0x64] ss:$16 sps:$4 sm:$0xff]   ;;  %v17635_v2 = vld [vmem:[%s24330_s4 + $0x6c] ss:$16 sps:$4 sm:$0xff]  }
 0x288   :  { %4370 = vmatprep.subr.bf16.mxu1 %v17575_v31  ;;  %v17630_v31 = vld [vmem:[%s24330_s4 + $0x60] ss:$16 sps:$4 sm:$0xff]   ;;  %v17638_v19 = vld [vmem:[%s24330_s4 + $0x44] ss:$16 sps:$4 sm:$0xff]  }
 0x28a   :  { %4513 = vmatpush1.bf16.msra.mxu0 %v17576_v58 }
 0x28b   :  { %4371 = vmatpush1.bf16.msra.mxu1 %v17573_v23  ;;  %4514 = vmatprep.subr.bf16.mxu0 %v17584_v52 }
 0x28c   :  { %4372 = vmatprep.subr.bf16.mxu1 %v17581_v56  ;;  %v17641_v56 = vld [vmem:[%s24330_s4 + $0x4c] ss:$16 sps:$4 sm:$0xff]  }
 0x28e   :  { %4515 = vmatpush1.bf16.msra.mxu0 %v17582_v54 }
 0x28f   :  { %4373 = vmatpush1.bf16.msra.mxu1 %v17579_v37  ;;  %4516 = vmatprep.subr.bf16.mxu0 %v17590_v46  ;;  %v17636_v46 = vld [vmem:[%s24330_s4 + $0x40] ss:$16 sps:$4 sm:$0xff]  }
 0x290   :  { %4374 = vmatprep.subr.bf16.mxu1 %v17587_v7  ;;  %v17639_v7 = vld [vmem:[%s24330_s4 + $0x48] ss:$16 sps:$4 sm:$0xff]  }
 0x292   :  { %4517 = vmatpush1.bf16.msra.mxu0 %v17588_v62 }
 0x293   :  { %4375 = vmatpush1.bf16.msra.mxu1 %v17585_v18  ;;  %4518 = vmatprep.subr.bf16.mxu0 %v17596_v60 }
 0x294   :  { %4376 = vmatprep.subr.bf16.mxu1 %v17593_v27  ;;  %v17642_v27 = vld [vmem:[%s24330_s4 + $0x20] ss:$16 sps:$4 sm:$0xff]  }
 0x296   :  { %4519 = vmatpush1.bf16.msra.mxu0 %v17594_v41  ;;  %v17644_v41 = vld [vmem:[%s24330_s4 + $0x24] ss:$16 sps:$4 sm:$0xff]  }
 0x297   :  { %4377 = vmatpush1.bf16.msra.mxu1 %v17591_v10  ;;  %4520 = vmatprep.subr.bf16.mxu0 %v17602_v25  ;;  %v17645_v10 = vld [vmem:[%s24330_s4 + $0x28] ss:$16 sps:$4 sm:$0xff]   ;;  %v17647_v25 = vld [vmem:[%s24330_s4 + $0x2c] ss:$16 sps:$4 sm:$0xff]  }
 0x298   :  { %4378 = vmatprep.subr.bf16.mxu1 %v17599_v14  ;;  %v17653_v14 = vld [vmem:[%s24330_s4 + $0xc] ss:$16 sps:$4 sm:$0xff]  }
 0x29a   :  { %4521 = vmatpush1.bf16.msra.mxu0 %v17600_v15  ;;  %v17648_v15 = vld [vmem:[%s24330_s4] ss:$16 sps:$4 sm:$0xff]  }
 0x29b   :  { %4379 = vmatpush1.bf16.msra.mxu1 %v17597_v34  ;;  %5010 = vmatprep.subr.bf16.mxu0 %v17611_v4  ;;  %v17651_v34 = vld [vmem:[%s24330_s4 + $0x8] ss:$16 sps:$4 sm:$0xff]  }
 0x29c   :  { %4380 = vmatprep.subr.bf16.mxu1 %v17605_v39  ;;  %v17659_v39 = vld [vmem:[%s24330_s4 + $0x1ec] ss:$16 sps:$4 sm:$0xff]   ;;  %v17681_v4 = vld [vmem:[%s24330_s4 + $0x168] ss:$16 sps:$4 sm:$0xff]  }
 0x29d   :  { %v2860_v33 = vpop.f32.mrf.mxu0  ;;  %4539 = vmatmul.mubr.bf16.vlgmr.msra.gmra.mxu0 %v4425_v55  ;;  %v17657_v55 = vld [vmem:[%s24330_s4 + $0x1e8] ss:$16 sps:$4 sm:$0xff]  }
 0x29e   :  { %5011 = vmatpush1.bf16.msra.mxu0 %v17609_v8  ;;  %v17678_v8 = vld [vmem:[%s24330_s4 + $0x160] ss:$16 sps:$4 sm:$0xff]  }
 0x29f   :  { %4381 = vmatpush1.bf16.msra.mxu1 %v17603_v13  ;;  %v2862_v29 = vpop.f32.mrf.mxu0  ;;  %5012 = vmatprep.subr.bf16.mxu0 %v17617_v5  ;;  %v17662_v13 = vld [vmem:[%s24330_s4 + $0x1c4] ss:$16 sps:$4 sm:$0xff]  }
 0x2a0   :  { %4969 = vmatprep.subr.bf16.mxu1 %v17608_v0 }
 0x2a1   :  { %v2864_v43 = vpop.f32.mrf.mxu0 }
 0x2a2   :  { %v2720_v1 = vpop.f32.mrf.mxu1  ;;  %4399 = vmatmul.mubr.bf16.vlgmr.msra.gmra.mxu1 %v4285_v24  ;;  %5013 = vmatpush1.bf16.msra.mxu0 %v17615_v51  ;;  %v17668_v24 = vld [vmem:[%s24330_s4 + $0x1a4] ss:$16 sps:$4 sm:$0xff]   ;;  %v17671_v43 = vld [vmem:[%s24330_s4 + $0x1ac] ss:$16 sps:$4 sm:$0xff]  }
 0x2a3   :  { %v2727_v48 = vadd.f32 %v2720_v1, %v19807_v12  ;;  %v2865_v42 = vpop.f32.mrf.mxu0  ;;  %4970 = vmatpush1.bf16.msra.mxu1 %v17606_v61  ;;  %5014 = vmatprep.subr.bf16.mxu0 %v17623_v30  ;;  %v17627_v12 = vld [vmem:[%s24330_s4 + $0x88] ss:$16 sps:$4 sm:$0xff]   ;;  %v17666_v1 = vld [vmem:[%s24330_s4 + $0x1a0] ss:$16 sps:$4 sm:$0xff]   ;;  %v17683_v61 = vld [vmem:[%s24330_s4 + $0x16c] ss:$16 sps:$4 sm:$0xff]  }
 0x2a4   :  { %v2722_v17 = vpop.f32.mrf.mxu1  ;;  %4971 = vmatprep.subr.bf16.mxu1 %v17614_v40  ;;  %v17674_v42 = vld [vmem:[%s24330_s4 + $0x184] ss:$16 sps:$4 sm:$0xff]  }
 0x2a5   :  { %v2728_v36 = vadd.f32 %v2722_v17, %v19819_v50  ;;  %v2867_v38 = vadd.f32 %v2860_v33, %v2727_v48  ;;  %v17633_v50 = vld [vmem:[%s24330_s4 + $0x68] ss:$16 sps:$4 sm:$0xff]   ;;  %v17660_v33 = vld [vmem:[%s24330_s4 + $0x1c0] ss:$16 sps:$4 sm:$0xff]   ;;  %v17677_v17 = vld [vmem:[%s24330_s4 + $0x18c] ss:$16 sps:$4 sm:$0xff]  }
 0x2a6   :  { %v2724_v47 = vpop.f32.mrf.mxu1  ;;  %5015 = vmatpush1.bf16.msra.mxu0 %v17621_v57  ;;  %v17669_v48 = vld [vmem:[%s24330_s4 + $0x1a8] ss:$16 sps:$4 sm:$0xff]  }
 0x2a7   :  { %v2868_v45 = vadd.f32 %v2862_v29, %v2728_v36  ;;  %4972 = vmatpush1.bf16.msra.mxu1 %v17612_v44  ;;  %5016 = vmatprep.subr.bf16.mxu0 %v17629_v6  ;;  %v17663_v29 = vld [vmem:[%s24330_s4 + $0x1c8] ss:$16 sps:$4 sm:$0xff]  }
 0x2a8   :  { %v2725_v49 = vpop.f32.mrf.mxu1  ;;  %4973 = vmatprep.subr.bf16.mxu1 %v17620_v11  ;;  %v17675_v47 = vld [vmem:[%s24330_s4 + $0x188] ss:$16 sps:$4 sm:$0xff]   ;;  %v17689_v11 = vld [vmem:[%s24330_s4 + $0x14c] ss:$16 sps:$4 sm:$0xff]  }
 0x2a9   :  { %v17680_v49 = vld [vmem:[%s24330_s4 + $0x164] ss:$16 sps:$4 sm:$0xff]   ;;  %v17687_v6 = vld [vmem:[%s24330_s4 + $0x148] ss:$16 sps:$4 sm:$0xff]  }
 0x2aa   :  { %5017 = vmatpush1.bf16.msra.mxu0 %v17627_v12 }
 0x2ab   :  { %4974 = vmatpush1.bf16.msra.mxu1 %v17618_v53  ;;  %5018 = vmatprep.subr.bf16.mxu0 %v17635_v2  ;;  %v17686_v53 = vld [vmem:[%s24330_s4 + $0x144] ss:$16 sps:$4 sm:$0xff]   ;;  %v17690_v2 = vld [vmem:[%s24330_s4 + $0x120] ss:$16 sps:$4 sm:$0xff]  }
 0x2ac   :  { %4975 = vmatprep.subr.bf16.mxu1 %v17626_v59  ;;  %v17684_v59 = vld [vmem:[%s24330_s4 + $0x140] ss:$16 sps:$4 sm:$0xff]  }
 0x2ae   :  { %5019 = vmatpush1.bf16.msra.mxu0 %v17633_v50  ;;  %v17701_v50 = vld [vmem:[%s24330_s4 + $0x10c] ss:$16 sps:$4 sm:$0xff]  }
 0x2af   :  { %4976 = vmatpush1.bf16.msra.mxu1 %v17624_v22  ;;  %5020 = vmatprep.subr.bf16.mxu0 %v17641_v56 }
 0x2b0   :  { %4977 = vmatprep.subr.bf16.mxu1 %v17632_v3  ;;  %v17695_v3 = vld [vmem:[%s24330_s4 + $0x12c] ss:$16 sps:$4 sm:$0xff]  }
 0x2b2   :  { %5021 = vmatpush1.bf16.msra.mxu0 %v17639_v7 }
 0x2b3   :  { %4978 = vmatpush1.bf16.msra.mxu1 %v17630_v31  ;;  %5022 = vmatprep.subr.bf16.mxu0 %v17647_v25  ;;  %v17698_v31 = vld [vmem:[%s24330_s4 + $0x104] ss:$16 sps:$4 sm:$0xff]  }
 0x2b4   :  { %4979 = vmatprep.subr.bf16.mxu1 %v17638_v19 }
 0x2b6   :  { %5023 = vmatpush1.bf16.msra.mxu0 %v17645_v10 }
 0x2b7   :  { %4980 = vmatpush1.bf16.msra.mxu1 %v17636_v46  ;;  %5024 = vmatprep.subr.bf16.mxu0 %v17653_v14 }
 0x2b8   :  { %4981 = vmatprep.subr.bf16.mxu1 %v17644_v41 }
 0x2ba   :  { %5025 = vmatpush1.bf16.msra.mxu0 %v17651_v34 }
 0x2bb   :  { %4982 = vmatpush1.bf16.msra.mxu1 %v17642_v27  ;;  %5026 = vmatprep.subr.bf16.mxu0 %v17659_v39 }
 0x2bc   :  { %4983 = vmatprep.subr.bf16.mxu1 %v17650_v28 }
 0x2bd   :  { %v3140_v21 = vpop.f32.mrf.mxu0 }
 0x2be   :  { %5027 = vmatpush2.bf16.msra.mxu0 %v17657_v55 }
 0x2bf   :  { %v3142_v63 = vpop.f32.mrf.mxu0  ;;  %4984 = vmatpush1.bf16.msra.mxu1 %v17648_v15  ;;  %5028 = vmatprep.subr.bf16.mxu0 %v17665_v26 }
 0x2c0   :  { %4985 = vmatprep.subr.bf16.mxu1 %v17656_v32 }
 0x2c1   :  { %v3144_v16 = vpop.f32.mrf.mxu0 }
 0x2c2   :  { %v3000_v35 = vpop.f32.mrf.mxu1  ;;  %5029 = vmatpush2.bf16.msra.mxu0 %v17663_v29  ;;  %v17693_v16 = vld [vmem:[%s24330_s4 + $0x128] ss:$16 sps:$4 sm:$0xff]  }
 0x2c3   :  { %v3007_v58 = vadd.f32 %v3000_v35, %v2867_v38  ;;  %v3145_v23 = vpop.f32.mrf.mxu0  ;;  %4986 = vmatpush2.bf16.msra.mxu1 %v17654_v20  ;;  %5030 = vmatprep.subr.bf16.mxu0 %v17671_v43  ;;  %v17672_v38 = vld [vmem:[%s24330_s4 + $0x180] ss:$16 sps:$4 sm:$0xff]  }
 0x2c4   :  { %v3002_v52 = vpop.f32.mrf.mxu1  ;;  %4987 = vmatprep.subr.bf16.mxu1 %v17662_v13  ;;  %v17696_v35 = vld [vmem:[%s24330_s4 + $0x100] ss:$16 sps:$4 sm:$0xff]   ;;  %v17704_v23 = vld [vmem:[%s24299_s11 + $0xe4] ss:$16 sps:$4 sm:$0xff]  }
 0x2c5   :  { %v3008_v54 = vadd.f32 %v3002_v52, %v2868_v45  ;;  %v19955_v37 = vadd.f32 %v3140_v21, %v3007_v58  ;;  %v17699_v58 = vld [vmem:[%s24330_s4 + $0x108] ss:$16 sps:$4 sm:$0xff]   ;;  %v17707_v52 = vld [vmem:[%s24299_s11 + $0xec] ss:$16 sps:$4 sm:$0xff]  }
 0x2c6   :  { %v3004_v62 = vpop.f32.mrf.mxu1  ;;  %5031 = vmatpush2.bf16.msra.mxu0 %v17669_v48 }
 0x2c7   :  { %v19963_v18 = vadd.f32 %v3142_v63, %v3008_v54  ;;  %4988 = vmatpush2.bf16.msra.mxu1 %v17660_v33  ;;  %5032 = vmatprep.subr.bf16.mxu0 %v17677_v17  ;;  %v17692_v63 = vld [vmem:[%s24330_s4 + $0x124] ss:$16 sps:$4 sm:$0xff]   ;;  %v4551_v17 = vlaneseq }
 0x2c8   :  { %v3005_v60 = vpop.f32.mrf.mxu1  ;;  %4989 = vmatprep.subr.bf16.mxu1 %v17668_v24 }
 0x2ca   :  { %5033 = vmatpush2.bf16.msra.mxu0 %v17675_v47 }
 0x2cb   :  { %4990 = vmatpush2.bf16.msra.mxu1 %v17666_v1  ;;  %5034 = vmatprep.subr.bf16.mxu0 %v17683_v61 }
 0x2cc   :  { %4991 = vmatprep.subr.bf16.mxu1 %v17674_v42 }
 0x2ce   :  { %5035 = vmatpush2.bf16.msra.mxu0 %v17681_v4  ;;  %v4549_v4 = vld [vmem:[%s24301_s6] sm:$0x3] }
 0x2cf   :  { %4992 = vmatpush2.bf16.msra.mxu1 %v17672_v38  ;;  %5036 = vmatprep.subr.bf16.mxu0 %v17689_v11  ;;  %v20093_v38 = vshrl.u32 %v4551_v17, 7  ;;  %v17746_v17 = vld [vmem:[%s24299_s11 + $0x4] ss:$16 sps:$4 sm:$0xff]  }
 0x2d0   :  { %4993 = vmatprep.subr.bf16.mxu1 %v17680_v49 }
 0x2d2   :  { %5037 = vmatpush2.bf16.msra.mxu0 %v17687_v6 }
 0x2d3   :  { %4994 = vmatpush2.bf16.msra.mxu1 %v17678_v8  ;;  %5038 = vmatprep.subr.bf16.mxu0 %v17695_v3  ;;  %v20096_v8 = vsub.s32 0, %v20093_v38 }
 0x2d4   :  { %4995 = vmatprep.subr.bf16.mxu1 %v17686_v53  ;;  %v4563_v53 = vld [vmem:[%s24302_s7] sm:$0x3] }
 0x2d6   :  { %5039 = vmatpush2.bf16.msra.mxu0 %v17693_v16 }
 0x2d7   :  { %4996 = vmatpush2.bf16.msra.mxu1 %v17684_v59  ;;  %5040 = vmatprep.subr.bf16.mxu0 %v17701_v50 }
 0x2d8   :  { %4997 = vmatprep.subr.bf16.mxu1 %v17692_v63 }
 0x2da   :  { %5041 = vmatpush2.bf16.msra.mxu0 %v17699_v58 }
 0x2db   :  { %4998 = vmatpush2.bf16.msra.mxu1 %v17690_v2  ;;  %5349 = vmatprep.subr.bf16.mxu0 %v17707_v52 }
 0x2dc   :  { %4999 = vmatprep.subr.bf16.mxu1 %v17698_v31 }
 0x2dd   :  { %v3420_v36 = vpop.f32.mrf.mxu0 }
 0x2df   :  { %v3422_v45 = vpop.f32.mrf.mxu0  ;;  %5000 = vmatpush2.bf16.msra.mxu1 %v17696_v35 }
 0x2e0   :  { %5308 = vmatprep.subr.bf16.mxu1 %v17704_v23 }
 0x2e1   :  { %v3424_v0 = vpop.f32.mrf.mxu0 }
 0x2e2   :  { %v3280_v44 = vpop.f32.mrf.mxu1 }
 0x2e3   :  { %v3287_v40 = vadd.f32 %v3280_v44, %v19955_v37  ;;  %v3425_v51 = vpop.f32.mrf.mxu0 }
 0x2e4   :  { %v3282_v5 = vpop.f32.mrf.mxu1  ;;  %v20102_v51 = vsub.s32 1, %v20093_v38 }
 0x2e5   :  { %v3288_v57 = vadd.f32 %v3282_v5, %v19963_v18  ;;  %v3427_v30 = vadd.f32 %v3420_v36, %v3287_v40 }
 0x2e6   :  { %v3284_v21 = vpop.f32.mrf.mxu1  ;;  %v4558_v63 = vrot.slane %v4549_v4, %v20102_v51  ;;  %v4572_v31 = vrot.slane %v4563_v53, %v20102_v51 }
 0x2e7   :  { %v3428_v22 = vadd.f32 %v3422_v45, %v3288_v57  ;;  %v4554_v57 = vrot.slane %v4549_v4, %v20096_v8  ;;  %v17750_v4 = vld [vmem:[%s24300_s12 + $0xe0] ss:$16 sps:$4 sm:$0xff]  }
 0x2e8   :  { %v3285_v12 = vpop.f32.mrf.mxu1 }
 0x2fd   :  { %v3700_v19 = vpop.f32.mrf.mxu0 }
 0x2ff   :  { %v3702_v56 = vpop.f32.mrf.mxu0 }
 0x301   :  { %v3704_v54 = vpop.f32.mrf.mxu0 }
 0x302   :  { %v3560_v37 = vpop.f32.mrf.mxu1 }
 0x303   :  { %v3567_v46 = vadd.f32 %v3560_v37, %v3427_v30  ;;  %v3705_v7 = vpop.f32.mrf.mxu0 }
 0x304   :  { %v3562_v62 = vpop.f32.mrf.mxu1  ;;  %v17705_v7 = vld [vmem:[%s24299_s11 + $0xe8] ss:$16 sps:$4 sm:$0xff]  }
 0x305   :  { %v3568_v18 = vadd.f32 %v3562_v62, %v3428_v22  ;;  %v3707_v60 = vadd.f32 %v3700_v19, %v3567_v46  ;;  %v4568_v22 = vrot.slane %v4563_v53, %v20096_v8  ;;  %v17702_v46 = vld [vmem:[%s24299_s11 + $0xe0] ss:$16 sps:$4 sm:$0xff]  }
 0x306   :  { %v3564_v27 = vpop.f32.mrf.mxu1  ;;  %v17756_v53 = vld [vmem:[%s24300_s12 + $0xc0] ss:$16 sps:$4 sm:$0xff]  }
 0x307   :  { %v3708_v41 = vadd.f32 %v3702_v56, %v3568_v18  ;;  %v17710_v18 = vld [vmem:[%s24299_s11 + $0xc4] ss:$16 sps:$4 sm:$0xff]   ;;  %v17708_v27 = vld [vmem:[%s24299_s11 + $0xc0] ss:$16 sps:$4 sm:$0xff]  }
 0x308   :  { %v3565_v10 = vpop.f32.mrf.mxu1 }
 0x309   :  { %v17716_v10 = vld [vmem:[%s24299_s11 + $0xa4] ss:$16 sps:$4 sm:$0xff]  }
 0x31d   :  { %v3980_v25 = vpop.f32.mrf.mxu0 }
 0x31f   :  { %v3982_v28 = vpop.f32.mrf.mxu0 }
 0x321   :  { %v3984_v14 = vpop.f32.mrf.mxu0 }
 0x322   :  { %v3840_v15 = vpop.f32.mrf.mxu1  ;;  %v17717_v14 = vld [vmem:[%s24299_s11 + $0xa8] ss:$16 sps:$4 sm:$0xff]  }
 0x323   :  { %v3847_v34 = vadd.f32 %v3840_v15, %v3707_v60  ;;  %v3985_v32 = vpop.f32.mrf.mxu0  ;;  %v17713_v60 = vld [vmem:[%s24299_s11 + $0xcc] ss:$16 sps:$4 sm:$0xff]   ;;  %v17722_v15 = vld [vmem:[%s24299_s11 + $0x84] ss:$16 sps:$4 sm:$0xff]  }
 0x324   :  { %v3842_v39 = vpop.f32.mrf.mxu1  ;;  %v17723_v32 = vld [vmem:[%s24299_s11 + $0x88] ss:$16 sps:$4 sm:$0xff]  }
 0x325   :  { %v3987_v20 = vadd.f32 %v3980_v25, %v3847_v34  ;;  %v3848_v36 = vadd.f32 %v3842_v39, %v3708_v41  ;;  %v17711_v41 = vld [vmem:[%s24299_s11 + $0xc8] ss:$16 sps:$4 sm:$0xff]   ;;  %v17719_v25 = vld [vmem:[%s24299_s11 + $0xac] ss:$16 sps:$4 sm:$0xff]   ;;  %v17720_v34 = vld [vmem:[%s24299_s11 + $0x80] ss:$16 sps:$4 sm:$0xff]  }
 0x326   :  { %v3844_v55 = vpop.f32.mrf.mxu1  ;;  %v17728_v39 = vld [vmem:[%s24299_s11 + $0x64] ss:$16 sps:$4 sm:$0xff]  }
 0x327   :  { %v3988_v45 = vadd.f32 %v3982_v28, %v3848_v36  ;;  %v17714_v28 = vld [vmem:[%s24299_s11 + $0xa0] ss:$16 sps:$4 sm:$0xff]   ;;  %v17749_v36 = vld [vmem:[%s24299_s11 + $0xc] ss:$16 sps:$4 sm:$0xff]  }
 0x328   :  { %v3845_v13 = vpop.f32.mrf.mxu1  ;;  %v17726_v55 = vld [vmem:[%s24299_s11 + $0x60] ss:$16 sps:$4 sm:$0xff]  }
 0x329   :  { %v17729_v13 = vld [vmem:[%s24299_s11 + $0x68] ss:$16 sps:$4 sm:$0xff]  }
 0x33d   :  { %v4260_v26 = vpop.f32.mrf.mxu0 }
 0x33f   :  { %v4262_v33 = vpop.f32.mrf.mxu0 }
 0x341   :  { %v4264_v29 = vpop.f32.mrf.mxu0 }
 0x342   :  { %v4120_v24 = vpop.f32.mrf.mxu1  ;;  %v17732_v29 = vld [vmem:[%s24299_s11 + $0x40] ss:$16 sps:$4 sm:$0xff]  }
 0x343   :  { %v4265_v43 = vpop.f32.mrf.mxu0  ;;  %v4127_v47 = vadd.f32 %v4120_v24, %v3987_v20  ;;  %v17731_v20 = vld [vmem:[%s24299_s11 + $0x6c] ss:$16 sps:$4 sm:$0xff]   ;;  %v17735_v24 = vld [vmem:[%s24299_s11 + $0x48] ss:$16 sps:$4 sm:$0xff]  }
 0x344   :  { %v4122_v1 = vpop.f32.mrf.mxu1  ;;  %v17740_v43 = vld [vmem:[%s24299_s11 + $0x24] ss:$16 sps:$4 sm:$0xff]  }
 0x345   :  { %v4128_v61 = vadd.f32 %v4122_v1, %v3988_v45  ;;  %v4267_v44 = vadd.f32 %v4260_v26, %v4127_v47  ;;  %v17734_v26 = vld [vmem:[%s24299_s11 + $0x44] ss:$16 sps:$4 sm:$0xff]   ;;  %v17743_v1 = vld [vmem:[%s24299_s11 + $0x2c] ss:$16 sps:$4 sm:$0xff]   ;;  %v17744_v47 = vld [vmem:[%s24299_s11] ss:$16 sps:$4 sm:$0xff]  }
 0x346   :  { %v4124_v48 = vpop.f32.mrf.mxu1  ;;  %v17747_v45 = vld [vmem:[%s24299_s11 + $0x8] ss:$16 sps:$4 sm:$0xff]  }
 0x347   :  { %v4268_v30 = vadd.f32 %v4262_v33, %v4128_v61  ;;  %v17737_v33 = vld [vmem:[%s24299_s11 + $0x4c] ss:$16 sps:$4 sm:$0xff]   ;;  %v17738_v48 = vld [vmem:[%s24299_s11 + $0x20] ss:$16 sps:$4 sm:$0xff]   ;;  %v17755_v61 = vld [vmem:[%s24300_s12 + $0x2e4] ss:$16 sps:$4 sm:$0xff]  }
 0x348   :  { %v4125_v42 = vpop.f32.mrf.mxu1 }
 0x349   :  { %v17741_v42 = vld [vmem:[%s24299_s11 + $0x28] ss:$16 sps:$4 sm:$0xff]  }
 0x35d   :  { %v4540_v49 = vpop.f32.mrf.mxu0 }
 0x35f   :  { %v4542_v0 = vpop.f32.mrf.mxu0 }
 0x361   :  { %v4544_v40 = vpop.f32.mrf.mxu0 }
 0x362   :  { %v4400_v5 = vpop.f32.mrf.mxu1  ;;  %v17758_v40 = vld [vmem:[%s24300_s12 + $0xc4] ss:$16 sps:$4 sm:$0xff]  }
 0x363   :  { %v4407_v11 = vadd.f32 %v4400_v5, %v4267_v44  ;;  %v4545_v59 = vpop.f32.mrf.mxu0  ;;  %v17753_v44 = vld [vmem:[%s24300_s12 + $0x2e0] ss:$16 sps:$4 sm:$0xff]   ;;  %v17761_v5 = vld [vmem:[%s24300_s12 + $0x2c4] ss:$16 sps:$4 sm:$0xff]  }
 0x364   :  { %v4402_v6 = vpop.f32.mrf.mxu1  ;;  %v17762_v59 = vld [vmem:[%s24300_s12 + $0xa0] ss:$16 sps:$4 sm:$0xff]  }
 0x365   :  { %v4547_v21 = vadd.f32 %v4540_v49, %v4407_v11  ;;  %v4408_v12 = vadd.f32 %v4402_v6, %v4268_v30  ;;  %v17752_v49 = vld [vmem:[%s24300_s12 + $0xe4] ss:$16 sps:$4 sm:$0xff]   ;;  %v17759_v11 = vld [vmem:[%s24300_s12 + $0x2c0] ss:$16 sps:$4 sm:$0xff]  }
 0x366   :  { %v4404_v3 = vpop.f32.mrf.mxu1  ;;  %v17767_v30 = vld [vmem:[%s24300_s12 + $0x2a4] ss:$16 sps:$4 sm:$0xff]   ;;  %v17765_v6 = vld [vmem:[%s24300_s12 + $0x2a0] ss:$16 sps:$4 sm:$0xff]  }
 0x367   :  { %v4561_v2 = vmul.f32 %v4554_v57, %v4547_v21  ;;  %v4548_v16 = vadd.f32 %v4542_v0, %v4408_v12  ;;  %v5115_v0 = vld [vmem:[%s24303_s1] sm:$0xf]  ;;  %v17764_v57 = vld [vmem:[%s24300_s12 + $0xa4] ss:$16 sps:$4 sm:$0xff]  }
 0x368   :  { %v4405_v50 = vpop.f32.mrf.mxu1  ;;  %v17770_v21 = vld [vmem:[%s24300_s12 + $0x84] ss:$16 sps:$4 sm:$0xff]   ;;  %v17768_v12 = vld [vmem:[%s24300_s12 + $0x80] ss:$16 sps:$4 sm:$0xff]  }
 0x369   :  { %v4575_v35 = vadd.f32 %v4568_v22, %v4561_v2  ;;  %v4562_v58 = vmul.f32 %v4558_v63, %v4548_v16  ;;  %v17773_v22 = vld [vmem:[%s24300_s12 + $0x284] ss:$16 sps:$4 sm:$0xff]   ;;  %v17771_v63 = vld [vmem:[%s24300_s12 + $0x280] ss:$16 sps:$4 sm:$0xff]  }
 0x36a   :  { %v17776_v3 = vld [vmem:[%s24300_s12 + $0x64] ss:$16 sps:$4 sm:$0xff]   ;;  %v17774_v16 = vld [vmem:[%s24300_s12 + $0x60] ss:$16 sps:$4 sm:$0xff]  }
 0x36b   :  { %vm4577_vm0 = vcmp.ge.f32.partialorder %v4575_v35, 0.0  ;;  %v4579_v23 = vmul.f32 0.01, %v4575_v35  ;;  %v4576_v52 = vadd.f32 %v4572_v31, %v4562_v58  ;;  %v17779_v2 = vld [vmem:[%s24300_s12 + $0x264] ss:$16 sps:$4 sm:$0xff]  }
 0x36c   :  { %v17777_v31 = vld [vmem:[%s24300_s12 + $0x260] ss:$16 sps:$4 sm:$0xff]   ;;  %v17782_v50 = vld [vmem:[%s24300_s12 + $0x44] ss:$16 sps:$4 sm:$0xff]  }
 0x36d   :  { %vm4578_vm1 = vcmp.ge.f32.partialorder %v4576_v52, 0.0  ;;  %v4580_v19 = vmul.f32 0.01, %v4576_v52  ;;  %v4581_v56 = vsel %vm4577_vm0, %v4575_v35, %v4579_v23  ;;  %v17785_v35 = vld [vmem:[%s24300_s12 + $0x244] ss:$16 sps:$4 sm:$0xff]  }
 0x36e   :  { %v4647_v62 = vpack.c.bf16 %v4581_v56, %v4581_v56  ;;  %v17780_v58 = vld [vmem:[%s24300_s12 + $0x40] ss:$16 sps:$4 sm:$0xff]  }
 0x36f   :  { %v4582_v54 = vsel %vm4578_vm1, %v4576_v52, %v4580_v19  ;;  %v17783_v23 = vld [vmem:[%s24300_s12 + $0x240] ss:$16 sps:$4 sm:$0xff]   ;;  %v17788_v52 = vld [vmem:[%s24300_s12 + $0x24] ss:$16 sps:$4 sm:$0xff]  }
 0x370   :  { %v4648_v37 = vpack.c.bf16 %v4582_v54, %v4582_v54  ;;  %v17791_v19 = vld [vmem:[%s24300_s12 + $0x224] ss:$16 sps:$4 sm:$0xff]   ;;  %v17786_v56 = vld [vmem:[%s24300_s12 + $0x20] ss:$16 sps:$4 sm:$0xff]  }
 0x371   :  { %v17789_v54 = vld [vmem:[%s24300_s12 + $0x220] ss:$16 sps:$4 sm:$0xff]  }
 0x372   :  { %5001 = vmatprep.mubr.bf16.mxu1 %v4648_v37  ;;  %5042 = vmatprep.mubr.bf16.mxu0 %v4648_v37  ;;  %v17794_v37 = vld [vmem:[%s24300_s12 + $0x4] ss:$16 sps:$4 sm:$0xff]  }
 0x373   :  { %5002 = vmatmul.mubr.bf16.vlgmr.msra.gmra.mxu1 %v4647_v62  ;;  %5043 = vmatmul.mubr.bf16.vlgmr.msra.gmra.mxu0 %v4647_v62  ;;  %v17795_v62 = vld [vmem:[%s24300_s12 + $0x200] ss:$16 sps:$4 sm:$0xff]  }
 0x374   :  { %5309 = vmatpush1.bf16.msra.mxu1 %v17702_v46  ;;  %5350 = vmatpush1.bf16.msra.mxu0 %v17705_v7  ;;  %v17797_v46 = vld [vmem:[%s24300_s12 + $0x204] ss:$16 sps:$4 sm:$0xff]   ;;  %v17792_v7 = vld [vmem:[%s24300_s12] ss:$16 sps:$4 sm:$0xff]  }
 0x375   :  { %5310 = vmatprep.subr.bf16.mxu1 %v17710_v18  ;;  %5351 = vmatprep.subr.bf16.mxu0 %v17713_v60  ;;  %v17800_v18 = vld [vmem:[%s24300_s12 + $0x1e4] ss:$16 sps:$4 sm:$0xff]  }
 0x376   :  { %5340 = vmatprep.mubr.bf16.mxu1 %v18010_v9  ;;  %5381 = vmatprep.mubr.bf16.mxu0 %v18010_v9  ;;  %v17725_v9 = vld [vmem:[%s24299_s11 + $0x8c] ss:$16 sps:$4 sm:$0xff]   ;;  %v17803_v60 = vld [vmem:[%s24300_s12 + $0x3e4] ss:$16 sps:$4 sm:$0xff]  }
 0x378   :  { %5311 = vmatpush1.bf16.msra.mxu1 %v17708_v27  ;;  %5352 = vmatpush1.bf16.msra.mxu0 %v17711_v41  ;;  %v17798_v27 = vld [vmem:[%s24300_s12 + $0x1e0] ss:$16 sps:$4 sm:$0xff]  }
 0x379   :  { %5312 = vmatprep.subr.bf16.mxu1 %v17716_v10  ;;  %5353 = vmatprep.subr.bf16.mxu0 %v17719_v25  ;;  %v17801_v41 = vld [vmem:[%s24300_s12 + $0x3e0] ss:$16 sps:$4 sm:$0xff]   ;;  %v17806_v10 = vld [vmem:[%s24300_s12 + $0x1c4] ss:$16 sps:$4 sm:$0xff]  }
 0x37a   :  { %v17809_v25 = vld [vmem:[%s24300_s12 + $0x3c4] ss:$16 sps:$4 sm:$0xff]  }
 0x37c   :  { %5313 = vmatpush1.bf16.msra.mxu1 %v17714_v28  ;;  %5354 = vmatpush1.bf16.msra.mxu0 %v17717_v14  ;;  %v17804_v28 = vld [vmem:[%s24300_s12 + $0x1c0] ss:$16 sps:$4 sm:$0xff]  }
 0x37d   :  { %5314 = vmatprep.subr.bf16.mxu1 %v17722_v15  ;;  %5355 = vmatprep.subr.bf16.mxu0 %v17725_v9  ;;  %v17807_v14 = vld [vmem:[%s24300_s12 + $0x3c0] ss:$16 sps:$4 sm:$0xff]   ;;  %v17812_v15 = vld [vmem:[%s24300_s12 + $0x1a4] ss:$16 sps:$4 sm:$0xff]  }
 0x37e   :  { %v17815_v9 = vld [vmem:[%s24300_s12 + $0x3a4] ss:$16 sps:$4 sm:$0xff]  }
 0x380   :  { %5315 = vmatpush1.bf16.msra.mxu1 %v17720_v34  ;;  %5356 = vmatpush1.bf16.msra.mxu0 %v17723_v32  ;;  %v17810_v34 = vld [vmem:[%s24300_s12 + $0x1a0] ss:$16 sps:$4 sm:$0xff]  }
 0x381   :  { %5316 = vmatprep.subr.bf16.mxu1 %v17728_v39  ;;  %5357 = vmatprep.subr.bf16.mxu0 %v17731_v20  ;;  %v17813_v32 = vld [vmem:[%s24300_s12 + $0x3a0] ss:$16 sps:$4 sm:$0xff]   ;;  %v17818_v39 = vld [vmem:[%s24300_s12 + $0x184] ss:$16 sps:$4 sm:$0xff]  }
 0x382   :  { %v17821_v20 = vld [vmem:[%s24300_s12 + $0x384] ss:$16 sps:$4 sm:$0xff]  }
 0x384   :  { %5317 = vmatpush1.bf16.msra.mxu1 %v17726_v55  ;;  %5358 = vmatpush1.bf16.msra.mxu0 %v17729_v13  ;;  %v17816_v55 = vld [vmem:[%s24300_s12 + $0x180] ss:$16 sps:$4 sm:$0xff]  }
 0x385   :  { %5318 = vmatprep.subr.bf16.mxu1 %v17734_v26  ;;  %5359 = vmatprep.subr.bf16.mxu0 %v17737_v33  ;;  %v17819_v13 = vld [vmem:[%s24300_s12 + $0x380] ss:$16 sps:$4 sm:$0xff]   ;;  %v17824_v26 = vld [vmem:[%s24300_s12 + $0x164] ss:$16 sps:$4 sm:$0xff]  }
 0x386   :  { %v17827_v33 = vld [vmem:[%s24300_s12 + $0x364] ss:$16 sps:$4 sm:$0xff]  }
 0x388   :  { %5319 = vmatpush1.bf16.msra.mxu1 %v17732_v29  ;;  %5360 = vmatpush1.bf16.msra.mxu0 %v17735_v24  ;;  %v17822_v29 = vld [vmem:[%s24300_s12 + $0x160] ss:$16 sps:$4 sm:$0xff]  }
 0x389   :  { %5320 = vmatprep.subr.bf16.mxu1 %v17740_v43  ;;  %5361 = vmatprep.subr.bf16.mxu0 %v17743_v1  ;;  %v17825_v24 = vld [vmem:[%s24300_s12 + $0x360] ss:$16 sps:$4 sm:$0xff]   ;;  %v17830_v43 = vld [vmem:[%s24300_s12 + $0x144] ss:$16 sps:$4 sm:$0xff]  }
 0x38a   :  { %v17833_v1 = vld [vmem:[%s24300_s12 + $0x344] ss:$16 sps:$4 sm:$0xff]  }
 0x38c   :  { %5321 = vmatpush1.bf16.msra.mxu1 %v17738_v48  ;;  %5362 = vmatpush1.bf16.msra.mxu0 %v17741_v42  ;;  %v17828_v48 = vld [vmem:[%s24300_s12 + $0x140] ss:$16 sps:$4 sm:$0xff]  }
 0x38d   :  { %5322 = vmatprep.subr.bf16.mxu1 %v17746_v17  ;;  %5363 = vmatprep.subr.bf16.mxu0 %v17749_v36  ;;  %v17831_v42 = vld [vmem:[%s24300_s12 + $0x340] ss:$16 sps:$4 sm:$0xff]   ;;  %v17836_v17 = vld [vmem:[%s24300_s12 + $0x124] ss:$16 sps:$4 sm:$0xff]  }
 0x38e   :  { %v17839_v36 = vld [vmem:[%s24300_s12 + $0x324] ss:$16 sps:$4 sm:$0xff]  }
 0x390   :  { %5323 = vmatpush1.bf16.msra.mxu1 %v17744_v47  ;;  %5364 = vmatpush1.bf16.msra.mxu0 %v17747_v45  ;;  %v17834_v47 = vld [vmem:[%s24300_s12 + $0x120] ss:$16 sps:$4 sm:$0xff]  }
 0x391   :  { %6174 = vmatprep.subr.bf16.mxu1 %v17752_v49  ;;  %6215 = vmatprep.subr.bf16.mxu0 %v17755_v61  ;;  %v17837_v45 = vld [vmem:[%s24300_s12 + $0x320] ss:$16 sps:$4 sm:$0xff]   ;;  %v17842_v49 = vld [vmem:[%s24300_s12 + $0x104] ss:$16 sps:$4 sm:$0xff]  }
 0x392   :  { %v17845_v61 = vld [vmem:[%s24300_s12 + $0x304] ss:$16 sps:$4 sm:$0xff]  }
 0x393   :  { %5341 = vmatmul.mubr.bf16.vlgmr.msra.gmra.mxu1 %v5115_v0  ;;  %5382 = vmatmul.mubr.bf16.vlgmr.msra.gmra.mxu0 %v5115_v0  ;;  %v17840_v0 = vld [vmem:[%s24300_s12 + $0x100] ss:$16 sps:$4 sm:$0xff]  }
 0x394   :  { %6175 = vmatpush1.bf16.msra.mxu1 %v17750_v4  ;;  %6216 = vmatpush1.bf16.msra.mxu0 %v17753_v44  ;;  %v17843_v4 = vld [vmem:[%s24300_s12 + $0x300] ss:$16 sps:$4 sm:$0xff]   ;;  %v17848_v44 = vld [vmem:[%s24300_s12 + $0xec] ss:$16 sps:$4 sm:$0xff]  }
 0x395   :  { %6176 = vmatprep.subr.bf16.mxu1 %v17758_v40  ;;  %6217 = vmatprep.subr.bf16.mxu0 %v17761_v5  ;;  %v17851_v40 = vld [vmem:[%s24300_s12 + $0x2ec] ss:$16 sps:$4 sm:$0xff]   ;;  %v20405_v5 = vsub.s32 2, %v20093_v38 }
 0x398   :  { %6177 = vmatpush1.bf16.msra.mxu1 %v17756_v53  ;;  %6218 = vmatpush1.bf16.msra.mxu0 %v17759_v11  ;;  %v5051_v53 = vld [vmem:[%s24304_s9] sm:$0xf] }
 0x399   :  { %6178 = vmatprep.subr.bf16.mxu1 %v17764_v57  ;;  %6219 = vmatprep.subr.bf16.mxu0 %v17767_v30  ;;  %v5077_v11 = vld [vmem:[%s24305_s10] sm:$0xf]  ;;  %v5064_v57 = vrot.slane %v5051_v53, %v20405_v5  ;;  %v17890_v53 = vld [vmem:[%s24300_s12 + $0xc] ss:$16 sps:$4 sm:$0xff]  }
 0x39a   :  { %v5090_v30 = vrot.slane %v5077_v11, %v20405_v5  ;;  %v17893_v11 = vld [vmem:[%s24300_s12 + $0x20c] ss:$16 sps:$4 sm:$0xff]  }
 0x39c   :  { %6179 = vmatpush1.bf16.msra.mxu1 %v17762_v59  ;;  %6220 = vmatpush1.bf16.msra.mxu0 %v17765_v6 }
 0x39d   :  { %6180 = vmatprep.subr.bf16.mxu1 %v17770_v21  ;;  %6221 = vmatprep.subr.bf16.mxu0 %v17773_v22 }
 0x3a0   :  { %6181 = vmatpush1.bf16.msra.mxu1 %v17768_v12  ;;  %6222 = vmatpush1.bf16.msra.mxu0 %v17771_v63 }
 0x3a1   :  { %6182 = vmatprep.subr.bf16.mxu1 %v17776_v3  ;;  %6223 = vmatprep.subr.bf16.mxu0 %v17779_v2 }
 0x3a4   :  { %6183 = vmatpush1.bf16.msra.mxu1 %v17774_v16  ;;  %6224 = vmatpush1.bf16.msra.mxu0 %v17777_v31 }
 0x3a5   :  { %6184 = vmatprep.subr.bf16.mxu1 %v17782_v50  ;;  %6225 = vmatprep.subr.bf16.mxu0 %v17785_v35 }
 0x3a8   :  { %6185 = vmatpush1.bf16.msra.mxu1 %v17780_v58  ;;  %6226 = vmatpush1.bf16.msra.mxu0 %v17783_v23 }
 0x3a9   :  { %6186 = vmatprep.subr.bf16.mxu1 %v17788_v52  ;;  %6227 = vmatprep.subr.bf16.mxu0 %v17791_v19 }
 0x3ac   :  { %6187 = vmatpush1.bf16.msra.mxu1 %v17786_v56  ;;  %6228 = vmatpush1.bf16.msra.mxu0 %v17789_v54 }
 0x3ad   :  { %6188 = vmatprep.subr.bf16.mxu1 %v17794_v37  ;;  %6229 = vmatprep.subr.bf16.mxu0 %v17797_v46 }
 0x3b0   :  { %6189 = vmatpush1.bf16.msra.mxu1 %v17792_v7  ;;  %6230 = vmatpush1.bf16.msra.mxu0 %v17795_v62 }
 0x3b1   :  { %6190 = vmatprep.subr.bf16.mxu1 %v17800_v18  ;;  %6231 = vmatprep.subr.bf16.mxu0 %v17803_v60 }
 0x3b4   :  { %6191 = vmatpush2.bf16.msra.mxu1 %v17798_v27  ;;  %6232 = vmatpush2.bf16.msra.mxu0 %v17801_v41 }
 0x3b5   :  { %6192 = vmatprep.subr.bf16.mxu1 %v17806_v10  ;;  %6233 = vmatprep.subr.bf16.mxu0 %v17809_v25  ;;  %v17846_v25 = vld [vmem:[%s24300_s12 + $0xe8] ss:$16 sps:$4 sm:$0xff]  }
 0x3b8   :  { %6193 = vmatpush2.bf16.msra.mxu1 %v17804_v28  ;;  %6234 = vmatpush2.bf16.msra.mxu0 %v17807_v14 }
 0x3b9   :  { %6194 = vmatprep.subr.bf16.mxu1 %v17812_v15  ;;  %6235 = vmatprep.subr.bf16.mxu0 %v17815_v9  ;;  %v17849_v15 = vld [vmem:[%s24300_s12 + $0x2e8] ss:$16 sps:$4 sm:$0xff]  }
 0x3bc   :  { %6195 = vmatpush2.bf16.msra.mxu1 %v17810_v34  ;;  %6236 = vmatpush2.bf16.msra.mxu0 %v17813_v32  ;;  %v17854_v34 = vld [vmem:[%s24300_s12 + $0xcc] ss:$16 sps:$4 sm:$0xff]  }
 0x3bd   :  { %6196 = vmatprep.subr.bf16.mxu1 %v17818_v39  ;;  %6237 = vmatprep.subr.bf16.mxu0 %v17821_v20  ;;  %v17857_v32 = vld [vmem:[%s24300_s12 + $0x2cc] ss:$16 sps:$4 sm:$0xff]   ;;  %v17852_v39 = vld [vmem:[%s24300_s12 + $0xc8] ss:$16 sps:$4 sm:$0xff]  }
 0x3be   :  { %v17855_v20 = vld [vmem:[%s24300_s12 + $0x2c8] ss:$16 sps:$4 sm:$0xff]  }
 0x3c0   :  { %6197 = vmatpush2.bf16.msra.mxu1 %v17816_v55  ;;  %6238 = vmatpush2.bf16.msra.mxu0 %v17819_v13  ;;  %v17860_v55 = vld [vmem:[%s24300_s12 + $0xac] ss:$16 sps:$4 sm:$0xff]  }
 0x3c1   :  { %6198 = vmatprep.subr.bf16.mxu1 %v17824_v26  ;;  %6239 = vmatprep.subr.bf16.mxu0 %v17827_v33  ;;  %v17863_v13 = vld [vmem:[%s24300_s12 + $0x2ac] ss:$16 sps:$4 sm:$0xff]   ;;  %v17858_v26 = vld [vmem:[%s24300_s12 + $0xa8] ss:$16 sps:$4 sm:$0xff]  }
 0x3c2   :  { %v17861_v33 = vld [vmem:[%s24300_s12 + $0x2a8] ss:$16 sps:$4 sm:$0xff]  }
 0x3c4   :  { %6199 = vmatpush2.bf16.msra.mxu1 %v17822_v29  ;;  %6240 = vmatpush2.bf16.msra.mxu0 %v17825_v24  ;;  %v17866_v29 = vld [vmem:[%s24300_s12 + $0x8c] ss:$16 sps:$4 sm:$0xff]  }
 0x3c5   :  { %6200 = vmatprep.subr.bf16.mxu1 %v17830_v43  ;;  %6241 = vmatprep.subr.bf16.mxu0 %v17833_v1  ;;  %v17869_v24 = vld [vmem:[%s24300_s12 + $0x28c] ss:$16 sps:$4 sm:$0xff]   ;;  %v17864_v43 = vld [vmem:[%s24300_s12 + $0x88] ss:$16 sps:$4 sm:$0xff]  }
 0x3c6   :  { %v17867_v1 = vld [vmem:[%s24300_s12 + $0x288] ss:$16 sps:$4 sm:$0xff]  }
 0x3c8   :  { %6201 = vmatpush2.bf16.msra.mxu1 %v17828_v48  ;;  %6242 = vmatpush2.bf16.msra.mxu0 %v17831_v42  ;;  %v17872_v48 = vld [vmem:[%s24300_s12 + $0x6c] ss:$16 sps:$4 sm:$0xff]  }
 0x3c9   :  { %6202 = vmatprep.subr.bf16.mxu1 %v17836_v17  ;;  %6243 = vmatprep.subr.bf16.mxu0 %v17839_v36  ;;  %v17875_v42 = vld [vmem:[%s24300_s12 + $0x26c] ss:$16 sps:$4 sm:$0xff]   ;;  %v17870_v17 = vld [vmem:[%s24300_s12 + $0x68] ss:$16 sps:$4 sm:$0xff]  }
 0x3ca   :  { %v17873_v36 = vld [vmem:[%s24300_s12 + $0x268] ss:$16 sps:$4 sm:$0xff]  }
 0x3cc   :  { %6203 = vmatpush2.bf16.msra.mxu1 %v17834_v47  ;;  %6244 = vmatpush2.bf16.msra.mxu0 %v17837_v45  ;;  %v17878_v47 = vld [vmem:[%s24300_s12 + $0x4c] ss:$16 sps:$4 sm:$0xff]  }
 0x3cd   :  { %6204 = vmatprep.subr.bf16.mxu1 %v17842_v49  ;;  %6245 = vmatprep.subr.bf16.mxu0 %v17845_v61  ;;  %v17881_v45 = vld [vmem:[%s24300_s12 + $0x24c] ss:$16 sps:$4 sm:$0xff]   ;;  %v17876_v49 = vld [vmem:[%s24300_s12 + $0x48] ss:$16 sps:$4 sm:$0xff]  }
 0x3ce   :  { %v17879_v61 = vld [vmem:[%s24300_s12 + $0x248] ss:$16 sps:$4 sm:$0xff]  }
 0x3d0   :  { %6205 = vmatpush2.bf16.msra.mxu1 %v17840_v0  ;;  %6246 = vmatpush2.bf16.msra.mxu0 %v17843_v4  ;;  %v17884_v0 = vld [vmem:[%s24300_s12 + $0x2c] ss:$16 sps:$4 sm:$0xff]  }
 0x3d1   :  { %6256 = vmatprep.subr.bf16.mxu1 %v17848_v44  ;;  %6297 = vmatprep.subr.bf16.mxu0 %v17851_v40  ;;  %v17887_v4 = vld [vmem:[%s24300_s12 + $0x22c] ss:$16 sps:$4 sm:$0xff]   ;;  %v17882_v44 = vld [vmem:[%s24300_s12 + $0x28] ss:$16 sps:$4 sm:$0xff]  }
 0x3d2   :  { %v17885_v40 = vld [vmem:[%s24300_s12 + $0x228] ss:$16 sps:$4 sm:$0xff]  }
 0x433   :  { %v20415_v59 = vpop.f32.mrf.mxu1  ;;  %v5044_v6 = vpop.f32.mrf.mxu0 }
 0x434   :  { %v5075_v21 = vmul.f32 %v5064_v57, %v5044_v6  ;;  %v17888_v57 = vld [vmem:[%s24300_s12 + $0x8] ss:$16 sps:$4 sm:$0xff]   ;;  %v17896_v6 = vld [vmem:[%s24300_s12 + $0x1ec] ss:$16 sps:$4 sm:$0xff]  }
 0x435   :  { %v20417_v22 = vpop.f32.mrf.mxu1  ;;  %v20419_v12 = vpop.f32.mrf.mxu0 }
 0x436   :  { %v20421_v63 = vadd.f32 %v5090_v30, %v5075_v21  ;;  %v17891_v30 = vld [vmem:[%s24300_s12 + $0x208] ss:$16 sps:$4 sm:$0xff]   ;;  %v17899_v21 = vld [vmem:[%s24300_s12 + $0x3ec] ss:$16 sps:$4 sm:$0xff]  }
 0x437   :  { %v5007_v3 = vpop.f32.mrf.mxu1  ;;  %v5048_v2 = vpop.f32.mrf.mxu0 }
 0x438   :  { %v17894_v3 = vld [vmem:[%s24300_s12 + $0x1e8] ss:$16 sps:$4 sm:$0xff]   ;;  %vm5105_vm13 = vcmp.ge.f32.partialorder %v20421_v63, 0.0 }
 0x439   :  { %v5008_v16 = vpop.f32.mrf.mxu1  ;;  %v5049_v31 = vpop.f32.mrf.mxu0  ;;  %v17897_v2 = vld [vmem:[%s24300_s12 + $0x3e8] ss:$16 sps:$4 sm:$0xff]  }
 0x43a   :  { %v17902_v16 = vld [vmem:[%s24300_s12 + $0x1cc] ss:$16 sps:$4 sm:$0xff]  }
 0x43b   :  { %v17905_v31 = vld [vmem:[%s24300_s12 + $0x3cc] ss:$16 sps:$4 sm:$0xff]  }
 0x453   :  { %v5342_v50 = vpop.f32.mrf.mxu1  ;;  %v5383_v35 = vpop.f32.mrf.mxu0 }
 0x454   :  { %vm5390_vm2 = vcmp.ge.f32.partialorder %v5342_v50, 0.0  ;;  %v5394_v58 = vmul.f32 0.01, %v5342_v50  ;;  %v5396_v23 = vmul.f32 0.01, %v5383_v35  ;;  %vm5392_vm3 = vcmp.ge.f32.partialorder %v5383_v35, 0.0 }
 0x455   :  { %v5344_v52 = vpop.f32.mrf.mxu1  ;;  %v5385_v19 = vpop.f32.mrf.mxu0 }
 0x456   :  { %vm5391_vm4 = vcmp.ge.f32.partialorder %v5344_v52, 0.0  ;;  %v5395_v56 = vmul.f32 0.01, %v5344_v52  ;;  %v5398_v54 = vsel %vm5390_vm2, %v5342_v50, %v5394_v58  ;;  %vm5393_vm5 = vcmp.ge.f32.partialorder %v5385_v19, 0.0  ;;  %v17900_v50 = vld [vmem:[%s24300_s12 + $0x1c8] ss:$16 sps:$4 sm:$0xff]  }
 0x457   :  { %v5397_v37 = vmul.f32 0.01, %v5385_v19  ;;  %v5346_v46 = vpop.f32.mrf.mxu1  ;;  %v5387_v7 = vpop.f32.mrf.mxu0  ;;  %v5400_v62 = vsel %vm5392_vm3, %v5383_v35, %v5396_v23  ;;  %v20426_v28 = vpack.c.bf16 %v5398_v54, %v5398_v54  ;;  %v17903_v35 = vld [vmem:[%s24300_s12 + $0x3c8] ss:$16 sps:$4 sm:$0xff]   ;;  %v17908_v58 = vld [vmem:[%s24300_s12 + $0x1ac] ss:$16 sps:$4 sm:$0xff]  }
 0x458   :  { %v5399_v18 = vsel %vm5391_vm4, %v5344_v52, %v5395_v56  ;;  %v20431_v9 = vpack.c.bf16 %v5400_v62, %v5400_v62  ;;  %v17911_v23 = vld [vmem:[%s24300_s12 + $0x3ac] ss:$16 sps:$4 sm:$0xff]   ;;  %v17906_v52 = vld [vmem:[%s24300_s12 + $0x1a8] ss:$16 sps:$4 sm:$0xff]  }
 0x459   :  { %v5531_v60 = vpack.c.bf16 %v5399_v18, %v5399_v18  ;;  %v5401_v27 = vsel %vm5393_vm5, %v5385_v19, %v5397_v37  ;;  %v5347_v41 = vpop.f32.mrf.mxu1  ;;  %v5388_v10 = vpop.f32.mrf.mxu0  ;;  %v17909_v19 = vld [vmem:[%s24300_s12 + $0x3a8] ss:$16 sps:$4 sm:$0xff]   ;;  %v17914_v56 = vld [vmem:[%s24300_s12 + $0x18c] ss:$16 sps:$4 sm:$0xff]  }
 0x45a   :  { %v5533_v14 = vpack.c.bf16 %v5401_v27, %v5401_v27  ;;  %v17917_v54 = vld [vmem:[%s24300_s12 + $0x38c] ss:$16 sps:$4 sm:$0xff]   ;;  %v17912_v37 = vld [vmem:[%s24300_s12 + $0x188] ss:$16 sps:$4 sm:$0xff]  }
 0x45b   :  { %6206 = vmatprep.mubr.bf16.mxu1 %v5531_v60  ;;  %v17915_v46 = vld [vmem:[%s24300_s12 + $0x388] ss:$16 sps:$4 sm:$0xff]   ;;  %v17920_v7 = vld [vmem:[%s24300_s12 + $0x16c] ss:$16 sps:$4 sm:$0xff]  }
 0x45c   :  { %6247 = vmatprep.mubr.bf16.mxu0 %v5533_v14  ;;  %6207 = vmatmul.mubr.bf16.vlgmr.msra.gmra.mxu1 %v20426_v28  ;;  %v17923_v62 = vld [vmem:[%s24300_s12 + $0x36c] ss:$16 sps:$4 sm:$0xff]   ;;  %v17918_v18 = vld [vmem:[%s24300_s12 + $0x168] ss:$16 sps:$4 sm:$0xff]  }
 0x45d   :  { %6248 = vmatmul.mubr.bf16.vlgmr.msra.gmra.mxu0 %v20431_v9  ;;  %6257 = vmatpush1.bf16.msra.mxu1 %v17846_v25  ;;  %v17926_v27 = vld [vmem:[%s24300_s12 + $0x14c] ss:$16 sps:$4 sm:$0xff]   ;;  %v17924_v10 = vld [vmem:[%s24300_s12 + $0x148] ss:$16 sps:$4 sm:$0xff]  }
 0x45e   :  { %6298 = vmatpush1.bf16.msra.mxu0 %v17849_v15  ;;  %6288 = vmatprep.mubr.bf16.mxu1 %v5531_v60  ;;  %v17921_v60 = vld [vmem:[%s24300_s12 + $0x368] ss:$16 sps:$4 sm:$0xff]   ;;  %v17929_v41 = vld [vmem:[%s24300_s12 + $0x34c] ss:$16 sps:$4 sm:$0xff]  }
 0x45f   :  { %6329 = vmatprep.mubr.bf16.mxu0 %v5533_v14  ;;  %6258 = vmatprep.subr.bf16.mxu1 %v17854_v34  ;;  %v17927_v25 = vld [vmem:[%s24300_s12 + $0x348] ss:$16 sps:$4 sm:$0xff]   ;;  %v17932_v14 = vld [vmem:[%s24300_s12 + $0x12c] ss:$16 sps:$4 sm:$0xff]  }
 0x460   :  { %6299 = vmatprep.subr.bf16.mxu0 %v17857_v32  ;;  %v17935_v15 = vld [vmem:[%s24300_s12 + $0x32c] ss:$16 sps:$4 sm:$0xff]   ;;  %v17930_v34 = vld [vmem:[%s24300_s12 + $0x128] ss:$16 sps:$4 sm:$0xff]  }
 0x461   :  { %6259 = vmatpush1.bf16.msra.mxu1 %v17852_v39  ;;  %v17933_v32 = vld [vmem:[%s24300_s12 + $0x328] ss:$16 sps:$4 sm:$0xff]   ;;  %v17938_v39 = vld [vmem:[%s24300_s12 + $0x10c] ss:$16 sps:$4 sm:$0xff]  }
 0x462   :  { %6300 = vmatpush1.bf16.msra.mxu0 %v17855_v20  ;;  %6260 = vmatprep.subr.bf16.mxu1 %v17860_v55  ;;  %v17941_v20 = vld [vmem:[%s24300_s12 + $0x30c] ss:$16 sps:$4 sm:$0xff]   ;;  %v6666_v55 = vld [vmem:[%s24306_s14 + $0x1c0] sm:$0xff] }
 0x463   :  { %6301 = vmatprep.subr.bf16.mxu0 %v17863_v13  ;;  %v6670_v13 = vld [vmem:[%s24306_s14 + $0x1e0] sm:$0xff] }
 0x465   :  { %6261 = vmatpush1.bf16.msra.mxu1 %v17858_v26  ;;  %v17936_v26 = vld [vmem:[%s24300_s12 + $0x108] ss:$16 sps:$4 sm:$0xff]  }
 0x466   :  { %6302 = vmatpush1.bf16.msra.mxu0 %v17861_v33  ;;  %6262 = vmatprep.subr.bf16.mxu1 %v17866_v29  ;;  %v17939_v33 = vld [vmem:[%s24300_s12 + $0x308] ss:$16 sps:$4 sm:$0xff]   ;;  %v15413_v29 = vcombine.high %v6666_v55, %v6670_v13 }
 0x467   :  { %6303 = vmatprep.subr.bf16.mxu0 %v17869_v24  ;;  %v6658_v24 = vld [vmem:[%s24306_s14 + $0x180] sm:$0xff] }
 0x469   :  { %6263 = vmatpush1.bf16.msra.mxu1 %v17864_v43  ;;  %v6662_v43 = vld [vmem:[%s24306_s14 + $0x1a0] sm:$0xff] }
 0x46a   :  { %6304 = vmatpush1.bf16.msra.mxu0 %v17867_v1  ;;  %6264 = vmatprep.subr.bf16.mxu1 %v17872_v48  ;;  %v15412_v1 = vcombine.low %v6666_v55, %v6670_v13  ;;  %v15405_v48 = vcombine.high %v6658_v24, %v6662_v43 }
 0x46b   :  { %6305 = vmatprep.subr.bf16.mxu0 %v17875_v42  ;;  %v6650_v42 = vld [vmem:[%s24306_s14 + $0x140] sm:$0xff] }
 0x46d   :  { %6265 = vmatpush1.bf16.msra.mxu1 %v17870_v17  ;;  %v6654_v17 = vld [vmem:[%s24306_s14 + $0x160] sm:$0xff] }
 0x46e   :  { %6306 = vmatpush1.bf16.msra.mxu0 %v17873_v36  ;;  %6266 = vmatprep.subr.bf16.mxu1 %v17878_v47  ;;  %v15404_v36 = vcombine.low %v6658_v24, %v6662_v43  ;;  %v15397_v47 = vcombine.high %v6650_v42, %v6654_v17  ;;  %v6726_v24 = vld [vmem:[%s24306_s14 + $0x3a0] sm:$0xff] }
 0x46f   :  { %6307 = vmatprep.subr.bf16.mxu0 %v17881_v45  ;;  %v6642_v45 = vld [vmem:[%s24306_s14 + $0x100] sm:$0xff] }
 0x470   :  { %v6754_v43 = vld [vmem:[%s24306_s14 + $0x480] sm:$0xff] }
 0x471   :  { %6267 = vmatpush1.bf16.msra.mxu1 %v17876_v49  ;;  %v6646_v49 = vld [vmem:[%s24306_s14 + $0x120] sm:$0xff] }
 0x472   :  { %6308 = vmatpush1.bf16.msra.mxu0 %v17879_v61  ;;  %6268 = vmatprep.subr.bf16.mxu1 %v17884_v0  ;;  %v15396_v61 = vcombine.low %v6650_v42, %v6654_v17  ;;  %v15389_v0 = vcombine.high %v6642_v45, %v6646_v49 }
 0x473   :  { %6309 = vmatprep.subr.bf16.mxu0 %v17887_v4  ;;  %v6794_v4 = vld [vmem:[%s24306_s14 + $0x5c0] sm:$0xff] }
 0x475   :  { %6269 = vmatpush1.bf16.msra.mxu1 %v17882_v44  ;;  %v6798_v44 = vld [vmem:[%s24306_s14 + $0x5e0] sm:$0xff] }
 0x476   :  { %6310 = vmatpush1.bf16.msra.mxu0 %v17885_v40  ;;  %6270 = vmatprep.subr.bf16.mxu1 %v17890_v53  ;;  %v15388_v40 = vcombine.low %v6642_v45, %v6646_v49  ;;  %v15540_v53 = vcombine.low %v6794_v4, %v6798_v44  ;;  %v6718_v45 = vld [vmem:[%s24306_s14 + $0x360] sm:$0xff] }
 0x477   :  { %6311 = vmatprep.subr.bf16.mxu0 %v17893_v11  ;;  %v15541_v11 = vcombine.high %v6794_v4, %v6798_v44  ;;  %v6746_v49 = vld [vmem:[%s24306_s14 + $0x440] sm:$0xff] }
 0x478   :  { %v6706_v44 = vld [vmem:[%s24306_s14 + $0x300] sm:$0xff] }
 0x479   :  { %6271 = vmatpush1.bf16.msra.mxu1 %v17888_v57  ;;  %v20656_v57 = vld [vmem:[%s24306_s14 + $0x1c8] sm:$0xff] }
 0x47a   :  { %6312 = vmatpush1.bf16.msra.mxu0 %v17891_v30  ;;  %6272 = vmatprep.subr.bf16.mxu1 %v17896_v6  ;;  %v20661_v30 = vld [vmem:[%s24306_s14 + $0x1e8] sm:$0xff] }
 0x47b   :  { %6313 = vmatprep.subr.bf16.mxu0 %v17899_v21  ;;  %v6626_v21 = vld [vmem:[%s24306_s14 + $0x80] sm:$0xff] }
 0x47d   :  { %6273 = vmatpush2.bf16.msra.mxu1 %v17894_v3  ;;  %v6630_v3 = vld [vmem:[%s24306_s14 + $0xa0] sm:$0xff] }
 0x47e   :  { %6314 = vmatpush2.bf16.msra.mxu0 %v17897_v2  ;;  %6274 = vmatprep.subr.bf16.mxu1 %v17902_v16  ;;  %v15414_v2 = vcombine.low %v20656_v57, %v20661_v30  ;;  %v6786_v16 = vld [vmem:[%s24306_s14 + $0x580] sm:$0xff] }
 0x47f   :  { %6315 = vmatprep.subr.bf16.mxu0 %v17905_v31  ;;  %v6790_v31 = vld [vmem:[%s24306_s14 + $0x5a0] sm:$0xff] }
 0x481   :  { %6275 = vmatpush2.bf16.msra.mxu1 %v17900_v50 }
 0x482   :  { %6316 = vmatpush2.bf16.msra.mxu0 %v17903_v35  ;;  %6276 = vmatprep.subr.bf16.mxu1 %v17908_v58  ;;  %v15532_v35 = vcombine.low %v6786_v16, %v6790_v31  ;;  %v15533_v58 = vcombine.high %v6786_v16, %v6790_v31  ;;  %v6698_v31 = vld [vmem:[%s24306_s14 + $0x2c0] sm:$0xff] }
 0x483   :  { %6317 = vmatprep.subr.bf16.mxu0 %v17911_v23  ;;  %v15373_v23 = vcombine.high %v6626_v21, %v6630_v3 }
 0x485   :  { %6277 = vmatpush2.bf16.msra.mxu1 %v17906_v52  ;;  %v6618_v52 = vld [vmem:[%s24306_s14 + $0x40] sm:$0xff] }
 0x486   :  { %6318 = vmatpush2.bf16.msra.mxu0 %v17909_v19  ;;  %6278 = vmatprep.subr.bf16.mxu1 %v17914_v56  ;;  %v6622_v19 = vld [vmem:[%s24306_s14 + $0x60] sm:$0xff] }
 0x487   :  { %6319 = vmatprep.subr.bf16.mxu0 %v17917_v54  ;;  %v6778_v56 = vld [vmem:[%s24306_s14 + $0x540] sm:$0xff] }
 0x488   :  { %v6782_v54 = vld [vmem:[%s24306_s14 + $0x560] sm:$0xff] }
 0x489   :  { %6279 = vmatpush2.bf16.msra.mxu1 %v17912_v37  ;;  %v15372_v37 = vcombine.low %v6626_v21, %v6630_v3 }
 0x48a   :  { %6320 = vmatpush2.bf16.msra.mxu0 %v17915_v46  ;;  %6280 = vmatprep.subr.bf16.mxu1 %v17920_v7  ;;  %v15524_v46 = vcombine.low %v6778_v56, %v6782_v54  ;;  %v15525_v7 = vcombine.high %v6778_v56, %v6782_v54  ;;  %v6690_v54 = vld [vmem:[%s24306_s14 + $0x280] sm:$0xff] }
 0x48b   :  { %6321 = vmatprep.subr.bf16.mxu0 %v17923_v62  ;;  %v15365_v62 = vcombine.high %v6618_v52, %v6622_v19 }
 0x48d   :  { %6281 = vmatpush2.bf16.msra.mxu1 %v17918_v18  ;;  %v6610_v18 = vld [vmem:[%s24306_s14] sm:$0xff] }
 0x48e   :  { %6322 = vmatpush2.bf16.msra.mxu0 %v17921_v60  ;;  %6282 = vmatprep.subr.bf16.mxu1 %v17926_v27  ;;  %v6614_v60 = vld [vmem:[%s24306_s14 + $0x20] sm:$0xff] }
 0x48f   :  { %6323 = vmatprep.subr.bf16.mxu0 %v17929_v41  ;;  %v6770_v27 = vld [vmem:[%s24306_s14 + $0x500] sm:$0xff]  ;;  %v15356_v55 = vcombine.low %v6610_v18, %v6614_v60 }
 0x490   :  { %v6774_v41 = vld [vmem:[%s24306_s14 + $0x520] sm:$0xff] }
 0x491   :  { %6283 = vmatpush2.bf16.msra.mxu1 %v17924_v10  ;;  %v15364_v10 = vcombine.low %v6618_v52, %v6622_v19 }
 0x492   :  { %6324 = vmatpush2.bf16.msra.mxu0 %v17927_v25  ;;  %6284 = vmatprep.subr.bf16.mxu1 %v17932_v14  ;;  %v15516_v25 = vcombine.low %v6770_v27, %v6774_v41  ;;  %v15517_v14 = vcombine.high %v6770_v27, %v6774_v41  ;;  %v6682_v41 = vld [vmem:[%s24306_s14 + $0x240] sm:$0xff] }
 0x493   :  { %6325 = vmatprep.subr.bf16.mxu0 %v17935_v15  ;;  %v15357_v15 = vcombine.high %v6610_v18, %v6614_v60 }
 0x495   :  { %6285 = vmatpush2.bf16.msra.mxu1 %v17930_v34  ;;  %v6730_v34 = vld [vmem:[%s24306_s14 + $0x3c0] sm:$0xff] }
 0x496   :  { %6326 = vmatpush2.bf16.msra.mxu0 %v17933_v32  ;;  %6286 = vmatprep.subr.bf16.mxu1 %v17938_v39  ;;  %v6734_v32 = vld [vmem:[%s24306_s14 + $0x3e0] sm:$0xff] }
 0x497   :  { %6327 = vmatprep.subr.bf16.mxu0 %v17941_v20  ;;  %v6762_v39 = vld [vmem:[%s24306_s14 + $0x4c0] sm:$0xff] }
 0x498   :  { %v6766_v20 = vld [vmem:[%s24306_s14 + $0x4e0] sm:$0xff] }
 0x499   :  { %6287 = vmatpush2.bf16.msra.mxu1 %v17936_v26  ;;  %v15508_v13 = vcombine.low %v6762_v39, %v6766_v20  ;;  %v15509_v26 = vcombine.high %v6762_v39, %v6766_v20  ;;  %v6674_v20 = vld [vmem:[%s24306_s14 + $0x200] sm:$0xff] }
 0x49a   :  { %6328 = vmatpush2.bf16.msra.mxu0 %v17939_v33  ;;  %8150 = vmatprep.subr.bf16.mxu1 %v15413_v29  ;;  %v15477_v33 = vcombine.high %v6730_v34, %v6734_v32  ;;  %v6722_v29 = vld [vmem:[%s24306_s14 + $0x380] sm:$0xff] }
 0x49b   :  { %8191 = vmatprep.subr.bf16.mxu0 %v15541_v11  ;;  %v6742_v11 = vld [vmem:[%s24306_s14 + $0x420] sm:$0xff] }
 0x49c   :  { %6289 = vmatmul.mubr.bf16.vlgmr.msra.gmra.mxu1 %v20426_v28  ;;  %v6634_v28 = vld [vmem:[%s24306_s14 + $0xc0] sm:$0xff] }
 0x49d   :  { %6330 = vmatmul.mubr.bf16.vlgmr.msra.gmra.mxu0 %v20431_v9  ;;  %8151 = vmatpush1.bf16.msra.mxu1 %v15412_v1  ;;  %v6638_v9 = vld [vmem:[%s24306_s14 + $0xe0] sm:$0xff] }
 0x49e   :  { %8152 = vmatprep.subr.bf16.mxu1 %v15405_v48  ;;  %v15381_v6 = vcombine.high %v6634_v28, %v6638_v9  ;;  %8192 = vmatpush1.bf16.msra.mxu0 %v15540_v53  ;;  %v15380_v50 = vcombine.low %v6634_v28, %v6638_v9  ;;  %v6758_v1 = vld [vmem:[%s24306_s14 + $0x4a0] sm:$0xff]  ;;  %v15476_v48 = vcombine.low %v6730_v34, %v6734_v32 }
 0x49f   :  { %8193 = vmatprep.subr.bf16.mxu0 %v15533_v58  ;;  %v15500_v42 = vcombine.low %v6754_v43, %v6758_v1  ;;  %v15501_v17 = vcombine.high %v6754_v43, %v6758_v1  ;;  %v6738_v53 = vld [vmem:[%s24306_s14 + $0x400] sm:$0xff] }
 0x4a0   :  { %v15484_v21 = vcombine.low %v6738_v53, %v6742_v11  ;;  %v15485_v3 = vcombine.high %v6738_v53, %v6742_v11  ;;  %v6862_v58 = vld [vmem:[%s24306_s14 + $0x7e0] sm:$0xff] }
 0x4a1   :  { %8153 = vmatpush1.bf16.msra.mxu1 %v15404_v36  ;;  %v15469_v36 = vcombine.high %v6722_v29, %v6726_v24  ;;  %v6826_v1 = vld [vmem:[%s24306_s14 + $0x6c0] sm:$0xff] }
 0x4a2   :  { %8154 = vmatprep.subr.bf16.mxu1 %v15397_v47  ;;  %8194 = vmatpush1.bf16.msra.mxu0 %v15532_v35  ;;  %v6714_v47 = vld [vmem:[%s24306_s14 + $0x340] sm:$0xff] }
 0x4a3   :  { %8195 = vmatprep.subr.bf16.mxu0 %v15525_v7  ;;  %v15461_v4 = vcombine.high %v6714_v47, %v6718_v45  ;;  %v6858_v35 = vld [vmem:[%s24306_s14 + $0x7c0] sm:$0xff] }
 0x4a4   :  { %v15604_v52 = vcombine.low %v6858_v35, %v6862_v58  ;;  %v15605_v19 = vcombine.high %v6858_v35, %v6862_v58  ;;  %v6854_v7 = vld [vmem:[%s24306_s14 + $0x7a0] sm:$0xff] }
 0x4a5   :  { %8155 = vmatpush1.bf16.msra.mxu1 %v15396_v61  ;;  %v6750_v61 = vld [vmem:[%s24306_s14 + $0x460] sm:$0xff] }
 0x4a6   :  { %8156 = vmatprep.subr.bf16.mxu1 %v15389_v0  ;;  %8196 = vmatpush1.bf16.msra.mxu0 %v15524_v46  ;;  %v15468_v0 = vcombine.low %v6722_v29, %v6726_v24  ;;  %v15492_v28 = vcombine.low %v6746_v49, %v6750_v61  ;;  %v15493_v9 = vcombine.high %v6746_v49, %v6750_v61  ;;  %v6850_v46 = vld [vmem:[%s24306_s14 + $0x780] sm:$0xff] }
 0x4a7   :  { %8197 = vmatprep.subr.bf16.mxu0 %v15517_v14  ;;  %v15596_v18 = vcombine.low %v6850_v46, %v6854_v7  ;;  %v15597_v60 = vcombine.high %v6850_v46, %v6854_v7  ;;  %v6846_v14 = vld [vmem:[%s24306_s14 + $0x760] sm:$0xff] }
 0x4a8   :  { %v6822_v49 = vld [vmem:[%s24306_s14 + $0x6a0] sm:$0xff] }
 0x4a9   :  { %8157 = vmatpush1.bf16.msra.mxu1 %v15388_v40  ;;  %v6710_v40 = vld [vmem:[%s24306_s14 + $0x320] sm:$0xff] }
 0x4aa   :  { %8158 = vmatprep.subr.bf16.mxu1 %v15381_v6  ;;  %8198 = vmatpush1.bf16.msra.mxu0 %v15516_v25  ;;  %v15460_v6 = vcombine.low %v6714_v47, %v6718_v45  ;;  %v15453_v16 = vcombine.high %v6706_v44, %v6710_v40  ;;  %v6842_v25 = vld [vmem:[%s24306_s14 + $0x740] sm:$0xff]  ;;  %v15415_v47 = vcombine.high %v20656_v57, %v20661_v30  ;;  %v6635_v57 = vld [vmem:[%s24306_s14 + $0xc8] sm:$0xff] }
 0x4ab   :  { %8199 = vmatprep.subr.bf16.mxu0 %v15509_v26  ;;  %v15588_v34 = vcombine.low %v6842_v25, %v6846_v14  ;;  %v15589_v32 = vcombine.high %v6842_v25, %v6846_v14  ;;  %v6838_v26 = vld [vmem:[%s24306_s14 + $0x720] sm:$0xff]  ;;  %v6639_v30 = vld [vmem:[%s24306_s14 + $0xe8] sm:$0xff] }
 0x4ac   :  { %v6818_v45 = vld [vmem:[%s24306_s14 + $0x680] sm:$0xff] }
 0x4ad   :  { %8159 = vmatpush1.bf16.msra.mxu1 %v15380_v50  ;;  %v6702_v50 = vld [vmem:[%s24306_s14 + $0x2e0] sm:$0xff]  ;;  %v15564_v61 = vcombine.low %v6818_v45, %v6822_v49 }
 0x4ae   :  { %8160 = vmatprep.subr.bf16.mxu1 %v15373_v23  ;;  %8200 = vmatpush1.bf16.msra.mxu0 %v15508_v13  ;;  %v15452_v23 = vcombine.low %v6706_v44, %v6710_v40  ;;  %v15445_v56 = vcombine.high %v6698_v31, %v6702_v50  ;;  %v6834_v13 = vld [vmem:[%s24306_s14 + $0x700] sm:$0xff] }
 0x4af   :  { %8201 = vmatprep.subr.bf16.mxu0 %v15501_v17  ;;  %v15580_v29 = vcombine.low %v6834_v13, %v6838_v26  ;;  %v15581_v24 = vcombine.high %v6834_v13, %v6838_v26  ;;  %v6802_v40 = vld [vmem:[%s24306_s14 + $0x600] sm:$0xff] }
 0x4b0   :  { %v6806_v53 = vld [vmem:[%s24306_s14 + $0x620] sm:$0xff] }
 0x4b1   :  { %8161 = vmatpush1.bf16.msra.mxu1 %v15372_v37  ;;  %v6694_v37 = vld [vmem:[%s24306_s14 + $0x2a0] sm:$0xff]  ;;  %v15549_v11 = vcombine.high %v6802_v40, %v6806_v53 }
 0x4b2   :  { %8162 = vmatprep.subr.bf16.mxu1 %v15365_v62  ;;  %8202 = vmatpush1.bf16.msra.mxu0 %v15500_v42  ;;  %v15444_v62 = vcombine.low %v6698_v31, %v6702_v50  ;;  %v15437_v27 = vcombine.high %v6690_v54, %v6694_v37 }
 0x4b3   :  { %8203 = vmatprep.subr.bf16.mxu0 %v15493_v9  ;;  %v6814_v9 = vld [vmem:[%s24306_s14 + $0x660] sm:$0xff] }
 0x4b5   :  { %8163 = vmatpush1.bf16.msra.mxu1 %v15364_v10  ;;  %v6686_v10 = vld [vmem:[%s24306_s14 + $0x260] sm:$0xff] }
 0x4b6   :  { %8164 = vmatprep.subr.bf16.mxu1 %v15357_v15  ;;  %8204 = vmatpush1.bf16.msra.mxu0 %v15492_v28  ;;  %v15436_v15 = vcombine.low %v6690_v54, %v6694_v37  ;;  %v15429_v39 = vcombine.high %v6682_v41, %v6686_v10  ;;  %v6810_v28 = vld [vmem:[%s24306_s14 + $0x640] sm:$0xff] }
 0x4b7   :  { %8205 = vmatprep.subr.bf16.mxu0 %v15485_v3  ;;  %v15556_v44 = vcombine.low %v6810_v28, %v6814_v9  ;;  %v20831_v3 = vld [vmem:[%s24306_s14 + $0x5e8] sm:$0xff] }
 0x4b9   :  { %8165 = vmatpush1.bf16.msra.mxu1 %v15356_v55  ;;  %v6678_v55 = vld [vmem:[%s24306_s14 + $0x220] sm:$0xff] }
 0x4ba   :  { %8166 = vmatprep.subr.bf16.mxu1 %v15477_v33  ;;  %8206 = vmatpush1.bf16.msra.mxu0 %v15484_v21  ;;  %v15428_v33 = vcombine.low %v6682_v41, %v6686_v10  ;;  %v15421_v43 = vcombine.high %v6674_v20, %v6678_v55  ;;  %v15420_v42 = vcombine.low %v6674_v20, %v6678_v55  ;;  %v20826_v21 = vld [vmem:[%s24306_s14 + $0x5c8] sm:$0xff] }
 0x4bb   :  { %8207 = vmatprep.subr.bf16.mxu0 %v15605_v19  ;;  %v15542_v31 = vcombine.low %v20826_v21, %v20831_v3  ;;  %v6643_v20 = vld [vmem:[%s24306_s14 + $0x108] sm:$0xff] }
 0x4bc   :  { %v6647_v55 = vld [vmem:[%s24306_s14 + $0x128] sm:$0xff] }
 0x4bd   :  { %8167 = vmatpush2.bf16.msra.mxu1 %v15476_v48  ;;  %v6830_v48 = vld [vmem:[%s24306_s14 + $0x6e0] sm:$0xff]  ;;  %v15391_v26 = vcombine.high %v6643_v20, %v6647_v55 }
 0x4be   :  { %8168 = vmatprep.subr.bf16.mxu1 %v15469_v36  ;;  %8208 = vmatpush2.bf16.msra.mxu0 %v15604_v52  ;;  %v15572_v17 = vcombine.low %v6826_v1, %v6830_v48  ;;  %v15573_v36 = vcombine.high %v6826_v1, %v6830_v48  ;;  %v6619_v48 = vld [vmem:[%s24306_s14 + $0x48] sm:$0xff] }
 0x4bf   :  { %8209 = vmatprep.subr.bf16.mxu0 %v15597_v60  ;;  %v6659_v60 = vld [vmem:[%s24306_s14 + $0x188] sm:$0xff] }
 0x4c1   :  { %8169 = vmatpush2.bf16.msra.mxu1 %v15468_v0  ;;  %v15565_v0 = vcombine.high %v6818_v45, %v6822_v49  ;;  %v6615_v45 = vld [vmem:[%s24306_s14 + $0x28] sm:$0xff] }
 0x4c2   :  { %8170 = vmatprep.subr.bf16.mxu1 %v15461_v4  ;;  %8210 = vmatpush2.bf16.msra.mxu0 %v15596_v18  ;;  %v15557_v4 = vcombine.high %v6810_v28, %v6814_v9  ;;  %v6735_v28 = vld [vmem:[%s24306_s14 + $0x3e8] sm:$0xff] }
 0x4c3   :  { %8211 = vmatprep.subr.bf16.mxu0 %v15589_v32 }
 0x4c5   :  { %8171 = vmatpush2.bf16.msra.mxu1 %v15460_v6  ;;  %v15548_v6 = vcombine.low %v6802_v40, %v6806_v53  ;;  %v6727_v40 = vld [vmem:[%s24306_s14 + $0x3a8] sm:$0xff] }
 0x4c6   :  { %8172 = vmatprep.subr.bf16.mxu1 %v15453_v16  ;;  %8212 = vmatpush2.bf16.msra.mxu0 %v15588_v34  ;;  %v15543_v16 = vcombine.high %v20826_v21, %v20831_v3  ;;  %v6655_v34 = vld [vmem:[%s24306_s14 + $0x168] sm:$0xff]  ;;  %v6644_v3 = vld [vmem:[%s24306_s14 + $0x110] sm:$0xff] }
 0x4c7   :  { %8213 = vmatprep.subr.bf16.mxu0 %v15581_v24  ;;  %v6631_v24 = vld [vmem:[%s24306_s14 + $0xa8] sm:$0xff] }
 0x4c8   :  { %v6775_v21 = vld [vmem:[%s24306_s14 + $0x528] sm:$0xff] }
 0x4c9   :  { %8173 = vmatpush2.bf16.msra.mxu1 %v15452_v23 }
 0x4ca   :  { %8174 = vmatprep.subr.bf16.mxu1 %v15445_v56  ;;  %8214 = vmatpush2.bf16.msra.mxu0 %v15580_v29  ;;  %v6627_v29 = vld [vmem:[%s24306_s14 + $0x88] sm:$0xff] }
 0x4cb   :  { %8215 = vmatprep.subr.bf16.mxu0 %v15573_v36  ;;  %v15375_v1 = vcombine.high %v6627_v29, %v6631_v24 }
 0x4cd   :  { %8175 = vmatpush2.bf16.msra.mxu1 %v15444_v62 }
 0x4ce   :  { %8176 = vmatprep.subr.bf16.mxu1 %v15437_v27  ;;  %8216 = vmatpush2.bf16.msra.mxu0 %v15572_v17  ;;  %v6663_v27 = vld [vmem:[%s24306_s14 + $0x1a8] sm:$0xff]  ;;  %v15374_v17 = vcombine.low %v6627_v29, %v6631_v24 }
 0x4cf   :  { %8217 = vmatprep.subr.bf16.mxu0 %v15565_v0  ;;  %v15407_v14 = vcombine.high %v6659_v60, %v6663_v27  ;;  %v15406_v32 = vcombine.low %v6659_v60, %v6663_v27  ;;  %v6731_v0 = vld [vmem:[%s24306_s14 + $0x3c8] sm:$0xff] }
 0x4d0   :  { %v15478_v53 = vcombine.low %v6731_v0, %v6735_v28  ;;  %v6683_v27 = vld [vmem:[%s24306_s14 + $0x248] sm:$0xff] }
 0x4d1   :  { %8177 = vmatpush2.bf16.msra.mxu1 %v15436_v15  ;;  %v6651_v15 = vld [vmem:[%s24306_s14 + $0x148] sm:$0xff] }
 0x4d2   :  { %8178 = vmatprep.subr.bf16.mxu1 %v15429_v39  ;;  %8218 = vmatpush2.bf16.msra.mxu0 %v15564_v61  ;;  %v15399_v39 = vcombine.high %v6651_v15, %v6655_v34  ;;  %v15398_v13 = vcombine.low %v6651_v15, %v6655_v34  ;;  %v6675_v34 = vld [vmem:[%s24306_s14 + $0x208] sm:$0xff] }
 0x4d3   :  { %8219 = vmatprep.subr.bf16.mxu0 %v15557_v4  ;;  %v15479_v4 = vcombine.high %v6731_v0, %v6735_v28  ;;  %v6791_v0 = vld [vmem:[%s24306_s14 + $0x5a8] sm:$0xff]  ;;  %v6660_v28 = vld [vmem:[%s24306_s14 + $0x190] sm:$0xff] }
 0x4d5   :  { %8179 = vmatpush2.bf16.msra.mxu1 %v15428_v33  ;;  %v15383_v33 = vcombine.high %v6635_v57, %v6639_v30 }
 0x4d6   :  { %8180 = vmatprep.subr.bf16.mxu1 %v15421_v43  ;;  %8220 = vmatpush2.bf16.msra.mxu0 %v15556_v44  ;;  %v15382_v43 = vcombine.low %v6635_v57, %v6639_v30  ;;  %v6723_v44 = vld [vmem:[%s24306_s14 + $0x388] sm:$0xff] }
 0x4d7   :  { %8221 = vmatprep.subr.bf16.mxu0 %v15549_v11  ;;  %v15471_v11 = vcombine.high %v6723_v44, %v6727_v40 }
 0x4d9   :  { %8181 = vmatpush2.bf16.msra.mxu1 %v15420_v42  ;;  %v6623_v42 = vld [vmem:[%s24306_s14 + $0x68] sm:$0xff] }
 0x4da   :  { %8232 = vmatprep.subr.bf16.mxu1 %v15415_v47  ;;  %8222 = vmatpush2.bf16.msra.mxu0 %v15548_v6  ;;  %v15367_v36 = vcombine.high %v6619_v48, %v6623_v42  ;;  %v6611_v47 = vld [vmem:[%s24306_s14 + $0x8] sm:$0xff]  ;;  %v15366_v49 = vcombine.low %v6619_v48, %v6623_v42 }
 0x4db   :  { %8273 = vmatprep.subr.bf16.mxu0 %v15543_v16  ;;  %v15359_v61 = vcombine.high %v6611_v47, %v6615_v45  ;;  %v15358_v9 = vcombine.low %v6611_v47, %v6615_v45  ;;  %v6715_v6 = vld [vmem:[%s24306_s14 + $0x348] sm:$0xff] }
 0x4dc   :  { %v6719_v16 = vld [vmem:[%s24306_s14 + $0x368] sm:$0xff] }
 0x51c   :  { %v6208_v50 = vpop.f32.mrf.mxu1 }
 0x51d   :  { %v6249_v35 = vpop.f32.mrf.mxu0 }
 0x51e   :  { %v6250_v58 = vadd.f32 %v6249_v35, %v6208_v50  ;;  %v6210_v23 = vpop.f32.mrf.mxu1  ;;  %v15470_v50 = vcombine.low %v6723_v44, %v6727_v40  ;;  %v15463_v35 = vcombine.high %v6715_v6, %v6719_v16 }
 0x51f   :  { %v6251_v52 = vpop.f32.mrf.mxu0 }
 0x520   :  { %vm6338_vm6 = vcmp.ge.f32.partialorder %v6250_v58, 0.0  ;;  %v6342_v19 = vmul.f32 0.01, %v6250_v58  ;;  %v6252_v56 = vadd.f32 %v6251_v52, %v6210_v23  ;;  %v6212_v54 = vpop.f32.mrf.mxu1  ;;  %v6711_v23 = vld [vmem:[%s24306_s14 + $0x328] sm:$0xff]  ;;  %v15462_v52 = vcombine.low %v6715_v6, %v6719_v16 }
 0x521   :  { %v6253_v37 = vpop.f32.mrf.mxu0  ;;  %v6703_v54 = vld [vmem:[%s24306_s14 + $0x2e8] sm:$0xff] }
 0x522   :  { %vm6339_vm7 = vcmp.ge.f32.partialorder %v6252_v56, 0.0  ;;  %v6343_v46 = vmul.f32 0.01, %v6252_v56  ;;  %v6213_v7 = vpop.f32.mrf.mxu1  ;;  %v6346_v62 = vsel %vm6338_vm6, %v6250_v58, %v6342_v19  ;;  %v6707_v58 = vld [vmem:[%s24306_s14 + $0x308] sm:$0xff] }
 0x523   :  { %v6254_v18 = vpop.f32.mrf.mxu0  ;;  %v20845_v25 = vpack.c.bf16 %v6346_v62, %v6346_v62  ;;  %v15455_v19 = vcombine.high %v6707_v58, %v6711_v23  ;;  %v15454_v37 = vcombine.low %v6707_v58, %v6711_v23  ;;  %v6691_v7 = vld [vmem:[%s24306_s14 + $0x288] sm:$0xff] }
 0x524   :  { %v6347_v41 = vsel %vm6339_vm7, %v6252_v56, %v6343_v46  ;;  %v6699_v56 = vld [vmem:[%s24306_s14 + $0x2c8] sm:$0xff] }
 0x525   :  { %v20843_v10 = vpack.c.bf16 %v6347_v41, %v6347_v41  ;;  %v15447_v46 = vcombine.high %v6699_v56, %v6703_v54  ;;  %v6695_v62 = vld [vmem:[%s24306_s14 + $0x2a8] sm:$0xff]  ;;  %v15446_v18 = vcombine.low %v6699_v56, %v6703_v54 }
 0x526   :  { %v15439_v60 = vcombine.high %v6691_v7, %v6695_v62  ;;  %v6687_v41 = vld [vmem:[%s24306_s14 + $0x268] sm:$0xff] }
 0x527   :  { %8182 = vmatprep.mubr.bf16.mxu1 %v20843_v10  ;;  %v15431_v15 = vcombine.high %v6683_v27, %v6687_v41  ;;  %v6779_v6 = vld [vmem:[%s24306_s14 + $0x548] sm:$0xff] }
 0x528   :  { %8183 = vmatmul.mubr.bf16.vlgmr.msra.gmra.mxu1 %v20845_v25  ;;  %v6783_v16 = vld [vmem:[%s24306_s14 + $0x568] sm:$0xff] }
 0x529   :  { %8233 = vmatpush1.bf16.msra.mxu1 %v15414_v2  ;;  %8264 = vmatprep.mubr.bf16.mxu1 %v20843_v10  ;;  %v15390_v2 = vcombine.low %v6643_v20, %v6647_v55  ;;  %v15430_v55 = vcombine.low %v6683_v27, %v6687_v41  ;;  %v6771_v56 = vld [vmem:[%s24306_s14 + $0x508] sm:$0xff]  ;;  %v15526_v54 = vcombine.low %v6779_v6, %v6783_v16  ;;  %v6640_v27 = vld [vmem:[%s24306_s14 + $0xf0] sm:$0xff] }
 0x52a   :  { %8234 = vmatprep.subr.bf16.mxu1 %v15407_v14  ;;  %v15438_v14 = vcombine.low %v6691_v7, %v6695_v62  ;;  %v6763_v62 = vld [vmem:[%s24306_s14 + $0x4c8] sm:$0xff]  ;;  %v15518_v41 = vcombine.low %v6771_v56, %v6775_v21 }
 0x52d   :  { %8235 = vmatpush1.bf16.msra.mxu1 %v15406_v32  ;;  %v6679_v32 = vld [vmem:[%s24306_s14 + $0x228] sm:$0xff] }
 0x52e   :  { %8236 = vmatprep.subr.bf16.mxu1 %v15399_v39  ;;  %v15423_v57 = vcombine.high %v6675_v34, %v6679_v32  ;;  %v15422_v48 = vcombine.low %v6675_v34, %v6679_v32  ;;  %v6755_v32 = vld [vmem:[%s24306_s14 + $0x488] sm:$0xff] }
 0x531   :  { %8237 = vmatpush1.bf16.msra.mxu1 %v15398_v13 }
 0x532   :  { %8238 = vmatprep.subr.bf16.mxu1 %v15391_v26 }
 0x535   :  { %8239 = vmatpush1.bf16.msra.mxu1 %v15390_v2  ;;  %v6668_v2 = vld [vmem:[%s24306_s14 + $0x1d0] sm:$0xff] }
 0x536   :  { %8240 = vmatprep.subr.bf16.mxu1 %v15383_v33  ;;  %v6672_v33 = vld [vmem:[%s24306_s14 + $0x1f0] sm:$0xff] }
 0x537   :  { %v15416_v40 = vcombine.low %v6668_v2, %v6672_v33 }
 0x539   :  { %8241 = vmatpush1.bf16.msra.mxu1 %v15382_v43 }
 0x53a   :  { %8242 = vmatprep.subr.bf16.mxu1 %v15375_v1 }
 0x53d   :  { %8243 = vmatpush1.bf16.msra.mxu1 %v15374_v17 }
 0x53e   :  { %8244 = vmatprep.subr.bf16.mxu1 %v15367_v36  ;;  %v15417_v36 = vcombine.high %v6668_v2, %v6672_v33  ;;  %v6747_v2 = vld [vmem:[%s24306_s14 + $0x448] sm:$0xff] }
 0x53f   :  { %v6751_v33 = vld [vmem:[%s24306_s14 + $0x468] sm:$0xff] }
 0x541   :  { %8245 = vmatpush1.bf16.msra.mxu1 %v15366_v49  ;;  %v6787_v49 = vld [vmem:[%s24306_s14 + $0x588] sm:$0xff] }
 0x542   :  { %8246 = vmatprep.subr.bf16.mxu1 %v15359_v61  ;;  %v15534_v58 = vcombine.low %v6787_v49, %v6791_v0 }
 0x545   :  { %8247 = vmatpush1.bf16.msra.mxu1 %v15358_v9  ;;  %v6664_v9 = vld [vmem:[%s24306_s14 + $0x1b0] sm:$0xff] }
 0x546   :  { %8248 = vmatprep.subr.bf16.mxu1 %v15479_v4  ;;  %v15408_v23 = vcombine.low %v6660_v28, %v6664_v9 }
 0x549   :  { %8249 = vmatpush2.bf16.msra.mxu1 %v15478_v53  ;;  %v15535_v53 = vcombine.high %v6787_v49, %v6791_v0  ;;  %v15494_v49 = vcombine.low %v6747_v2, %v6751_v33 }
 0x54a   :  { %8250 = vmatprep.subr.bf16.mxu1 %v15471_v11  ;;  %v15409_v11 = vcombine.high %v6660_v28, %v6664_v9  ;;  %v6859_v9 = vld [vmem:[%s24306_s14 + $0x7c8] sm:$0xff] }
 0x54d   :  { %8251 = vmatpush2.bf16.msra.mxu1 %v15470_v50  ;;  %v6652_v50 = vld [vmem:[%s24306_s14 + $0x150] sm:$0xff] }
 0x54e   :  { %8252 = vmatprep.subr.bf16.mxu1 %v15463_v35  ;;  %v6656_v35 = vld [vmem:[%s24306_s14 + $0x170] sm:$0xff] }
 0x551   :  { %8253 = vmatpush2.bf16.msra.mxu1 %v15462_v52  ;;  %v15527_v52 = vcombine.high %v6779_v6, %v6783_v16 }
 0x552   :  { %8254 = vmatprep.subr.bf16.mxu1 %v15455_v19  ;;  %v15401_v19 = vcombine.high %v6652_v50, %v6656_v35 }
 0x555   :  { %8255 = vmatpush2.bf16.msra.mxu1 %v15454_v37  ;;  %v15400_v37 = vcombine.low %v6652_v50, %v6656_v35 }
 0x556   :  { %8256 = vmatprep.subr.bf16.mxu1 %v15447_v46  ;;  %v15519_v46 = vcombine.high %v6771_v56, %v6775_v21 }
 0x559   :  { %8257 = vmatpush2.bf16.msra.mxu1 %v15446_v18  ;;  %v6767_v18 = vld [vmem:[%s24306_s14 + $0x4e8] sm:$0xff] }
 0x55a   :  { %8258 = vmatprep.subr.bf16.mxu1 %v15439_v60  ;;  %v6636_v60 = vld [vmem:[%s24306_s14 + $0xd0] sm:$0xff] }
 0x55b   :  { %v15385_v34 = vcombine.high %v6636_v60, %v6640_v27 }
 0x55c   :  { %v6290_v39 = vpop.f32.mrf.mxu1 }
 0x55d   :  { %v6331_v20 = vpop.f32.mrf.mxu0  ;;  %8259 = vmatpush2.bf16.msra.mxu1 %v15438_v14 }
 0x55e   :  { %v6332_v13 = vadd.f32 %v6331_v20, %v6290_v39  ;;  %v6292_v26 = vpop.f32.mrf.mxu1  ;;  %8260 = vmatprep.subr.bf16.mxu1 %v15431_v15  ;;  %v15511_v15 = vcombine.high %v6763_v62, %v6767_v18  ;;  %v6759_v39 = vld [vmem:[%s24306_s14 + $0x4a8] sm:$0xff]  ;;  %v6628_v20 = vld [vmem:[%s24306_s14 + $0x90] sm:$0xff] }
 0x55f   :  { %v6333_v30 = vpop.f32.mrf.mxu0 }
 0x560   :  { %vm6340_vm8 = vcmp.ge.f32.partialorder %v6332_v13, 0.0  ;;  %v6344_v29 = vmul.f32 0.01, %v6332_v13  ;;  %v6334_v24 = vadd.f32 %v6333_v30, %v6292_v26  ;;  %v6294_v43 = vpop.f32.mrf.mxu1  ;;  %v15384_v26 = vcombine.low %v6636_v60, %v6640_v27 }
 0x561   :  { %v6335_v1 = vpop.f32.mrf.mxu0  ;;  %8261 = vmatpush2.bf16.msra.mxu1 %v15430_v55  ;;  %v6632_v55 = vld [vmem:[%s24306_s14 + $0xb0] sm:$0xff]  ;;  %v15502_v43 = vcombine.low %v6755_v32, %v6759_v39 }
 0x562   :  { %vm6341_vm9 = vcmp.ge.f32.partialorder %v6334_v24, 0.0  ;;  %v6345_v42 = vmul.f32 0.01, %v6334_v24  ;;  %v6295_v17 = vpop.f32.mrf.mxu1  ;;  %8262 = vmatprep.subr.bf16.mxu1 %v15423_v57  ;;  %v6348_v47 = vsel %vm6340_vm8, %v6332_v13, %v6344_v29  ;;  %v15510_v13 = vcombine.low %v6763_v62, %v6767_v18  ;;  %v6620_v29 = vld [vmem:[%s24306_s14 + $0x50] sm:$0xff] }
 0x563   :  { %v6336_v45 = vpop.f32.mrf.mxu0  ;;  %v20957_v44 = vpack.c.bf16 %v6348_v47, %v6348_v47  ;;  %v15503_v57 = vcombine.high %v6755_v32, %v6759_v39  ;;  %v15377_v30 = vcombine.high %v6628_v20, %v6632_v55  ;;  %v15376_v1 = vcombine.low %v6628_v20, %v6632_v55  ;;  %v6739_v17 = vld [vmem:[%s24306_s14 + $0x408] sm:$0xff]  ;;  %v6612_v47 = vld [vmem:[%s24306_s14 + $0x10] sm:$0xff] }
 0x564   :  { %v6349_v61 = vsel %vm6341_vm9, %v6334_v24, %v6345_v42  ;;  %v6624_v24 = vld [vmem:[%s24306_s14 + $0x70] sm:$0xff] }
 0x565   :  { %v20955_v4 = vpack.c.bf16 %v6349_v61, %v6349_v61  ;;  %8263 = vmatpush2.bf16.msra.mxu1 %v15422_v48  ;;  %v15495_v48 = vcombine.high %v6747_v2, %v6751_v33  ;;  %v15369_v42 = vcombine.high %v6620_v29, %v6624_v24  ;;  %v6616_v45 = vld [vmem:[%s24306_s14 + $0x30] sm:$0xff]  ;;  %v15368_v61 = vcombine.low %v6620_v29, %v6624_v24 }
 0x566   :  { %8314 = vmatprep.subr.bf16.mxu1 %v15417_v36  ;;  %v6743_v36 = vld [vmem:[%s24306_s14 + $0x428] sm:$0xff]  ;;  %v15361_v28 = vcombine.high %v6612_v47, %v6616_v45  ;;  %v15360_v16 = vcombine.low %v6612_v47, %v6616_v45 }
 0x567   :  { %8223 = vmatprep.mubr.bf16.mxu0 %v20955_v4  ;;  %v15487_v0 = vcombine.high %v6739_v17, %v6743_v36  ;;  %v15486_v6 = vcombine.low %v6739_v17, %v6743_v36 }
 0x568   :  { %8224 = vmatmul.mubr.bf16.vlgmr.msra.gmra.mxu0 %v20957_v44  ;;  %8265 = vmatmul.mubr.bf16.vlgmr.msra.gmra.mxu1 %v20845_v25 }
 0x569   :  { %8274 = vmatpush1.bf16.msra.mxu0 %v15542_v31  ;;  %8305 = vmatprep.mubr.bf16.mxu0 %v20955_v4  ;;  %v6648_v31 = vld [vmem:[%s24306_s14 + $0x130] sm:$0xff] }
 0x56a   :  { %8315 = vmatpush1.bf16.msra.mxu1 %v15416_v40  ;;  %8346 = vmatprep.mubr.bf16.mxu1 %v20843_v10  ;;  %v15393_v7 = vcombine.high %v6644_v3, %v6648_v31  ;;  %v15392_v14 = vcombine.low %v6644_v3, %v6648_v31  ;;  %v6863_v40 = vld [vmem:[%s24306_s14 + $0x7e8] sm:$0xff] }
 0x56b   :  { %8275 = vmatprep.subr.bf16.mxu0 %v15535_v53  ;;  %8316 = vmatprep.subr.bf16.mxu1 %v15409_v11  ;;  %v6732_v53 = vld [vmem:[%s24306_s14 + $0x3d0] sm:$0xff]  ;;  %v15607_v50 = vcombine.high %v6859_v9, %v6863_v40  ;;  %v15606_v56 = vcombine.low %v6859_v9, %v6863_v40 }
 0x56c   :  { %v6736_v11 = vld [vmem:[%s24306_s14 + $0x3f0] sm:$0xff] }
 0x56d   :  { %8276 = vmatpush1.bf16.msra.mxu0 %v15534_v58  ;;  %v15481_v35 = vcombine.high %v6732_v53, %v6736_v11  ;;  %v6851_v58 = vld [vmem:[%s24306_s14 + $0x788] sm:$0xff]  ;;  %v15480_v21 = vcombine.low %v6732_v53, %v6736_v11 }
 0x56e   :  { %8317 = vmatpush1.bf16.msra.mxu1 %v15408_v23  ;;  %8277 = vmatprep.subr.bf16.mxu0 %v15527_v52  ;;  %v6855_v23 = vld [vmem:[%s24306_s14 + $0x7a8] sm:$0xff]  ;;  %v6724_v52 = vld [vmem:[%s24306_s14 + $0x390] sm:$0xff] }
 0x56f   :  { %8318 = vmatprep.subr.bf16.mxu1 %v15401_v19  ;;  %v6728_v19 = vld [vmem:[%s24306_s14 + $0x3b0] sm:$0xff]  ;;  %v15599_v3 = vcombine.high %v6851_v58, %v6855_v23  ;;  %v15598_v62 = vcombine.low %v6851_v58, %v6855_v23 }
 0x570   :  { %v15473_v31 = vcombine.high %v6724_v52, %v6728_v19  ;;  %v15472_v18 = vcombine.low %v6724_v52, %v6728_v19 }
 0x571   :  { %8278 = vmatpush1.bf16.msra.mxu0 %v15526_v54  ;;  %v6843_v54 = vld [vmem:[%s24306_s14 + $0x748] sm:$0xff] }
 0x572   :  { %8319 = vmatpush1.bf16.msra.mxu1 %v15400_v37  ;;  %8279 = vmatprep.subr.bf16.mxu0 %v15519_v46  ;;  %v6847_v37 = vld [vmem:[%s24306_s14 + $0x768] sm:$0xff]  ;;  %v6716_v46 = vld [vmem:[%s24306_s14 + $0x350] sm:$0xff] }
 0x573   :  { %8320 = vmatprep.subr.bf16.mxu1 %v15393_v7  ;;  %v6720_v7 = vld [vmem:[%s24306_s14 + $0x370] sm:$0xff]  ;;  %v15591_v60 = vcombine.high %v6843_v54, %v6847_v37  ;;  %v15590_v32 = vcombine.low %v6843_v54, %v6847_v37 }
 0x574   :  { %v15465_v27 = vcombine.high %v6716_v46, %v6720_v7  ;;  %v15464_v39 = vcombine.low %v6716_v46, %v6720_v7 }
 0x575   :  { %8280 = vmatpush1.bf16.msra.mxu0 %v15518_v41  ;;  %v6835_v41 = vld [vmem:[%s24306_s14 + $0x708] sm:$0xff] }
 0x576   :  { %8321 = vmatpush1.bf16.msra.mxu1 %v15392_v14  ;;  %8281 = vmatprep.subr.bf16.mxu0 %v15511_v15  ;;  %v6839_v14 = vld [vmem:[%s24306_s14 + $0x728] sm:$0xff]  ;;  %v6708_v15 = vld [vmem:[%s24306_s14 + $0x310] sm:$0xff] }
 0x577   :  { %8322 = vmatprep.subr.bf16.mxu1 %v15385_v34  ;;  %v6712_v34 = vld [vmem:[%s24306_s14 + $0x330] sm:$0xff]  ;;  %v15583_v20 = vcombine.high %v6835_v41, %v6839_v14  ;;  %v15582_v2 = vcombine.low %v6835_v41, %v6839_v14  ;;  %v6665_v41 = vld [vmem:[%s24306_s14 + $0x1b8] sm:$0xff] }
 0x578   :  { %v15457_v55 = vcombine.high %v6708_v15, %v6712_v34  ;;  %v15456_v33 = vcombine.low %v6708_v15, %v6712_v34  ;;  %v6780_v34 = vld [vmem:[%s24306_s14 + $0x550] sm:$0xff] }
 0x579   :  { %8282 = vmatpush1.bf16.msra.mxu0 %v15510_v13  ;;  %v6827_v13 = vld [vmem:[%s24306_s14 + $0x6c8] sm:$0xff] }
 0x57a   :  { %8323 = vmatpush1.bf16.msra.mxu1 %v15384_v26  ;;  %8283 = vmatprep.subr.bf16.mxu0 %v15503_v57  ;;  %v6831_v26 = vld [vmem:[%s24306_s14 + $0x6e8] sm:$0xff]  ;;  %v6700_v57 = vld [vmem:[%s24306_s14 + $0x2d0] sm:$0xff] }
 0x57b   :  { %8324 = vmatprep.subr.bf16.mxu1 %v15377_v30  ;;  %v6704_v30 = vld [vmem:[%s24306_s14 + $0x2f0] sm:$0xff]  ;;  %v15575_v29 = vcombine.high %v6827_v13, %v6831_v26  ;;  %v15574_v17 = vcombine.low %v6827_v13, %v6831_v26 }
 0x57c   :  { %v15449_v24 = vcombine.high %v6700_v57, %v6704_v30  ;;  %v15448_v36 = vcombine.low %v6700_v57, %v6704_v30 }
 0x57d   :  { %8284 = vmatpush1.bf16.msra.mxu0 %v15502_v43  ;;  %v6819_v43 = vld [vmem:[%s24306_s14 + $0x688] sm:$0xff] }
 0x57e   :  { %8325 = vmatpush1.bf16.msra.mxu1 %v15376_v1  ;;  %8285 = vmatprep.subr.bf16.mxu0 %v15495_v48  ;;  %v6823_v1 = vld [vmem:[%s24306_s14 + $0x6a8] sm:$0xff]  ;;  %v6692_v48 = vld [vmem:[%s24306_s14 + $0x290] sm:$0xff] }
 0x57f   :  { %8326 = vmatprep.subr.bf16.mxu1 %v15369_v42  ;;  %v6696_v42 = vld [vmem:[%s24306_s14 + $0x2b0] sm:$0xff]  ;;  %v15567_v47 = vcombine.high %v6819_v43, %v6823_v1  ;;  %v15566_v9 = vcombine.low %v6819_v43, %v6823_v1 }
 0x580   :  { %v15441_v45 = vcombine.high %v6692_v48, %v6696_v42  ;;  %v15440_v40 = vcombine.low %v6692_v48, %v6696_v42  ;;  %v6764_v42 = vld [vmem:[%s24306_s14 + $0x4d0] sm:$0xff] }
 0x581   :  { %8286 = vmatpush1.bf16.msra.mxu0 %v15494_v49  ;;  %v6811_v49 = vld [vmem:[%s24306_s14 + $0x648] sm:$0xff] }
 0x582   :  { %8327 = vmatpush1.bf16.msra.mxu1 %v15368_v61  ;;  %8287 = vmatprep.subr.bf16.mxu0 %v15487_v0  ;;  %v6815_v61 = vld [vmem:[%s24306_s14 + $0x668] sm:$0xff]  ;;  %v6684_v0 = vld [vmem:[%s24306_s14 + $0x250] sm:$0xff] }
 0x583   :  { %8328 = vmatprep.subr.bf16.mxu1 %v15361_v28  ;;  %v6688_v28 = vld [vmem:[%s24306_s14 + $0x270] sm:$0xff]  ;;  %v15559_v53 = vcombine.high %v6811_v49, %v6815_v61  ;;  %v15558_v58 = vcombine.low %v6811_v49, %v6815_v61 }
 0x584   :  { %v15433_v11 = vcombine.high %v6684_v0, %v6688_v28  ;;  %v15432_v23 = vcombine.low %v6684_v0, %v6688_v28  ;;  %v6756_v28 = vld [vmem:[%s24306_s14 + $0x490] sm:$0xff] }
 0x585   :  { %8288 = vmatpush1.bf16.msra.mxu0 %v15486_v6  ;;  %v6803_v6 = vld [vmem:[%s24306_s14 + $0x608] sm:$0xff] }
 0x586   :  { %8329 = vmatpush1.bf16.msra.mxu1 %v15360_v16  ;;  %8289 = vmatprep.subr.bf16.mxu0 %v15607_v50  ;;  %v6807_v16 = vld [vmem:[%s24306_s14 + $0x628] sm:$0xff]  ;;  %v6676_v50 = vld [vmem:[%s24306_s14 + $0x210] sm:$0xff] }
 0x587   :  { %8330 = vmatprep.subr.bf16.mxu1 %v15481_v35  ;;  %v6680_v35 = vld [vmem:[%s24306_s14 + $0x230] sm:$0xff]  ;;  %v15551_v52 = vcombine.high %v6803_v6, %v6807_v16  ;;  %v15550_v54 = vcombine.low %v6803_v6, %v6807_v16 }
 0x588   :  { %v15425_v19 = vcombine.high %v6676_v50, %v6680_v35  ;;  %v15424_v37 = vcombine.low %v6676_v50, %v6680_v35  ;;  %v6748_v35 = vld [vmem:[%s24306_s14 + $0x450] sm:$0xff] }
 0x589   :  { %8290 = vmatpush2.bf16.msra.mxu0 %v15606_v56  ;;  %v6796_v56 = vld [vmem:[%s24306_s14 + $0x5d0] sm:$0xff] }
 0x58a   :  { %8331 = vmatpush2.bf16.msra.mxu1 %v15480_v21  ;;  %8291 = vmatprep.subr.bf16.mxu0 %v15599_v3  ;;  %v6800_v21 = vld [vmem:[%s24306_s14 + $0x5f0] sm:$0xff]  ;;  %v6669_v3 = vld [vmem:[%s24306_s14 + $0x1d8] sm:$0xff] }
 0x58b   :  { %8332 = vmatprep.subr.bf16.mxu1 %v15473_v31  ;;  %v6673_v31 = vld [vmem:[%s24306_s14 + $0x1f8] sm:$0xff]  ;;  %v15545_v46 = vcombine.high %v6796_v56, %v6800_v21 }
 0x58c   :  { %v15419_v7 = vcombine.high %v6669_v3, %v6673_v31  ;;  %v15418_v14 = vcombine.low %v6669_v3, %v6673_v31  ;;  %v6740_v31 = vld [vmem:[%s24306_s14 + $0x410] sm:$0xff] }
 0x58d   :  { %8292 = vmatpush2.bf16.msra.mxu0 %v15598_v62  ;;  %v6788_v62 = vld [vmem:[%s24306_s14 + $0x590] sm:$0xff] }
 0x58e   :  { %8333 = vmatpush2.bf16.msra.mxu1 %v15472_v18  ;;  %8293 = vmatprep.subr.bf16.mxu0 %v15591_v60  ;;  %v6792_v18 = vld [vmem:[%s24306_s14 + $0x5b0] sm:$0xff]  ;;  %v15544_v60 = vcombine.low %v6796_v56, %v6800_v21 }
 0x58f   :  { %8334 = vmatprep.subr.bf16.mxu1 %v15465_v27  ;;  %v6661_v27 = vld [vmem:[%s24306_s14 + $0x198] sm:$0xff]  ;;  %v15537_v15 = vcombine.high %v6788_v62, %v6792_v18  ;;  %v15536_v13 = vcombine.low %v6788_v62, %v6792_v18 }
 0x590   :  { %v15410_v26 = vcombine.low %v6661_v27, %v6665_v41 }
 0x591   :  { %8294 = vmatpush2.bf16.msra.mxu0 %v15590_v32  ;;  %v6784_v32 = vld [vmem:[%s24306_s14 + $0x570] sm:$0xff] }
 0x592   :  { %8335 = vmatpush2.bf16.msra.mxu1 %v15464_v39  ;;  %8295 = vmatprep.subr.bf16.mxu0 %v15583_v20  ;;  %v15411_v39 = vcombine.high %v6661_v27, %v6665_v41  ;;  %v6653_v20 = vld [vmem:[%s24306_s14 + $0x158] sm:$0xff]  ;;  %v15529_v57 = vcombine.high %v6780_v34, %v6784_v32  ;;  %v6860_v27 = vld [vmem:[%s24306_s14 + $0x7d0] sm:$0xff] }
 0x593   :  { %8336 = vmatprep.subr.bf16.mxu1 %v15457_v55  ;;  %v6657_v55 = vld [vmem:[%s24306_s14 + $0x178] sm:$0xff]  ;;  %v6864_v41 = vld [vmem:[%s24306_s14 + $0x7f0] sm:$0xff] }
 0x594   :  { %v15403_v30 = vcombine.high %v6653_v20, %v6657_v55  ;;  %v15402_v43 = vcombine.low %v6653_v20, %v6657_v55  ;;  %v6852_v55 = vld [vmem:[%s24306_s14 + $0x790] sm:$0xff] }
 0x595   :  { %8296 = vmatpush2.bf16.msra.mxu0 %v15582_v2  ;;  %v6772_v2 = vld [vmem:[%s24306_s14 + $0x510] sm:$0xff] }
 0x596   :  { %8337 = vmatpush2.bf16.msra.mxu1 %v15456_v33  ;;  %8297 = vmatprep.subr.bf16.mxu0 %v15575_v29  ;;  %v6776_v33 = vld [vmem:[%s24306_s14 + $0x530] sm:$0xff]  ;;  %v6645_v29 = vld [vmem:[%s24306_s14 + $0x118] sm:$0xff] }
 0x597   :  { %8338 = vmatprep.subr.bf16.mxu1 %v15449_v24  ;;  %v6649_v24 = vld [vmem:[%s24306_s14 + $0x138] sm:$0xff]  ;;  %v15521_v1 = vcombine.high %v6772_v2, %v6776_v33 }
 0x598   :  { %v15395_v48 = vcombine.high %v6645_v29, %v6649_v24  ;;  %v15394_v49 = vcombine.low %v6645_v29, %v6649_v24  ;;  %v6844_v24 = vld [vmem:[%s24306_s14 + $0x750] sm:$0xff] }
 0x599   :  { %8298 = vmatpush2.bf16.msra.mxu0 %v15574_v17  ;;  %v6768_v17 = vld [vmem:[%s24306_s14 + $0x4f0] sm:$0xff] }
 0x59a   :  { %8339 = vmatpush2.bf16.msra.mxu1 %v15448_v36  ;;  %8299 = vmatprep.subr.bf16.mxu0 %v15567_v47  ;;  %v6637_v36 = vld [vmem:[%s24306_s14 + $0xd8] sm:$0xff]  ;;  %v15513_v61 = vcombine.high %v6764_v42, %v6768_v17 }
 0x59b   :  { %8340 = vmatprep.subr.bf16.mxu1 %v15441_v45  ;;  %v6641_v47 = vld [vmem:[%s24306_s14 + $0xf8] sm:$0xff]  ;;  %v15520_v45 = vcombine.low %v6772_v2, %v6776_v33 }
 0x59c   :  { %v15387_v0 = vcombine.high %v6637_v36, %v6641_v47  ;;  %v15386_v6 = vcombine.low %v6637_v36, %v6641_v47  ;;  %v6836_v47 = vld [vmem:[%s24306_s14 + $0x710] sm:$0xff] }
 0x59d   :  { %8300 = vmatpush2.bf16.msra.mxu0 %v15566_v9  ;;  %v6760_v9 = vld [vmem:[%s24306_s14 + $0x4b0] sm:$0xff] }
 0x59e   :  { %8341 = vmatpush2.bf16.msra.mxu1 %v15440_v40  ;;  %8301 = vmatprep.subr.bf16.mxu0 %v15559_v53  ;;  %v6629_v40 = vld [vmem:[%s24306_s14 + $0x98] sm:$0xff]  ;;  %v15505_v16 = vcombine.high %v6756_v28, %v6760_v9 }
 0x59f   :  { %8342 = vmatprep.subr.bf16.mxu1 %v15433_v11  ;;  %v6633_v53 = vld [vmem:[%s24306_s14 + $0xb8] sm:$0xff]  ;;  %v15512_v11 = vcombine.low %v6764_v42, %v6768_v17 }
 0x5a0   :  { %v15379_v50 = vcombine.high %v6629_v40, %v6633_v53  ;;  %v15378_v56 = vcombine.low %v6629_v40, %v6633_v53  ;;  %v6828_v53 = vld [vmem:[%s24306_s14 + $0x6d0] sm:$0xff] }
 0x5a1   :  { %8302 = vmatpush2.bf16.msra.mxu0 %v15558_v58  ;;  %v6752_v58 = vld [vmem:[%s24306_s14 + $0x470] sm:$0xff] }
 0x5a2   :  { %8343 = vmatpush2.bf16.msra.mxu1 %v15432_v23  ;;  %8303 = vmatprep.subr.bf16.mxu0 %v15551_v52  ;;  %v6621_v23 = vld [vmem:[%s24306_s14 + $0x58] sm:$0xff]  ;;  %v15497_v21 = vcombine.high %v6748_v35, %v6752_v58 }
 0x5a3   :  { %8344 = vmatprep.subr.bf16.mxu1 %v15425_v19  ;;  %v6625_v52 = vld [vmem:[%s24306_s14 + $0x78] sm:$0xff]  ;;  %v15504_v19 = vcombine.low %v6756_v28, %v6760_v9 }
 0x5a4   :  { %v15371_v3 = vcombine.high %v6621_v23, %v6625_v52  ;;  %v15370_v62 = vcombine.low %v6621_v23, %v6625_v52  ;;  %v6820_v52 = vld [vmem:[%s24306_s14 + $0x690] sm:$0xff] }
 0x5a5   :  { %8304 = vmatpush2.bf16.msra.mxu0 %v15550_v54  ;;  %v6744_v54 = vld [vmem:[%s24306_s14 + $0x430] sm:$0xff] }
 0x5a6   :  { %8345 = vmatpush2.bf16.msra.mxu1 %v15424_v37  ;;  %8355 = vmatprep.subr.bf16.mxu0 %v15545_v46  ;;  %v6613_v37 = vld [vmem:[%s24306_s14 + $0x18] sm:$0xff]  ;;  %v15489_v18 = vcombine.high %v6740_v31, %v6744_v54 }
 0x5a7   :  { %8396 = vmatprep.subr.bf16.mxu1 %v15419_v7  ;;  %v6617_v46 = vld [vmem:[%s24306_s14 + $0x38] sm:$0xff]  ;;  %v15496_v7 = vcombine.low %v6748_v35, %v6752_v58 }
 0x5a8   :  { %8306 = vmatmul.mubr.bf16.vlgmr.msra.gmra.mxu0 %v20957_v44 }
 0x5a9   :  { %8347 = vmatmul.mubr.bf16.vlgmr.msra.gmra.mxu1 %v20845_v25  ;;  %8356 = vmatpush1.bf16.msra.mxu0 %v15544_v60  ;;  %v15363_v60 = vcombine.high %v6613_v37, %v6617_v46 }
 0x5aa   :  { %8387 = vmatprep.mubr.bf16.mxu0 %v20955_v4  ;;  %8397 = vmatpush1.bf16.msra.mxu1 %v15418_v14  ;;  %v6733_v14 = vld [vmem:[%s24306_s14 + $0x3d8] sm:$0xff] }
 0x5ab   :  { %8428 = vmatprep.mubr.bf16.mxu1 %v20843_v10  ;;  %8357 = vmatprep.subr.bf16.mxu0 %v15537_v15  ;;  %v15528_v10 = vcombine.low %v6780_v34, %v6784_v32  ;;  %v6737_v15 = vld [vmem:[%s24306_s14 + $0x3f8] sm:$0xff]  ;;  %v15488_v34 = vcombine.low %v6740_v31, %v6744_v54  ;;  %v15362_v32 = vcombine.low %v6613_v37, %v6617_v46  ;;  %v21310_v31 = vld [vmem:[%s24304_s9] sm:$0xf] }
 0x5ac   :  { %8398 = vmatprep.subr.bf16.mxu1 %v15411_v39  ;;  %v15609_v39 = vcombine.high %v6860_v27, %v6864_v41  ;;  %v15483_v20 = vcombine.high %v6733_v14, %v6737_v15  ;;  %v15482_v2 = vcombine.low %v6733_v14, %v6737_v15  ;;  %v5060_v54 = vrot.slane %v21310_v31, %v20102_v51 }
 0x5ad   :  { %8358 = vmatpush1.bf16.msra.mxu0 %v15536_v13  ;;  %v6856_v13 = vld [vmem:[%s24306_s14 + $0x7b0] sm:$0xff] }
 0x5ae   :  { %8399 = vmatpush1.bf16.msra.mxu1 %v15410_v26  ;;  %8359 = vmatprep.subr.bf16.mxu0 %v15529_v57  ;;  %v6725_v26 = vld [vmem:[%s24306_s14 + $0x398] sm:$0xff]  ;;  %v15601_v33 = vcombine.high %v6852_v55, %v6856_v13 }
 0x5af   :  { %8400 = vmatprep.subr.bf16.mxu1 %v15403_v30  ;;  %v6729_v57 = vld [vmem:[%s24306_s14 + $0x3b8] sm:$0xff]  ;;  %v15608_v30 = vcombine.low %v6860_v27, %v6864_v41  ;;  %v21329_v41 = vld [vmem:[%s24305_s10] sm:$0xf] }
 0x5b0   :  { %v15475_v29 = vcombine.high %v6725_v26, %v6729_v57  ;;  %v15474_v42 = vcombine.low %v6725_v26, %v6729_v57  ;;  %v6689_v27 = vld [vmem:[%s24306_s14 + $0x278] sm:$0xff]  ;;  %v5086_v14 = vrot.slane %v21329_v41, %v20102_v51 }
 0x5b1   :  { %8360 = vmatpush1.bf16.msra.mxu0 %v15528_v10  ;;  %v6848_v10 = vld [vmem:[%s24306_s14 + $0x770] sm:$0xff]  ;;  %v6677_v26 = vld [vmem:[%s24306_s14 + $0x218] sm:$0xff] }
 0x5b2   :  { %8401 = vmatpush1.bf16.msra.mxu1 %v15402_v43  ;;  %8361 = vmatprep.subr.bf16.mxu0 %v15521_v1  ;;  %v6717_v43 = vld [vmem:[%s24306_s14 + $0x358] sm:$0xff]  ;;  %v15593_v17 = vcombine.high %v6844_v24, %v6848_v10 }
 0x5b3   :  { %8402 = vmatprep.subr.bf16.mxu1 %v15395_v48  ;;  %v6721_v1 = vld [vmem:[%s24306_s14 + $0x378] sm:$0xff]  ;;  %v15600_v48 = vcombine.low %v6852_v55, %v6856_v13  ;;  %v6804_v55 = vld [vmem:[%s24306_s14 + $0x610] sm:$0xff] }
 0x5b4   :  { %v15467_v36 = vcombine.high %v6717_v43, %v6721_v1  ;;  %v15466_v28 = vcombine.low %v6717_v43, %v6721_v1  ;;  %v6808_v13 = vld [vmem:[%s24306_s14 + $0x630] sm:$0xff]  ;;  %v6406_v43 = vld [vmem:[%s24307_s13 + $0x1c0] sm:$0xff] }
 0x5b5   :  { %8362 = vmatpush1.bf16.msra.mxu0 %v15520_v45  ;;  %v6840_v45 = vld [vmem:[%s24306_s14 + $0x730] sm:$0xff]  ;;  %v6410_v1 = vld [vmem:[%s24307_s13 + $0x1e0] sm:$0xff] }
 0x5b6   :  { %8403 = vmatpush1.bf16.msra.mxu1 %v15394_v49  ;;  %8363 = vmatprep.subr.bf16.mxu0 %v15513_v61  ;;  %v6709_v49 = vld [vmem:[%s24306_s14 + $0x318] sm:$0xff]  ;;  %v15585_v9 = vcombine.high %v6836_v47, %v6840_v45 }
 0x5b7   :  { %8404 = vmatprep.subr.bf16.mxu1 %v15387_v0  ;;  %v6713_v61 = vld [vmem:[%s24306_s14 + $0x338] sm:$0xff]  ;;  %v15592_v0 = vcombine.low %v6844_v24, %v6848_v10 }
 0x5b8   :  { %v15459_v40 = vcombine.high %v6709_v49, %v6713_v61  ;;  %v15458_v35 = vcombine.low %v6709_v49, %v6713_v61  ;;  %v6797_v24 = vld [vmem:[%s24306_s14 + $0x5d8] sm:$0xff] }
 0x5b9   :  { %8364 = vmatpush1.bf16.msra.mxu0 %v15512_v11  ;;  %v6832_v11 = vld [vmem:[%s24306_s14 + $0x6f0] sm:$0xff]  ;;  %v6801_v10 = vld [vmem:[%s24306_s14 + $0x5f8] sm:$0xff] }
 0x5ba   :  { %8405 = vmatpush1.bf16.msra.mxu1 %v15386_v6  ;;  %8365 = vmatprep.subr.bf16.mxu0 %v15505_v16  ;;  %v6701_v6 = vld [vmem:[%s24306_s14 + $0x2d8] sm:$0xff]  ;;  %v15577_v58 = vcombine.high %v6828_v53, %v6832_v11  ;;  %v15546_v61 = vcombine.low %v6797_v24, %v6801_v10 }
 0x5bb   :  { %8406 = vmatprep.subr.bf16.mxu1 %v15379_v50  ;;  %v6705_v16 = vld [vmem:[%s24306_s14 + $0x2f8] sm:$0xff]  ;;  %v15584_v50 = vcombine.low %v6836_v47, %v6840_v45  ;;  %v15669_v47 = vcombine.high %v6406_v43, %v6410_v1 }
 0x5bc   :  { %v15451_v23 = vcombine.high %v6701_v6, %v6705_v16  ;;  %v15450_v37 = vcombine.low %v6701_v6, %v6705_v16  ;;  %v6789_v45 = vld [vmem:[%s24306_s14 + $0x598] sm:$0xff] }
 0x5bd   :  { %8366 = vmatpush1.bf16.msra.mxu0 %v15504_v19  ;;  %v6824_v19 = vld [vmem:[%s24306_s14 + $0x6b0] sm:$0xff]  ;;  %v6793_v49 = vld [vmem:[%s24306_s14 + $0x5b8] sm:$0xff] }
 0x5be   :  { %8407 = vmatpush1.bf16.msra.mxu1 %v15378_v56  ;;  %8367 = vmatprep.subr.bf16.mxu0 %v15497_v21  ;;  %v6693_v56 = vld [vmem:[%s24306_s14 + $0x298] sm:$0xff]  ;;  %v15569_v46 = vcombine.high %v6820_v52, %v6824_v19  ;;  %v15568_v15 = vcombine.low %v6820_v52, %v6824_v19  ;;  %v15538_v52 = vcombine.low %v6789_v45, %v6793_v49 }
 0x5bf   :  { %8408 = vmatprep.subr.bf16.mxu1 %v15371_v3  ;;  %v6697_v21 = vld [vmem:[%s24306_s14 + $0x2b8] sm:$0xff]  ;;  %v15576_v3 = vcombine.low %v6828_v53, %v6832_v11  ;;  %v15539_v53 = vcombine.high %v6789_v45, %v6793_v49 }
 0x5c0   :  { %v6781_v11 = vld [vmem:[%s24306_s14 + $0x558] sm:$0xff] }
 0x5c1   :  { %8368 = vmatpush1.bf16.msra.mxu0 %v15496_v7  ;;  %v15443_v7 = vcombine.high %v6693_v56, %v6697_v21  ;;  %v6785_v6 = vld [vmem:[%s24306_s14 + $0x578] sm:$0xff] }
 0x5c2   :  { %8409 = vmatpush1.bf16.msra.mxu1 %v15370_v62  ;;  %8369 = vmatprep.subr.bf16.mxu0 %v15489_v18  ;;  %v6812_v62 = vld [vmem:[%s24306_s14 + $0x650] sm:$0xff]  ;;  %v6741_v45 = vld [vmem:[%s24306_s14 + $0x418] sm:$0xff] }
 0x5c3   :  { %8410 = vmatprep.subr.bf16.mxu1 %v15363_v60  ;;  %v6816_v18 = vld [vmem:[%s24306_s14 + $0x670] sm:$0xff]  ;;  %v6685_v60 = vld [vmem:[%s24306_s14 + $0x258] sm:$0xff] }
 0x5c4   :  { %v15560_v57 = vcombine.low %v6812_v62, %v6816_v18  ;;  %v6745_v49 = vld [vmem:[%s24306_s14 + $0x438] sm:$0xff] }
 0x5c5   :  { %8370 = vmatpush1.bf16.msra.mxu0 %v15488_v34  ;;  %v5074_v34 = vmul.f32 %v5060_v54, %v20417_v22  ;;  %v6681_v22 = vld [vmem:[%s24306_s14 + $0x238] sm:$0xff] }
 0x5c6   :  { %8411 = vmatpush1.bf16.msra.mxu1 %v15362_v32  ;;  %8371 = vmatprep.subr.bf16.mxu0 %v15609_v39  ;;  %v15442_v32 = vcombine.low %v6693_v56, %v6697_v21  ;;  %v15561_v39 = vcombine.high %v6812_v62, %v6816_v18  ;;  %v15531_v21 = vcombine.high %v6781_v11, %v6785_v6  ;;  %v6773_v54 = vld [vmem:[%s24306_s14 + $0x518] sm:$0xff] }
 0x5c7   :  { %8412 = vmatprep.subr.bf16.mxu1 %v15483_v20  ;;  %v15435_v20 = vcombine.high %v6685_v60, %v6689_v27 }
 0x5c9   :  { %8372 = vmatpush2.bf16.msra.mxu0 %v15608_v30  ;;  %v5100_v30 = vadd.f32 %v5086_v14, %v5074_v34  ;;  %v6765_v14 = vld [vmem:[%s24306_s14 + $0x4d8] sm:$0xff]  ;;  %v6374_v34 = vld [vmem:[%s24307_s13 + $0xc0] sm:$0xff] }
 0x5ca   :  { %8413 = vmatpush2.bf16.msra.mxu1 %v15482_v2  ;;  %8373 = vmatprep.subr.bf16.mxu0 %v15601_v33  ;;  %v15434_v2 = vcombine.low %v6685_v60, %v6689_v27  ;;  %v15553_v33 = vcombine.high %v6804_v55, %v6808_v13 }
 0x5cb   :  { %8414 = vmatprep.subr.bf16.mxu1 %v15475_v29  ;;  %v15427_v29 = vcombine.high %v6677_v26, %v6681_v22  ;;  %vm5104_vm10 = vcmp.ge.f32.partialorder %v5100_v30, 0.0 }
 0x5cd   :  { %8374 = vmatpush2.bf16.msra.mxu0 %v15600_v48  ;;  %v15552_v48 = vcombine.low %v6804_v55, %v6808_v13 }
 0x5ce   :  { %8415 = vmatpush2.bf16.msra.mxu1 %v15474_v42  ;;  %8375 = vmatprep.subr.bf16.mxu0 %v15593_v17  ;;  %v5108_v42 = vmul.f32 0.01, %v5100_v30  ;;  %v15426_v17 = vcombine.low %v6677_v26, %v6681_v22  ;;  %v6757_v26 = vld [vmem:[%s24306_s14 + $0x498] sm:$0xff] }
 0x5cf   :  { %8416 = vmatprep.subr.bf16.mxu1 %v15467_v36  ;;  %v15547_v36 = vcombine.high %v6797_v24, %v6801_v10  ;;  %v6761_v22 = vld [vmem:[%s24306_s14 + $0x4b8] sm:$0xff] }
 0x5d0   :  { %v6749_v10 = vld [vmem:[%s24306_s14 + $0x458] sm:$0xff] }
 0x5d1   :  { %8376 = vmatpush2.bf16.msra.mxu0 %v15592_v0  ;;  %v6398_v0 = vld [vmem:[%s24307_s13 + $0x180] sm:$0xff] }
 0x5d2   :  { %8417 = vmatpush2.bf16.msra.mxu1 %v15466_v28  ;;  %8377 = vmatprep.subr.bf16.mxu0 %v15585_v9  ;;  %v6402_v28 = vld [vmem:[%s24307_s13 + $0x1a0] sm:$0xff]  ;;  %v5112_v9 = vsel %vm5104_vm10, %v5100_v30, %v5108_v42  ;;  %v15506_v42 = vcombine.low %v6757_v26, %v6761_v22 }
 0x5d3   :  { %8418 = vmatprep.subr.bf16.mxu1 %v15459_v40  ;;  %v15668_v40 = vcombine.low %v6406_v43, %v6410_v1  ;;  %v15660_v56 = vcombine.low %v6398_v0, %v6402_v28  ;;  %v6370_v30 = vld [vmem:[%s24307_s13 + $0xa0] sm:$0xff]  ;;  %v6753_v43 = vld [vmem:[%s24306_s14 + $0x478] sm:$0xff] }
 0x5d4   :  { %v6358_v1 = vld [vmem:[%s24307_s13 + $0x40] sm:$0xff] }
 0x5d5   :  { %8378 = vmatpush2.bf16.msra.mxu0 %v15584_v50  ;;  %v15661_v50 = vcombine.high %v6398_v0, %v6402_v28  ;;  %v6354_v0 = vld [vmem:[%s24307_s13 + $0x20] sm:$0xff]  ;;  %v15498_v28 = vcombine.low %v6749_v10, %v6753_v43 }
 0x5d6   :  { %8419 = vmatpush2.bf16.msra.mxu1 %v15458_v35  ;;  %8379 = vmatprep.subr.bf16.mxu0 %v15577_v58  ;;  %v6390_v35 = vld [vmem:[%s24307_s13 + $0x140] sm:$0xff] }
 0x5d7   :  { %8420 = vmatprep.subr.bf16.mxu1 %v15451_v23  ;;  %v6394_v58 = vld [vmem:[%s24307_s13 + $0x160] sm:$0xff]  ;;  %v21385_v23 = vpack.c.bf16 %v5112_v9, %v5112_v9 }
 0x5d8   :  { %v15652_v18 = vcombine.low %v6390_v35, %v6394_v58 }
 0x5d9   :  { %8380 = vmatpush2.bf16.msra.mxu0 %v15576_v3  ;;  %v15653_v3 = vcombine.high %v6390_v35, %v6394_v58  ;;  %v6474_v35 = vld [vmem:[%s24307_s13 + $0x3e0] sm:$0xff]  ;;  %v15490_v58 = vcombine.low %v6741_v45, %v6745_v49 }
 0x5da   :  { %8421 = vmatpush2.bf16.msra.mxu1 %v15450_v37  ;;  %8381 = vmatprep.subr.bf16.mxu0 %v15569_v46  ;;  %v6386_v46 = vld [vmem:[%s24307_s13 + $0x120] sm:$0xff] }
 0x5db   :  { %8422 = vmatprep.subr.bf16.mxu1 %v15443_v7  ;;  %v15530_v7 = vcombine.low %v6781_v11, %v6785_v6  ;;  %v6861_v11 = vld [vmem:[%s24306_s14 + $0x7d8] sm:$0xff] }
 0x5dc   :  { %v6865_v6 = vld [vmem:[%s24306_s14 + $0x7f8] sm:$0xff] }
 0x5dd   :  { %8382 = vmatpush2.bf16.msra.mxu0 %v15568_v15  ;;  %v6769_v15 = vld [vmem:[%s24306_s14 + $0x4f8] sm:$0xff] }
 0x5de   :  { %8423 = vmatpush2.bf16.msra.mxu1 %v15442_v32  ;;  %8383 = vmatprep.subr.bf16.mxu0 %v15561_v39  ;;  %v6378_v32 = vld [vmem:[%s24307_s13 + $0xe0] sm:$0xff]  ;;  %v15515_v55 = vcombine.high %v6765_v14, %v6769_v15 }
 0x5df   :  { %8424 = vmatprep.subr.bf16.mxu1 %v15435_v20  ;;  %v15637_v13 = vcombine.high %v6374_v34, %v6378_v32 }
 0x5e1   :  { %8384 = vmatpush2.bf16.msra.mxu0 %v15560_v57  ;;  %v6366_v57 = vld [vmem:[%s24307_s13 + $0x80] sm:$0xff] }
 0x5e2   :  { %8425 = vmatpush2.bf16.msra.mxu1 %v15434_v2  ;;  %8385 = vmatprep.subr.bf16.mxu0 %v15553_v33  ;;  %v15514_v2 = vcombine.low %v6765_v14, %v6769_v15  ;;  %v15636_v33 = vcombine.low %v6374_v34, %v6378_v32  ;;  %v15629_v24 = vcombine.high %v6366_v57, %v6370_v30  ;;  %v6458_v14 = vld [vmem:[%s24307_s13 + $0x360] sm:$0xff] }
 0x5e3   :  { %8426 = vmatprep.subr.bf16.mxu1 %v15427_v29  ;;  %v15507_v29 = vcombine.high %v6757_v26, %v6761_v22  ;;  %v6450_v26 = vld [vmem:[%s24307_s13 + $0x320] sm:$0xff] }
 0x5e5   :  { %8386 = vmatpush2.bf16.msra.mxu0 %v15552_v48  ;;  %v6362_v48 = vld [vmem:[%s24307_s13 + $0x60] sm:$0xff] }
 0x5e6   :  { %8427 = vmatpush2.bf16.msra.mxu1 %v15426_v17  ;;  %8437 = vmatprep.subr.bf16.mxu0 %v15547_v36  ;;  %v15628_v17 = vcombine.low %v6366_v57, %v6370_v30  ;;  %v15499_v36 = vcombine.high %v6749_v10, %v6753_v43  ;;  %v15620_v9 = vcombine.low %v6358_v1, %v6362_v48  ;;  %v6442_v10 = vld [vmem:[%s24307_s13 + $0x2e0] sm:$0xff]  ;;  %v21513_v43 = vsub.s32 3, %v20093_v38 }
 0x5e7   :  { %9758 = vmatprep.subr.bf16.mxu1 %v15669_v47  ;;  %v15621_v47 = vcombine.high %v6358_v1, %v6362_v48 }
 0x5e8   :  { %8388 = vmatmul.mubr.bf16.vlgmr.msra.gmra.mxu0 %v20957_v44  ;;  %v21377_v16 = vpop.f32.mrf.mxu1 }
 0x5e9   :  { %8429 = vmatmul.mubr.bf16.vlgmr.msra.gmra.mxu1 %v20845_v25  ;;  %8438 = vmatpush1.bf16.msra.mxu0 %v15546_v61  ;;  %v6777_v25 = vld [vmem:[%s24306_s14 + $0x538] sm:$0xff]  ;;  %v6350_v61 = vld [vmem:[%s24307_s13] sm:$0xff] }
 0x5ea   :  { %8469 = vmatprep.mubr.bf16.mxu0 %v20955_v4  ;;  %9759 = vmatpush1.bf16.msra.mxu1 %v15668_v40  ;;  %v21389_v19 = vpop.f32.mrf.mxu1  ;;  %v6382_v4 = vld [vmem:[%s24307_s13 + $0x100] sm:$0xff]  ;;  %v15523_v60 = vcombine.high %v6773_v54, %v6777_v25  ;;  %v15522_v39 = vcombine.low %v6773_v54, %v6777_v25  ;;  %v15491_v40 = vcombine.high %v6741_v45, %v6745_v49  ;;  %v6857_v54 = vld [vmem:[%s24306_s14 + $0x7b8] sm:$0xff] }
 0x5eb   :  { %9790 = vmatprep.mubr.bf16.mxu1 %v21385_v23  ;;  %8439 = vmatprep.subr.bf16.mxu0 %v15539_v53  ;;  %v15645_v27 = vcombine.high %v6382_v4, %v6386_v46  ;;  %v15644_v20 = vcombine.low %v6382_v4, %v6386_v46  ;;  %v15613_v53 = vcombine.high %v6350_v61, %v6354_v0  ;;  %v6462_v25 = vld [vmem:[%s24307_s13 + $0x380] sm:$0xff] }
 0x5ec   :  { %9760 = vmatprep.subr.bf16.mxu1 %v15661_v50  ;;  %v8188_v37 = vpop.f32.mrf.mxu1  ;;  %v6470_v50 = vld [vmem:[%s24307_s13 + $0x3c0] sm:$0xff]  ;;  %v15610_v4 = vcombine.low %v6861_v11, %v6865_v6  ;;  %v5056_v45 = vrot.slane %v21310_v31, %v20096_v8 }
 0x5ed   :  { %8440 = vmatpush1.bf16.msra.mxu0 %v15538_v52  ;;  %v15612_v52 = vcombine.low %v6350_v61, %v6354_v0  ;;  %v6466_v37 = vld [vmem:[%s24307_s13 + $0x3a0] sm:$0xff]  ;;  %v15732_v46 = vcombine.low %v6470_v50, %v6474_v35  ;;  %v5068_v0 = vrot.slane %v21310_v31, %v21513_v43  ;;  %v5082_v31 = vrot.slane %v21329_v41, %v20096_v8 }
 0x5ee   :  { %9761 = vmatpush1.bf16.msra.mxu1 %v15660_v56  ;;  %v8189_v62 = vpop.f32.mrf.mxu1  ;;  %8441 = vmatprep.subr.bf16.mxu0 %v15531_v21  ;;  %v15611_v56 = vcombine.high %v6861_v11, %v6865_v6  ;;  %v15733_v21 = vcombine.high %v6470_v50, %v6474_v35  ;;  %v15724_v34 = vcombine.low %v6462_v25, %v6466_v37  ;;  %v6430_v49 = vld [vmem:[%s24307_s13 + $0x280] sm:$0xff]  ;;  %v6813_v11 = vld [vmem:[%s24306_s14 + $0x658] sm:$0xff] }
 0x5ef   :  { %9762 = vmatprep.subr.bf16.mxu1 %v15653_v3  ;;  %v6853_v3 = vld [vmem:[%s24306_s14 + $0x798] sm:$0xff]  ;;  %v15725_v62 = vcombine.high %v6462_v25, %v6466_v37  ;;  %v6434_v61 = vld [vmem:[%s24307_s13 + $0x2a0] sm:$0xff]  ;;  %v5073_v50 = vmul.f32 %v5056_v45, %v20415_v59 }
 0x5f0   :  { %v15602_v15 = vcombine.low %v6853_v3, %v6857_v54  ;;  %v6817_v6 = vld [vmem:[%s24306_s14 + $0x678] sm:$0xff]  ;;  %v6422_v35 = vld [vmem:[%s24307_s13 + $0x240] sm:$0xff]  ;;  %v15692_v59 = vcombine.low %v6430_v49, %v6434_v61 }
 0x5f1   :  { %8442 = vmatpush1.bf16.msra.mxu0 %v15530_v7  ;;  %v15603_v7 = vcombine.high %v6853_v3, %v6857_v54  ;;  %v15563_v3 = vcombine.high %v6813_v11, %v6817_v6  ;;  %v6805_v25 = vld [vmem:[%s24306_s14 + $0x618] sm:$0xff] }
 0x5f2   :  { %9763 = vmatpush1.bf16.msra.mxu1 %v15652_v18  ;;  %8443 = vmatprep.subr.bf16.mxu0 %v15523_v60  ;;  %v6845_v18 = vld [vmem:[%s24306_s14 + $0x758] sm:$0xff] }
 0x5f3   :  { %9764 = vmatprep.subr.bf16.mxu1 %v15645_v27  ;;  %v6849_v60 = vld [vmem:[%s24306_s14 + $0x778] sm:$0xff]  ;;  %v6454_v27 = vld [vmem:[%s24307_s13 + $0x340] sm:$0xff] }
 0x5f4   :  { %v15595_v32 = vcombine.high %v6845_v18, %v6849_v60  ;;  %v15594_v22 = vcombine.low %v6845_v18, %v6849_v60  ;;  %v15716_v57 = vcombine.low %v6454_v27, %v6458_v14  ;;  %v6809_v37 = vld [vmem:[%s24306_s14 + $0x638] sm:$0xff] }
 0x5f5   :  { %8444 = vmatpush1.bf16.msra.mxu0 %v15522_v39  ;;  %v15717_v39 = vcombine.high %v6454_v27, %v6458_v14  ;;  %v15555_v18 = vcombine.high %v6805_v25, %v6809_v37  ;;  %v6534_v27 = vld [vmem:[%s24307_s13 + $0x5c0] sm:$0xff] }
 0x5f6   :  { %9765 = vmatpush1.bf16.msra.mxu1 %v15644_v20  ;;  %8445 = vmatprep.subr.bf16.mxu0 %v15515_v55  ;;  %v6837_v20 = vld [vmem:[%s24306_s14 + $0x718] sm:$0xff]  ;;  %v6538_v14 = vld [vmem:[%s24307_s13 + $0x5e0] sm:$0xff] }
 0x5f7   :  { %9766 = vmatprep.subr.bf16.mxu1 %v15637_v13  ;;  %v6841_v55 = vld [vmem:[%s24306_s14 + $0x738] sm:$0xff]  ;;  %v6446_v13 = vld [vmem:[%s24307_s13 + $0x300] sm:$0xff] }
 0x5f8   :  { %v15587_v30 = vcombine.high %v6837_v20, %v6841_v55  ;;  %v15586_v1 = vcombine.low %v6837_v20, %v6841_v55  ;;  %v15708_v48 = vcombine.low %v6446_v13, %v6450_v26  ;;  %v15554_v20 = vcombine.low %v6805_v25, %v6809_v37  ;;  %v6502_v37 = vld [vmem:[%s24307_s13 + $0x4c0] sm:$0xff] }
 0x5f9   :  { %8446 = vmatpush1.bf16.msra.mxu0 %v15514_v2  ;;  %v15709_v2 = vcombine.high %v6446_v13, %v6450_v26  ;;  %v15797_v13 = vcombine.high %v6534_v27, %v6538_v14 }
 0x5fa   :  { %9767 = vmatpush1.bf16.msra.mxu1 %v15636_v33  ;;  %8447 = vmatprep.subr.bf16.mxu0 %v15507_v29  ;;  %v6829_v33 = vld [vmem:[%s24306_s14 + $0x6d8] sm:$0xff] }
 0x5fb   :  { %9768 = vmatprep.subr.bf16.mxu1 %v15629_v24  ;;  %v6833_v29 = vld [vmem:[%s24306_s14 + $0x6f8] sm:$0xff]  ;;  %v6438_v24 = vld [vmem:[%s24307_s13 + $0x2c0] sm:$0xff] }
 0x5fd   :  { %8448 = vmatpush1.bf16.msra.mxu0 %v15506_v42  ;;  %v15579_v42 = vcombine.high %v6829_v33, %v6833_v29 }
 0x5fe   :  { %9769 = vmatpush1.bf16.msra.mxu1 %v15628_v17  ;;  %8449 = vmatprep.subr.bf16.mxu0 %v15499_v36  ;;  %v15701_v17 = vcombine.high %v6438_v24, %v6442_v10  ;;  %v6821_v36 = vld [vmem:[%s24306_s14 + $0x698] sm:$0xff] }
 0x5ff   :  { %9770 = vmatprep.subr.bf16.mxu1 %v15621_v47  ;;  %v6825_v47 = vld [vmem:[%s24306_s14 + $0x6b8] sm:$0xff] }
 0x601   :  { %8450 = vmatpush1.bf16.msra.mxu0 %v15498_v28  ;;  %v15578_v28 = vcombine.low %v6829_v33, %v6833_v29  ;;  %v15796_v33 = vcombine.low %v6534_v27, %v6538_v14  ;;  %v6399_v29 = vld [vmem:[%s24307_s13 + $0x188] sm:$0xff]  ;;  %v6498_v27 = vld [vmem:[%s24307_s13 + $0x4a0] sm:$0xff] }
 0x602   :  { %9771 = vmatpush1.bf16.msra.mxu1 %v15620_v9  ;;  %8451 = vmatprep.subr.bf16.mxu0 %v15491_v40  ;;  %v15700_v9 = vcombine.low %v6438_v24, %v6442_v10  ;;  %v15571_v40 = vcombine.high %v6821_v36, %v6825_v47  ;;  %v6403_v24 = vld [vmem:[%s24307_s13 + $0x1a8] sm:$0xff] }
 0x603   :  { %9772 = vmatprep.subr.bf16.mxu1 %v15613_v53  ;;  %v15693_v53 = vcombine.high %v6430_v49, %v6434_v61  ;;  %v15663_v49 = vcombine.high %v6399_v29, %v6403_v24  ;;  %v6391_v61 = vld [vmem:[%s24307_s13 + $0x148] sm:$0xff] }
 0x604   :  { %v6367_v14 = vld [vmem:[%s24307_s13 + $0x88] sm:$0xff] }
 0x605   :  { %8452 = vmatpush1.bf16.msra.mxu0 %v15490_v58  ;;  %v6426_v58 = vld [vmem:[%s24307_s13 + $0x260] sm:$0xff] }
 0x606   :  { %9773 = vmatpush1.bf16.msra.mxu1 %v15612_v52  ;;  %8453 = vmatprep.subr.bf16.mxu0 %v15611_v56  ;;  %v5076_v52 = vmul.f32 %v5068_v0, %v20419_v12  ;;  %v5094_v56 = vrot.slane %v21329_v41, %v21513_v43  ;;  %v15685_v54 = vcombine.high %v6422_v35, %v6426_v58  ;;  %v6414_v41 = vld [vmem:[%s24307_s13 + $0x200] sm:$0xff]  ;;  %v6395_v0 = vld [vmem:[%s24307_s13 + $0x168] sm:$0xff] }
 0x607   :  { %9774 = vmatprep.subr.bf16.mxu1 %v15733_v21  ;;  %v15570_v21 = vcombine.low %v6821_v36, %v6825_v47  ;;  %v5099_v12 = vadd.f32 %v5082_v31, %v5073_v50  ;;  %v6510_v50 = vld [vmem:[%s24307_s13 + $0x500] sm:$0xff] }
 0x608   :  { %v6514_v31 = vld [vmem:[%s24307_s13 + $0x520] sm:$0xff] }
 0x609   :  { %8454 = vmatpush2.bf16.msra.mxu0 %v15610_v4  ;;  %v6418_v4 = vld [vmem:[%s24307_s13 + $0x220] sm:$0xff]  ;;  %vm5103_vm11 = vcmp.ge.f32.partialorder %v5099_v12, 0.0 }
 0x60a   :  { %9775 = vmatpush2.bf16.msra.mxu1 %v15732_v46  ;;  %8455 = vmatprep.subr.bf16.mxu0 %v15603_v7  ;;  %v5102_v46 = vadd.f32 %v5094_v56, %v5076_v52  ;;  %v15562_v7 = vcombine.low %v6813_v11, %v6817_v6  ;;  %v15677_v60 = vcombine.high %v6414_v41, %v6418_v4  ;;  %v6383_v52 = vld [vmem:[%s24307_s13 + $0x108] sm:$0xff] }
 0x60b   :  { %9776 = vmatprep.subr.bf16.mxu1 %v15725_v62  ;;  %v15684_v62 = vcombine.low %v6422_v35, %v6426_v58  ;;  %v15676_v55 = vcombine.low %v6414_v41, %v6418_v4  ;;  %v6375_v41 = vld [vmem:[%s24307_s13 + $0xc8] sm:$0xff] }
 0x60c   :  { %vm5106_vm12 = vcmp.ge.f32.partialorder %v5102_v46, 0.0  ;;  %v6379_v4 = vld [vmem:[%s24307_s13 + $0xe8] sm:$0xff] }
 0x60d   :  { %8456 = vmatpush2.bf16.msra.mxu0 %v15602_v15  ;;  %v5107_v15 = vmul.f32 0.01, %v5099_v12 }
 0x60e   :  { %9777 = vmatpush2.bf16.msra.mxu1 %v15724_v34  ;;  %8457 = vmatprep.subr.bf16.mxu0 %v15595_v32  ;;  %v6407_v34 = vld [vmem:[%s24307_s13 + $0x1c8] sm:$0xff] }
 0x60f   :  { %9778 = vmatprep.subr.bf16.mxu1 %v15717_v39  ;;  %v6411_v32 = vld [vmem:[%s24307_s13 + $0x1e8] sm:$0xff]  ;;  %v5110_v39 = vmul.f32 0.01, %v5102_v46 }
 0x610   :  { %v15671_v26 = vcombine.high %v6407_v34, %v6411_v32  ;;  %v15670_v10 = vcombine.low %v6407_v34, %v6411_v32  ;;  %v15638_v32 = vcombine.low %v6375_v41, %v6379_v4 }
 0x611   :  { %8458 = vmatpush2.bf16.msra.mxu0 %v15594_v22  ;;  %v5111_v22 = vsel %vm5103_vm11, %v5099_v12, %v5107_v15  ;;  %v6506_v12 = vld [vmem:[%s24307_s13 + $0x4e0] sm:$0xff]  ;;  %v6371_v15 = vld [vmem:[%s24307_s13 + $0xa8] sm:$0xff] }
 0x612   :  { %9779 = vmatpush2.bf16.msra.mxu1 %v15716_v57  ;;  %8459 = vmatprep.subr.bf16.mxu0 %v15587_v30  ;;  %v6526_v57 = vld [vmem:[%s24307_s13 + $0x580] sm:$0xff]  ;;  %v15764_v34 = vcombine.low %v6502_v37, %v6506_v12 }
 0x613   :  { %9780 = vmatprep.subr.bf16.mxu1 %v15709_v2  ;;  %v6530_v30 = vld [vmem:[%s24307_s13 + $0x5a0] sm:$0xff]  ;;  %v5114_v2 = vsel %vm5106_vm12, %v5102_v46, %v5110_v39  ;;  %v15772_v46 = vcombine.low %v6510_v50, %v6514_v31 }
 0x614   :  { %v21593_v36 = vpack.c.bf16 %v5114_v2, %v5114_v2 }
 0x615   :  { %8460 = vmatpush2.bf16.msra.mxu0 %v15586_v1  ;;  %v21585_v1 = vpack.c.bf16 %v5111_v22, %v5111_v22  ;;  %v6363_v22 = vld [vmem:[%s24307_s13 + $0x68] sm:$0xff] }
 0x616   :  { %9781 = vmatpush2.bf16.msra.mxu1 %v15708_v48  ;;  %8461 = vmatprep.subr.bf16.mxu0 %v15579_v42  ;;  %v15789_v48 = vcombine.high %v6526_v57, %v6530_v30  ;;  %v6518_v42 = vld [vmem:[%s24307_s13 + $0x540] sm:$0xff] }
 0x617   :  { %9782 = vmatprep.subr.bf16.mxu1 %v15701_v17  ;;  %v6522_v17 = vld [vmem:[%s24307_s13 + $0x560] sm:$0xff] }
 0x618   :  { %v15781_v11 = vcombine.high %v6518_v42, %v6522_v17  ;;  %v15780_v56 = vcombine.low %v6518_v42, %v6522_v17 }
 0x619   :  { %8462 = vmatpush2.bf16.msra.mxu0 %v15578_v28 }
 0x61a   :  { %9783 = vmatpush2.bf16.msra.mxu1 %v15700_v9  ;;  %8463 = vmatprep.subr.bf16.mxu0 %v15571_v40  ;;  %v15788_v9 = vcombine.low %v6526_v57, %v6530_v30  ;;  %v15630_v30 = vcombine.low %v6367_v14, %v6371_v15 }
 0x61b   :  { %9784 = vmatprep.subr.bf16.mxu1 %v15693_v53  ;;  %v15662_v53 = vcombine.low %v6399_v29, %v6403_v24  ;;  %v6478_v29 = vld [vmem:[%s24307_s13 + $0x400] sm:$0xff] }
 0x61c   :  { %v6482_v24 = vld [vmem:[%s24307_s13 + $0x420] sm:$0xff] }
 0x61d   :  { %8464 = vmatpush2.bf16.msra.mxu0 %v15570_v21 }
 0x61e   :  { %9785 = vmatpush2.bf16.msra.mxu1 %v15692_v59  ;;  %8465 = vmatprep.subr.bf16.mxu0 %v15563_v3  ;;  %v15654_v3 = vcombine.low %v6391_v61, %v6395_v0 }
 0x61f   :  { %9786 = vmatprep.subr.bf16.mxu1 %v15685_v54  ;;  %v15773_v54 = vcombine.high %v6510_v50, %v6514_v31  ;;  %v6590_v31 = vld [vmem:[%s24307_s13 + $0x780] sm:$0xff] }
 0x621   :  { %8466 = vmatpush2.bf16.msra.mxu0 %v15562_v7 }
 0x622   :  { %9787 = vmatpush2.bf16.msra.mxu1 %v15684_v62  ;;  %8467 = vmatprep.subr.bf16.mxu0 %v15555_v18  ;;  %v15765_v62 = vcombine.high %v6502_v37, %v6506_v12  ;;  %v15639_v18 = vcombine.high %v6375_v41, %v6379_v4  ;;  %v6459_v37 = vld [vmem:[%s24307_s13 + $0x368] sm:$0xff] }
 0x623   :  { %9788 = vmatprep.subr.bf16.mxu1 %v15677_v60  ;;  %v6494_v60 = vld [vmem:[%s24307_s13 + $0x480] sm:$0xff] }
 0x624   :  { %v15757_v39 = vcombine.high %v6494_v60, %v6498_v27  ;;  %v15756_v57 = vcombine.low %v6494_v60, %v6498_v27  ;;  %v6451_v60 = vld [vmem:[%s24307_s13 + $0x328] sm:$0xff] }
 0x625   :  { %8468 = vmatpush2.bf16.msra.mxu0 %v15554_v20  ;;  %v15631_v20 = vcombine.high %v6367_v14, %v6371_v15 }
 0x626   :  { %9789 = vmatpush2.bf16.msra.mxu1 %v15676_v55  ;;  %9799 = vmatprep.subr.bf16.mxu0 %v15797_v13  ;;  %v6486_v55 = vld [vmem:[%s24307_s13 + $0x440] sm:$0xff] }
 0x627   :  { %9840 = vmatprep.subr.bf16.mxu1 %v15671_v26  ;;  %v6490_v13 = vld [vmem:[%s24307_s13 + $0x460] sm:$0xff]  ;;  %v6359_v26 = vld [vmem:[%s24307_s13 + $0x48] sm:$0xff] }
 0x628   :  { %8470 = vmatmul.mubr.bf16.vlgmr.msra.gmra.mxu0 %v20957_v44  ;;  %v8225_v47 = vpop.f32.mrf.mxu0  ;;  %v21596_v45 = vpop.f32.mrf.mxu1  ;;  %v15749_v2 = vcombine.high %v6486_v55, %v6490_v13  ;;  %v15748_v42 = vcombine.low %v6486_v55, %v6490_v13  ;;  %v15622_v17 = vcombine.low %v6359_v26, %v6363_v22  ;;  %v6443_v55 = vld [vmem:[%s24307_s13 + $0x2e8] sm:$0xff] }
 0x629   :  { %v21605_v28 = vadd.f32 %v8225_v47, %v21377_v16  ;;  %9791 = vmatmul.mubr.bf16.vlgmr.msra.gmra.mxu1 %v21585_v1  ;;  %9800 = vmatpush1.bf16.msra.mxu0 %v15796_v33  ;;  %v15655_v16 = vcombine.high %v6391_v61, %v6395_v0  ;;  %v15623_v33 = vcombine.high %v6359_v26, %v6363_v22  ;;  %v6598_v61 = vld [vmem:[%s24307_s13 + $0x7c0] sm:$0xff] }
 0x62a   :  { %9831 = vmatprep.mubr.bf16.mxu0 %v21593_v36  ;;  %9841 = vmatpush1.bf16.msra.mxu1 %v15670_v10  ;;  %v8227_v44 = vpop.f32.mrf.mxu0  ;;  %v21609_v40 = vpop.f32.mrf.mxu1  ;;  %v6351_v10 = vld [vmem:[%s24307_s13 + $0x8] sm:$0xff]  ;;  %v15741_v47 = vcombine.high %v6478_v29, %v6482_v24  ;;  %v6602_v0 = vld [vmem:[%s24307_s13 + $0x7e0] sm:$0xff] }
 0x62b   :  { %9872 = vmatprep.mubr.bf16.mxu1 %v21385_v23  ;;  %v21613_v6 = vadd.f32 %v8227_v44, %v21389_v19  ;;  %9801 = vmatprep.subr.bf16.mxu0 %v15789_v48  ;;  %v6387_v19 = vld [vmem:[%s24307_s13 + $0x128] sm:$0xff] }
 0x62c   :  { %v8229_v35 = vpop.f32.mrf.mxu0  ;;  %v8270_v58 = vpop.f32.mrf.mxu1  ;;  %9842 = vmatprep.subr.bf16.mxu1 %v15663_v49  ;;  %v15647_v25 = vcombine.high %v6383_v52, %v6387_v19  ;;  %v15646_v7 = vcombine.low %v6383_v52, %v6387_v19  ;;  %v6355_v48 = vld [vmem:[%s24307_s13 + $0x28] sm:$0xff]  ;;  %v15860_v19 = vcombine.low %v6598_v61, %v6602_v0 }
 0x62d   :  { %9802 = vmatpush1.bf16.msra.mxu0 %v15788_v9  ;;  %v15615_v49 = vcombine.high %v6351_v10, %v6355_v48  ;;  %v6471_v9 = vld [vmem:[%s24307_s13 + $0x3c8] sm:$0xff]  ;;  %v6594_v35 = vld [vmem:[%s24307_s13 + $0x7a0] sm:$0xff] }
 0x62e   :  { %9843 = vmatpush1.bf16.msra.mxu1 %v15662_v53  ;;  %v8230_v21 = vpop.f32.mrf.mxu0  ;;  %v8271_v59 = vpop.f32.mrf.mxu1  ;;  %9803 = vmatprep.subr.bf16.mxu0 %v15781_v11  ;;  %v6475_v44 = vld [vmem:[%s24307_s13 + $0x3e8] sm:$0xff]  ;;  %v15740_v53 = vcombine.low %v6478_v29, %v6482_v24  ;;  %v15614_v11 = vcombine.low %v6351_v10, %v6355_v48  ;;  %v15852_v12 = vcombine.low %v6590_v31, %v6594_v35 }
 0x62f   :  { %9844 = vmatprep.subr.bf16.mxu1 %v15655_v16  ;;  %v15861_v16 = vcombine.high %v6598_v61, %v6602_v0  ;;  %v15735_v50 = vcombine.high %v6471_v9, %v6475_v44  ;;  %v6463_v58 = vld [vmem:[%s24307_s13 + $0x388] sm:$0xff]  ;;  %v15853_v21 = vcombine.high %v6590_v31, %v6594_v35 }
 0x630   :  { %v6467_v52 = vld [vmem:[%s24307_s13 + $0x3a8] sm:$0xff] }
 0x631   :  { %9804 = vmatpush1.bf16.msra.mxu0 %v15780_v56  ;;  %v15734_v56 = vcombine.low %v6471_v9, %v6475_v44  ;;  %v15727_v59 = vcombine.high %v6463_v58, %v6467_v52  ;;  %v15726_v41 = vcombine.low %v6463_v58, %v6467_v52  ;;  %v6435_v29 = vld [vmem:[%s24307_s13 + $0x2a8] sm:$0xff] }
 0x632   :  { %9845 = vmatpush1.bf16.msra.mxu1 %v15654_v3  ;;  %9805 = vmatprep.subr.bf16.mxu0 %v15773_v54  ;;  %v6582_v3 = vld [vmem:[%s24307_s13 + $0x740] sm:$0xff]  ;;  %v6427_v61 = vld [vmem:[%s24307_s13 + $0x268] sm:$0xff] }
 0x633   :  { %9846 = vmatprep.subr.bf16.mxu1 %v15647_v25  ;;  %v6586_v54 = vld [vmem:[%s24307_s13 + $0x760] sm:$0xff]  ;;  %v6455_v25 = vld [vmem:[%s24307_s13 + $0x348] sm:$0xff] }
 0x634   :  { %v15845_v4 = vcombine.high %v6582_v3, %v6586_v54  ;;  %v15844_v27 = vcombine.low %v6582_v3, %v6586_v54  ;;  %v15718_v14 = vcombine.low %v6455_v25, %v6459_v37  ;;  %v6419_v31 = vld [vmem:[%s24307_s13 + $0x228] sm:$0xff]  ;;  %v6408_v3 = vld [vmem:[%s24307_s13 + $0x1d0] sm:$0xff] }
 0x635   :  { %9806 = vmatpush1.bf16.msra.mxu0 %v15772_v46  ;;  %v15719_v46 = vcombine.high %v6455_v25, %v6459_v37  ;;  %v6412_v54 = vld [vmem:[%s24307_s13 + $0x1f0] sm:$0xff] }
 0x636   :  { %9847 = vmatpush1.bf16.msra.mxu1 %v15646_v7  ;;  %9807 = vmatprep.subr.bf16.mxu0 %v15765_v62  ;;  %v6574_v7 = vld [vmem:[%s24307_s13 + $0x700] sm:$0xff] }
 0x637   :  { %9848 = vmatprep.subr.bf16.mxu1 %v15639_v18  ;;  %v6578_v62 = vld [vmem:[%s24307_s13 + $0x720] sm:$0xff]  ;;  %v6447_v18 = vld [vmem:[%s24307_s13 + $0x308] sm:$0xff] }
 0x638   :  { %v15837_v15 = vcombine.high %v6574_v7, %v6578_v62  ;;  %v15836_v13 = vcombine.low %v6574_v7, %v6578_v62  ;;  %v15710_v26 = vcombine.low %v6447_v18, %v6451_v60  ;;  %v6531_v7 = vld [vmem:[%s24307_s13 + $0x5a8] sm:$0xff] }
 0x639   :  { %9808 = vmatpush1.bf16.msra.mxu0 %v15764_v34  ;;  %v15711_v34 = vcombine.high %v6447_v18, %v6451_v60  ;;  %v6400_v18 = vld [vmem:[%s24307_s13 + $0x190] sm:$0xff] }
 0x63a   :  { %9849 = vmatpush1.bf16.msra.mxu1 %v15638_v32  ;;  %9809 = vmatprep.subr.bf16.mxu0 %v15757_v39  ;;  %v6566_v32 = vld [vmem:[%s24307_s13 + $0x6c0] sm:$0xff] }
 0x63b   :  { %9850 = vmatprep.subr.bf16.mxu1 %v15631_v20  ;;  %v6570_v39 = vld [vmem:[%s24307_s13 + $0x6e0] sm:$0xff]  ;;  %v6439_v20 = vld [vmem:[%s24307_s13 + $0x2c8] sm:$0xff] }
 0x63c   :  { %v15829_v22 = vcombine.high %v6566_v32, %v6570_v39  ;;  %v15828_v24 = vcombine.low %v6566_v32, %v6570_v39  ;;  %v15702_v10 = vcombine.low %v6439_v20, %v6443_v55 }
 0x63d   :  { %9810 = vmatpush1.bf16.msra.mxu0 %v15756_v57  ;;  %v15703_v57 = vcombine.high %v6439_v20, %v6443_v55  ;;  %v6392_v20 = vld [vmem:[%s24307_s13 + $0x150] sm:$0xff] }
 0x63e   :  { %9851 = vmatpush1.bf16.msra.mxu1 %v15630_v30  ;;  %9811 = vmatprep.subr.bf16.mxu0 %v15749_v2  ;;  %v6558_v30 = vld [vmem:[%s24307_s13 + $0x680] sm:$0xff]  ;;  %v6396_v55 = vld [vmem:[%s24307_s13 + $0x170] sm:$0xff] }
 0x63f   :  { %9852 = vmatprep.subr.bf16.mxu1 %v15623_v33  ;;  %v6562_v2 = vld [vmem:[%s24307_s13 + $0x6a0] sm:$0xff]  ;;  %v6431_v33 = vld [vmem:[%s24307_s13 + $0x288] sm:$0xff] }
 0x640   :  { %v15821_v48 = vcombine.high %v6558_v30, %v6562_v2  ;;  %v15820_v0 = vcombine.low %v6558_v30, %v6562_v2  ;;  %v15694_v9 = vcombine.low %v6431_v33, %v6435_v29 }
 0x641   :  { %9812 = vmatpush1.bf16.msra.mxu0 %v15748_v42  ;;  %v15695_v42 = vcombine.high %v6431_v33, %v6435_v29 }
 0x642   :  { %9853 = vmatpush1.bf16.msra.mxu1 %v15622_v17  ;;  %9813 = vmatprep.subr.bf16.mxu0 %v15741_v47  ;;  %v6550_v17 = vld [vmem:[%s24307_s13 + $0x640] sm:$0xff] }
 0x643   :  { %9854 = vmatprep.subr.bf16.mxu1 %v15615_v49  ;;  %v6554_v47 = vld [vmem:[%s24307_s13 + $0x660] sm:$0xff]  ;;  %v6423_v49 = vld [vmem:[%s24307_s13 + $0x248] sm:$0xff] }
 0x644   :  { %v15813_v44 = vcombine.high %v6550_v17, %v6554_v47  ;;  %v15812_v35 = vcombine.low %v6550_v17, %v6554_v47  ;;  %v15686_v58 = vcombine.low %v6423_v49, %v6427_v61 }
 0x645   :  { %9814 = vmatpush1.bf16.msra.mxu0 %v15740_v53  ;;  %v15687_v53 = vcombine.high %v6423_v49, %v6427_v61  ;;  %v15656_v61 = vcombine.low %v6392_v20, %v6396_v55 }
 0x646   :  { %9855 = vmatpush1.bf16.msra.mxu1 %v15614_v11  ;;  %9815 = vmatprep.subr.bf16.mxu0 %v15861_v16  ;;  %v6542_v11 = vld [vmem:[%s24307_s13 + $0x600] sm:$0xff] }
 0x647   :  { %9856 = vmatprep.subr.bf16.mxu1 %v15735_v50  ;;  %v6546_v16 = vld [vmem:[%s24307_s13 + $0x620] sm:$0xff]  ;;  %v6415_v50 = vld [vmem:[%s24307_s13 + $0x208] sm:$0xff] }
 0x648   :  { %v15805_v52 = vcombine.high %v6542_v11, %v6546_v16  ;;  %v15804_v25 = vcombine.low %v6542_v11, %v6546_v16  ;;  %v15678_v37 = vcombine.low %v6415_v50, %v6419_v31  ;;  %v6507_v11 = vld [vmem:[%s24307_s13 + $0x4e8] sm:$0xff]  ;;  %v6376_v16 = vld [vmem:[%s24307_s13 + $0xd0] sm:$0xff] }
 0x649   :  { %9816 = vmatpush2.bf16.msra.mxu0 %v15860_v19  ;;  %v5109_v19 = vmul.f32 0.01, %v20421_v63 }
 0x64a   :  { %9857 = vmatpush2.bf16.msra.mxu1 %v15734_v56  ;;  %9817 = vmatprep.subr.bf16.mxu0 %v15853_v21  ;;  %v15679_v56 = vcombine.high %v6415_v50, %v6419_v31  ;;  %v6535_v21 = vld [vmem:[%s24307_s13 + $0x5c8] sm:$0xff]  ;;  %v6380_v50 = vld [vmem:[%s24307_s13 + $0xf0] sm:$0xff] }
 0x64b   :  { %9858 = vmatprep.subr.bf16.mxu1 %v15727_v59  ;;  %v6539_v59 = vld [vmem:[%s24307_s13 + $0x5e8] sm:$0xff] }
 0x64c   :  { %v15798_v62 = vcombine.low %v6535_v21, %v6539_v59 }
 0x64d   :  { %9818 = vmatpush2.bf16.msra.mxu0 %v15852_v12  ;;  %v15799_v12 = vcombine.high %v6535_v21, %v6539_v59  ;;  %v6368_v21 = vld [vmem:[%s24307_s13 + $0x90] sm:$0xff] }
 0x64e   :  { %9859 = vmatpush2.bf16.msra.mxu1 %v15726_v41  ;;  %9819 = vmatprep.subr.bf16.mxu0 %v15845_v4  ;;  %v5113_v41 = vsel %vm5105_vm13, %v20421_v63, %v5109_v19  ;;  %v15673_v4 = vcombine.high %v6408_v3, %v6412_v54  ;;  %v6404_v63 = vld [vmem:[%s24307_s13 + $0x1b0] sm:$0xff]  ;;  %v6495_v19 = vld [vmem:[%s24307_s13 + $0x488] sm:$0xff] }
 0x64f   :  { %9860 = vmatprep.subr.bf16.mxu1 %v15719_v46  ;;  %v6527_v46 = vld [vmem:[%s24307_s13 + $0x588] sm:$0xff]  ;;  %v21798_v60 = vpack.c.bf16 %v5113_v41, %v5113_v41  ;;  %v15665_v39 = vcombine.high %v6400_v18, %v6404_v63  ;;  %v15664_v30 = vcombine.low %v6400_v18, %v6404_v63  ;;  %v6372_v59 = vld [vmem:[%s24307_s13 + $0xb0] sm:$0xff] }
 0x650   :  { %v6491_v41 = vld [vmem:[%s24307_s13 + $0x468] sm:$0xff] }
 0x651   :  { %9820 = vmatpush2.bf16.msra.mxu0 %v15844_v27  ;;  %v15672_v27 = vcombine.low %v6408_v3, %v6412_v54  ;;  %v15640_v54 = vcombine.low %v6376_v16, %v6380_v50 }
 0x652   :  { %9861 = vmatpush2.bf16.msra.mxu1 %v15718_v14  ;;  %9821 = vmatprep.subr.bf16.mxu0 %v15837_v15  ;;  %v15791_v14 = vcombine.high %v6527_v46, %v6531_v7  ;;  %v6519_v15 = vld [vmem:[%s24307_s13 + $0x548] sm:$0xff] }
 0x653   :  { %9862 = vmatprep.subr.bf16.mxu1 %v15711_v34  ;;  %v6523_v34 = vld [vmem:[%s24307_s13 + $0x568] sm:$0xff] }
 0x654   :  { %v15783_v2 = vcombine.high %v6519_v15, %v6523_v34  ;;  %v15782_v47 = vcombine.low %v6519_v15, %v6523_v34  ;;  %v6352_v15 = vld [vmem:[%s24307_s13 + $0x10] sm:$0xff] }
 0x655   :  { %9822 = vmatpush2.bf16.msra.mxu0 %v15836_v13  ;;  %v6356_v34 = vld [vmem:[%s24307_s13 + $0x30] sm:$0xff] }
 0x656   :  { %9863 = vmatpush2.bf16.msra.mxu1 %v15710_v26  ;;  %9823 = vmatprep.subr.bf16.mxu0 %v15829_v22  ;;  %v15790_v22 = vcombine.low %v6527_v46, %v6531_v7  ;;  %v6364_v46 = vld [vmem:[%s24307_s13 + $0x70] sm:$0xff] }
 0x657   :  { %9864 = vmatprep.subr.bf16.mxu1 %v15703_v57 }
 0x659   :  { %9824 = vmatpush2.bf16.msra.mxu0 %v15828_v24  ;;  %v6511_v24 = vld [vmem:[%s24307_s13 + $0x508] sm:$0xff] }
 0x65a   :  { %9865 = vmatpush2.bf16.msra.mxu1 %v15702_v10  ;;  %9825 = vmatprep.subr.bf16.mxu0 %v15821_v48  ;;  %v6515_v10 = vld [vmem:[%s24307_s13 + $0x528] sm:$0xff] }
 0x65b   :  { %9866 = vmatprep.subr.bf16.mxu1 %v15695_v42  ;;  %v6388_v42 = vld [vmem:[%s24307_s13 + $0x130] sm:$0xff]  ;;  %v15774_v31 = vcombine.low %v6511_v24, %v6515_v10 }
 0x65d   :  { %9826 = vmatpush2.bf16.msra.mxu0 %v15820_v0  ;;  %v15775_v0 = vcombine.high %v6511_v24, %v6515_v10  ;;  %v15616_v24 = vcombine.low %v6352_v15, %v6356_v34 }
 0x65e   :  { %9867 = vmatpush2.bf16.msra.mxu1 %v15694_v9  ;;  %9827 = vmatprep.subr.bf16.mxu0 %v15813_v44 }
 0x65f   :  { %9868 = vmatprep.subr.bf16.mxu1 %v15687_v53  ;;  %v6503_v53 = vld [vmem:[%s24307_s13 + $0x4c8] sm:$0xff] }
 0x660   :  { %v15766_v3 = vcombine.low %v6503_v53, %v6507_v11 }
 0x661   :  { %9828 = vmatpush2.bf16.msra.mxu0 %v15812_v35 }
 0x662   :  { %9869 = vmatpush2.bf16.msra.mxu1 %v15686_v58  ;;  %9829 = vmatprep.subr.bf16.mxu0 %v15805_v52  ;;  %v15767_v58 = vcombine.high %v6503_v53, %v6507_v11  ;;  %v15641_v52 = vcombine.high %v6376_v16, %v6380_v50  ;;  %v6587_v53 = vld [vmem:[%s24307_s13 + $0x768] sm:$0xff]  ;;  %v6456_v11 = vld [vmem:[%s24307_s13 + $0x350] sm:$0xff] }
 0x663   :  { %9870 = vmatprep.subr.bf16.mxu1 %v15679_v56  ;;  %v6499_v56 = vld [vmem:[%s24307_s13 + $0x4a8] sm:$0xff]  ;;  %v6460_v16 = vld [vmem:[%s24307_s13 + $0x370] sm:$0xff] }
 0x664   :  { %v15758_v7 = vcombine.low %v6495_v19, %v6499_v56 }
 0x665   :  { %9830 = vmatpush2.bf16.msra.mxu0 %v15804_v25  ;;  %v15759_v25 = vcombine.high %v6495_v19, %v6499_v56  ;;  %v6579_v19 = vld [vmem:[%s24307_s13 + $0x728] sm:$0xff]  ;;  %v6448_v56 = vld [vmem:[%s24307_s13 + $0x310] sm:$0xff] }
 0x666   :  { %9871 = vmatpush2.bf16.msra.mxu1 %v15678_v37  ;;  %9881 = vmatprep.subr.bf16.mxu0 %v15799_v12  ;;  %v15633_v37 = vcombine.high %v6368_v21, %v6372_v59  ;;  %v6487_v12 = vld [vmem:[%s24307_s13 + $0x448] sm:$0xff] }
 0x667   :  { %9922 = vmatprep.subr.bf16.mxu1 %v15673_v4  ;;  %v6360_v4 = vld [vmem:[%s24307_s13 + $0x50] sm:$0xff]  ;;  %v15751_v18 = vcombine.high %v6487_v12, %v6491_v41 }
 0x668   :  { %v8307_v32 = vpop.f32.mrf.mxu0  ;;  %9832 = vmatmul.mubr.bf16.vlgmr.msra.gmra.mxu0 %v21798_v60  ;;  %v15625_v63 = vcombine.high %v6360_v4, %v6364_v46 }
 0x669   :  { %v21814_v13 = vadd.f32 %v8307_v32, %v21596_v45  ;;  %v21816_v26 = vpop.f32.mrf.mxu1  ;;  %9873 = vmatmul.mubr.bf16.vlgmr.msra.gmra.mxu1 %v21585_v1  ;;  %9882 = vmatpush1.bf16.msra.mxu0 %v15798_v62  ;;  %v15657_v45 = vcombine.high %v6392_v20, %v6396_v55  ;;  %v15632_v62 = vcombine.low %v6368_v21, %v6372_v59  ;;  %v6452_v21 = vld [vmem:[%s24307_s13 + $0x330] sm:$0xff] }
 0x66a   :  { %9913 = vmatprep.mubr.bf16.mxu0 %v21593_v36  ;;  %v8309_v57 = vpop.f32.mrf.mxu0  ;;  %9923 = vmatpush1.bf16.msra.mxu1 %v15672_v27  ;;  %v6479_v27 = vld [vmem:[%s24307_s13 + $0x408] sm:$0xff]  ;;  %v15750_v32 = vcombine.low %v6487_v12, %v6491_v41  ;;  %v15617_v55 = vcombine.high %v6352_v15, %v6356_v34  ;;  %v6440_v41 = vld [vmem:[%s24307_s13 + $0x2d0] sm:$0xff] }
 0x66b   :  { %v21821_v33 = vadd.f32 %v8309_v57, %v21609_v40  ;;  %9954 = vmatprep.mubr.bf16.mxu1 %v21385_v23  ;;  %v21824_v29 = vpop.f32.mrf.mxu1  ;;  %9883 = vmatprep.subr.bf16.mxu0 %v15791_v14  ;;  %v6384_v40 = vld [vmem:[%s24307_s13 + $0x110] sm:$0xff]  ;;  %v6483_v14 = vld [vmem:[%s24307_s13 + $0x428] sm:$0xff] }
 0x66c   :  { %v8311_v48 = vpop.f32.mrf.mxu0  ;;  %9924 = vmatprep.subr.bf16.mxu1 %v15665_v39  ;;  %v15649_v44 = vcombine.high %v6384_v40, %v6388_v42  ;;  %v15648_v35 = vcombine.low %v6384_v40, %v6388_v42  ;;  %v15624_v39 = vcombine.low %v6360_v4, %v6364_v46  ;;  %v15743_v20 = vcombine.high %v6479_v27, %v6483_v14  ;;  %v6603_v57 = vld [vmem:[%s24307_s13 + $0x7e8] sm:$0xff]  ;;  %v6444_v4 = vld [vmem:[%s24307_s13 + $0x2f0] sm:$0xff] }
 0x66d   :  { %v8352_v17 = vpop.f32.mrf.mxu1  ;;  %9884 = vmatpush1.bf16.msra.mxu0 %v15790_v22  ;;  %v6599_v22 = vld [vmem:[%s24307_s13 + $0x7c8] sm:$0xff]  ;;  %v6436_v15 = vld [vmem:[%s24307_s13 + $0x2b0] sm:$0xff] }
 0x66e   :  { %v8312_v49 = vpop.f32.mrf.mxu0  ;;  %9925 = vmatpush1.bf16.msra.mxu1 %v15664_v30  ;;  %9885 = vmatprep.subr.bf16.mxu0 %v15783_v2  ;;  %v6472_v30 = vld [vmem:[%s24307_s13 + $0x3d0] sm:$0xff]  ;;  %v15863_v10 = vcombine.high %v6599_v22, %v6603_v57  ;;  %v6591_v40 = vld [vmem:[%s24307_s13 + $0x788] sm:$0xff] }
 0x66f   :  { %v8353_v9 = vpop.f32.mrf.mxu1  ;;  %9926 = vmatprep.subr.bf16.mxu1 %v15657_v45  ;;  %v6476_v2 = vld [vmem:[%s24307_s13 + $0x3f0] sm:$0xff]  ;;  %v15742_v45 = vcombine.low %v6479_v27, %v6483_v14  ;;  %v6595_v42 = vld [vmem:[%s24307_s13 + $0x7a8] sm:$0xff]  ;;  %v15862_v49 = vcombine.low %v6599_v22, %v6603_v57 }
 0x670   :  { %v15737_v48 = vcombine.high %v6472_v30, %v6476_v2  ;;  %v6464_v17 = vld [vmem:[%s24307_s13 + $0x390] sm:$0xff]  ;;  %v15854_v50 = vcombine.low %v6591_v40, %v6595_v42  ;;  %v6571_v12 = vld [vmem:[%s24307_s13 + $0x6e8] sm:$0xff] }
 0x671   :  { %9886 = vmatpush1.bf16.msra.mxu0 %v15782_v47  ;;  %v6468_v47 = vld [vmem:[%s24307_s13 + $0x3b0] sm:$0xff]  ;;  %v6563_v27 = vld [vmem:[%s24307_s13 + $0x6a8] sm:$0xff] }
 0x672   :  { %9927 = vmatpush1.bf16.msra.mxu1 %v15656_v61  ;;  %9887 = vmatprep.subr.bf16.mxu0 %v15775_v0  ;;  %v15736_v61 = vcombine.low %v6472_v30, %v6476_v2  ;;  %v15855_v0 = vcombine.high %v6591_v40, %v6595_v42  ;;  %v15729_v9 = vcombine.high %v6464_v17, %v6468_v47  ;;  %v6432_v14 = vld [vmem:[%s24307_s13 + $0x290] sm:$0xff]  ;;  %v6555_v22 = vld [vmem:[%s24307_s13 + $0x668] sm:$0xff] }
 0x673   :  { %9928 = vmatprep.subr.bf16.mxu1 %v15649_v44  ;;  %v6583_v44 = vld [vmem:[%s24307_s13 + $0x748] sm:$0xff]  ;;  %v6424_v57 = vld [vmem:[%s24307_s13 + $0x250] sm:$0xff] }
 0x674   :  { %v15846_v59 = vcombine.low %v6583_v44, %v6587_v53  ;;  %v6428_v30 = vld [vmem:[%s24307_s13 + $0x270] sm:$0xff]  ;;  %v6547_v40 = vld [vmem:[%s24307_s13 + $0x628] sm:$0xff] }
 0x675   :  { %9888 = vmatpush1.bf16.msra.mxu0 %v15774_v31  ;;  %v15728_v31 = vcombine.low %v6464_v17, %v6468_v47  ;;  %v6416_v42 = vld [vmem:[%s24307_s13 + $0x210] sm:$0xff] }
 0x676   :  { %9929 = vmatpush1.bf16.msra.mxu1 %v15648_v35  ;;  %9889 = vmatprep.subr.bf16.mxu0 %v15767_v58  ;;  %v15847_v35 = vcombine.high %v6583_v44, %v6587_v53  ;;  %v15721_v58 = vcombine.high %v6456_v11, %v6460_v16  ;;  %v6420_v17 = vld [vmem:[%s24307_s13 + $0x230] sm:$0xff]  ;;  %v6409_v53 = vld [vmem:[%s24307_s13 + $0x1d8] sm:$0xff] }
 0x677   :  { %9930 = vmatprep.subr.bf16.mxu1 %v15641_v52  ;;  %v6575_v52 = vld [vmem:[%s24307_s13 + $0x708] sm:$0xff]  ;;  %v6540_v44 = vld [vmem:[%s24307_s13 + $0x5f0] sm:$0xff] }
 0x678   :  { %v15838_v46 = vcombine.low %v6575_v52, %v6579_v19 }
 0x679   :  { %9890 = vmatpush1.bf16.msra.mxu0 %v15766_v3  ;;  %v15720_v3 = vcombine.low %v6456_v11, %v6460_v16  ;;  %v6413_v11 = vld [vmem:[%s24307_s13 + $0x1f8] sm:$0xff] }
 0x67a   :  { %9931 = vmatpush1.bf16.msra.mxu1 %v15640_v54  ;;  %9891 = vmatprep.subr.bf16.mxu0 %v15759_v25  ;;  %v15839_v54 = vcombine.high %v6575_v52, %v6579_v19  ;;  %v15713_v25 = vcombine.high %v6448_v56, %v6452_v21  ;;  %v6532_v52 = vld [vmem:[%s24307_s13 + $0x5b0] sm:$0xff] }
 0x67b   :  { %9932 = vmatprep.subr.bf16.mxu1 %v15633_v37  ;;  %v6567_v37 = vld [vmem:[%s24307_s13 + $0x6c8] sm:$0xff] }
 0x67c   :  { %v15830_v34 = vcombine.low %v6567_v37, %v6571_v12 }
 0x67d   :  { %9892 = vmatpush1.bf16.msra.mxu0 %v15758_v7  ;;  %v15712_v7 = vcombine.low %v6448_v56, %v6452_v21  ;;  %v6401_v56 = vld [vmem:[%s24307_s13 + $0x198] sm:$0xff] }
 0x67e   :  { %9933 = vmatpush1.bf16.msra.mxu1 %v15632_v62  ;;  %9893 = vmatprep.subr.bf16.mxu0 %v15751_v18  ;;  %v15831_v62 = vcombine.high %v6567_v37, %v6571_v12  ;;  %v15705_v18 = vcombine.high %v6440_v41, %v6444_v4  ;;  %v6405_v21 = vld [vmem:[%s24307_s13 + $0x1b8] sm:$0xff] }
 0x67f   :  { %9934 = vmatprep.subr.bf16.mxu1 %v15625_v63  ;;  %v6559_v63 = vld [vmem:[%s24307_s13 + $0x688] sm:$0xff]  ;;  %v15667_v12 = vcombine.high %v6401_v56, %v6405_v21 }
 0x680   :  { %v15822_v2 = vcombine.low %v6559_v63, %v6563_v27 }
 0x681   :  { %9894 = vmatpush1.bf16.msra.mxu0 %v15750_v32  ;;  %v15704_v32 = vcombine.low %v6440_v41, %v6444_v4  ;;  %v6393_v41 = vld [vmem:[%s24307_s13 + $0x158] sm:$0xff] }
 0x682   :  { %9935 = vmatpush1.bf16.msra.mxu1 %v15624_v39  ;;  %9895 = vmatprep.subr.bf16.mxu0 %v15743_v20  ;;  %v15823_v39 = vcombine.high %v6559_v63, %v6563_v27  ;;  %v15697_v20 = vcombine.high %v6432_v14, %v6436_v15  ;;  %v6397_v4 = vld [vmem:[%s24307_s13 + $0x178] sm:$0xff]  ;;  %v15666_v63 = vcombine.low %v6401_v56, %v6405_v21 }
 0x683   :  { %9936 = vmatprep.subr.bf16.mxu1 %v15617_v55  ;;  %v6551_v55 = vld [vmem:[%s24307_s13 + $0x648] sm:$0xff] }
 0x684   :  { %v15814_v47 = vcombine.low %v6551_v55, %v6555_v22 }
 0x685   :  { %9896 = vmatpush1.bf16.msra.mxu0 %v15742_v45  ;;  %v15696_v45 = vcombine.low %v6432_v14, %v6436_v15 }
 0x686   :  { %9937 = vmatpush1.bf16.msra.mxu1 %v15616_v24  ;;  %9897 = vmatprep.subr.bf16.mxu0 %v15863_v10  ;;  %v15815_v24 = vcombine.high %v6551_v55, %v6555_v22  ;;  %v15689_v10 = vcombine.high %v6424_v57, %v6428_v30 }
 0x687   :  { %9938 = vmatprep.subr.bf16.mxu1 %v15737_v48  ;;  %v6543_v48 = vld [vmem:[%s24307_s13 + $0x608] sm:$0xff] }
 0x688   :  { %v15806_v16 = vcombine.low %v6543_v48, %v6547_v40 }
 0x689   :  { %9898 = vmatpush2.bf16.msra.mxu0 %v15862_v49  ;;  %v15688_v49 = vcombine.low %v6424_v57, %v6428_v30  ;;  %v15658_v57 = vcombine.low %v6393_v41, %v6397_v4 }
 0x68a   :  { %9939 = vmatpush2.bf16.msra.mxu1 %v15736_v61  ;;  %9899 = vmatprep.subr.bf16.mxu0 %v15855_v0  ;;  %v15807_v61 = vcombine.high %v6543_v48, %v6547_v40  ;;  %v15681_v0 = vcombine.high %v6416_v42, %v6420_v17  ;;  %v6377_v48 = vld [vmem:[%s24307_s13 + $0xd8] sm:$0xff] }
 0x68b   :  { %9940 = vmatprep.subr.bf16.mxu1 %v15729_v9  ;;  %v6536_v9 = vld [vmem:[%s24307_s13 + $0x5d0] sm:$0xff]  ;;  %v6381_v40 = vld [vmem:[%s24307_s13 + $0xf8] sm:$0xff] }
 0x68c   :  { %v15800_v19 = vcombine.low %v6536_v9, %v6540_v44 }
 0x68d   :  { %9900 = vmatpush2.bf16.msra.mxu0 %v15854_v50  ;;  %v15680_v50 = vcombine.low %v6416_v42, %v6420_v17 }
 0x68e   :  { %9941 = vmatpush2.bf16.msra.mxu1 %v15728_v31  ;;  %9901 = vmatprep.subr.bf16.mxu0 %v15847_v35  ;;  %v15801_v31 = vcombine.high %v6536_v9, %v6540_v44  ;;  %v15675_v35 = vcombine.high %v6409_v53, %v6413_v11  ;;  %v6369_v9 = vld [vmem:[%s24307_s13 + $0x98] sm:$0xff] }
 0x68f   :  { %9942 = vmatprep.subr.bf16.mxu1 %v15721_v58  ;;  %v6528_v58 = vld [vmem:[%s24307_s13 + $0x590] sm:$0xff]  ;;  %v6373_v44 = vld [vmem:[%s24307_s13 + $0xb8] sm:$0xff] }
 0x690   :  { %v15634_v56 = vcombine.low %v6369_v9, %v6373_v44 }
 0x691   :  { %9902 = vmatpush2.bf16.msra.mxu0 %v15846_v59  ;;  %v15674_v59 = vcombine.low %v6409_v53, %v6413_v11  ;;  %v15642_v11 = vcombine.low %v6377_v48, %v6381_v40 }
 0x692   :  { %9943 = vmatpush2.bf16.msra.mxu1 %v15720_v3  ;;  %9903 = vmatprep.subr.bf16.mxu0 %v15839_v54  ;;  %v15793_v3 = vcombine.high %v6528_v58, %v6532_v52  ;;  %v6520_v54 = vld [vmem:[%s24307_s13 + $0x550] sm:$0xff] }
 0x693   :  { %9944 = vmatprep.subr.bf16.mxu1 %v15713_v25  ;;  %v6524_v25 = vld [vmem:[%s24307_s13 + $0x570] sm:$0xff] }
 0x694   :  { %v15785_v27 = vcombine.high %v6520_v54, %v6524_v25  ;;  %v15784_v55 = vcombine.low %v6520_v54, %v6524_v25  ;;  %v6484_v54 = vld [vmem:[%s24307_s13 + $0x430] sm:$0xff]  ;;  %v6353_v25 = vld [vmem:[%s24307_s13 + $0x18] sm:$0xff] }
 0x695   :  { %9904 = vmatpush2.bf16.msra.mxu0 %v15838_v46 }
 0x696   :  { %9945 = vmatpush2.bf16.msra.mxu1 %v15712_v7  ;;  %9905 = vmatprep.subr.bf16.mxu0 %v15831_v62  ;;  %v15792_v62 = vcombine.low %v6528_v58, %v6532_v52  ;;  %v6361_v58 = vld [vmem:[%s24307_s13 + $0x58] sm:$0xff] }
 0x697   :  { %9946 = vmatprep.subr.bf16.mxu1 %v15705_v18  ;;  %v6365_v52 = vld [vmem:[%s24307_s13 + $0x78] sm:$0xff] }
 0x699   :  { %9906 = vmatpush2.bf16.msra.mxu0 %v15830_v34  ;;  %v6512_v34 = vld [vmem:[%s24307_s13 + $0x510] sm:$0xff] }
 0x69a   :  { %9947 = vmatpush2.bf16.msra.mxu1 %v15704_v32  ;;  %9907 = vmatprep.subr.bf16.mxu0 %v15823_v39  ;;  %v6516_v32 = vld [vmem:[%s24307_s13 + $0x530] sm:$0xff] }
 0x69b   :  { %9948 = vmatprep.subr.bf16.mxu1 %v15697_v20  ;;  %v15777_v30 = vcombine.high %v6512_v34, %v6516_v32  ;;  %v15776_v42 = vcombine.low %v6512_v34, %v6516_v32 }
 0x69d   :  { %9908 = vmatpush2.bf16.msra.mxu0 %v15822_v2 }
 0x69e   :  { %9949 = vmatpush2.bf16.msra.mxu1 %v15696_v45  ;;  %9909 = vmatprep.subr.bf16.mxu0 %v15815_v24  ;;  %v6504_v24 = vld [vmem:[%s24307_s13 + $0x4d0] sm:$0xff] }
 0x69f   :  { %9950 = vmatprep.subr.bf16.mxu1 %v15689_v10  ;;  %v6508_v10 = vld [vmem:[%s24307_s13 + $0x4f0] sm:$0xff] }
 0x6a0   :  { %v15768_v53 = vcombine.low %v6504_v24, %v6508_v10 }
 0x6a1   :  { %9910 = vmatpush2.bf16.msra.mxu0 %v15814_v47  ;;  %v15769_v47 = vcombine.high %v6504_v24, %v6508_v10  ;;  %v6584_v24 = vld [vmem:[%s24307_s13 + $0x750] sm:$0xff] }
 0x6a2   :  { %9951 = vmatpush2.bf16.msra.mxu1 %v15688_v49  ;;  %9911 = vmatprep.subr.bf16.mxu0 %v15807_v61  ;;  %v15643_v49 = vcombine.high %v6377_v48, %v6381_v40  ;;  %v6496_v61 = vld [vmem:[%s24307_s13 + $0x490] sm:$0xff]  ;;  %v6457_v48 = vld [vmem:[%s24307_s13 + $0x358] sm:$0xff] }
 0x6a3   :  { %9952 = vmatprep.subr.bf16.mxu1 %v15681_v0  ;;  %v6500_v0 = vld [vmem:[%s24307_s13 + $0x4b0] sm:$0xff]  ;;  %v6461_v40 = vld [vmem:[%s24307_s13 + $0x378] sm:$0xff] }
 0x6a4   :  { %v6588_v10 = vld [vmem:[%s24307_s13 + $0x770] sm:$0xff] }
 0x6a5   :  { %9912 = vmatpush2.bf16.msra.mxu0 %v15806_v16  ;;  %v15761_v16 = vcombine.high %v6496_v61, %v6500_v0 }
 0x6a6   :  { %9953 = vmatpush2.bf16.msra.mxu1 %v15680_v50  ;;  %9963 = vmatprep.subr.bf16.mxu0 %v15801_v31  ;;  %v15635_v50 = vcombine.high %v6369_v9, %v6373_v44  ;;  %v6488_v31 = vld [vmem:[%s24307_s13 + $0x450] sm:$0xff]  ;;  %v6449_v9 = vld [vmem:[%s24307_s13 + $0x318] sm:$0xff] }
 0x6a7   :  { %10004 = vmatprep.subr.bf16.mxu1 %v15675_v35  ;;  %v6492_v35 = vld [vmem:[%s24307_s13 + $0x470] sm:$0xff]  ;;  %v6453_v44 = vld [vmem:[%s24307_s13 + $0x338] sm:$0xff] }
 0x6a8   :  { %v8389_v37 = vpop.f32.mrf.mxu0  ;;  %9914 = vmatmul.mubr.bf16.vlgmr.msra.gmra.mxu0 %v21798_v60  ;;  %v15753_v21 = vcombine.high %v6488_v31, %v6492_v35 }
 0x6a9   :  { %v22020_v46 = vadd.f32 %v8389_v37, %v21816_v26  ;;  %v22022_v7 = vpop.f32.mrf.mxu1  ;;  %9955 = vmatmul.mubr.bf16.vlgmr.msra.gmra.mxu1 %v21585_v1  ;;  %9964 = vmatpush1.bf16.msra.mxu0 %v15800_v19  ;;  %v15659_v26 = vcombine.high %v6393_v41, %v6397_v4  ;;  %v15760_v19 = vcombine.low %v6496_v61, %v6500_v0  ;;  %v6357_v37 = vld [vmem:[%s24307_s13 + $0x38] sm:$0xff]  ;;  %v6576_v61 = vld [vmem:[%s24307_s13 + $0x710] sm:$0xff] }
 0x6aa   :  { %9995 = vmatprep.mubr.bf16.mxu0 %v21593_v36  ;;  %v8391_v18 = vpop.f32.mrf.mxu0  ;;  %10005 = vmatpush1.bf16.msra.mxu1 %v15674_v59  ;;  %v15627_v59 = vcombine.high %v6361_v58, %v6365_v52  ;;  %v15626_v41 = vcombine.low %v6361_v58, %v6365_v52  ;;  %v15618_v32 = vcombine.low %v6353_v25, %v6357_v37  ;;  %v6580_v0 = vld [vmem:[%s24307_s13 + $0x730] sm:$0xff]  ;;  %v6441_v58 = vld [vmem:[%s24307_s13 + $0x2d8] sm:$0xff] }
 0x6ab   :  { %v22027_v14 = vadd.f32 %v8391_v18, %v21824_v29  ;;  %10036 = vmatprep.mubr.bf16.mxu1 %v21385_v23  ;;  %v22030_v15 = vpop.f32.mrf.mxu1  ;;  %9965 = vmatprep.subr.bf16.mxu0 %v15793_v3  ;;  %v6385_v29 = vld [vmem:[%s24307_s13 + $0x118] sm:$0xff]  ;;  %v6480_v3 = vld [vmem:[%s24307_s13 + $0x410] sm:$0xff] }
 0x6ac   :  { %v8393_v39 = vpop.f32.mrf.mxu0  ;;  %10006 = vmatprep.subr.bf16.mxu1 %v15667_v12  ;;  %v6389_v23 = vld [vmem:[%s24307_s13 + $0x138] sm:$0xff]  ;;  %v15752_v12 = vcombine.low %v6488_v31, %v6492_v35  ;;  %v15745_v4 = vcombine.high %v6480_v3, %v6484_v54  ;;  %v6600_v18 = vld [vmem:[%s24307_s13 + $0x7d0] sm:$0xff]  ;;  %v15744_v34 = vcombine.low %v6480_v3, %v6484_v54 }
 0x6ad   :  { %v8434_v20 = vpop.f32.mrf.mxu1  ;;  %9966 = vmatpush1.bf16.msra.mxu0 %v15792_v62  ;;  %v15651_v45 = vcombine.high %v6385_v29, %v6389_v23  ;;  %v15650_v17 = vcombine.low %v6385_v29, %v6389_v23  ;;  %v15619_v62 = vcombine.high %v6353_v25, %v6357_v37  ;;  %v6592_v23 = vld [vmem:[%s24307_s13 + $0x790] sm:$0xff]  ;;  %v6445_v52 = vld [vmem:[%s24307_s13 + $0x2f8] sm:$0xff] }
 0x6ae   :  { %v8394_v22 = vpop.f32.mrf.mxu0  ;;  %10007 = vmatpush1.bf16.msra.mxu1 %v15666_v63  ;;  %9967 = vmatprep.subr.bf16.mxu0 %v15785_v27  ;;  %v6604_v63 = vld [vmem:[%s24307_s13 + $0x7f0] sm:$0xff]  ;;  %v6473_v27 = vld [vmem:[%s24307_s13 + $0x3d8] sm:$0xff] }
 0x6af   :  { %v8435_v2 = vpop.f32.mrf.mxu1  ;;  %10008 = vmatprep.subr.bf16.mxu1 %v15659_v26  ;;  %v6477_v26 = vld [vmem:[%s24307_s13 + $0x3f8] sm:$0xff]  ;;  %v15865_v39 = vcombine.high %v6600_v18, %v6604_v63  ;;  %v6596_v20 = vld [vmem:[%s24307_s13 + $0x7b0] sm:$0xff] }
 0x6b0   :  { %v15739_v29 = vcombine.high %v6473_v27, %v6477_v26  ;;  %v6469_v22 = vld [vmem:[%s24307_s13 + $0x3b8] sm:$0xff]  ;;  %v15857_v2 = vcombine.high %v6592_v23, %v6596_v20  ;;  %v6568_v31 = vld [vmem:[%s24307_s13 + $0x6d0] sm:$0xff] }
 0x6b1   :  { %9968 = vmatpush1.bf16.msra.mxu0 %v15784_v55  ;;  %v6465_v55 = vld [vmem:[%s24307_s13 + $0x398] sm:$0xff]  ;;  %v6572_v35 = vld [vmem:[%s24307_s13 + $0x6f0] sm:$0xff] }
 0x6b2   :  { %10009 = vmatpush1.bf16.msra.mxu1 %v15658_v57  ;;  %9969 = vmatprep.subr.bf16.mxu0 %v15777_v30  ;;  %v15864_v57 = vcombine.low %v6600_v18, %v6604_v63  ;;  %v15738_v30 = vcombine.low %v6473_v27, %v6477_v26  ;;  %v6560_v3 = vld [vmem:[%s24307_s13 + $0x690] sm:$0xff]  ;;  %v6433_v25 = vld [vmem:[%s24307_s13 + $0x298] sm:$0xff] }
 0x6b3   :  { %10010 = vmatprep.subr.bf16.mxu1 %v15651_v45  ;;  %v15731_v45 = vcombine.high %v6465_v55, %v6469_v22  ;;  %v6564_v54 = vld [vmem:[%s24307_s13 + $0x6b0] sm:$0xff]  ;;  %v6437_v37 = vld [vmem:[%s24307_s13 + $0x2b8] sm:$0xff] }
 0x6b4   :  { %v6552_v18 = vld [vmem:[%s24307_s13 + $0x650] sm:$0xff]  ;;  %v6425_v27 = vld [vmem:[%s24307_s13 + $0x258] sm:$0xff] }
 0x6b5   :  { %9970 = vmatpush1.bf16.msra.mxu0 %v15776_v42  ;;  %v15856_v42 = vcombine.low %v6592_v23, %v6596_v20  ;;  %v6556_v63 = vld [vmem:[%s24307_s13 + $0x670] sm:$0xff]  ;;  %v6429_v26 = vld [vmem:[%s24307_s13 + $0x278] sm:$0xff] }
 0x6b6   :  { %10011 = vmatpush1.bf16.msra.mxu1 %v15650_v17  ;;  %9971 = vmatprep.subr.bf16.mxu0 %v15769_v47  ;;  %v15730_v17 = vcombine.low %v6465_v55, %v6469_v22  ;;  %v15849_v47 = vcombine.high %v6584_v24, %v6588_v10  ;;  %v6544_v23 = vld [vmem:[%s24307_s13 + $0x610] sm:$0xff]  ;;  %v6417_v55 = vld [vmem:[%s24307_s13 + $0x218] sm:$0xff] }
 0x6b7   :  { %10012 = vmatprep.subr.bf16.mxu1 %v15643_v49  ;;  %v15723_v49 = vcombine.high %v6457_v48, %v6461_v40  ;;  %v6548_v20 = vld [vmem:[%s24307_s13 + $0x630] sm:$0xff]  ;;  %v6421_v22 = vld [vmem:[%s24307_s13 + $0x238] sm:$0xff] }
 0x6b9   :  { %9972 = vmatpush1.bf16.msra.mxu0 %v15768_v53  ;;  %v15848_v53 = vcombine.low %v6584_v24, %v6588_v10  ;;  %v6537_v24 = vld [vmem:[%s24307_s13 + $0x5d8] sm:$0xff] }
 0x6ba   :  { %10013 = vmatpush1.bf16.msra.mxu1 %v15642_v11  ;;  %9973 = vmatprep.subr.bf16.mxu0 %v15761_v16  ;;  %v15722_v11 = vcombine.low %v6457_v48, %v6461_v40  ;;  %v15841_v16 = vcombine.high %v6576_v61, %v6580_v0  ;;  %v6541_v10 = vld [vmem:[%s24307_s13 + $0x5f8] sm:$0xff]  ;;  %v10216_v48 = vld [vmem:[%s24308_s16 + $0x1c0] sm:$0xff] }
 0x6bb   :  { %10014 = vmatprep.subr.bf16.mxu1 %v15635_v50  ;;  %v15715_v50 = vcombine.high %v6449_v9, %v6453_v44  ;;  %v10220_v40 = vld [vmem:[%s24308_s16 + $0x1e0] sm:$0xff] }
 0x6bd   :  { %9974 = vmatpush1.bf16.msra.mxu0 %v15760_v19  ;;  %v15840_v19 = vcombine.low %v6576_v61, %v6580_v0  ;;  %v6533_v61 = vld [vmem:[%s24307_s13 + $0x5b8] sm:$0xff]  ;;  %v15925_v0 = vcombine.high %v10216_v48, %v10220_v40 }
 0x6be   :  { %10015 = vmatpush1.bf16.msra.mxu1 %v15634_v56  ;;  %9975 = vmatprep.subr.bf16.mxu0 %v15753_v21  ;;  %v15714_v56 = vcombine.low %v6449_v9, %v6453_v44  ;;  %v15833_v21 = vcombine.high %v6568_v31, %v6572_v35  ;;  %v15802_v9 = vcombine.low %v6537_v24, %v6541_v10  ;;  %v10208_v44 = vld [vmem:[%s24308_s16 + $0x180] sm:$0xff] }
 0x6bf   :  { %10016 = vmatprep.subr.bf16.mxu1 %v15627_v59  ;;  %v15707_v59 = vcombine.high %v6441_v58, %v6445_v52 }
 0x6c1   :  { %9976 = vmatpush1.bf16.msra.mxu0 %v15752_v12  ;;  %v15832_v12 = vcombine.low %v6568_v31, %v6572_v35  ;;  %v15924_v31 = vcombine.low %v10216_v48, %v10220_v40  ;;  %v10180_v48 = vld [vmem:[%s24308_s16 + $0xa0] sm:$0xff] }
 0x6c2   :  { %10017 = vmatpush1.bf16.msra.mxu1 %v15626_v41  ;;  %9977 = vmatprep.subr.bf16.mxu0 %v15745_v4  ;;  %v15706_v41 = vcombine.low %v6441_v58, %v6445_v52  ;;  %v15825_v4 = vcombine.high %v6560_v3, %v6564_v54 }
 0x6c3   :  { %10018 = vmatprep.subr.bf16.mxu1 %v15619_v62  ;;  %v15699_v62 = vcombine.high %v6433_v25, %v6437_v37 }
 0x6c5   :  { %9978 = vmatpush1.bf16.msra.mxu0 %v15744_v34  ;;  %v15824_v34 = vcombine.low %v6560_v3, %v6564_v54 }
 0x6c6   :  { %10019 = vmatpush1.bf16.msra.mxu1 %v15618_v32  ;;  %9979 = vmatprep.subr.bf16.mxu0 %v15865_v39  ;;  %v15698_v32 = vcombine.low %v6433_v25, %v6437_v37  ;;  %v15817_v39 = vcombine.high %v6552_v18, %v6556_v63  ;;  %v6513_v37 = vld [vmem:[%s24307_s13 + $0x518] sm:$0xff] }
 0x6c7   :  { %10020 = vmatprep.subr.bf16.mxu1 %v15739_v29  ;;  %v15691_v29 = vcombine.high %v6425_v27, %v6429_v26 }
 0x6c9   :  { %9980 = vmatpush2.bf16.msra.mxu0 %v15864_v57  ;;  %v15816_v57 = vcombine.low %v6552_v18, %v6556_v63  ;;  %v10196_v18 = vld [vmem:[%s24308_s16 + $0x120] sm:$0xff] }
 0x6ca   :  { %10021 = vmatpush2.bf16.msra.mxu1 %v15738_v30  ;;  %9981 = vmatprep.subr.bf16.mxu0 %v15857_v2  ;;  %v15690_v30 = vcombine.low %v6425_v27, %v6429_v26  ;;  %v15809_v2 = vcombine.high %v6544_v23, %v6548_v20 }
 0x6cb   :  { %10022 = vmatprep.subr.bf16.mxu1 %v15731_v45  ;;  %v15683_v45 = vcombine.high %v6417_v55, %v6421_v22 }
 0x6cd   :  { %9982 = vmatpush2.bf16.msra.mxu0 %v15856_v42  ;;  %v15808_v42 = vcombine.low %v6544_v23, %v6548_v20  ;;  %v10184_v20 = vld [vmem:[%s24308_s16 + $0xc0] sm:$0xff] }
 0x6ce   :  { %10023 = vmatpush2.bf16.msra.mxu1 %v15730_v17  ;;  %9983 = vmatprep.subr.bf16.mxu0 %v15849_v47  ;;  %v15682_v17 = vcombine.low %v6417_v55, %v6421_v22  ;;  %v15803_v47 = vcombine.high %v6537_v24, %v6541_v10  ;;  %v10188_v55 = vld [vmem:[%s24308_s16 + $0xe0] sm:$0xff] }
 0x6cf   :  { %10024 = vmatprep.subr.bf16.mxu1 %v15723_v49  ;;  %v6529_v49 = vld [vmem:[%s24307_s13 + $0x598] sm:$0xff]  ;;  %v10176_v10 = vld [vmem:[%s24308_s16 + $0x80] sm:$0xff] }
 0x6d1   :  { %9984 = vmatpush2.bf16.msra.mxu0 %v15848_v53  ;;  %v10212_v53 = vld [vmem:[%s24308_s16 + $0x1a0] sm:$0xff] }
 0x6d2   :  { %10025 = vmatpush2.bf16.msra.mxu1 %v15722_v11  ;;  %9985 = vmatprep.subr.bf16.mxu0 %v15841_v16  ;;  %v15795_v11 = vcombine.high %v6529_v49, %v6533_v61  ;;  %v6521_v16 = vld [vmem:[%s24307_s13 + $0x558] sm:$0xff]  ;;  %v15917_v58 = vcombine.high %v10208_v44, %v10212_v53 }
 0x6d3   :  { %10026 = vmatprep.subr.bf16.mxu1 %v15715_v50  ;;  %v6525_v50 = vld [vmem:[%s24307_s13 + $0x578] sm:$0xff] }
 0x6d4   :  { %v15787_v54 = vcombine.high %v6521_v16, %v6525_v50 }
 0x6d5   :  { %9986 = vmatpush2.bf16.msra.mxu0 %v15840_v19 }
 0x6d6   :  { %10027 = vmatpush2.bf16.msra.mxu1 %v15714_v56  ;;  %9987 = vmatprep.subr.bf16.mxu0 %v15833_v21  ;;  %v15794_v56 = vcombine.low %v6529_v49, %v6533_v61  ;;  %v10200_v21 = vld [vmem:[%s24308_s16 + $0x140] sm:$0xff]  ;;  %v15885_v49 = vcombine.high %v10176_v10, %v10180_v48 }
 0x6d7   :  { %10028 = vmatprep.subr.bf16.mxu1 %v15707_v59  ;;  %v10204_v59 = vld [vmem:[%s24308_s16 + $0x160] sm:$0xff] }
 0x6d9   :  { %9988 = vmatpush2.bf16.msra.mxu0 %v15832_v12  ;;  %v6517_v12 = vld [vmem:[%s24307_s13 + $0x538] sm:$0xff] }
 0x6da   :  { %10029 = vmatpush2.bf16.msra.mxu1 %v15706_v41  ;;  %9989 = vmatprep.subr.bf16.mxu0 %v15825_v4  ;;  %v15779_v27 = vcombine.high %v6513_v37, %v6517_v12  ;;  %v15778_v23 = vcombine.low %v6513_v37, %v6517_v12  ;;  %v10280_v37 = vld [vmem:[%s24308_s16 + $0x3c0] sm:$0xff] }
 0x6db   :  { %10030 = vmatprep.subr.bf16.mxu1 %v15699_v62  ;;  %v15786_v62 = vcombine.low %v6521_v16, %v6525_v50  ;;  %v15884_v16 = vcombine.low %v10176_v10, %v10180_v48  ;;  %v10284_v12 = vld [vmem:[%s24308_s16 + $0x3e0] sm:$0xff] }
 0x6dc   :  { %v10260_v10 = vld [vmem:[%s24308_s16 + $0x320] sm:$0xff] }
 0x6dd   :  { %9990 = vmatpush2.bf16.msra.mxu0 %v15824_v34  ;;  %v6505_v34 = vld [vmem:[%s24307_s13 + $0x4d8] sm:$0xff] }
 0x6de   :  { %10031 = vmatpush2.bf16.msra.mxu1 %v15698_v32  ;;  %9991 = vmatprep.subr.bf16.mxu0 %v15817_v39  ;;  %v6509_v32 = vld [vmem:[%s24307_s13 + $0x4f8] sm:$0xff]  ;;  %v15908_v39 = vcombine.low %v10200_v21, %v10204_v59 }
 0x6df   :  { %10032 = vmatprep.subr.bf16.mxu1 %v15691_v29  ;;  %v15771_v22 = vcombine.high %v6505_v34, %v6509_v32  ;;  %v15770_v24 = vcombine.low %v6505_v34, %v6509_v32  ;;  %v6589_v34 = vld [vmem:[%s24307_s13 + $0x778] sm:$0xff]  ;;  %v15988_v32 = vcombine.low %v10280_v37, %v10284_v12 }
 0x6e1   :  { %9992 = vmatpush2.bf16.msra.mxu0 %v15816_v57  ;;  %v6497_v57 = vld [vmem:[%s24307_s13 + $0x498] sm:$0xff] }
 0x6e2   :  { %10033 = vmatpush2.bf16.msra.mxu1 %v15690_v30  ;;  %9993 = vmatprep.subr.bf16.mxu0 %v15809_v2  ;;  %v6501_v30 = vld [vmem:[%s24307_s13 + $0x4b8] sm:$0xff] }
 0x6e3   :  { %10034 = vmatprep.subr.bf16.mxu1 %v15683_v45  ;;  %v15893_v45 = vcombine.high %v10184_v20, %v10188_v55  ;;  %v15763_v40 = vcombine.high %v6497_v57, %v6501_v30  ;;  %v15762_v61 = vcombine.low %v6497_v57, %v6501_v30  ;;  %v6581_v57 = vld [vmem:[%s24307_s13 + $0x738] sm:$0xff] }
 0x6e5   :  { %9994 = vmatpush2.bf16.msra.mxu0 %v15808_v42  ;;  %v6489_v42 = vld [vmem:[%s24307_s13 + $0x458] sm:$0xff] }
 0x6e6   :  { %10035 = vmatpush2.bf16.msra.mxu1 %v15682_v17  ;;  %10045 = vmatprep.subr.bf16.mxu0 %v15803_v47  ;;  %v6493_v17 = vld [vmem:[%s24307_s13 + $0x478] sm:$0xff]  ;;  %v15892_v47 = vcombine.low %v10184_v20, %v10188_v55  ;;  %v10268_v20 = vld [vmem:[%s24308_s16 + $0x360] sm:$0xff] }
 0x6e7   :  { %13282 = vmatprep.subr.bf16.mxu1 %v15925_v0  ;;  %v10168_v0 = vld [vmem:[%s24308_s16 + $0x40] sm:$0xff] }
 0x6e8   :  { %v8471_v35 = vpop.f32.mrf.mxu0  ;;  %9996 = vmatmul.mubr.bf16.vlgmr.msra.gmra.mxu0 %v21798_v60 }
 0x6e9   :  { %v22220_v52 = vadd.f32 %v8471_v35, %v22022_v7  ;;  %v9792_v19 = vpop.f32.mrf.mxu1  ;;  %10037 = vmatmul.mubr.bf16.vlgmr.msra.gmra.mxu1 %v21585_v1  ;;  %10046 = vmatpush1.bf16.msra.mxu0 %v15802_v9  ;;  %v10172_v9 = vld [vmem:[%s24308_s16 + $0x60] sm:$0xff] }
 0x6ea   :  { %v22230_v3 = vadd.f32 %v9792_v19, %v21605_v28  ;;  %10077 = vmatprep.mubr.bf16.mxu0 %v21593_v36  ;;  %v8473_v7 = vpop.f32.mrf.mxu0  ;;  %10047 = vmatprep.subr.bf16.mxu0 %v15795_v11  ;;  %v15916_v28 = vcombine.low %v10208_v44, %v10212_v53  ;;  %v15909_v36 = vcombine.high %v10200_v21, %v10204_v59  ;;  %v6481_v53 = vld [vmem:[%s24307_s13 + $0x418] sm:$0xff]  ;;  %v10160_v35 = vld [vmem:[%s24308_s16] sm:$0xff] }
 0x6eb   :  { %v22234_v1 = vadd.f32 %v8473_v7, %v22030_v15  ;;  %v22236_v25 = vpop.f32.mrf.mxu1  ;;  %13283 = vmatpush1.bf16.msra.mxu1 %v15924_v31  ;;  %v10192_v15 = vld [vmem:[%s24308_s16 + $0x100] sm:$0xff]  ;;  %v15755_v44 = vcombine.high %v6489_v42, %v6493_v17  ;;  %v6485_v11 = vld [vmem:[%s24307_s13 + $0x438] sm:$0xff]  ;;  %v15877_v50 = vcombine.high %v10168_v0, %v10172_v9  ;;  %v15754_v31 = vcombine.low %v6489_v42, %v6493_v17 }
 0x6ec   :  { %v8475_v41 = vpop.f32.mrf.mxu0  ;;  %13284 = vmatprep.subr.bf16.mxu1 %v15917_v58  ;;  %v15901_v29 = vcombine.high %v10192_v15, %v10196_v18  ;;  %v15900_v2 = vcombine.low %v10192_v15, %v10196_v18  ;;  %v10164_v58 = vld [vmem:[%s24308_s16 + $0x20] sm:$0xff]  ;;  %v15747_v19 = vcombine.high %v6481_v53, %v6485_v11  ;;  %v6605_v21 = vld [vmem:[%s24307_s13 + $0x7f8] sm:$0xff]  ;;  %v15876_v59 = vcombine.low %v10168_v0, %v10172_v9 }
 0x6ed   :  { %v9796_v4 = vpop.f32.mrf.mxu1  ;;  %10048 = vmatpush1.bf16.msra.mxu0 %v15794_v56  ;;  %v6601_v56 = vld [vmem:[%s24307_s13 + $0x7d8] sm:$0xff]  ;;  %v15869_v7 = vcombine.high %v10160_v35, %v10164_v58  ;;  %v10272_v18 = vld [vmem:[%s24308_s16 + $0x380] sm:$0xff] }
 0x6ee   :  { %v8476_v63 = vpop.f32.mrf.mxu0  ;;  %10049 = vmatprep.subr.bf16.mxu0 %v15787_v54  ;;  %v15746_v54 = vcombine.low %v6481_v53, %v6485_v11  ;;  %v6593_v41 = vld [vmem:[%s24307_s13 + $0x798] sm:$0xff]  ;;  %v15868_v4 = vcombine.low %v10160_v35, %v10164_v58  ;;  %v15866_v15 = vcombine.low %v6601_v56, %v6605_v21  ;;  %v10252_v0 = vld [vmem:[%s24308_s16 + $0x2e0] sm:$0xff] }
 0x6ef   :  { %v9797_v26 = vpop.f32.mrf.mxu1  ;;  %13285 = vmatpush1.bf16.msra.mxu1 %v15916_v28  ;;  %v15867_v28 = vcombine.high %v6601_v56, %v6605_v21  ;;  %v10276_v63 = vld [vmem:[%s24308_s16 + $0x3a0] sm:$0xff]  ;;  %v6573_v42 = vld [vmem:[%s24307_s13 + $0x6f8] sm:$0xff] }
 0x6f0   :  { %13286 = vmatprep.subr.bf16.mxu1 %v15909_v36  ;;  %v6597_v36 = vld [vmem:[%s24307_s13 + $0x7b8] sm:$0xff]  ;;  %v15980_v30 = vcombine.low %v10272_v18, %v10276_v63  ;;  %v10244_v35 = vld [vmem:[%s24308_s16 + $0x2a0] sm:$0xff] }
 0x6f1   :  { %10050 = vmatpush1.bf16.msra.mxu0 %v15786_v62  ;;  %v15989_v62 = vcombine.high %v10280_v37, %v10284_v12  ;;  %v6585_v26 = vld [vmem:[%s24307_s13 + $0x758] sm:$0xff]  ;;  %v10236_v37 = vld [vmem:[%s24308_s16 + $0x260] sm:$0xff] }
 0x6f2   :  { %10051 = vmatprep.subr.bf16.mxu0 %v15779_v27  ;;  %v15859_v27 = vcombine.high %v6593_v41, %v6597_v36  ;;  %v15851_v55 = vcombine.high %v6585_v26, %v6589_v34  ;;  %v6565_v53 = vld [vmem:[%s24307_s13 + $0x6b8] sm:$0xff] }
 0x6f3   :  { %13287 = vmatpush1.bf16.msra.mxu1 %v15908_v39  ;;  %v15981_v39 = vcombine.high %v10272_v18, %v10276_v63  ;;  %v6557_v56 = vld [vmem:[%s24307_s13 + $0x678] sm:$0xff]  ;;  %v10228_v18 = vld [vmem:[%s24308_s16 + $0x220] sm:$0xff] }
 0x6f4   :  { %13288 = vmatprep.subr.bf16.mxu1 %v15901_v29  ;;  %v15858_v29 = vcombine.low %v6593_v41, %v6597_v36  ;;  %v6549_v41 = vld [vmem:[%s24307_s13 + $0x638] sm:$0xff] }
 0x6f5   :  { %10052 = vmatpush1.bf16.msra.mxu0 %v15778_v23  ;;  %v10264_v23 = vld [vmem:[%s24308_s16 + $0x340] sm:$0xff] }
 0x6f6   :  { %10053 = vmatprep.subr.bf16.mxu0 %v15771_v22  ;;  %v6577_v22 = vld [vmem:[%s24307_s13 + $0x718] sm:$0xff]  ;;  %v15972_v17 = vcombine.low %v10264_v23, %v10268_v20 }
 0x6f7   :  { %13289 = vmatpush1.bf16.msra.mxu1 %v15900_v2  ;;  %v15973_v2 = vcombine.high %v10264_v23, %v10268_v20  ;;  %v15843_v48 = vcombine.high %v6577_v22, %v6581_v57  ;;  %v22408_v23 = vld [vmem:[%s24308_s16 + $0x9e0] sm:$0xff] }
 0x6f8   :  { %13290 = vmatprep.subr.bf16.mxu1 %v15893_v45  ;;  %v15850_v45 = vcombine.low %v6585_v26, %v6589_v34  ;;  %v10344_v26 = vld [vmem:[%s24308_s16 + $0x5c0] sm:$0xff] }
 0x6f9   :  { %10054 = vmatpush1.bf16.msra.mxu0 %v15770_v24  ;;  %v10256_v24 = vld [vmem:[%s24308_s16 + $0x300] sm:$0xff] }
 0x6fa   :  { %10055 = vmatprep.subr.bf16.mxu0 %v15763_v40  ;;  %v6569_v40 = vld [vmem:[%s24307_s13 + $0x6d8] sm:$0xff]  ;;  %v15964_v11 = vcombine.low %v10256_v24, %v10260_v10  ;;  %v10348_v34 = vld [vmem:[%s24308_s16 + $0x5e0] sm:$0xff] }
 0x6fb   :  { %13291 = vmatpush1.bf16.msra.mxu1 %v15892_v47  ;;  %v15965_v47 = vcombine.high %v10256_v24, %v10260_v10  ;;  %v15835_v9 = vcombine.high %v6569_v40, %v6573_v42  ;;  %v16053_v20 = vcombine.high %v10344_v26, %v10348_v34 }
 0x6fc   :  { %13292 = vmatprep.subr.bf16.mxu1 %v15885_v49  ;;  %v15842_v49 = vcombine.low %v6577_v22, %v6581_v57  ;;  %v10336_v22 = vld [vmem:[%s24308_s16 + $0x580] sm:$0xff] }
 0x6fd   :  { %10056 = vmatpush1.bf16.msra.mxu0 %v15762_v61  ;;  %v10248_v61 = vld [vmem:[%s24308_s16 + $0x2c0] sm:$0xff] }
 0x6fe   :  { %10057 = vmatprep.subr.bf16.mxu0 %v15755_v44  ;;  %v6561_v44 = vld [vmem:[%s24307_s13 + $0x698] sm:$0xff]  ;;  %v15956_v21 = vcombine.low %v10248_v61, %v10252_v0  ;;  %v10340_v57 = vld [vmem:[%s24308_s16 + $0x5a0] sm:$0xff] }
 0x6ff   :  { %13293 = vmatpush1.bf16.msra.mxu1 %v15884_v16  ;;  %v15957_v16 = vcombine.high %v10248_v61, %v10252_v0  ;;  %v15827_v58 = vcombine.high %v6561_v44, %v6565_v53  ;;  %v16045_v24 = vcombine.high %v10336_v22, %v10340_v57  ;;  %v16044_v0 = vcombine.low %v10336_v22, %v10340_v57  ;;  %v10296_v22 = vld [vmem:[%s24308_s16 + $0x440] sm:$0xff] }
 0x700   :  { %13294 = vmatprep.subr.bf16.mxu1 %v15877_v50  ;;  %v15834_v50 = vcombine.low %v6569_v40, %v6573_v42  ;;  %v10332_v40 = vld [vmem:[%s24308_s16 + $0x560] sm:$0xff] }
 0x701   :  { %10058 = vmatpush1.bf16.msra.mxu0 %v15754_v31  ;;  %v10240_v31 = vld [vmem:[%s24308_s16 + $0x280] sm:$0xff] }
 0x702   :  { %10059 = vmatprep.subr.bf16.mxu0 %v15747_v19  ;;  %v6553_v19 = vld [vmem:[%s24307_s13 + $0x658] sm:$0xff]  ;;  %v15948_v36 = vcombine.low %v10240_v31, %v10244_v35  ;;  %v10300_v57 = vld [vmem:[%s24308_s16 + $0x460] sm:$0xff] }
 0x703   :  { %13295 = vmatpush1.bf16.msra.mxu1 %v15876_v59  ;;  %v15949_v59 = vcombine.high %v10240_v31, %v10244_v35  ;;  %v15819_v12 = vcombine.high %v6553_v19, %v6557_v56 }
 0x704   :  { %13296 = vmatprep.subr.bf16.mxu1 %v15869_v7  ;;  %v15826_v7 = vcombine.low %v6561_v44, %v6565_v53 }
 0x705   :  { %10060 = vmatpush1.bf16.msra.mxu0 %v15746_v54  ;;  %v10232_v54 = vld [vmem:[%s24308_s16 + $0x240] sm:$0xff] }
 0x706   :  { %10061 = vmatprep.subr.bf16.mxu0 %v15867_v28  ;;  %v6545_v28 = vld [vmem:[%s24307_s13 + $0x618] sm:$0xff] }
 0x707   :  { %13297 = vmatpush1.bf16.msra.mxu1 %v15868_v4  ;;  %v15941_v4 = vcombine.high %v10232_v54, %v10236_v37  ;;  %v15811_v63 = vcombine.high %v6545_v28, %v6549_v41 }
 0x708   :  { %13298 = vmatprep.subr.bf16.mxu1 %v15989_v62  ;;  %v15818_v62 = vcombine.low %v6553_v19, %v6557_v56 }
 0x709   :  { %10062 = vmatpush2.bf16.msra.mxu0 %v15866_v15  ;;  %v10224_v15 = vld [vmem:[%s24308_s16 + $0x200] sm:$0xff] }
 0x70a   :  { %10063 = vmatprep.subr.bf16.mxu0 %v15859_v27  ;;  %v15940_v27 = vcombine.low %v10232_v54, %v10236_v37  ;;  %v10464_v37 = vld [vmem:[%s24308_s16 + $0x980] sm:$0xff] }
 0x70b   :  { %13299 = vmatpush2.bf16.msra.mxu1 %v15988_v32  ;;  %v15933_v32 = vcombine.high %v10224_v15, %v10228_v18 }
 0x70c   :  { %13300 = vmatprep.subr.bf16.mxu1 %v15981_v39  ;;  %v15810_v39 = vcombine.low %v6545_v28, %v6549_v41 }
 0x70d   :  { %10064 = vmatpush2.bf16.msra.mxu0 %v15858_v29  ;;  %v22403_v29 = vld [vmem:[%s24308_s16 + $0x9c0] sm:$0xff] }
 0x70e   :  { %10065 = vmatprep.subr.bf16.mxu0 %v15851_v55  ;;  %v15932_v55 = vcombine.low %v10224_v15, %v10228_v18  ;;  %v22467_v15 = vld [vmem:[%s24308_s16 + $0x1c8] sm:$0xff] }
 0x70f   :  { %13301 = vmatpush2.bf16.msra.mxu1 %v15980_v30  ;;  %v22419_v30 = vld [vmem:[%s24309_s15] sm:$0xff] }
 0x710   :  { %13302 = vmatprep.subr.bf16.mxu1 %v15973_v2  ;;  %v16181_v2 = vcombine.high %v22403_v29, %v22408_v23  ;;  %v10091_v10 = vrot.slane %v22419_v30, %v20096_v8  ;;  %v10095_v61 = vrot.slane %v22419_v30, %v20102_v51 }
 0x711   :  { %10066 = vmatpush2.bf16.msra.mxu0 %v15850_v45  ;;  %v16052_v45 = vcombine.low %v10344_v26, %v10348_v34  ;;  %v22480_v34 = vld [vmem:[%s24308_s16 + $0x1e8] sm:$0xff] }
 0x712   :  { %10067 = vmatprep.subr.bf16.mxu0 %v15843_v48  ;;  %v10328_v48 = vld [vmem:[%s24308_s16 + $0x540] sm:$0xff] }
 0x713   :  { %13303 = vmatpush2.bf16.msra.mxu1 %v15972_v17  ;;  %v9795_v17 = vadd.f32 %v22236_v25, %v21613_v6  ;;  %v16037_v53 = vcombine.high %v10328_v48, %v10332_v40  ;;  %v10320_v6 = vld [vmem:[%s24308_s16 + $0x500] sm:$0xff]  ;;  %v16036_v35 = vcombine.low %v10328_v48, %v10332_v40  ;;  %v16005_v48 = vcombine.high %v10296_v22, %v10300_v57 }
 0x714   :  { %13304 = vmatprep.subr.bf16.mxu1 %v15965_v47 }
 0x715   :  { %10068 = vmatpush2.bf16.msra.mxu0 %v15842_v49 }
 0x716   :  { %10069 = vmatprep.subr.bf16.mxu0 %v15835_v9 }
 0x717   :  { %13305 = vmatpush2.bf16.msra.mxu1 %v15964_v11 }
 0x718   :  { %13306 = vmatprep.subr.bf16.mxu1 %v15957_v16 }
 0x719   :  { %10070 = vmatpush2.bf16.msra.mxu0 %v15834_v50 }
 0x71a   :  { %10071 = vmatprep.subr.bf16.mxu0 %v15827_v58 }
 0x71b   :  { %13307 = vmatpush2.bf16.msra.mxu1 %v15956_v21 }
 0x71c   :  { %13308 = vmatprep.subr.bf16.mxu1 %v15949_v59  ;;  %v10312_v59 = vld [vmem:[%s24308_s16 + $0x4c0] sm:$0xff] }
 0x71d   :  { %10072 = vmatpush2.bf16.msra.mxu0 %v15826_v7  ;;  %v10316_v7 = vld [vmem:[%s24308_s16 + $0x4e0] sm:$0xff] }
 0x71e   :  { %10073 = vmatprep.subr.bf16.mxu0 %v15819_v12  ;;  %v10468_v12 = vld [vmem:[%s24308_s16 + $0x9a0] sm:$0xff] }
 0x71f   :  { %13309 = vmatpush2.bf16.msra.mxu1 %v15948_v36  ;;  %v16173_v26 = vcombine.high %v10464_v37, %v10468_v12 }
 0x720   :  { %13310 = vmatprep.subr.bf16.mxu1 %v15941_v4  ;;  %v16021_v4 = vcombine.high %v10312_v59, %v10316_v7 }
 0x721   :  { %10074 = vmatpush2.bf16.msra.mxu0 %v15818_v62  ;;  %v16180_v62 = vcombine.low %v22403_v29, %v22408_v23  ;;  %v15926_v29 = vcombine.low %v22467_v15, %v22480_v34  ;;  %v16020_v23 = vcombine.low %v10312_v59, %v10316_v7 }
 0x722   :  { %10075 = vmatprep.subr.bf16.mxu0 %v15811_v63  ;;  %v10304_v63 = vld [vmem:[%s24308_s16 + $0x480] sm:$0xff] }
 0x723   :  { %13311 = vmatpush2.bf16.msra.mxu1 %v15940_v27  ;;  %v10308_v27 = vld [vmem:[%s24308_s16 + $0x4a0] sm:$0xff] }
 0x724   :  { %13312 = vmatprep.subr.bf16.mxu1 %v15933_v32  ;;  %v10456_v32 = vld [vmem:[%s24308_s16 + $0x940] sm:$0xff] }
 0x725   :  { %10076 = vmatpush2.bf16.msra.mxu0 %v15810_v39  ;;  %v10460_v39 = vld [vmem:[%s24308_s16 + $0x960] sm:$0xff] }
 0x726   :  { %13323 = vmatprep.subr.bf16.mxu0 %v16053_v20  ;;  %v16013_v20 = vcombine.high %v10304_v63, %v10308_v27  ;;  %v16164_v40 = vcombine.low %v10456_v32, %v10460_v39 }
 0x727   :  { %13313 = vmatpush2.bf16.msra.mxu1 %v15932_v55  ;;  %v16172_v55 = vcombine.low %v10464_v37, %v10468_v12  ;;  %v10392_v37 = vld [vmem:[%s24308_s16 + $0x740] sm:$0xff] }
 0x728   :  { %v9833_v42 = vpop.f32.mrf.mxu0  ;;  %10078 = vmatmul.mubr.bf16.vlgmr.msra.gmra.mxu0 %v21798_v60  ;;  %13364 = vmatprep.subr.bf16.mxu1 %v16181_v2  ;;  %v16165_v2 = vcombine.high %v10456_v32, %v10460_v39  ;;  %v10396_v12 = vld [vmem:[%s24308_s16 + $0x760] sm:$0xff] }
 0x729   :  { %v9834_v47 = vadd.f32 %v9833_v42, %v22230_v3  ;;  %v9874_v49 = vpop.f32.mrf.mxu1  ;;  %13324 = vmatpush1.bf16.msra.mxu0 %v16052_v45  ;;  %v10324_v3 = vld [vmem:[%s24308_s16 + $0x520] sm:$0xff] }
 0x72a   :  { %v22438_v9 = vadd.f32 %v9874_v49, %v21814_v13  ;;  %v9835_v44 = vpop.f32.mrf.mxu0  ;;  %13325 = vmatprep.subr.bf16.mxu0 %v16045_v24  ;;  %v16029_v19 = vcombine.high %v10320_v6, %v10324_v3  ;;  %v16028_v41 = vcombine.low %v10320_v6, %v10324_v3  ;;  %v10448_v45 = vld [vmem:[%s24308_s16 + $0x900] sm:$0xff] }
 0x72b   :  { %v10128_v11 = vadd.f32 %v10091_v10, %v9834_v47  ;;  %v9836_v60 = vadd.f32 %v9835_v44, %v9795_v17  ;;  %v22440_v16 = vpop.f32.mrf.mxu1  ;;  %v10452_v24 = vld [vmem:[%s24308_s16 + $0x920] sm:$0xff]  ;;  %v16012_v10 = vcombine.low %v10304_v63, %v10308_v27  ;;  %v16101_v63 = vcombine.high %v10392_v37, %v10396_v12 }
 0x72c   :  { %v9837_v25 = vpop.f32.mrf.mxu0  ;;  %v10288_v42 = vld [vmem:[%s24308_s16 + $0x400] sm:$0xff]  ;;  %v16157_v47 = vcombine.high %v10448_v45, %v10452_v24 }
 0x72d   :  { %vm10136_vm14 = vcmp.ge.f32.partialorder %v10128_v11, 0.0  ;;  %v10144_v50 = vmul.f32 0.01, %v10128_v11  ;;  %v10129_v13 = vadd.f32 %v10095_v61, %v9836_v60  ;;  %v9878_v31 = vpop.f32.mrf.mxu1  ;;  %13326 = vmatpush1.bf16.msra.mxu0 %v16044_v0  ;;  %v10292_v17 = vld [vmem:[%s24308_s16 + $0x420] sm:$0xff]  ;;  %v16004_v0 = vcombine.low %v10296_v22, %v10300_v57 }
 0x72e   :  { %v9838_v58 = vpop.f32.mrf.mxu0  ;;  %13327 = vmatprep.subr.bf16.mxu0 %v16037_v53  ;;  %v10440_v49 = vld [vmem:[%s24308_s16 + $0x8c0] sm:$0xff]  ;;  %v15997_v44 = vcombine.high %v10288_v42, %v10292_v17  ;;  %v16156_v53 = vcombine.low %v10448_v45, %v10452_v24 }
 0x72f   :  { %vm10137_vm15 = vcmp.ge.f32.partialorder %v10129_v13, 0.0  ;;  %v10145_v56 = vmul.f32 0.01, %v10129_v13  ;;  %v9879_v21 = vpop.f32.mrf.mxu1  ;;  %v10152_v54 = vsel %vm10136_vm14, %v10128_v11, %v10144_v50  ;;  %v10444_v61 = vld [vmem:[%s24308_s16 + $0x8e0] sm:$0xff]  ;;  %v15996_v50 = vcombine.low %v10288_v42, %v10292_v17 }
 0x730   :  { %v22469_v18 = vpack.c.bf16 %v10152_v54, %v10152_v54  ;;  %v10408_v11 = vld [vmem:[%s24308_s16 + $0x7c0] sm:$0xff]  ;;  %v16149_v6 = vcombine.high %v10440_v49, %v10444_v61  ;;  %v16148_v31 = vcombine.low %v10440_v49, %v10444_v61 }
 0x731   :  { %v10153_v28 = vsel %vm10137_vm15, %v10129_v13, %v10145_v56  ;;  %13328 = vmatpush1.bf16.msra.mxu0 %v16036_v35  ;;  %v10412_v60 = vld [vmem:[%s24308_s16 + $0x7e0] sm:$0xff] }
 0x732   :  { %v22460_v36 = vpack.c.bf16 %v10153_v28, %v10153_v28  ;;  %13329 = vmatprep.subr.bf16.mxu0 %v16029_v19  ;;  %v10432_v3 = vld [vmem:[%s24308_s16 + $0x880] sm:$0xff]  ;;  %v16117_v13 = vcombine.high %v10408_v11, %v10412_v60  ;;  %v16116_v59 = vcombine.low %v10408_v11, %v10412_v60 }
 0x733   :  { %v10436_v25 = vld [vmem:[%s24308_s16 + $0x8a0] sm:$0xff] }
 0x734   :  { %13314 = vmatprep.mubr.bf16.mxu1 %v22460_v36  ;;  %v10400_v35 = vld [vmem:[%s24308_s16 + $0x780] sm:$0xff]  ;;  %v16141_v19 = vcombine.high %v10432_v3, %v10436_v25  ;;  %v16140_v54 = vcombine.low %v10432_v3, %v10436_v25 }
 0x735   :  { %13315 = vmatmul.mubr.bf16.vlgmr.msra.gmra.mxu1 %v22469_v18  ;;  %13330 = vmatpush1.bf16.msra.mxu0 %v16028_v41  ;;  %v10404_v58 = vld [vmem:[%s24308_s16 + $0x7a0] sm:$0xff] }
 0x736   :  { %13331 = vmatprep.subr.bf16.mxu0 %v16021_v4  ;;  %13365 = vmatpush1.bf16.msra.mxu1 %v16180_v62  ;;  %v10424_v56 = vld [vmem:[%s24308_s16 + $0x840] sm:$0xff]  ;;  %v16109_v7 = vcombine.high %v10400_v35, %v10404_v58  ;;  %v16108_v62 = vcombine.low %v10400_v35, %v10404_v58 }
 0x737   :  { %13366 = vmatprep.subr.bf16.mxu1 %v16173_v26  ;;  %v10428_v21 = vld [vmem:[%s24308_s16 + $0x860] sm:$0xff] }
 0x738   :  { %v16133_v28 = vcombine.high %v10424_v56, %v10428_v21  ;;  %v10416_v41 = vld [vmem:[%s24308_s16 + $0x800] sm:$0xff]  ;;  %v16132_v27 = vcombine.low %v10424_v56, %v10428_v21 }
 0x739   :  { %13332 = vmatpush1.bf16.msra.mxu0 %v16020_v23  ;;  %v10420_v4 = vld [vmem:[%s24308_s16 + $0x820] sm:$0xff] }
 0x73a   :  { %13333 = vmatprep.subr.bf16.mxu0 %v16013_v20  ;;  %13367 = vmatpush1.bf16.msra.mxu1 %v16172_v55  ;;  %v10384_v26 = vld [vmem:[%s24308_s16 + $0x700] sm:$0xff]  ;;  %v16125_v39 = vcombine.high %v10416_v41, %v10420_v4  ;;  %v16100_v55 = vcombine.low %v10392_v37, %v10396_v12  ;;  %v16124_v57 = vcombine.low %v10416_v41, %v10420_v4 }
 0x73b   :  { %13368 = vmatprep.subr.bf16.mxu1 %v16165_v2  ;;  %v10388_v32 = vld [vmem:[%s24308_s16 + $0x720] sm:$0xff] }
 0x73c   :  { %v10536_v23 = vld [vmem:[%s24308_s16 + $0xbc0] sm:$0xff]  ;;  %v16093_v22 = vcombine.high %v10384_v26, %v10388_v32 }
 0x73d   :  { %13334 = vmatpush1.bf16.msra.mxu0 %v16012_v10  ;;  %v10540_v20 = vld [vmem:[%s24308_s16 + $0xbe0] sm:$0xff] }
 0x73e   :  { %13335 = vmatprep.subr.bf16.mxu0 %v16005_v48  ;;  %13369 = vmatpush1.bf16.msra.mxu1 %v16164_v40  ;;  %v10376_v2 = vld [vmem:[%s24308_s16 + $0x6c0] sm:$0xff]  ;;  %v16245_v24 = vcombine.high %v10536_v23, %v10540_v20  ;;  %v16092_v40 = vcombine.low %v10384_v26, %v10388_v32  ;;  %v16244_v17 = vcombine.low %v10536_v23, %v10540_v20 }
 0x73f   :  { %13370 = vmatprep.subr.bf16.mxu1 %v16157_v47  ;;  %v10380_v45 = vld [vmem:[%s24308_s16 + $0x6e0] sm:$0xff] }
 0x740   :  { %v10528_v10 = vld [vmem:[%s24308_s16 + $0xb80] sm:$0xff]  ;;  %v16085_v42 = vcombine.high %v10376_v2, %v10380_v45 }
 0x741   :  { %13336 = vmatpush1.bf16.msra.mxu0 %v16004_v0  ;;  %v10532_v48 = vld [vmem:[%s24308_s16 + $0xba0] sm:$0xff] }
 0x742   :  { %13337 = vmatprep.subr.bf16.mxu0 %v15997_v44  ;;  %13371 = vmatpush1.bf16.msra.mxu1 %v16156_v53  ;;  %v10368_v47 = vld [vmem:[%s24308_s16 + $0x680] sm:$0xff]  ;;  %v16237_v61 = vcombine.high %v10528_v10, %v10532_v48  ;;  %v16084_v53 = vcombine.low %v10376_v2, %v10380_v45  ;;  %v16236_v60 = vcombine.low %v10528_v10, %v10532_v48 }
 0x743   :  { %13372 = vmatprep.subr.bf16.mxu1 %v16149_v6  ;;  %v10372_v49 = vld [vmem:[%s24308_s16 + $0x6a0] sm:$0xff]  ;;  %v9877_v10 = vadd.f32 %v22440_v16, %v21821_v33 }
 0x744   :  { %v10520_v0 = vld [vmem:[%s24308_s16 + $0xb40] sm:$0xff]  ;;  %v16077_v11 = vcombine.high %v10368_v47, %v10372_v49 }
 0x745   :  { %13338 = vmatpush1.bf16.msra.mxu0 %v15996_v50  ;;  %v10524_v44 = vld [vmem:[%s24308_s16 + $0xb60] sm:$0xff] }
 0x746   :  { %13339 = vmatprep.subr.bf16.mxu0 %v16117_v13  ;;  %13373 = vmatpush1.bf16.msra.mxu1 %v16148_v31  ;;  %v10360_v6 = vld [vmem:[%s24308_s16 + $0x640] sm:$0xff]  ;;  %v16229_v25 = vcombine.high %v10520_v0, %v10524_v44  ;;  %v16076_v31 = vcombine.low %v10368_v47, %v10372_v49  ;;  %v16228_v58 = vcombine.low %v10520_v0, %v10524_v44 }
 0x747   :  { %13374 = vmatprep.subr.bf16.mxu1 %v16141_v19  ;;  %v10364_v3 = vld [vmem:[%s24308_s16 + $0x660] sm:$0xff] }
 0x748   :  { %v10512_v50 = vld [vmem:[%s24308_s16 + $0xb00] sm:$0xff]  ;;  %v16069_v35 = vcombine.high %v10360_v6, %v10364_v3 }
 0x749   :  { %13340 = vmatpush2.bf16.msra.mxu0 %v16116_v59  ;;  %v10516_v13 = vld [vmem:[%s24308_s16 + $0xb20] sm:$0xff] }
 0x74a   :  { %13341 = vmatprep.subr.bf16.mxu0 %v16109_v7  ;;  %13375 = vmatpush1.bf16.msra.mxu1 %v16140_v54  ;;  %v10352_v19 = vld [vmem:[%s24308_s16 + $0x600] sm:$0xff]  ;;  %v16221_v21 = vcombine.high %v10512_v50, %v10516_v13  ;;  %v16068_v54 = vcombine.low %v10360_v6, %v10364_v3  ;;  %v16220_v12 = vcombine.low %v10512_v50, %v10516_v13 }
 0x74b   :  { %13376 = vmatprep.subr.bf16.mxu1 %v16133_v28  ;;  %v10356_v56 = vld [vmem:[%s24308_s16 + $0x620] sm:$0xff] }
 0x74c   :  { %v10504_v59 = vld [vmem:[%s24308_s16 + $0xac0] sm:$0xff]  ;;  %v16061_v37 = vcombine.high %v10352_v19, %v10356_v56 }
 0x74d   :  { %13342 = vmatpush2.bf16.msra.mxu0 %v16108_v62  ;;  %v10508_v7 = vld [vmem:[%s24308_s16 + $0xae0] sm:$0xff] }
 0x74e   :  { %13343 = vmatprep.subr.bf16.mxu0 %v16101_v63  ;;  %13377 = vmatpush1.bf16.msra.mxu1 %v16132_v27  ;;  %v16213_v28 = vcombine.high %v10504_v59, %v10508_v7  ;;  %v22615_v41 = vld [vmem:[%s24308_s16 + $0xdc0] sm:$0xff]  ;;  %v16060_v27 = vcombine.low %v10352_v19, %v10356_v56  ;;  %v16212_v26 = vcombine.low %v10504_v59, %v10508_v7  ;;  %v22669_v56 = vld [vmem:[%s24308_s16 + $0x5c8] sm:$0xff] }
 0x74f   :  { %13378 = vmatprep.subr.bf16.mxu1 %v16125_v39  ;;  %v22620_v4 = vld [vmem:[%s24308_s16 + $0xde0] sm:$0xff] }
 0x750   :  { %v10496_v62 = vld [vmem:[%s24308_s16 + $0xa80] sm:$0xff]  ;;  %v16309_v32 = vcombine.high %v22615_v41, %v22620_v4  ;;  %v16308_v19 = vcombine.low %v22615_v41, %v22620_v4 }
 0x751   :  { %13344 = vmatpush2.bf16.msra.mxu0 %v16100_v55  ;;  %v10500_v63 = vld [vmem:[%s24308_s16 + $0xaa0] sm:$0xff] }
 0x752   :  { %13345 = vmatprep.subr.bf16.mxu0 %v16093_v22  ;;  %13379 = vmatpush1.bf16.msra.mxu1 %v16124_v57  ;;  %v16205_v39 = vcombine.high %v10496_v62, %v10500_v63  ;;  %v10488_v23 = vld [vmem:[%s24308_s16 + $0xa40] sm:$0xff]  ;;  %v16204_v55 = vcombine.low %v10496_v62, %v10500_v63  ;;  %v10099_v22 = vrot.slane %v22419_v30, %v20405_v5 }
 0x753   :  { %13380 = vmatprep.subr.bf16.mxu1 %v16245_v24  ;;  %v10492_v20 = vld [vmem:[%s24308_s16 + $0xa60] sm:$0xff] }
 0x754   :  { %v16197_v57 = vcombine.high %v10488_v23, %v10492_v20  ;;  %v10480_v45 = vld [vmem:[%s24308_s16 + $0xa00] sm:$0xff]  ;;  %v16196_v49 = vcombine.low %v10488_v23, %v10492_v20 }
 0x755   :  { %13346 = vmatpush2.bf16.msra.mxu0 %v16092_v40  ;;  %v10484_v24 = vld [vmem:[%s24308_s16 + $0xa20] sm:$0xff] }
 0x756   :  { %13347 = vmatprep.subr.bf16.mxu0 %v16085_v42  ;;  %13381 = vmatpush2.bf16.msra.mxu1 %v16244_v17  ;;  %v10103_v42 = vrot.slane %v22419_v30, %v21513_v43  ;;  %v16188_v6 = vcombine.low %v10480_v45, %v10484_v24  ;;  %v10592_v13 = vld [vmem:[%s24308_s16 + $0xd80] sm:$0xff] }
 0x757   :  { %13382 = vmatprep.subr.bf16.mxu1 %v16237_v61  ;;  %v10576_v4 = vld [vmem:[%s24308_s16 + $0xd00] sm:$0xff] }
 0x758   :  { %v10580_v62 = vld [vmem:[%s24308_s16 + $0xd20] sm:$0xff] }
 0x759   :  { %13348 = vmatpush2.bf16.msra.mxu0 %v16084_v53  ;;  %v16189_v53 = vcombine.high %v10480_v45, %v10484_v24  ;;  %v10560_v20 = vld [vmem:[%s24308_s16 + $0xc80] sm:$0xff] }
 0x75a   :  { %13349 = vmatprep.subr.bf16.mxu0 %v16077_v11  ;;  %13383 = vmatpush2.bf16.msra.mxu1 %v16236_v60  ;;  %v10556_v45 = vld [vmem:[%s24308_s16 + $0xc60] sm:$0xff] }
 0x75b   :  { %13384 = vmatprep.subr.bf16.mxu1 %v16229_v25  ;;  %v15927_v25 = vcombine.high %v22467_v15, %v22480_v34  ;;  %v10185_v15 = vld [vmem:[%s24308_s16 + $0xc8] sm:$0xff] }
 0x75c   :  { %v10189_v34 = vld [vmem:[%s24308_s16 + $0xe8] sm:$0xff] }
 0x75d   :  { %13350 = vmatpush2.bf16.msra.mxu0 %v16076_v31  ;;  %v10596_v31 = vld [vmem:[%s24308_s16 + $0xda0] sm:$0xff] }
 0x75e   :  { %13351 = vmatprep.subr.bf16.mxu0 %v16069_v35  ;;  %13385 = vmatpush2.bf16.msra.mxu1 %v16228_v58  ;;  %v16301_v7 = vcombine.high %v10592_v13, %v10596_v31 }
 0x75f   :  { %13386 = vmatprep.subr.bf16.mxu1 %v16221_v21  ;;  %v22674_v21 = vld [vmem:[%s24308_s16 + $0x5e8] sm:$0xff] }
 0x761   :  { %13352 = vmatpush2.bf16.msra.mxu0 %v16068_v54  ;;  %v10584_v54 = vld [vmem:[%s24308_s16 + $0xd40] sm:$0xff] }
 0x762   :  { %13353 = vmatprep.subr.bf16.mxu0 %v16061_v37  ;;  %13387 = vmatpush2.bf16.msra.mxu1 %v16220_v12  ;;  %v10588_v37 = vld [vmem:[%s24308_s16 + $0xd60] sm:$0xff]  ;;  %v16054_v12 = vcombine.low %v22669_v56, %v22674_v21 }
 0x763   :  { %13388 = vmatprep.subr.bf16.mxu1 %v16213_v28  ;;  %v16300_v28 = vcombine.low %v10592_v13, %v10596_v31  ;;  %v16293_v41 = vcombine.high %v10584_v54, %v10588_v37  ;;  %v16292_v63 = vcombine.low %v10584_v54, %v10588_v37  ;;  %v10624_v37 = vld [vmem:[%s24308_s16 + $0xe80] sm:$0xff] }
 0x765   :  { %13354 = vmatpush2.bf16.msra.mxu0 %v16060_v27  ;;  %v16285_v27 = vcombine.high %v10576_v4, %v10580_v62 }
 0x766   :  { %13389 = vmatpush2.bf16.msra.mxu1 %v16212_v26  ;;  %13405 = vmatprep.subr.bf16.mxu0 %v16309_v32  ;;  %v10568_v26 = vld [vmem:[%s24308_s16 + $0xcc0] sm:$0xff] }
 0x767   :  { %13390 = vmatprep.subr.bf16.mxu1 %v16205_v39  ;;  %v10572_v32 = vld [vmem:[%s24308_s16 + $0xce0] sm:$0xff]  ;;  %v16284_v39 = vcombine.low %v10576_v4, %v10580_v62  ;;  %v10106_v4 = vsub.s32 4, %v20093_v38 }
 0x768   :  { %v9915_v2 = vpop.f32.mrf.mxu0  ;;  %v16277_v23 = vcombine.high %v10568_v26, %v10572_v32 }
 0x769   :  { %v9916_v48 = vadd.f32 %v9915_v2, %v22438_v9  ;;  %v9956_v40 = vpop.f32.mrf.mxu1  ;;  %v10552_v2 = vld [vmem:[%s24308_s16 + $0xc40] sm:$0xff] }
 0x76a   :  { %v22650_v17 = vadd.f32 %v9956_v40, %v22020_v46  ;;  %v9917_v47 = vpop.f32.mrf.mxu0  ;;  %13391 = vmatpush2.bf16.msra.mxu1 %v16204_v55  ;;  %v10564_v55 = vld [vmem:[%s24308_s16 + $0xca0] sm:$0xff] }
 0x76b   :  { %v10130_v61 = vadd.f32 %v10099_v22, %v9916_v48  ;;  %v9918_v0 = vadd.f32 %v9917_v47, %v9877_v10  ;;  %v22652_v44 = vpop.f32.mrf.mxu1  ;;  %13392 = vmatprep.subr.bf16.mxu1 %v16197_v57  ;;  %v16276_v22 = vcombine.low %v10568_v26, %v10572_v32  ;;  %v16269_v57 = vcombine.high %v10560_v20, %v10564_v55  ;;  %v10544_v48 = vld [vmem:[%s24308_s16 + $0xc00] sm:$0xff] }
 0x76c   :  { %v9919_v11 = vpop.f32.mrf.mxu0  ;;  %v16268_v24 = vcombine.low %v10560_v20, %v10564_v55  ;;  %v16261_v10 = vcombine.high %v10552_v2, %v10556_v45  ;;  %v10548_v40 = vld [vmem:[%s24308_s16 + $0xc20] sm:$0xff]  ;;  %v10110_v26 = vsub.s32 5, %v20093_v38 }
 0x76d   :  { %vm10138_vm0 = vcmp.ge.f32.partialorder %v10130_v61, 0.0  ;;  %v10146_v33 = vmul.f32 0.01, %v10130_v61  ;;  %v10131_v9 = vadd.f32 %v10103_v42, %v9918_v0  ;;  %v9960_v16 = vpop.f32.mrf.mxu1  ;;  %v16260_v42 = vcombine.low %v10552_v2, %v10556_v45  ;;  %v10656_v11 = vld [vmem:[%s24308_s16 + $0xf80] sm:$0xff] }
 0x76e   :  { %v9920_v60 = vpop.f32.mrf.mxu0  ;;  %13393 = vmatpush2.bf16.msra.mxu1 %v16196_v49  ;;  %v16253_v47 = vcombine.high %v10544_v48, %v10548_v40  ;;  %v10664_v49 = vld [vmem:[%s24308_s16 + $0xfc0] sm:$0xff]  ;;  %v16252_v0 = vcombine.low %v10544_v48, %v10548_v40 }
 0x76f   :  { %vm10139_vm1 = vcmp.ge.f32.partialorder %v10131_v9, 0.0  ;;  %v10147_v46 = vmul.f32 0.01, %v10131_v9  ;;  %v9961_v3 = vpop.f32.mrf.mxu1  ;;  %13394 = vmatprep.subr.bf16.mxu1 %v16189_v53  ;;  %v10154_v50 = vsel %vm10138_vm0, %v10130_v61, %v10146_v33  ;;  %v10668_v61 = vld [vmem:[%s24308_s16 + $0xfe0] sm:$0xff] }
 0x770   :  { %v22676_v59 = vpack.c.bf16 %v10154_v50, %v10154_v50  ;;  %v16373_v53 = vcombine.high %v10664_v49, %v10668_v61  ;;  %v10660_v33 = vld [vmem:[%s24308_s16 + $0xfa0] sm:$0xff] }
 0x771   :  { %v10155_v35 = vsel %vm10139_vm1, %v10131_v9, %v10147_v46  ;;  %v16372_v9 = vcombine.low %v10664_v49, %v10668_v61  ;;  %v16365_v16 = vcombine.high %v10656_v11, %v10660_v33  ;;  %v10648_v60 = vld [vmem:[%s24308_s16 + $0xf40] sm:$0xff]  ;;  %v16364_v46 = vcombine.low %v10656_v11, %v10660_v33 }
 0x772   :  { %v22662_v58 = vpack.c.bf16 %v10155_v35, %v10155_v35  ;;  %13395 = vmatpush2.bf16.msra.mxu1 %v16188_v6  ;;  %v10652_v6 = vld [vmem:[%s24308_s16 + $0xf60] sm:$0xff] }
 0x773   :  { %13446 = vmatprep.subr.bf16.mxu1 %v15927_v25  ;;  %v16357_v3 = vcombine.high %v10648_v60, %v10652_v6  ;;  %v10640_v25 = vld [vmem:[%s24308_s16 + $0xf00] sm:$0xff]  ;;  %v16356_v13 = vcombine.low %v10648_v60, %v10652_v6  ;;  %v10209_v60 = vld [vmem:[%s24308_s16 + $0x188] sm:$0xff] }
 0x774   :  { %13355 = vmatprep.mubr.bf16.mxu0 %v22662_v58  ;;  %v10644_v50 = vld [vmem:[%s24308_s16 + $0xf20] sm:$0xff]  ;;  %v10213_v6 = vld [vmem:[%s24308_s16 + $0x1a8] sm:$0xff] }
 0x775   :  { %13356 = vmatmul.mubr.bf16.vlgmr.msra.gmra.mxu0 %v22676_v59  ;;  %v16349_v31 = vcombine.high %v10640_v25, %v10644_v50  ;;  %v10632_v35 = vld [vmem:[%s24308_s16 + $0xec0] sm:$0xff] }
 0x776   :  { %13406 = vmatpush1.bf16.msra.mxu0 %v16308_v19  ;;  %v10636_v19 = vld [vmem:[%s24308_s16 + $0xee0] sm:$0xff] }
 0x777   :  { %13407 = vmatprep.subr.bf16.mxu0 %v16301_v7  ;;  %v16348_v7 = vcombine.low %v10640_v25, %v10644_v50  ;;  %v16341_v54 = vcombine.high %v10632_v35, %v10636_v19  ;;  %v10608_v55 = vld [vmem:[%s24308_s16 + $0xe00] sm:$0xff]  ;;  %v15919_v50 = vcombine.high %v10209_v60, %v10213_v6 }
 0x77a   :  { %13408 = vmatpush1.bf16.msra.mxu0 %v16300_v28  ;;  %v10628_v28 = vld [vmem:[%s24308_s16 + $0xea0] sm:$0xff] }
 0x77b   :  { %13409 = vmatprep.subr.bf16.mxu0 %v16293_v41  ;;  %v16340_v41 = vcombine.low %v10632_v35, %v10636_v19  ;;  %v16333_v62 = vcombine.high %v10624_v37, %v10628_v28  ;;  %v16332_v32 = vcombine.low %v10624_v37, %v10628_v28  ;;  %v15918_v35 = vcombine.low %v10209_v60, %v10213_v6  ;;  %v10249_v60 = vld [vmem:[%s24308_s16 + $0x2c8] sm:$0xff] }
 0x77c   :  { %v10253_v6 = vld [vmem:[%s24308_s16 + $0x2e8] sm:$0xff] }
 0x77e   :  { %13410 = vmatpush1.bf16.msra.mxu0 %v16292_v63  ;;  %v10616_v63 = vld [vmem:[%s24308_s16 + $0xe40] sm:$0xff] }
 0x77f   :  { %13411 = vmatprep.subr.bf16.mxu0 %v16285_v27  ;;  %v10620_v27 = vld [vmem:[%s24308_s16 + $0xe60] sm:$0xff] }
 0x780   :  { %v16324_v40 = vcombine.low %v10616_v63, %v10620_v27 }
 0x782   :  { %13412 = vmatpush1.bf16.msra.mxu0 %v16284_v39  ;;  %v10107_v39 = vrot.slane %v22419_v30, %v10106_v4 }
 0x783   :  { %13413 = vmatprep.subr.bf16.mxu0 %v16277_v23  ;;  %v16325_v23 = vcombine.high %v10616_v63, %v10620_v27  ;;  %v10181_v63 = vld [vmem:[%s24308_s16 + $0xa8] sm:$0xff]  ;;  %v15894_v27 = vcombine.low %v10185_v15, %v10189_v34 }
 0x786   :  { %13414 = vmatpush1.bf16.msra.mxu0 %v16276_v22  ;;  %v10612_v22 = vld [vmem:[%s24308_s16 + $0xe20] sm:$0xff] }
 0x787   :  { %13415 = vmatprep.subr.bf16.mxu0 %v16269_v57  ;;  %v9959_v57 = vadd.f32 %v22652_v44, %v22027_v14  ;;  %v16317_v61 = vcombine.high %v10608_v55, %v10612_v22  ;;  %v16316_v11 = vcombine.low %v10608_v55, %v10612_v22  ;;  %v10161_v22 = vld [vmem:[%s24308_s16 + $0x8] sm:$0xff] }
 0x78a   :  { %13416 = vmatpush1.bf16.msra.mxu0 %v16268_v24  ;;  %v10111_v24 = vrot.slane %v22419_v30, %v10110_v26 }
 0x78b   :  { %13417 = vmatprep.subr.bf16.mxu0 %v16261_v10 }
 0x78e   :  { %13418 = vmatpush1.bf16.msra.mxu0 %v16260_v42 }
 0x78f   :  { %13419 = vmatprep.subr.bf16.mxu0 %v16253_v47 }
 0x792   :  { %13420 = vmatpush1.bf16.msra.mxu0 %v16252_v0 }
 0x793   :  { %13421 = vmatprep.subr.bf16.mxu0 %v16373_v53 }
 0x796   :  { %13422 = vmatpush2.bf16.msra.mxu0 %v16372_v9  ;;  %v16055_v9 = vcombine.high %v22669_v56, %v22674_v21  ;;  %v10325_v56 = vld [vmem:[%s24308_s16 + $0x528] sm:$0xff] }
 0x797   :  { %13423 = vmatprep.subr.bf16.mxu0 %v16365_v16  ;;  %v10449_v21 = vld [vmem:[%s24308_s16 + $0x908] sm:$0xff] }
 0x79a   :  { %13424 = vmatpush2.bf16.msra.mxu0 %v16364_v46 }
 0x79b   :  { %13425 = vmatprep.subr.bf16.mxu0 %v16357_v3 }
 0x79e   :  { %13426 = vmatpush2.bf16.msra.mxu0 %v16356_v13  ;;  %v10201_v13 = vld [vmem:[%s24308_s16 + $0x148] sm:$0xff] }
 0x79f   :  { %13427 = vmatprep.subr.bf16.mxu0 %v16349_v31  ;;  %v10205_v31 = vld [vmem:[%s24308_s16 + $0x168] sm:$0xff] }
 0x7a0   :  { %v15911_v19 = vcombine.high %v10201_v13, %v10205_v31  ;;  %v15910_v37 = vcombine.low %v10201_v13, %v10205_v31  ;;  %v10241_v13 = vld [vmem:[%s24308_s16 + $0x288] sm:$0xff] }
 0x7a1   :  { %v10245_v31 = vld [vmem:[%s24308_s16 + $0x2a8] sm:$0xff] }
 0x7a2   :  { %13428 = vmatpush2.bf16.msra.mxu0 %v16348_v7  ;;  %v10193_v7 = vld [vmem:[%s24308_s16 + $0x108] sm:$0xff] }
 0x7a3   :  { %13429 = vmatprep.subr.bf16.mxu0 %v16341_v54  ;;  %v10197_v54 = vld [vmem:[%s24308_s16 + $0x128] sm:$0xff] }
 0x7a4   :  { %v15903_v28 = vcombine.high %v10193_v7, %v10197_v54 }
 0x7a6   :  { %13430 = vmatpush2.bf16.msra.mxu0 %v16340_v41  ;;  %v15895_v41 = vcombine.high %v10185_v15, %v10189_v34  ;;  %v15950_v15 = vcombine.low %v10241_v13, %v10245_v31 }
 0x7a7   :  { %13431 = vmatprep.subr.bf16.mxu0 %v16333_v62  ;;  %v10177_v62 = vld [vmem:[%s24308_s16 + $0x88] sm:$0xff] }
 0x7a8   :  { %v9997_v20 = vpop.f32.mrf.mxu0 }
 0x7a9   :  { %v9998_v2 = vadd.f32 %v9997_v20, %v22650_v17  ;;  %v10038_v45 = vpop.f32.mrf.mxu1  ;;  %v15886_v20 = vcombine.low %v10177_v62, %v10181_v63 }
 0x7aa   :  { %v22778_v10 = vadd.f32 %v10038_v45, %v22220_v52  ;;  %v9999_v48 = vpop.f32.mrf.mxu0  ;;  %13432 = vmatpush2.bf16.msra.mxu0 %v16332_v32  ;;  %v15887_v32 = vcombine.high %v10177_v62, %v10181_v63  ;;  %v10225_v62 = vld [vmem:[%s24308_s16 + $0x208] sm:$0xff] }
 0x7ab   :  { %v10132_v42 = vadd.f32 %v10107_v39, %v9998_v2  ;;  %v10000_v47 = vadd.f32 %v9999_v48, %v9959_v57  ;;  %v22780_v49 = vpop.f32.mrf.mxu1  ;;  %13433 = vmatprep.subr.bf16.mxu0 %v16325_v23  ;;  %v10169_v39 = vld [vmem:[%s24308_s16 + $0x48] sm:$0xff] }
 0x7ac   :  { %v10001_v14 = vpop.f32.mrf.mxu0  ;;  %v10173_v23 = vld [vmem:[%s24308_s16 + $0x68] sm:$0xff] }
 0x7ad   :  { %vm10140_vm2 = vcmp.ge.f32.partialorder %v10132_v42, 0.0  ;;  %v10148_v17 = vmul.f32 0.01, %v10132_v42  ;;  %v10133_v44 = vadd.f32 %v10111_v24, %v10000_v47  ;;  %v10042_v0 = vpop.f32.mrf.mxu1  ;;  %v15879_v55 = vcombine.high %v10169_v39, %v10173_v23  ;;  %v10165_v57 = vld [vmem:[%s24308_s16 + $0x28] sm:$0xff] }
 0x7ae   :  { %v10002_v53 = vpop.f32.mrf.mxu0  ;;  %13434 = vmatpush2.bf16.msra.mxu0 %v16324_v40  ;;  %v15878_v2 = vcombine.low %v10169_v39, %v10173_v23  ;;  %v15871_v45 = vcombine.high %v10161_v22, %v10165_v57  ;;  %v10281_v24 = vld [vmem:[%s24308_s16 + $0x3c8] sm:$0xff]  ;;  %v15870_v40 = vcombine.low %v10161_v22, %v10165_v57 }
 0x7af   :  { %vm10141_vm3 = vcmp.ge.f32.partialorder %v10133_v44, 0.0  ;;  %v10149_v52 = vmul.f32 0.01, %v10133_v44  ;;  %v10043_v33 = vpop.f32.mrf.mxu1  ;;  %13435 = vmatprep.subr.bf16.mxu0 %v16317_v61  ;;  %v10156_v16 = vsel %vm10140_vm2, %v10132_v42, %v10148_v17  ;;  %v10285_v48 = vld [vmem:[%s24308_s16 + $0x3e8] sm:$0xff] }
 0x7b0   :  { %v22792_v25 = vpack.c.bf16 %v10156_v16, %v10156_v16  ;;  %v15991_v42 = vcombine.high %v10281_v24, %v10285_v48  ;;  %v10273_v47 = vld [vmem:[%s24308_s16 + $0x388] sm:$0xff]  ;;  %v15990_v14 = vcombine.low %v10281_v24, %v10285_v48 }
 0x7b1   :  { %v10157_v46 = vsel %vm10141_vm3, %v10133_v44, %v10149_v52  ;;  %v10277_v61 = vld [vmem:[%s24308_s16 + $0x3a8] sm:$0xff] }
 0x7b2   :  { %v22790_v3 = vpack.c.bf16 %v10157_v46, %v10157_v46  ;;  %13436 = vmatpush2.bf16.msra.mxu0 %v16316_v11  ;;  %v15983_v17 = vcombine.high %v10273_v47, %v10277_v61  ;;  %v10265_v44 = vld [vmem:[%s24308_s16 + $0x348] sm:$0xff]  ;;  %v15982_v53 = vcombine.low %v10273_v47, %v10277_v61 }
 0x7b3   :  { %13487 = vmatprep.subr.bf16.mxu0 %v16055_v9  ;;  %v10269_v0 = vld [vmem:[%s24308_s16 + $0x368] sm:$0xff] }
 0x7b4   :  { %13396 = vmatprep.mubr.bf16.mxu1 %v22790_v3  ;;  %v15975_v11 = vcombine.high %v10265_v44, %v10269_v0  ;;  %v10257_v52 = vld [vmem:[%s24308_s16 + $0x308] sm:$0xff]  ;;  %v15974_v9 = vcombine.low %v10265_v44, %v10269_v0 }
 0x7b5   :  { %13397 = vmatmul.mubr.bf16.vlgmr.msra.gmra.mxu1 %v22792_v25  ;;  %v10261_v33 = vld [vmem:[%s24308_s16 + $0x328] sm:$0xff] }
 0x7b6   :  { %13447 = vmatpush1.bf16.msra.mxu1 %v15926_v29  ;;  %13478 = vmatprep.mubr.bf16.mxu1 %v22460_v36  ;;  %v15902_v29 = vcombine.low %v10193_v7, %v10197_v54  ;;  %v15967_v16 = vcombine.high %v10257_v52, %v10261_v33  ;;  %v15966_v46 = vcombine.low %v10257_v52, %v10261_v33  ;;  %v10233_v54 = vld [vmem:[%s24308_s16 + $0x248] sm:$0xff] }
 0x7b7   :  { %13448 = vmatprep.subr.bf16.mxu1 %v15919_v50  ;;  %v15959_v50 = vcombine.high %v10249_v60, %v10253_v6  ;;  %v15951_v7 = vcombine.high %v10241_v13, %v10245_v31  ;;  %v10229_v63 = vld [vmem:[%s24308_s16 + $0x228] sm:$0xff] }
 0x7b8   :  { %v15935_v57 = vcombine.high %v10225_v62, %v10229_v63  ;;  %v15934_v24 = vcombine.low %v10225_v62, %v10229_v63  ;;  %v10337_v47 = vld [vmem:[%s24308_s16 + $0x588] sm:$0xff] }
 0x7b9   :  { %v10469_v44 = vld [vmem:[%s24308_s16 + $0x9a8] sm:$0xff] }
 0x7ba   :  { %13449 = vmatpush1.bf16.msra.mxu1 %v15918_v35  ;;  %v15958_v35 = vcombine.low %v10249_v60, %v10253_v6  ;;  %v10329_v52 = vld [vmem:[%s24308_s16 + $0x548] sm:$0xff] }
 0x7bb   :  { %13450 = vmatprep.subr.bf16.mxu1 %v15911_v19  ;;  %v10114_v19 = vsub.s32 6, %v20093_v38  ;;  %v10457_v60 = vld [vmem:[%s24308_s16 + $0x948] sm:$0xff] }
 0x7bc   :  { %v10461_v6 = vld [vmem:[%s24308_s16 + $0x968] sm:$0xff] }
 0x7bd   :  { %v10115_v34 = vrot.slane %v22419_v30, %v10114_v19  ;;  %v10313_v63 = vld [vmem:[%s24308_s16 + $0x4c8] sm:$0xff] }
 0x7be   :  { %13451 = vmatpush1.bf16.msra.mxu1 %v15910_v37  ;;  %v10237_v37 = vld [vmem:[%s24308_s16 + $0x268] sm:$0xff] }
 0x7bf   :  { %13452 = vmatprep.subr.bf16.mxu1 %v15903_v28  ;;  %v10118_v28 = vsub.s32 7, %v20093_v38 }
 0x7c1   :  { %v10119_v39 = vrot.slane %v22419_v30, %v10118_v28 }
 0x7c2   :  { %13453 = vmatpush1.bf16.msra.mxu1 %v15902_v29  ;;  %v15943_v29 = vcombine.high %v10233_v54, %v10237_v37 }
 0x7c3   :  { %13454 = vmatprep.subr.bf16.mxu1 %v15895_v41 }
 0x7c6   :  { %13455 = vmatpush1.bf16.msra.mxu1 %v15894_v27  ;;  %v10041_v27 = vadd.f32 %v22780_v49, %v22234_v1  ;;  %v10477_v1 = vld [vmem:[%s24308_s16 + $0x9e8] sm:$0xff] }
 0x7c7   :  { %13456 = vmatprep.subr.bf16.mxu1 %v15887_v32 }
 0x7ca   :  { %13457 = vmatpush1.bf16.msra.mxu1 %v15886_v20  ;;  %v15942_v20 = vcombine.low %v10233_v54, %v10237_v37  ;;  %v10321_v54 = vld [vmem:[%s24308_s16 + $0x508] sm:$0xff] }
 0x7cb   :  { %13458 = vmatprep.subr.bf16.mxu1 %v15879_v55 }
 0x7ce   :  { %13459 = vmatpush1.bf16.msra.mxu1 %v15878_v2 }
 0x7cf   :  { %13460 = vmatprep.subr.bf16.mxu1 %v15871_v45  ;;  %v10473_v45 = vld [vmem:[%s24308_s16 + $0x9c8] sm:$0xff] }
 0x7d2   :  { %13461 = vmatpush1.bf16.msra.mxu1 %v15870_v40  ;;  %v16183_v40 = vcombine.high %v10473_v45, %v10477_v1 }
 0x7d3   :  { %13462 = vmatprep.subr.bf16.mxu1 %v15991_v42 }
 0x7d6   :  { %13463 = vmatpush2.bf16.msra.mxu1 %v15990_v14  ;;  %v10341_v14 = vld [vmem:[%s24308_s16 + $0x5a8] sm:$0xff] }
 0x7d7   :  { %13464 = vmatprep.subr.bf16.mxu1 %v15983_v17  ;;  %v10465_v17 = vld [vmem:[%s24308_s16 + $0x988] sm:$0xff]  ;;  %v16047_v33 = vcombine.high %v10337_v47, %v10341_v14 }
 0x7d8   :  { %v16174_v13 = vcombine.low %v10465_v17, %v10469_v44 }
 0x7da   :  { %13465 = vmatpush2.bf16.msra.mxu1 %v15982_v53  ;;  %v16182_v53 = vcombine.low %v10473_v45, %v10477_v1  ;;  %v10433_v45 = vld [vmem:[%s24308_s16 + $0x888] sm:$0xff] }
 0x7db   :  { %13466 = vmatprep.subr.bf16.mxu1 %v15975_v11  ;;  %v10437_v1 = vld [vmem:[%s24308_s16 + $0x8a8] sm:$0xff] }
 0x7de   :  { %13467 = vmatpush2.bf16.msra.mxu1 %v15974_v9  ;;  %v16175_v9 = vcombine.high %v10465_v17, %v10469_v44 }
 0x7df   :  { %13468 = vmatprep.subr.bf16.mxu1 %v15967_v16  ;;  %v10333_v16 = vld [vmem:[%s24308_s16 + $0x568] sm:$0xff] }
 0x7e2   :  { %13469 = vmatpush2.bf16.msra.mxu1 %v15966_v46 }
 0x7e3   :  { %13470 = vmatprep.subr.bf16.mxu1 %v15959_v50  ;;  %v16046_v50 = vcombine.low %v10337_v47, %v10341_v14  ;;  %v10429_v47 = vld [vmem:[%s24308_s16 + $0x868] sm:$0xff]  ;;  %v16142_v14 = vcombine.low %v10433_v45, %v10437_v1 }
 0x7e6   :  { %13471 = vmatpush2.bf16.msra.mxu1 %v15958_v35  ;;  %v16039_v35 = vcombine.high %v10329_v52, %v10333_v16 }
 0x7e7   :  { %13472 = vmatprep.subr.bf16.mxu1 %v15951_v7  ;;  %v16167_v7 = vcombine.high %v10457_v60, %v10461_v6 }
 0x7e8   :  { %v10079_v41 = vpop.f32.mrf.mxu0 }
 0x7e9   :  { %v10080_v32 = vadd.f32 %v10079_v41, %v22778_v10  ;;  %v16031_v41 = vcombine.high %v10321_v54, %v10325_v56 }
 0x7ea   :  { %13473 = vmatpush2.bf16.msra.mxu1 %v15950_v15  ;;  %v10081_v23 = vpop.f32.mrf.mxu0  ;;  %v16038_v15 = vcombine.low %v10329_v52, %v10333_v16  ;;  %v10293_v52 = vld [vmem:[%s24308_s16 + $0x428] sm:$0xff] }
 0x7eb   :  { %v10134_v55 = vadd.f32 %v10115_v34, %v10080_v32  ;;  %v10082_v22 = vadd.f32 %v10081_v23, %v10041_v27  ;;  %13474 = vmatprep.subr.bf16.mxu1 %v15943_v29  ;;  %v16166_v34 = vcombine.low %v10457_v60, %v10461_v6  ;;  %v10317_v27 = vld [vmem:[%s24308_s16 + $0x4e8] sm:$0xff]  ;;  %v16030_v23 = vcombine.low %v10321_v54, %v10325_v56 }
 0x7ec   :  { %v10083_v2 = vpop.f32.mrf.mxu0  ;;  %v10441_v32 = vld [vmem:[%s24308_s16 + $0x8c8] sm:$0xff] }
 0x7ed   :  { %vm10142_vm4 = vcmp.ge.f32.partialorder %v10134_v55, 0.0  ;;  %v10150_v10 = vmul.f32 0.01, %v10134_v55  ;;  %v10135_v49 = vadd.f32 %v10119_v39, %v10082_v22  ;;  %v10445_v39 = vld [vmem:[%s24308_s16 + $0x8e8] sm:$0xff] }
 0x7ee   :  { %13475 = vmatpush2.bf16.msra.mxu1 %v15942_v20  ;;  %v10084_v30 = vpop.f32.mrf.mxu0  ;;  %v16151_v22 = vcombine.high %v10441_v32, %v10445_v39  ;;  %v10309_v2 = vld [vmem:[%s24308_s16 + $0x4a8] sm:$0xff] }
 0x7ef   :  { %vm10143_vm5 = vcmp.ge.f32.partialorder %v10135_v49, 0.0  ;;  %v10151_v48 = vmul.f32 0.01, %v10135_v49  ;;  %13476 = vmatprep.subr.bf16.mxu1 %v15935_v57  ;;  %v10158_v42 = vsel %vm10142_vm4, %v10134_v55, %v10150_v10  ;;  %v16023_v55 = vcombine.high %v10313_v63, %v10317_v27  ;;  %v10305_v57 = vld [vmem:[%s24308_s16 + $0x488] sm:$0xff] }
 0x7f0   :  { %v22915_v11 = vpack.c.bf16 %v10158_v42, %v10158_v42  ;;  %v16022_v10 = vcombine.low %v10313_v63, %v10317_v27  ;;  %v16015_v30 = vcombine.high %v10305_v57, %v10309_v2  ;;  %v10425_v42 = vld [vmem:[%s24308_s16 + $0x848] sm:$0xff] }
 0x7f1   :  { %v10159_v61 = vsel %vm10143_vm5, %v10135_v49, %v10151_v48  ;;  %v16150_v49 = vcombine.low %v10441_v32, %v10445_v39  ;;  %v10297_v48 = vld [vmem:[%s24308_s16 + $0x448] sm:$0xff]  ;;  %v16135_v44 = vcombine.high %v10425_v42, %v10429_v47  ;;  %v16134_v60 = vcombine.low %v10425_v42, %v10429_v47 }
 0x7f2   :  { %v22913_v0 = vpack.c.bf16 %v10159_v61, %v10159_v61  ;;  %13477 = vmatpush2.bf16.msra.mxu1 %v15934_v24  ;;  %v16143_v24 = vcombine.high %v10433_v45, %v10437_v1  ;;  %v16014_v61 = vcombine.low %v10305_v57, %v10309_v2  ;;  %v10541_v54 = vld [vmem:[%s24308_s16 + $0xbe8] sm:$0xff] }
 0x7f3   :  { %13528 = vmatprep.subr.bf16.mxu1 %v16183_v40  ;;  %v10301_v40 = vld [vmem:[%s24308_s16 + $0x468] sm:$0xff] }
 0x7f4   :  { %13437 = vmatprep.mubr.bf16.mxu0 %v22913_v0  ;;  %v16007_v17 = vcombine.high %v10297_v48, %v10301_v40  ;;  %v16006_v16 = vcombine.low %v10297_v48, %v10301_v40  ;;  %v10393_v39 = vld [vmem:[%s24308_s16 + $0x748] sm:$0xff] }
 0x7f5   :  { %13479 = vmatmul.mubr.bf16.vlgmr.msra.gmra.mxu1 %v22469_v18  ;;  %v22931_v46 = vpop.f32.mrf.mxu1  ;;  %13438 = vmatmul.mubr.bf16.vlgmr.msra.gmra.mxu0 %v22915_v11  ;;  %v10385_v1 = vld [vmem:[%s24308_s16 + $0x708] sm:$0xff] }
 0x7f6   :  { %13488 = vmatpush1.bf16.msra.mxu0 %v16054_v12  ;;  %13529 = vmatpush1.bf16.msra.mxu1 %v16182_v53  ;;  %v10453_v12 = vld [vmem:[%s24308_s16 + $0x928] sm:$0xff] }
 0x7f7   :  { %13560 = vmatprep.mubr.bf16.mxu1 %v22790_v3  ;;  %13519 = vmatprep.mubr.bf16.mxu0 %v22662_v58  ;;  %v22939_v31 = vpop.f32.mrf.mxu1  ;;  %v16159_v62 = vcombine.high %v10449_v21, %v10453_v12  ;;  %v16158_v20 = vcombine.low %v10449_v21, %v10453_v12  ;;  %v10289_v53 = vld [vmem:[%s24308_s16 + $0x408] sm:$0xff] }
 0x7f8   :  { %13489 = vmatprep.subr.bf16.mxu0 %v16047_v33  ;;  %13530 = vmatprep.subr.bf16.mxu1 %v16175_v9  ;;  %v10417_v33 = vld [vmem:[%s24308_s16 + $0x808] sm:$0xff]  ;;  %v15999_v6 = vcombine.high %v10289_v53, %v10293_v52  ;;  %v15998_v56 = vcombine.low %v10289_v53, %v10293_v52 }
 0x7f9   :  { %v13320_v37 = vpop.f32.mrf.mxu1  ;;  %v10421_v9 = vld [vmem:[%s24308_s16 + $0x828] sm:$0xff] }
 0x7fa   :  { %13490 = vmatpush1.bf16.msra.mxu0 %v16046_v50  ;;  %13531 = vmatpush1.bf16.msra.mxu1 %v16174_v13  ;;  %v16127_v50 = vcombine.high %v10417_v33, %v10421_v9  ;;  %v10409_v13 = vld [vmem:[%s24308_s16 + $0x7c8] sm:$0xff]  ;;  %v16126_v21 = vcombine.low %v10417_v33, %v10421_v9 }
 0x7fb   :  { %v13321_v29 = vpop.f32.mrf.mxu1  ;;  %13491 = vmatprep.subr.bf16.mxu0 %v16039_v35  ;;  %13532 = vmatprep.subr.bf16.mxu1 %v16167_v7  ;;  %v10413_v35 = vld [vmem:[%s24308_s16 + $0x7e8] sm:$0xff] }
 0x7fc   :  { %v10537_v7 = vld [vmem:[%s24308_s16 + $0xbc8] sm:$0xff]  ;;  %v16119_v12 = vcombine.high %v10409_v13, %v10413_v35 }
 0x7fd   :  { %v16247_v37 = vcombine.high %v10537_v7, %v10541_v54  ;;  %v10529_v29 = vld [vmem:[%s24308_s16 + $0xb88] sm:$0xff]  ;;  %v16246_v63 = vcombine.low %v10537_v7, %v10541_v54 }
 0x7fe   :  { %13492 = vmatpush1.bf16.msra.mxu0 %v16038_v15  ;;  %13533 = vmatpush1.bf16.msra.mxu1 %v16166_v34  ;;  %v10401_v15 = vld [vmem:[%s24308_s16 + $0x788] sm:$0xff] }
 0x7ff   :  { %13493 = vmatprep.subr.bf16.mxu0 %v16031_v41  ;;  %13534 = vmatprep.subr.bf16.mxu1 %v16159_v62  ;;  %v10405_v34 = vld [vmem:[%s24308_s16 + $0x7a8] sm:$0xff]  ;;  %v16118_v62 = vcombine.low %v10409_v13, %v10413_v35 }
 0x800   :  { %v10533_v41 = vld [vmem:[%s24308_s16 + $0xba8] sm:$0xff]  ;;  %v16111_v27 = vcombine.high %v10401_v15, %v10405_v34 }
 0x801   :  { %v16239_v32 = vcombine.high %v10529_v29, %v10533_v41  ;;  %v16238_v57 = vcombine.low %v10529_v29, %v10533_v41  ;;  %v10377_v47 = vld [vmem:[%s24308_s16 + $0x6c8] sm:$0xff] }
 0x802   :  { %13494 = vmatpush1.bf16.msra.mxu0 %v16030_v23  ;;  %13535 = vmatpush1.bf16.msra.mxu1 %v16158_v20  ;;  %v10397_v23 = vld [vmem:[%s24308_s16 + $0x768] sm:$0xff] }
 0x803   :  { %13495 = vmatprep.subr.bf16.mxu0 %v16023_v55  ;;  %13536 = vmatprep.subr.bf16.mxu1 %v16151_v22  ;;  %v10521_v20 = vld [vmem:[%s24308_s16 + $0xb48] sm:$0xff]  ;;  %v16110_v22 = vcombine.low %v10401_v15, %v10405_v34  ;;  %v16103_v2 = vcombine.high %v10393_v39, %v10397_v23 }
 0x804   :  { %v10525_v55 = vld [vmem:[%s24308_s16 + $0xb68] sm:$0xff] }
 0x805   :  { %v16231_v45 = vcombine.high %v10521_v20, %v10525_v55  ;;  %v16230_v48 = vcombine.low %v10521_v20, %v10525_v55  ;;  %v10369_v9 = vld [vmem:[%s24308_s16 + $0x688] sm:$0xff] }
 0x806   :  { %13496 = vmatpush1.bf16.msra.mxu0 %v16022_v10  ;;  %13537 = vmatpush1.bf16.msra.mxu1 %v16150_v49  ;;  %v10389_v10 = vld [vmem:[%s24308_s16 + $0x728] sm:$0xff] }
 0x807   :  { %13497 = vmatprep.subr.bf16.mxu0 %v16015_v30  ;;  %13538 = vmatprep.subr.bf16.mxu1 %v16143_v24  ;;  %v10513_v49 = vld [vmem:[%s24308_s16 + $0xb08] sm:$0xff]  ;;  %v16102_v24 = vcombine.low %v10393_v39, %v10397_v23  ;;  %v16095_v40 = vcombine.high %v10385_v1, %v10389_v10 }
 0x808   :  { %v10517_v30 = vld [vmem:[%s24308_s16 + $0xb28] sm:$0xff] }
 0x809   :  { %v16223_v42 = vcombine.high %v10513_v49, %v10517_v30  ;;  %v16222_v53 = vcombine.low %v10513_v49, %v10517_v30  ;;  %v10361_v54 = vld [vmem:[%s24308_s16 + $0x648] sm:$0xff] }
 0x80a   :  { %13498 = vmatpush1.bf16.msra.mxu0 %v16014_v61  ;;  %13539 = vmatpush1.bf16.msra.mxu1 %v16142_v14  ;;  %v10381_v61 = vld [vmem:[%s24308_s16 + $0x6e8] sm:$0xff] }
 0x80b   :  { %13499 = vmatprep.subr.bf16.mxu0 %v16007_v17  ;;  %13540 = vmatprep.subr.bf16.mxu1 %v16135_v44  ;;  %v10505_v14 = vld [vmem:[%s24308_s16 + $0xac8] sm:$0xff]  ;;  %v16094_v44 = vcombine.low %v10385_v1, %v10389_v10  ;;  %v16087_v52 = vcombine.high %v10377_v47, %v10381_v61 }
 0x80c   :  { %v10509_v17 = vld [vmem:[%s24308_s16 + $0xae8] sm:$0xff] }
 0x80d   :  { %v16215_v33 = vcombine.high %v10505_v14, %v10509_v17  ;;  %v16214_v13 = vcombine.low %v10505_v14, %v10509_v17  ;;  %v10353_v41 = vld [vmem:[%s24308_s16 + $0x608] sm:$0xff] }
 0x80e   :  { %13500 = vmatpush1.bf16.msra.mxu0 %v16006_v16  ;;  %13541 = vmatpush1.bf16.msra.mxu1 %v16134_v60  ;;  %v10373_v16 = vld [vmem:[%s24308_s16 + $0x6a8] sm:$0xff] }
 0x80f   :  { %13501 = vmatprep.subr.bf16.mxu0 %v15999_v6  ;;  %13542 = vmatprep.subr.bf16.mxu1 %v16127_v50  ;;  %v10497_v60 = vld [vmem:[%s24308_s16 + $0xa88] sm:$0xff]  ;;  %v16086_v50 = vcombine.low %v10377_v47, %v10381_v61  ;;  %v16079_v35 = vcombine.high %v10369_v9, %v10373_v16  ;;  %v10214_v47 = vld [vmem:[%s24308_s16 + $0x1b0] sm:$0xff] }
 0x810   :  { %v10501_v6 = vld [vmem:[%s24308_s16 + $0xaa8] sm:$0xff] }
 0x811   :  { %v16207_v7 = vcombine.high %v10497_v60, %v10501_v6  ;;  %v16206_v15 = vcombine.low %v10497_v60, %v10501_v6  ;;  %v10601_v55 = vld [vmem:[%s24308_s16 + $0xdc8] sm:$0xff] }
 0x812   :  { %13502 = vmatpush1.bf16.msra.mxu0 %v15998_v56  ;;  %13543 = vmatpush1.bf16.msra.mxu1 %v16126_v21  ;;  %v10365_v56 = vld [vmem:[%s24308_s16 + $0x668] sm:$0xff] }
 0x813   :  { %13503 = vmatprep.subr.bf16.mxu0 %v16119_v12  ;;  %13544 = vmatprep.subr.bf16.mxu1 %v16247_v37  ;;  %v10489_v21 = vld [vmem:[%s24308_s16 + $0xa48] sm:$0xff]  ;;  %v16078_v37 = vcombine.low %v10369_v9, %v10373_v16  ;;  %v16071_v34 = vcombine.high %v10361_v54, %v10365_v56  ;;  %v10202_v9 = vld [vmem:[%s24308_s16 + $0x150] sm:$0xff] }
 0x814   :  { %v10493_v12 = vld [vmem:[%s24308_s16 + $0xa68] sm:$0xff] }
 0x815   :  { %v16199_v29 = vcombine.high %v10489_v21, %v10493_v12  ;;  %v16198_v39 = vcombine.low %v10489_v21, %v10493_v12  ;;  %v10194_v12 = vld [vmem:[%s24308_s16 + $0x110] sm:$0xff] }
 0x816   :  { %13504 = vmatpush2.bf16.msra.mxu0 %v16118_v62  ;;  %13545 = vmatpush2.bf16.msra.mxu1 %v16246_v63  ;;  %v10357_v62 = vld [vmem:[%s24308_s16 + $0x628] sm:$0xff] }
 0x817   :  { %13505 = vmatprep.subr.bf16.mxu0 %v16111_v27  ;;  %13546 = vmatprep.subr.bf16.mxu1 %v16239_v32  ;;  %v10481_v63 = vld [vmem:[%s24308_s16 + $0xa08] sm:$0xff]  ;;  %v16070_v32 = vcombine.low %v10361_v54, %v10365_v56  ;;  %v16063_v23 = vcombine.high %v10353_v41, %v10357_v62  ;;  %v16062_v1 = vcombine.low %v10353_v41, %v10357_v62 }
 0x818   :  { %v10485_v27 = vld [vmem:[%s24308_s16 + $0xa28] sm:$0xff] }
 0x819   :  { %v16191_v20 = vcombine.high %v10481_v63, %v10485_v27  ;;  %v16190_v10 = vcombine.low %v10481_v63, %v10485_v27  ;;  %v10581_v56 = vld [vmem:[%s24308_s16 + $0xd28] sm:$0xff] }
 0x81a   :  { %13506 = vmatpush2.bf16.msra.mxu0 %v16110_v22  ;;  %13547 = vmatpush2.bf16.msra.mxu1 %v16238_v57  ;;  %v10605_v22 = vld [vmem:[%s24308_s16 + $0xde8] sm:$0xff]  ;;  %v10218_v57 = vld [vmem:[%s24308_s16 + $0x1d0] sm:$0xff] }
 0x81b   :  { %13507 = vmatprep.subr.bf16.mxu0 %v16103_v2  ;;  %13548 = vmatprep.subr.bf16.mxu1 %v16231_v45  ;;  %v10222_v2 = vld [vmem:[%s24308_s16 + $0x1f0] sm:$0xff]  ;;  %v10680_v45 = vld [vmem:[%s24310_s17] sm:$0xff]  ;;  %v16311_v49 = vcombine.high %v10601_v55, %v10605_v22  ;;  %v10569_v63 = vld [vmem:[%s24308_s16 + $0xcc8] sm:$0xff] }
 0x81c   :  { %v15929_v30 = vcombine.high %v10218_v57, %v10222_v2  ;;  %v10689_v61 = vrot.slane %v10680_v45, %v20102_v51  ;;  %v15928_v14 = vcombine.low %v10218_v57, %v10222_v2  ;;  %v10573_v27 = vld [vmem:[%s24308_s16 + $0xce8] sm:$0xff] }
 0x81d   :  { %v10561_v57 = vld [vmem:[%s24308_s16 + $0xc88] sm:$0xff] }
 0x81e   :  { %13508 = vmatpush2.bf16.msra.mxu0 %v16102_v24  ;;  %13549 = vmatpush2.bf16.msra.mxu1 %v16230_v48  ;;  %v10685_v24 = vrot.slane %v10680_v45, %v20096_v8  ;;  %v10593_v48 = vld [vmem:[%s24308_s16 + $0xd88] sm:$0xff]  ;;  %v16310_v8 = vcombine.low %v10601_v55, %v10605_v22  ;;  %v13319_v16 = vadd.f32 %v22939_v31, %v10689_v61  ;;  %v10178_v45 = vld [vmem:[%s24308_s16 + $0x90] sm:$0xff] }
 0x81f   :  { %13509 = vmatprep.subr.bf16.mxu0 %v16095_v40  ;;  %13550 = vmatprep.subr.bf16.mxu1 %v16223_v42  ;;  %v10597_v40 = vld [vmem:[%s24308_s16 + $0xda8] sm:$0xff]  ;;  %v10210_v42 = vld [vmem:[%s24308_s16 + $0x190] sm:$0xff]  ;;  %v16279_v55 = vcombine.high %v10569_v63, %v10573_v27 }
 0x820   :  { %v13317_v17 = vadd.f32 %v22931_v46, %v10685_v24  ;;  %v10206_v46 = vld [vmem:[%s24308_s16 + $0x170] sm:$0xff]  ;;  %v16302_v6 = vcombine.low %v10593_v48, %v10597_v40  ;;  %v10577_v31 = vld [vmem:[%s24308_s16 + $0xd08] sm:$0xff] }
 0x821   :  { %v15913_v54 = vcombine.high %v10202_v9, %v10206_v46  ;;  %v16287_v41 = vcombine.high %v10577_v31, %v10581_v56  ;;  %v10565_v2 = vld [vmem:[%s24308_s16 + $0xca8] sm:$0xff] }
 0x822   :  { %13510 = vmatpush2.bf16.msra.mxu0 %v16094_v44  ;;  %13551 = vmatpush2.bf16.msra.mxu1 %v16222_v53  ;;  %v16303_v44 = vcombine.high %v10593_v48, %v10597_v40  ;;  %v15921_v53 = vcombine.high %v10210_v42, %v10214_v47  ;;  %v10553_v48 = vld [vmem:[%s24308_s16 + $0xc48] sm:$0xff]  ;;  %v16270_v61 = vcombine.low %v10561_v57, %v10565_v2 }
 0x823   :  { %13511 = vmatprep.subr.bf16.mxu0 %v16087_v52  ;;  %13552 = vmatprep.subr.bf16.mxu1 %v16215_v33  ;;  %v10585_v52 = vld [vmem:[%s24308_s16 + $0xd48] sm:$0xff] }
 0x824   :  { %v10589_v33 = vld [vmem:[%s24308_s16 + $0xd68] sm:$0xff] }
 0x825   :  { %v10557_v40 = vld [vmem:[%s24308_s16 + $0xc68] sm:$0xff] }
 0x826   :  { %13512 = vmatpush2.bf16.msra.mxu0 %v16086_v50  ;;  %13553 = vmatpush2.bf16.msra.mxu1 %v16214_v13  ;;  %v15920_v13 = vcombine.low %v10210_v42, %v10214_v47  ;;  %v10170_v42 = vld [vmem:[%s24308_s16 + $0x50] sm:$0xff] }
 0x827   :  { %13513 = vmatprep.subr.bf16.mxu0 %v16079_v35  ;;  %13554 = vmatprep.subr.bf16.mxu1 %v16207_v7  ;;  %v16295_v35 = vcombine.high %v10585_v52, %v10589_v33  ;;  %v10174_v47 = vld [vmem:[%s24308_s16 + $0x70] sm:$0xff] }
 0x82a   :  { %13514 = vmatpush2.bf16.msra.mxu0 %v16078_v37  ;;  %13555 = vmatpush2.bf16.msra.mxu1 %v16206_v15  ;;  %v10198_v37 = vld [vmem:[%s24308_s16 + $0x130] sm:$0xff]  ;;  %v16294_v15 = vcombine.low %v10585_v52, %v10589_v33 }
 0x82b   :  { %13515 = vmatprep.subr.bf16.mxu0 %v16071_v34  ;;  %13556 = vmatprep.subr.bf16.mxu1 %v16199_v29  ;;  %v15912_v29 = vcombine.low %v10202_v9, %v10206_v46  ;;  %v15905_v62 = vcombine.high %v10194_v12, %v10198_v37  ;;  %v10162_v52 = vld [vmem:[%s24308_s16 + $0x10] sm:$0xff]  ;;  %v15880_v9 = vcombine.low %v10170_v42, %v10174_v47 }
 0x82c   :  { %v10166_v33 = vld [vmem:[%s24308_s16 + $0x30] sm:$0xff] }
 0x82e   :  { %13516 = vmatpush2.bf16.msra.mxu0 %v16070_v32  ;;  %13557 = vmatpush2.bf16.msra.mxu1 %v16198_v39  ;;  %v10186_v32 = vld [vmem:[%s24308_s16 + $0xd0] sm:$0xff] }
 0x82f   :  { %13517 = vmatprep.subr.bf16.mxu0 %v16063_v23  ;;  %13558 = vmatprep.subr.bf16.mxu1 %v16191_v20  ;;  %v10190_v39 = vld [vmem:[%s24308_s16 + $0xf0] sm:$0xff]  ;;  %v16286_v23 = vcombine.low %v10577_v31, %v10581_v56  ;;  %v15904_v20 = vcombine.low %v10194_v12, %v10198_v37  ;;  %v15872_v31 = vcombine.low %v10162_v52, %v10166_v33  ;;  %v10657_v12 = vld [vmem:[%s24308_s16 + $0xf88] sm:$0xff] }
 0x830   :  { %v15897_v22 = vcombine.high %v10186_v32, %v10190_v39  ;;  %v10661_v37 = vld [vmem:[%s24308_s16 + $0xfa8] sm:$0xff] }
 0x832   :  { %13518 = vmatpush2.bf16.msra.mxu0 %v16062_v1  ;;  %13559 = vmatpush2.bf16.msra.mxu1 %v16190_v10  ;;  %v10182_v1 = vld [vmem:[%s24308_s16 + $0xb0] sm:$0xff]  ;;  %v16278_v10 = vcombine.low %v10569_v63, %v10573_v27  ;;  %v10649_v27 = vld [vmem:[%s24308_s16 + $0xf48] sm:$0xff] }
 0x833   :  { %13569 = vmatprep.subr.bf16.mxu0 %v16311_v49  ;;  %13610 = vmatprep.subr.bf16.mxu1 %v15929_v30  ;;  %v15896_v49 = vcombine.low %v10186_v32, %v10190_v39  ;;  %v16271_v30 = vcombine.high %v10561_v57, %v10565_v2  ;;  %v15889_v24 = vcombine.high %v10178_v45, %v10182_v1  ;;  %v10653_v32 = vld [vmem:[%s24308_s16 + $0xf68] sm:$0xff]  ;;  %v10266_v39 = vld [vmem:[%s24308_s16 + $0x350] sm:$0xff] }
 0x834   :  { %v10641_v2 = vld [vmem:[%s24308_s16 + $0xf08] sm:$0xff] }
 0x835   :  { %13520 = vmatmul.mubr.bf16.vlgmr.msra.gmra.mxu0 %v22676_v59  ;;  %13561 = vmatmul.mubr.bf16.vlgmr.msra.gmra.mxu1 %v22792_v25  ;;  %v13357_v51 = vpop.f32.mrf.mxu0 }
 0x836   :  { %v23142_v60 = vadd.f32 %v13357_v51, %v13317_v17  ;;  %13570 = vmatpush1.bf16.msra.mxu0 %v16310_v8  ;;  %13601 = vmatprep.mubr.bf16.mxu0 %v22913_v0  ;;  %v15888_v8 = vcombine.low %v10178_v45, %v10182_v1  ;;  %v15881_v17 = vcombine.high %v10170_v42, %v10174_v47  ;;  %v10645_v45 = vld [vmem:[%s24308_s16 + $0xf28] sm:$0xff]  ;;  %v10258_v1 = vld [vmem:[%s24308_s16 + $0x310] sm:$0xff] }
 0x837   :  { %13611 = vmatpush1.bf16.msra.mxu1 %v15928_v14  ;;  %13642 = vmatprep.mubr.bf16.mxu1 %v22460_v36  ;;  %v13359_v50 = vpop.f32.mrf.mxu0  ;;  %v16263_v14 = vcombine.high %v10553_v48, %v10557_v40  ;;  %v16262_v51 = vcombine.low %v10553_v48, %v10557_v40  ;;  %v10633_v40 = vld [vmem:[%s24308_s16 + $0xec8] sm:$0xff]  ;;  %v10250_v47 = vld [vmem:[%s24308_s16 + $0x2d0] sm:$0xff] }
 0x838   :  { %v23146_v7 = vadd.f32 %v13359_v50, %v13319_v16  ;;  %13571 = vmatprep.subr.bf16.mxu0 %v16303_v44  ;;  %13612 = vmatprep.subr.bf16.mxu1 %v15921_v53  ;;  %v10545_v44 = vld [vmem:[%s24308_s16 + $0xc08] sm:$0xff]  ;;  %v15873_v16 = vcombine.high %v10162_v52, %v10166_v33  ;;  %v10242_v33 = vld [vmem:[%s24308_s16 + $0x290] sm:$0xff] }
 0x839   :  { %v13361_v21 = vpop.f32.mrf.mxu0  ;;  %v10549_v53 = vld [vmem:[%s24308_s16 + $0xc28] sm:$0xff] }
 0x83a   :  { %13572 = vmatpush1.bf16.msra.mxu0 %v16302_v6  ;;  %v16255_v46 = vcombine.high %v10545_v44, %v10549_v53  ;;  %v10665_v6 = vld [vmem:[%s24308_s16 + $0xfc8] sm:$0xff] }
 0x83b   :  { %13613 = vmatpush1.bf16.msra.mxu1 %v15920_v13  ;;  %v13362_v34 = vpop.f32.mrf.mxu0  ;;  %13573 = vmatprep.subr.bf16.mxu0 %v16295_v35  ;;  %v10669_v50 = vld [vmem:[%s24308_s16 + $0xfe8] sm:$0xff]  ;;  %v10282_v13 = vld [vmem:[%s24308_s16 + $0x3d0] sm:$0xff] }
 0x83c   :  { %13614 = vmatprep.subr.bf16.mxu1 %v15913_v54  ;;  %v10286_v35 = vld [vmem:[%s24308_s16 + $0x3f0] sm:$0xff]  ;;  %v16254_v54 = vcombine.low %v10545_v44, %v10549_v53  ;;  %v16375_v56 = vcombine.high %v10665_v6, %v10669_v50  ;;  %v10637_v42 = vld [vmem:[%s24308_s16 + $0xee8] sm:$0xff] }
 0x83d   :  { %v15993_v21 = vcombine.high %v10282_v13, %v10286_v35  ;;  %v10278_v34 = vld [vmem:[%s24308_s16 + $0x3b0] sm:$0xff]  ;;  %v10625_v53 = vld [vmem:[%s24308_s16 + $0xe88] sm:$0xff] }
 0x83e   :  { %13574 = vmatpush1.bf16.msra.mxu0 %v16294_v15  ;;  %v10274_v15 = vld [vmem:[%s24308_s16 + $0x390] sm:$0xff]  ;;  %v10629_v52 = vld [vmem:[%s24308_s16 + $0xea8] sm:$0xff] }
 0x83f   :  { %13615 = vmatpush1.bf16.msra.mxu1 %v15912_v29  ;;  %13575 = vmatprep.subr.bf16.mxu0 %v16287_v41  ;;  %v16374_v29 = vcombine.low %v10665_v6, %v10669_v50  ;;  %v15992_v41 = vcombine.low %v10282_v13, %v10286_v35  ;;  %v15985_v63 = vcombine.high %v10274_v15, %v10278_v34  ;;  %v10617_v50 = vld [vmem:[%s24308_s16 + $0xe48] sm:$0xff]  ;;  %v10234_v35 = vld [vmem:[%s24308_s16 + $0x250] sm:$0xff] }
 0x840   :  { %13616 = vmatprep.subr.bf16.mxu1 %v15905_v62  ;;  %v16367_v62 = vcombine.high %v10657_v12, %v10661_v37  ;;  %v10621_v13 = vld [vmem:[%s24308_s16 + $0xe68] sm:$0xff] }
 0x842   :  { %13576 = vmatpush1.bf16.msra.mxu0 %v16286_v23  ;;  %v10270_v23 = vld [vmem:[%s24308_s16 + $0x370] sm:$0xff] }
 0x843   :  { %13617 = vmatpush1.bf16.msra.mxu1 %v15904_v20  ;;  %13577 = vmatprep.subr.bf16.mxu0 %v16279_v55  ;;  %v16366_v20 = vcombine.low %v10657_v12, %v10661_v37  ;;  %v15984_v55 = vcombine.low %v10274_v15, %v10278_v34  ;;  %v15977_v57 = vcombine.high %v10266_v39, %v10270_v23  ;;  %v10609_v37 = vld [vmem:[%s24308_s16 + $0xe08] sm:$0xff]  ;;  %v10226_v34 = vld [vmem:[%s24308_s16 + $0x210] sm:$0xff] }
 0x844   :  { %13618 = vmatprep.subr.bf16.mxu1 %v15897_v22  ;;  %v16359_v22 = vcombine.high %v10649_v27, %v10653_v32  ;;  %v10613_v15 = vld [vmem:[%s24308_s16 + $0xe28] sm:$0xff] }
 0x846   :  { %13578 = vmatpush1.bf16.msra.mxu0 %v16278_v10  ;;  %v10262_v10 = vld [vmem:[%s24308_s16 + $0x330] sm:$0xff] }
 0x847   :  { %13619 = vmatpush1.bf16.msra.mxu1 %v15896_v49  ;;  %13579 = vmatprep.subr.bf16.mxu0 %v16271_v30  ;;  %v16358_v49 = vcombine.low %v10649_v27, %v10653_v32  ;;  %v15976_v30 = vcombine.low %v10266_v39, %v10270_v23  ;;  %v15969_v48 = vcombine.high %v10258_v1, %v10262_v10  ;;  %v10346_v32 = vld [vmem:[%s24308_s16 + $0x5d0] sm:$0xff] }
 0x848   :  { %13620 = vmatprep.subr.bf16.mxu1 %v15889_v24  ;;  %v16351_v24 = vcombine.high %v10641_v2, %v10645_v45  ;;  %v10350_v39 = vld [vmem:[%s24308_s16 + $0x5f0] sm:$0xff] }
 0x849   :  { %v10474_v23 = vld [vmem:[%s24308_s16 + $0x9d0] sm:$0xff] }
 0x84a   :  { %13580 = vmatpush1.bf16.msra.mxu0 %v16270_v61  ;;  %v10254_v61 = vld [vmem:[%s24308_s16 + $0x2f0] sm:$0xff] }
 0x84b   :  { %13621 = vmatpush1.bf16.msra.mxu1 %v15888_v8  ;;  %13581 = vmatprep.subr.bf16.mxu0 %v16263_v14  ;;  %v16350_v8 = vcombine.low %v10641_v2, %v10645_v45  ;;  %v15968_v14 = vcombine.low %v10258_v1, %v10262_v10  ;;  %v15961_v44 = vcombine.high %v10250_v47, %v10254_v61  ;;  %v10338_v45 = vld [vmem:[%s24308_s16 + $0x590] sm:$0xff] }
 0x84c   :  { %13622 = vmatprep.subr.bf16.mxu1 %v15881_v17  ;;  %v16343_v17 = vcombine.high %v10633_v40, %v10637_v42  ;;  %v10342_v1 = vld [vmem:[%s24308_s16 + $0x5b0] sm:$0xff]  ;;  %v16056_v10 = vcombine.low %v10346_v32, %v10350_v39 }
 0x84e   :  { %13582 = vmatpush1.bf16.msra.mxu0 %v16262_v51  ;;  %v10246_v51 = vld [vmem:[%s24308_s16 + $0x2b0] sm:$0xff] }
 0x84f   :  { %13623 = vmatpush1.bf16.msra.mxu1 %v15880_v9  ;;  %13583 = vmatprep.subr.bf16.mxu0 %v16255_v46  ;;  %v16342_v9 = vcombine.low %v10633_v40, %v10637_v42  ;;  %v15960_v46 = vcombine.low %v10250_v47, %v10254_v61  ;;  %v15953_v6 = vcombine.high %v10242_v33, %v10246_v51  ;;  %v10330_v40 = vld [vmem:[%s24308_s16 + $0x550] sm:$0xff] }
 0x850   :  { %13624 = vmatprep.subr.bf16.mxu1 %v15873_v16  ;;  %v16335_v16 = vcombine.high %v10625_v53, %v10629_v52  ;;  %v10334_v42 = vld [vmem:[%s24308_s16 + $0x570] sm:$0xff] }
 0x852   :  { %13584 = vmatpush1.bf16.msra.mxu0 %v16254_v54  ;;  %v10238_v54 = vld [vmem:[%s24308_s16 + $0x270] sm:$0xff] }
 0x853   :  { %13625 = vmatpush1.bf16.msra.mxu1 %v15872_v31  ;;  %13585 = vmatprep.subr.bf16.mxu0 %v16375_v56  ;;  %v16334_v31 = vcombine.low %v10625_v53, %v10629_v52  ;;  %v15952_v56 = vcombine.low %v10242_v33, %v10246_v51  ;;  %v15945_v12 = vcombine.high %v10234_v35, %v10238_v54  ;;  %v10322_v51 = vld [vmem:[%s24308_s16 + $0x510] sm:$0xff] }
 0x854   :  { %13626 = vmatprep.subr.bf16.mxu1 %v15993_v21  ;;  %v16327_v21 = vcombine.high %v10617_v50, %v10621_v13  ;;  %v16041_v52 = vcombine.high %v10330_v40, %v10334_v42 }
 0x856   :  { %13586 = vmatpush2.bf16.msra.mxu0 %v16374_v29  ;;  %v10230_v29 = vld [vmem:[%s24308_s16 + $0x230] sm:$0xff] }
 0x857   :  { %13627 = vmatpush2.bf16.msra.mxu1 %v15992_v41  ;;  %13587 = vmatprep.subr.bf16.mxu0 %v16367_v62  ;;  %v16326_v41 = vcombine.low %v10617_v50, %v10621_v13  ;;  %v15944_v62 = vcombine.low %v10234_v35, %v10238_v54  ;;  %v15937_v27 = vcombine.high %v10226_v34, %v10230_v29 }
 0x858   :  { %13628 = vmatprep.subr.bf16.mxu1 %v15985_v63  ;;  %v16319_v63 = vcombine.high %v10609_v37, %v10613_v15  ;;  %v16040_v50 = vcombine.low %v10330_v40, %v10334_v42  ;;  %v10418_v40 = vld [vmem:[%s24308_s16 + $0x810] sm:$0xff] }
 0x859   :  { %v10422_v42 = vld [vmem:[%s24308_s16 + $0x830] sm:$0xff] }
 0x85a   :  { %13588 = vmatpush2.bf16.msra.mxu0 %v16366_v20  ;;  %v10478_v20 = vld [vmem:[%s24308_s16 + $0x9f0] sm:$0xff] }
 0x85b   :  { %13629 = vmatpush2.bf16.msra.mxu1 %v15984_v55  ;;  %13589 = vmatprep.subr.bf16.mxu0 %v16359_v22  ;;  %v16318_v55 = vcombine.low %v10609_v37, %v10613_v15  ;;  %v15936_v22 = vcombine.low %v10226_v34, %v10230_v29  ;;  %v16185_v2 = vcombine.high %v10474_v23, %v10478_v20  ;;  %v10446_v37 = vld [vmem:[%s24308_s16 + $0x8f0] sm:$0xff] }
 0x85c   :  { %13630 = vmatprep.subr.bf16.mxu1 %v15977_v57  ;;  %v16057_v57 = vcombine.high %v10346_v32, %v10350_v39  ;;  %v10438_v32 = vld [vmem:[%s24308_s16 + $0x8b0] sm:$0xff] }
 0x85e   :  { %13590 = vmatpush2.bf16.msra.mxu0 %v16358_v49  ;;  %v10466_v49 = vld [vmem:[%s24308_s16 + $0x990] sm:$0xff] }
 0x85f   :  { %13631 = vmatpush2.bf16.msra.mxu1 %v15976_v30  ;;  %13591 = vmatprep.subr.bf16.mxu0 %v16351_v24  ;;  %v10470_v30 = vld [vmem:[%s24308_s16 + $0x9b0] sm:$0xff]  ;;  %v16184_v24 = vcombine.low %v10474_v23, %v10478_v20 }
 0x860   :  { %13632 = vmatprep.subr.bf16.mxu1 %v15969_v48  ;;  %v16049_v48 = vcombine.high %v10338_v45, %v10342_v1  ;;  %v16177_v61 = vcombine.high %v10466_v49, %v10470_v30  ;;  %v16176_v53 = vcombine.low %v10466_v49, %v10470_v30 }
 0x862   :  { %13592 = vmatpush2.bf16.msra.mxu0 %v16350_v8  ;;  %v10458_v8 = vld [vmem:[%s24308_s16 + $0x950] sm:$0xff] }
 0x863   :  { %13633 = vmatpush2.bf16.msra.mxu1 %v15968_v14  ;;  %13593 = vmatprep.subr.bf16.mxu0 %v16343_v17  ;;  %v10462_v14 = vld [vmem:[%s24308_s16 + $0x970] sm:$0xff]  ;;  %v16048_v17 = vcombine.low %v10338_v45, %v10342_v1 }
 0x864   :  { %13634 = vmatprep.subr.bf16.mxu1 %v15961_v44  ;;  %v16169_v33 = vcombine.high %v10458_v8, %v10462_v14  ;;  %v16168_v35 = vcombine.low %v10458_v8, %v10462_v14  ;;  %v10430_v45 = vld [vmem:[%s24308_s16 + $0x870] sm:$0xff] }
 0x866   :  { %13594 = vmatpush2.bf16.msra.mxu0 %v16342_v9  ;;  %v10326_v9 = vld [vmem:[%s24308_s16 + $0x530] sm:$0xff] }
 0x867   :  { %13635 = vmatpush2.bf16.msra.mxu1 %v15960_v46  ;;  %13595 = vmatprep.subr.bf16.mxu0 %v16335_v16  ;;  %v10450_v16 = vld [vmem:[%s24308_s16 + $0x910] sm:$0xff]  ;;  %v16033_v54 = vcombine.high %v10322_v51, %v10326_v9  ;;  %v16032_v15 = vcombine.low %v10322_v51, %v10326_v9 }
 0x868   :  { %13636 = vmatprep.subr.bf16.mxu1 %v15953_v6  ;;  %v10454_v6 = vld [vmem:[%s24308_s16 + $0x930] sm:$0xff] }
 0x869   :  { %v16160_v34 = vcombine.low %v10450_v16, %v10454_v6  ;;  %v10542_v51 = vld [vmem:[%s24308_s16 + $0xbf0] sm:$0xff] }
 0x86a   :  { %13596 = vmatpush2.bf16.msra.mxu0 %v16334_v31  ;;  %v16161_v31 = vcombine.high %v10450_v16, %v10454_v6 }
 0x86b   :  { %13637 = vmatpush2.bf16.msra.mxu1 %v15952_v56  ;;  %13597 = vmatprep.subr.bf16.mxu0 %v16327_v21  ;;  %v10314_v56 = vld [vmem:[%s24308_s16 + $0x4d0] sm:$0xff] }
 0x86c   :  { %13638 = vmatprep.subr.bf16.mxu1 %v15945_v12  ;;  %v10318_v21 = vld [vmem:[%s24308_s16 + $0x4f0] sm:$0xff] }
 0x86d   :  { %v10442_v12 = vld [vmem:[%s24308_s16 + $0x8d0] sm:$0xff]  ;;  %v16025_v29 = vcombine.high %v10314_v56, %v10318_v21  ;;  %v16024_v39 = vcombine.low %v10314_v56, %v10318_v21 }
 0x86e   :  { %13598 = vmatpush2.bf16.msra.mxu0 %v16326_v41  ;;  %v16153_v41 = vcombine.high %v10442_v12, %v10446_v37  ;;  %v16152_v23 = vcombine.low %v10442_v12, %v10446_v37  ;;  %v10394_v37 = vld [vmem:[%s24308_s16 + $0x750] sm:$0xff] }
 0x86f   :  { %13639 = vmatpush2.bf16.msra.mxu1 %v15944_v62  ;;  %13599 = vmatprep.subr.bf16.mxu0 %v16319_v63  ;;  %v10306_v62 = vld [vmem:[%s24308_s16 + $0x490] sm:$0xff] }
 0x870   :  { %13640 = vmatprep.subr.bf16.mxu1 %v15937_v27  ;;  %v10310_v63 = vld [vmem:[%s24308_s16 + $0x4b0] sm:$0xff] }
 0x871   :  { %v10434_v27 = vld [vmem:[%s24308_s16 + $0x890] sm:$0xff]  ;;  %v16017_v20 = vcombine.high %v10306_v62, %v10310_v63  ;;  %v16016_v1 = vcombine.low %v10306_v62, %v10310_v63 }
 0x872   :  { %13600 = vmatpush2.bf16.msra.mxu0 %v16318_v55  ;;  %v16145_v55 = vcombine.high %v10434_v27, %v10438_v32 }
 0x873   :  { %13641 = vmatpush2.bf16.msra.mxu1 %v15936_v22  ;;  %13651 = vmatprep.subr.bf16.mxu0 %v16057_v57  ;;  %v10298_v22 = vld [vmem:[%s24308_s16 + $0x450] sm:$0xff] }
 0x874   :  { %13692 = vmatprep.subr.bf16.mxu1 %v16185_v2  ;;  %v10302_v57 = vld [vmem:[%s24308_s16 + $0x470] sm:$0xff] }
 0x875   :  { %13602 = vmatmul.mubr.bf16.vlgmr.msra.gmra.mxu0 %v22915_v11  ;;  %v23335_v47 = vpop.f32.mrf.mxu1  ;;  %v10426_v2 = vld [vmem:[%s24308_s16 + $0x850] sm:$0xff]  ;;  %v16009_v49 = vcombine.high %v10298_v22, %v10302_v57 }
 0x876   :  { %13643 = vmatmul.mubr.bf16.vlgmr.msra.gmra.mxu1 %v22469_v18  ;;  %13652 = vmatpush1.bf16.msra.mxu0 %v16056_v10  ;;  %v16144_v10 = vcombine.low %v10434_v27, %v10438_v32  ;;  %v16137_v30 = vcombine.high %v10426_v2, %v10430_v45  ;;  %v16136_v8 = vcombine.low %v10426_v2, %v10430_v45  ;;  %v10386_v32 = vld [vmem:[%s24308_s16 + $0x710] sm:$0xff] }
 0x877   :  { %13683 = vmatprep.mubr.bf16.mxu0 %v22662_v58  ;;  %13693 = vmatpush1.bf16.msra.mxu1 %v16184_v24  ;;  %v23345_v44 = vpop.f32.mrf.mxu1  ;;  %v10290_v24 = vld [vmem:[%s24308_s16 + $0x410] sm:$0xff] }
 0x878   :  { %13724 = vmatprep.mubr.bf16.mxu1 %v22790_v3  ;;  %13653 = vmatprep.subr.bf16.mxu0 %v16049_v48  ;;  %v10294_v48 = vld [vmem:[%s24308_s16 + $0x430] sm:$0xff] }
 0x879   :  { %13694 = vmatprep.subr.bf16.mxu1 %v16177_v61  ;;  %v13402_v46 = vpop.f32.mrf.mxu1  ;;  %v16008_v61 = vcombine.low %v10298_v22, %v10302_v57  ;;  %v16001_v14 = vcombine.high %v10290_v24, %v10294_v48  ;;  %v16000_v9 = vcombine.low %v10290_v24, %v10294_v48  ;;  %v10378_v45 = vld [vmem:[%s24308_s16 + $0x6d0] sm:$0xff] }
 0x87a   :  { %13654 = vmatpush1.bf16.msra.mxu0 %v16048_v17  ;;  %v16129_v17 = vcombine.high %v10418_v40, %v10422_v42  ;;  %v16128_v46 = vcombine.low %v10418_v40, %v10422_v42  ;;  %v10370_v42 = vld [vmem:[%s24308_s16 + $0x690] sm:$0xff] }
 0x87b   :  { %13695 = vmatpush1.bf16.msra.mxu1 %v16176_v53  ;;  %v13403_v13 = vpop.f32.mrf.mxu1  ;;  %13655 = vmatprep.subr.bf16.mxu0 %v16041_v52  ;;  %v10410_v53 = vld [vmem:[%s24308_s16 + $0x7d0] sm:$0xff] }
 0x87c   :  { %13696 = vmatprep.subr.bf16.mxu1 %v16169_v33  ;;  %v10414_v52 = vld [vmem:[%s24308_s16 + $0x7f0] sm:$0xff] }
 0x87d   :  { %v10538_v33 = vld [vmem:[%s24308_s16 + $0xbd0] sm:$0xff]  ;;  %v16121_v16 = vcombine.high %v10410_v53, %v10414_v52 }
 0x87e   :  { %13656 = vmatpush1.bf16.msra.mxu0 %v16040_v50  ;;  %v16249_v6 = vcombine.high %v10538_v33, %v10542_v51  ;;  %v10402_v50 = vld [vmem:[%s24308_s16 + $0x790] sm:$0xff]  ;;  %v16248_v56 = vcombine.low %v10538_v33, %v10542_v51 }
 0x87f   :  { %13697 = vmatpush1.bf16.msra.mxu1 %v16168_v35  ;;  %13657 = vmatprep.subr.bf16.mxu0 %v16033_v54  ;;  %v10406_v13 = vld [vmem:[%s24308_s16 + $0x7b0] sm:$0xff] }
 0x880   :  { %13698 = vmatprep.subr.bf16.mxu1 %v16161_v31  ;;  %v10530_v35 = vld [vmem:[%s24308_s16 + $0xb90] sm:$0xff]  ;;  %v16120_v31 = vcombine.low %v10410_v53, %v10414_v52  ;;  %v16113_v21 = vcombine.high %v10402_v50, %v10406_v13 }
 0x881   :  { %v10534_v54 = vld [vmem:[%s24308_s16 + $0xbb0] sm:$0xff] }
 0x882   :  { %13658 = vmatpush1.bf16.msra.mxu0 %v16032_v15  ;;  %v16241_v12 = vcombine.high %v10530_v35, %v10534_v54  ;;  %v10398_v15 = vld [vmem:[%s24308_s16 + $0x770] sm:$0xff]  ;;  %v16240_v62 = vcombine.low %v10530_v35, %v10534_v54 }
 0x883   :  { %13699 = vmatpush1.bf16.msra.mxu1 %v16160_v34  ;;  %13659 = vmatprep.subr.bf16.mxu0 %v16025_v29  ;;  %v10522_v34 = vld [vmem:[%s24308_s16 + $0xb50] sm:$0xff]  ;;  %v16105_v63 = vcombine.high %v10394_v37, %v10398_v15 }
 0x884   :  { %13700 = vmatprep.subr.bf16.mxu1 %v16153_v41  ;;  %v10526_v29 = vld [vmem:[%s24308_s16 + $0xb70] sm:$0xff]  ;;  %v16112_v41 = vcombine.low %v10402_v50, %v10406_v13 }
 0x885   :  { %v16233_v27 = vcombine.high %v10522_v34, %v10526_v29  ;;  %v16232_v22 = vcombine.low %v10522_v34, %v10526_v29  ;;  %v10362_v51 = vld [vmem:[%s24308_s16 + $0x650] sm:$0xff] }
 0x886   :  { %13660 = vmatpush1.bf16.msra.mxu0 %v16024_v39  ;;  %v10390_v39 = vld [vmem:[%s24308_s16 + $0x730] sm:$0xff] }
 0x887   :  { %13701 = vmatpush1.bf16.msra.mxu1 %v16152_v23  ;;  %13661 = vmatprep.subr.bf16.mxu0 %v16017_v20  ;;  %v10514_v23 = vld [vmem:[%s24308_s16 + $0xb10] sm:$0xff]  ;;  %v16097_v57 = vcombine.high %v10386_v32, %v10390_v39 }
 0x888   :  { %13702 = vmatprep.subr.bf16.mxu1 %v16145_v55  ;;  %v10518_v20 = vld [vmem:[%s24308_s16 + $0xb30] sm:$0xff]  ;;  %v16104_v55 = vcombine.low %v10394_v37, %v10398_v15 }
 0x889   :  { %v16225_v2 = vcombine.high %v10514_v23, %v10518_v20  ;;  %v16224_v24 = vcombine.low %v10514_v23, %v10518_v20  ;;  %v10354_v54 = vld [vmem:[%s24308_s16 + $0x610] sm:$0xff] }
 0x88a   :  { %13662 = vmatpush1.bf16.msra.mxu0 %v16016_v1  ;;  %v10382_v1 = vld [vmem:[%s24308_s16 + $0x6f0] sm:$0xff] }
 0x88b   :  { %13703 = vmatpush1.bf16.msra.mxu1 %v16144_v10  ;;  %13663 = vmatprep.subr.bf16.mxu0 %v16009_v49  ;;  %v10506_v10 = vld [vmem:[%s24308_s16 + $0xad0] sm:$0xff]  ;;  %v16089_v48 = vcombine.high %v10378_v45, %v10382_v1 }
 0x88c   :  { %13704 = vmatprep.subr.bf16.mxu1 %v16137_v30  ;;  %v10510_v49 = vld [vmem:[%s24308_s16 + $0xaf0] sm:$0xff]  ;;  %v16096_v30 = vcombine.low %v10386_v32, %v10390_v39 }
 0x88d   :  { %v16217_v40 = vcombine.high %v10506_v10, %v10510_v49  ;;  %v16216_v53 = vcombine.low %v10506_v10, %v10510_v49  ;;  %v10602_v29 = vld [vmem:[%s24308_s16 + $0xdd0] sm:$0xff] }
 0x88e   :  { %13664 = vmatpush1.bf16.msra.mxu0 %v16008_v61  ;;  %v10374_v61 = vld [vmem:[%s24308_s16 + $0x6b0] sm:$0xff] }
 0x88f   :  { %13705 = vmatpush1.bf16.msra.mxu1 %v16136_v8  ;;  %13665 = vmatprep.subr.bf16.mxu0 %v16001_v14  ;;  %v10498_v8 = vld [vmem:[%s24308_s16 + $0xa90] sm:$0xff]  ;;  %v16081_v52 = vcombine.high %v10370_v42, %v10374_v61 }
 0x890   :  { %13706 = vmatprep.subr.bf16.mxu1 %v16129_v17  ;;  %v10502_v14 = vld [vmem:[%s24308_s16 + $0xab0] sm:$0xff]  ;;  %v16088_v17 = vcombine.low %v10378_v45, %v10382_v1  ;;  %v13399_v1 = vadd.f32 %v23335_v47, %v23142_v60  ;;  %v10207_v47 = vld [vmem:[%s24308_s16 + $0x178] sm:$0xff] }
 0x891   :  { %v16209_v33 = vcombine.high %v10498_v8, %v10502_v14  ;;  %v16208_v50 = vcombine.low %v10498_v8, %v10502_v14  ;;  %v10594_v20 = vld [vmem:[%s24308_s16 + $0xd90] sm:$0xff] }
 0x892   :  { %13666 = vmatpush1.bf16.msra.mxu0 %v16000_v9  ;;  %v10366_v9 = vld [vmem:[%s24308_s16 + $0x670] sm:$0xff] }
 0x893   :  { %13707 = vmatpush1.bf16.msra.mxu1 %v16128_v46  ;;  %13667 = vmatprep.subr.bf16.mxu0 %v16121_v16  ;;  %v10490_v46 = vld [vmem:[%s24308_s16 + $0xa50] sm:$0xff]  ;;  %v16073_v13 = vcombine.high %v10362_v51, %v10366_v9 }
 0x894   :  { %13708 = vmatprep.subr.bf16.mxu1 %v16249_v6  ;;  %v10494_v16 = vld [vmem:[%s24308_s16 + $0xa70] sm:$0xff]  ;;  %v16080_v6 = vcombine.low %v10370_v42, %v10374_v61  ;;  %v13401_v42 = vadd.f32 %v23345_v44, %v23146_v7 }
 0x895   :  { %v16201_v35 = vcombine.high %v10490_v46, %v10494_v16  ;;  %v16200_v37 = vcombine.low %v10490_v46, %v10494_v16  ;;  %v10586_v49 = vld [vmem:[%s24308_s16 + $0xd50] sm:$0xff]  ;;  %v10195_v46 = vld [vmem:[%s24308_s16 + $0x118] sm:$0xff] }
 0x896   :  { %13668 = vmatpush2.bf16.msra.mxu0 %v16120_v31  ;;  %v10358_v31 = vld [vmem:[%s24308_s16 + $0x630] sm:$0xff] }
 0x897   :  { %13709 = vmatpush2.bf16.msra.mxu1 %v16248_v56  ;;  %13669 = vmatprep.subr.bf16.mxu0 %v16113_v21  ;;  %v10482_v56 = vld [vmem:[%s24308_s16 + $0xa10] sm:$0xff]  ;;  %v16065_v15 = vcombine.high %v10354_v54, %v10358_v31 }
 0x898   :  { %13710 = vmatprep.subr.bf16.mxu1 %v16241_v12  ;;  %v10486_v21 = vld [vmem:[%s24308_s16 + $0xa30] sm:$0xff]  ;;  %v16072_v12 = vcombine.low %v10362_v51, %v10366_v9 }
 0x899   :  { %v16193_v34 = vcombine.high %v10482_v56, %v10486_v21  ;;  %v16192_v32 = vcombine.low %v10482_v56, %v10486_v21  ;;  %v10578_v44 = vld [vmem:[%s24308_s16 + $0xd10] sm:$0xff] }
 0x89a   :  { %13670 = vmatpush2.bf16.msra.mxu0 %v16112_v41  ;;  %v10606_v41 = vld [vmem:[%s24308_s16 + $0xdf0] sm:$0xff] }
 0x89b   :  { %13711 = vmatpush2.bf16.msra.mxu1 %v16240_v62  ;;  %13671 = vmatprep.subr.bf16.mxu0 %v16105_v63  ;;  %v10219_v62 = vld [vmem:[%s24308_s16 + $0x1d8] sm:$0xff]  ;;  %v16313_v39 = vcombine.high %v10602_v29, %v10606_v41  ;;  %v10582_v9 = vld [vmem:[%s24308_s16 + $0xd30] sm:$0xff] }
 0x89c   :  { %13712 = vmatprep.subr.bf16.mxu1 %v16233_v27  ;;  %v10223_v63 = vld [vmem:[%s24308_s16 + $0x1f8] sm:$0xff]  ;;  %v16064_v27 = vcombine.low %v10354_v54, %v10358_v31  ;;  %v10570_v54 = vld [vmem:[%s24308_s16 + $0xcd0] sm:$0xff] }
 0x89d   :  { %v15931_v23 = vcombine.high %v10219_v62, %v10223_v63  ;;  %v15930_v45 = vcombine.low %v10219_v62, %v10223_v63  ;;  %v16288_v62 = vcombine.low %v10578_v44, %v10582_v9  ;;  %v10562_v63 = vld [vmem:[%s24308_s16 + $0xc90] sm:$0xff] }
 0x89e   :  { %13672 = vmatpush2.bf16.msra.mxu0 %v16104_v55  ;;  %v10598_v55 = vld [vmem:[%s24308_s16 + $0xdb0] sm:$0xff] }
 0x89f   :  { %13713 = vmatpush2.bf16.msra.mxu1 %v16232_v22  ;;  %13673 = vmatprep.subr.bf16.mxu0 %v16097_v57  ;;  %v16312_v22 = vcombine.low %v10602_v29, %v10606_v41  ;;  %v10211_v57 = vld [vmem:[%s24308_s16 + $0x198] sm:$0xff]  ;;  %v16305_v10 = vcombine.high %v10594_v20, %v10598_v55  ;;  %v16304_v8 = vcombine.low %v10594_v20, %v10598_v55 }
 0x8a0   :  { %13714 = vmatprep.subr.bf16.mxu1 %v16225_v2  ;;  %v10215_v2 = vld [vmem:[%s24308_s16 + $0x1b8] sm:$0xff] }
 0x8a1   :  { %v15923_v60 = vcombine.high %v10211_v57, %v10215_v2  ;;  %v10191_v29 = vld [vmem:[%s24308_s16 + $0xf8] sm:$0xff] }
 0x8a2   :  { %13674 = vmatpush2.bf16.msra.mxu0 %v16096_v30  ;;  %v10590_v30 = vld [vmem:[%s24308_s16 + $0xd70] sm:$0xff]  ;;  %v10183_v20 = vld [vmem:[%s24308_s16 + $0xb8] sm:$0xff] }
 0x8a3   :  { %13715 = vmatpush2.bf16.msra.mxu1 %v16224_v24  ;;  %13675 = vmatprep.subr.bf16.mxu0 %v16089_v48  ;;  %v10203_v24 = vld [vmem:[%s24308_s16 + $0x158] sm:$0xff] }
 0x8a4   :  { %13716 = vmatprep.subr.bf16.mxu1 %v16217_v40  ;;  %v15915_v7 = vcombine.high %v10203_v24, %v10207_v47  ;;  %v15914_v21 = vcombine.low %v10203_v24, %v10207_v47 }
 0x8a6   :  { %13676 = vmatpush2.bf16.msra.mxu0 %v16088_v17 }
 0x8a7   :  { %13717 = vmatpush2.bf16.msra.mxu1 %v16216_v53  ;;  %13677 = vmatprep.subr.bf16.mxu0 %v16081_v52  ;;  %v15922_v53 = vcombine.low %v10211_v57, %v10215_v2  ;;  %v16297_v52 = vcombine.high %v10586_v49, %v10590_v30  ;;  %v10554_v57 = vld [vmem:[%s24308_s16 + $0xc50] sm:$0xff] }
 0x8a8   :  { %13718 = vmatprep.subr.bf16.mxu1 %v16209_v33 }
 0x8aa   :  { %13678 = vmatpush2.bf16.msra.mxu0 %v16080_v6 }
 0x8ab   :  { %13719 = vmatpush2.bf16.msra.mxu1 %v16208_v50  ;;  %13679 = vmatprep.subr.bf16.mxu0 %v16073_v13 }
 0x8ac   :  { %13720 = vmatprep.subr.bf16.mxu1 %v16201_v35  ;;  %v16296_v35 = vcombine.low %v10586_v49, %v10590_v30  ;;  %v10175_v49 = vld [vmem:[%s24308_s16 + $0x78] sm:$0xff] }
 0x8ae   :  { %13680 = vmatpush2.bf16.msra.mxu0 %v16072_v12  ;;  %v16289_v12 = vcombine.high %v10578_v44, %v10582_v9  ;;  %v10283_v44 = vld [vmem:[%s24308_s16 + $0x3d8] sm:$0xff] }
 0x8af   :  { %13721 = vmatpush2.bf16.msra.mxu1 %v16200_v37  ;;  %13681 = vmatprep.subr.bf16.mxu0 %v16065_v15  ;;  %v10574_v15 = vld [vmem:[%s24308_s16 + $0xcf0] sm:$0xff]  ;;  %v10287_v9 = vld [vmem:[%s24308_s16 + $0x3f8] sm:$0xff] }
 0x8b0   :  { %13722 = vmatprep.subr.bf16.mxu1 %v16193_v34  ;;  %v10187_v34 = vld [vmem:[%s24308_s16 + $0xd8] sm:$0xff] }
 0x8b1   :  { %v15899_v55 = vcombine.high %v10187_v34, %v10191_v29  ;;  %v15898_v2 = vcombine.low %v10187_v34, %v10191_v29  ;;  %v10267_v34 = vld [vmem:[%s24308_s16 + $0x358] sm:$0xff] }
 0x8b2   :  { %13682 = vmatpush2.bf16.msra.mxu0 %v16064_v27  ;;  %v10271_v29 = vld [vmem:[%s24308_s16 + $0x378] sm:$0xff] }
 0x8b3   :  { %13723 = vmatpush2.bf16.msra.mxu1 %v16192_v32  ;;  %13733 = vmatprep.subr.bf16.mxu0 %v16313_v39  ;;  %v16281_v32 = vcombine.high %v10570_v54, %v10574_v15  ;;  %v10566_v39 = vld [vmem:[%s24308_s16 + $0xcb0] sm:$0xff] }
 0x8b4   :  { %13774 = vmatprep.subr.bf16.mxu1 %v15931_v23  ;;  %v10179_v23 = vld [vmem:[%s24308_s16 + $0x98] sm:$0xff]  ;;  %v16272_v24 = vcombine.low %v10562_v63, %v10566_v39 }
 0x8b5   :  { %v23539_v48 = vpop.f32.mrf.mxu1  ;;  %13684 = vmatmul.mubr.bf16.vlgmr.msra.gmra.mxu0 %v22676_v59  ;;  %v13439_v40 = vpop.f32.mrf.mxu0  ;;  %v15891_v30 = vcombine.high %v10179_v23, %v10183_v20 }
 0x8b6   :  { %13725 = vmatmul.mubr.bf16.vlgmr.msra.gmra.mxu1 %v22792_v25  ;;  %v13440_v61 = vadd.f32 %v13439_v40, %v13399_v1  ;;  %13734 = vmatpush1.bf16.msra.mxu0 %v16312_v22  ;;  %v16280_v22 = vcombine.low %v10570_v54, %v10574_v15  ;;  %v10558_v1 = vld [vmem:[%s24308_s16 + $0xc70] sm:$0xff]  ;;  %v10279_v54 = vld [vmem:[%s24308_s16 + $0x3b8] sm:$0xff] }
 0x8b7   :  { %13765 = vmatprep.mubr.bf16.mxu0 %v22913_v0  ;;  %13775 = vmatpush1.bf16.msra.mxu1 %v15930_v45  ;;  %v23549_v14 = vpop.f32.mrf.mxu1  ;;  %v13441_v17 = vpop.f32.mrf.mxu0  ;;  %v16273_v45 = vcombine.high %v10562_v63, %v10566_v39  ;;  %v10546_v40 = vld [vmem:[%s24308_s16 + $0xc10] sm:$0xff]  ;;  %v16265_v47 = vcombine.high %v10554_v57, %v10558_v1 }
 0x8b8   :  { %vm13938_vm6 = vcmp.ge.f32.partialorder %v13440_v61, 0.0  ;;  %v13946_v33 = vmul.f32 0.01, %v13440_v61  ;;  %13806 = vmatprep.mubr.bf16.mxu1 %v22460_v36  ;;  %v13442_v51 = vadd.f32 %v13441_v17, %v13401_v42  ;;  %13735 = vmatprep.subr.bf16.mxu0 %v16305_v10  ;;  %v10199_v36 = vld [vmem:[%s24308_s16 + $0x138] sm:$0xff]  ;;  %v10550_v42 = vld [vmem:[%s24308_s16 + $0xc30] sm:$0xff] }
 0x8b9   :  { %v13484_v16 = vpop.f32.mrf.mxu1  ;;  %13776 = vmatprep.subr.bf16.mxu1 %v15923_v60  ;;  %v13443_v6 = vpop.f32.mrf.mxu0  ;;  %v15907_v37 = vcombine.high %v10195_v46, %v10199_v36  ;;  %v15906_v27 = vcombine.low %v10195_v46, %v10199_v36  ;;  %v10171_v10 = vld [vmem:[%s24308_s16 + $0x58] sm:$0xff]  ;;  %v15890_v60 = vcombine.low %v10179_v23, %v10183_v20 }
 0x8ba   :  { %v13954_v50 = vsel %vm13938_vm6, %v13440_v61, %v13946_v33  ;;  %vm13939_vm7 = vcmp.ge.f32.partialorder %v13442_v51, 0.0  ;;  %v13947_v13 = vmul.f32 0.01, %v13442_v51  ;;  %13736 = vmatpush1.bf16.msra.mxu0 %v16304_v8  ;;  %v10163_v61 = vld [vmem:[%s24308_s16 + $0x18] sm:$0xff]  ;;  %v15883_v17 = vcombine.high %v10171_v10, %v10175_v49  ;;  %v10658_v6 = vld [vmem:[%s24308_s16 + $0xf90] sm:$0xff] }
 0x8bb   :  { %14649 = vst [vmem:[%s24312_s21] sm:$0xff] %v13954_v50  ;;  %13777 = vmatpush1.bf16.msra.mxu1 %v15922_v53  ;;  %v13485_v31 = vpop.f32.mrf.mxu1  ;;  %v13444_v56 = vpop.f32.mrf.mxu0  ;;  %13737 = vmatprep.subr.bf16.mxu0 %v16297_v52  ;;  %v10167_v8 = vld [vmem:[%s24308_s16 + $0x38] sm:$0xff]  ;;  %v16264_v53 = vcombine.low %v10554_v57, %v10558_v1  ;;  %v10666_v52 = vld [vmem:[%s24308_s16 + $0xfd0] sm:$0xff]  ;;  %v15882_v33 = vcombine.low %v10171_v10, %v10175_v49 }
 0x8bc   :  { %13778 = vmatprep.subr.bf16.mxu1 %v15915_v7  ;;  %v23580_v41 = vsel %vm13939_vm7, %v13442_v51, %v13947_v13  ;;  %v16257_v51 = vcombine.high %v10546_v40, %v10550_v42  ;;  %v10670_v7 = vld [vmem:[%s24308_s16 + $0xff0] sm:$0xff]  ;;  %v15875_v46 = vcombine.high %v10163_v61, %v10167_v8  ;;  %v16256_v16 = vcombine.low %v10546_v40, %v10550_v42  ;;  %v10259_v20 = vld [vmem:[%s24308_s16 + $0x318] sm:$0xff] }
 0x8bd   :  { %14650 = vst [vmem:[%s24312_s21 + $0x8] sm:$0xff] %v23580_v41  ;;  %v15874_v36 = vcombine.low %v10163_v61, %v10167_v8  ;;  %v16377_v50 = vcombine.high %v10666_v52, %v10670_v7  ;;  %v10662_v13 = vld [vmem:[%s24308_s16 + $0xfb0] sm:$0xff]  ;;  %v15995_v31 = vcombine.high %v10283_v44, %v10287_v9  ;;  %v16376_v56 = vcombine.low %v10666_v52, %v10670_v7  ;;  %v10251_v49 = vld [vmem:[%s24308_s16 + $0x2d8] sm:$0xff] }
 0x8be   :  { %13738 = vmatpush1.bf16.msra.mxu0 %v16296_v35  ;;  %v10275_v35 = vld [vmem:[%s24308_s16 + $0x398] sm:$0xff]  ;;  %v16369_v15 = vcombine.high %v10658_v6, %v10662_v13  ;;  %v16368_v63 = vcombine.low %v10658_v6, %v10662_v13  ;;  %v15978_v1 = vcombine.low %v10267_v34, %v10271_v29 }
 0x8bf   :  { %13779 = vmatpush1.bf16.msra.mxu1 %v15914_v21  ;;  %13739 = vmatprep.subr.bf16.mxu0 %v16289_v12  ;;  %v10650_v21 = vld [vmem:[%s24308_s16 + $0xf50] sm:$0xff]  ;;  %v15986_v39 = vcombine.low %v10275_v35, %v10279_v54  ;;  %v10243_v8 = vld [vmem:[%s24308_s16 + $0x298] sm:$0xff] }
 0x8c0   :  { %13780 = vmatprep.subr.bf16.mxu1 %v15907_v37  ;;  %v10654_v12 = vld [vmem:[%s24308_s16 + $0xf70] sm:$0xff]  ;;  %v15994_v37 = vcombine.low %v10283_v44, %v10287_v9  ;;  %v10235_v9 = vld [vmem:[%s24308_s16 + $0x258] sm:$0xff] }
 0x8c1   :  { %v16361_v23 = vcombine.high %v10650_v21, %v10654_v12  ;;  %v16360_v57 = vcombine.low %v10650_v21, %v10654_v12  ;;  %v10347_v12 = vld [vmem:[%s24308_s16 + $0x5d8] sm:$0xff] }
 0x8c2   :  { %13740 = vmatpush1.bf16.msra.mxu0 %v16288_v62  ;;  %v15987_v62 = vcombine.high %v10275_v35, %v10279_v54  ;;  %v10227_v54 = vld [vmem:[%s24308_s16 + $0x218] sm:$0xff] }
 0x8c3   :  { %13781 = vmatpush1.bf16.msra.mxu1 %v15906_v27  ;;  %13741 = vmatprep.subr.bf16.mxu0 %v16281_v32  ;;  %v10642_v27 = vld [vmem:[%s24308_s16 + $0xf10] sm:$0xff] }
 0x8c4   :  { %13782 = vmatprep.subr.bf16.mxu1 %v15899_v55  ;;  %v10646_v32 = vld [vmem:[%s24308_s16 + $0xf30] sm:$0xff]  ;;  %v10263_v55 = vld [vmem:[%s24308_s16 + $0x338] sm:$0xff] }
 0x8c5   :  { %v16353_v10 = vcombine.high %v10642_v27, %v10646_v32  ;;  %v16352_v40 = vcombine.low %v10642_v27, %v10646_v32  ;;  %v15970_v42 = vcombine.low %v10259_v20, %v10263_v55 }
 0x8c6   :  { %13742 = vmatpush1.bf16.msra.mxu0 %v16280_v22  ;;  %v15979_v22 = vcombine.high %v10267_v34, %v10271_v29  ;;  %v10475_v29 = vld [vmem:[%s24308_s16 + $0x9d8] sm:$0xff] }
 0x8c7   :  { %13783 = vmatpush1.bf16.msra.mxu1 %v15898_v2  ;;  %13743 = vmatprep.subr.bf16.mxu0 %v16273_v45  ;;  %v10634_v2 = vld [vmem:[%s24308_s16 + $0xed0] sm:$0xff] }
 0x8c8   :  { %13784 = vmatprep.subr.bf16.mxu1 %v15891_v30  ;;  %v10638_v45 = vld [vmem:[%s24308_s16 + $0xef0] sm:$0xff]  ;;  %v10255_v30 = vld [vmem:[%s24308_s16 + $0x2f8] sm:$0xff] }
 0x8c9   :  { %v16345_v61 = vcombine.high %v10634_v2, %v10638_v45  ;;  %v16344_v52 = vcombine.low %v10634_v2, %v10638_v45  ;;  %v15962_v7 = vcombine.low %v10251_v49, %v10255_v30  ;;  %v10471_v2 = vld [vmem:[%s24308_s16 + $0x9b8] sm:$0xff] }
 0x8ca   :  { %13744 = vmatpush1.bf16.msra.mxu0 %v16272_v24  ;;  %v15971_v24 = vcombine.high %v10259_v20, %v10263_v55  ;;  %v10339_v20 = vld [vmem:[%s24308_s16 + $0x598] sm:$0xff] }
 0x8cb   :  { %13785 = vmatpush1.bf16.msra.mxu1 %v15890_v60  ;;  %13745 = vmatprep.subr.bf16.mxu0 %v16265_v47  ;;  %v10626_v60 = vld [vmem:[%s24308_s16 + $0xe90] sm:$0xff]  ;;  %v10343_v55 = vld [vmem:[%s24308_s16 + $0x5b8] sm:$0xff] }
 0x8cc   :  { %13786 = vmatprep.subr.bf16.mxu1 %v15883_v17  ;;  %v10630_v47 = vld [vmem:[%s24308_s16 + $0xeb0] sm:$0xff]  ;;  %v10247_v17 = vld [vmem:[%s24308_s16 + $0x2b8] sm:$0xff] }
 0x8cd   :  { %v16337_v44 = vcombine.high %v10626_v60, %v10630_v47  ;;  %v16336_v6 = vcombine.low %v10626_v60, %v10630_v47  ;;  %v15954_v13 = vcombine.low %v10243_v8, %v10247_v17  ;;  %v10459_v60 = vld [vmem:[%s24308_s16 + $0x958] sm:$0xff] }
 0x8ce   :  { %13746 = vmatpush1.bf16.msra.mxu0 %v16264_v53  ;;  %v15963_v53 = vcombine.high %v10251_v49, %v10255_v30  ;;  %v10335_v49 = vld [vmem:[%s24308_s16 + $0x578] sm:$0xff] }
 0x8cf   :  { %13787 = vmatpush1.bf16.msra.mxu1 %v15882_v33  ;;  %13747 = vmatprep.subr.bf16.mxu0 %v16257_v51  ;;  %v10618_v33 = vld [vmem:[%s24308_s16 + $0xe50] sm:$0xff]  ;;  %v10463_v47 = vld [vmem:[%s24308_s16 + $0x978] sm:$0xff] }
 0x8d0   :  { %13788 = vmatprep.subr.bf16.mxu1 %v15875_v46  ;;  %v10622_v51 = vld [vmem:[%s24308_s16 + $0xe70] sm:$0xff]  ;;  %v10239_v46 = vld [vmem:[%s24308_s16 + $0x278] sm:$0xff] }
 0x8d1   :  { %v16329_v35 = vcombine.high %v10618_v33, %v10622_v51  ;;  %v16328_v21 = vcombine.low %v10618_v33, %v10622_v51  ;;  %v10323_v33 = vld [vmem:[%s24308_s16 + $0x518] sm:$0xff] }
 0x8d2   :  { %13748 = vmatpush1.bf16.msra.mxu0 %v16256_v16  ;;  %v15955_v16 = vcombine.high %v10243_v8, %v10247_v17 }
 0x8d3   :  { %13789 = vmatpush1.bf16.msra.mxu1 %v15874_v36  ;;  %13749 = vmatprep.subr.bf16.mxu0 %v16377_v50  ;;  %v10610_v36 = vld [vmem:[%s24308_s16 + $0xe10] sm:$0xff] }
 0x8d4   :  { %13790 = vmatprep.subr.bf16.mxu1 %v15995_v31  ;;  %v10614_v50 = vld [vmem:[%s24308_s16 + $0xe30] sm:$0xff]  ;;  %v10231_v31 = vld [vmem:[%s24308_s16 + $0x238] sm:$0xff] }
 0x8d5   :  { %v16321_v34 = vcombine.high %v10610_v36, %v10614_v50  ;;  %v16320_v27 = vcombine.low %v10610_v36, %v10614_v50  ;;  %v15938_v32 = vcombine.low %v10227_v54, %v10231_v31  ;;  %v10315_v50 = vld [vmem:[%s24308_s16 + $0x4d8] sm:$0xff] }
 0x8d6   :  { %13750 = vmatpush2.bf16.msra.mxu0 %v16376_v56  ;;  %v15947_v56 = vcombine.high %v10235_v9, %v10239_v46 }
 0x8d7   :  { %13791 = vmatpush2.bf16.msra.mxu1 %v15994_v37  ;;  %13751 = vmatprep.subr.bf16.mxu0 %v16369_v15  ;;  %v10351_v37 = vld [vmem:[%s24308_s16 + $0x5f8] sm:$0xff]  ;;  %v15946_v15 = vcombine.low %v10235_v9, %v10239_v46 }
 0x8d8   :  { %13792 = vmatprep.subr.bf16.mxu1 %v15987_v62  ;;  %v10479_v62 = vld [vmem:[%s24308_s16 + $0x9f8] sm:$0xff] }
 0x8d9   :  { %v16186_v45 = vcombine.low %v10475_v29, %v10479_v62 }
 0x8da   :  { %13752 = vmatpush2.bf16.msra.mxu0 %v16368_v63  ;;  %v15939_v63 = vcombine.high %v10227_v54, %v10231_v31  ;;  %v10447_v54 = vld [vmem:[%s24308_s16 + $0x8f8] sm:$0xff] }
 0x8db   :  { %13793 = vmatpush2.bf16.msra.mxu1 %v15986_v39  ;;  %13753 = vmatprep.subr.bf16.mxu0 %v16361_v23  ;;  %v16059_v39 = vcombine.high %v10347_v12, %v10351_v37  ;;  %v16187_v23 = vcombine.high %v10475_v29, %v10479_v62  ;;  %v10439_v29 = vld [vmem:[%s24308_s16 + $0x8b8] sm:$0xff] }
 0x8dc   :  { %13794 = vmatprep.subr.bf16.mxu1 %v15979_v22  ;;  %v16058_v22 = vcombine.low %v10347_v12, %v10351_v37  ;;  %v10307_v37 = vld [vmem:[%s24308_s16 + $0x498] sm:$0xff] }
 0x8de   :  { %13754 = vmatpush2.bf16.msra.mxu0 %v16360_v57  ;;  %v10467_v57 = vld [vmem:[%s24308_s16 + $0x998] sm:$0xff] }
 0x8df   :  { %13795 = vmatpush2.bf16.msra.mxu1 %v15978_v1  ;;  %13755 = vmatprep.subr.bf16.mxu0 %v16353_v10  ;;  %v16051_v1 = vcombine.high %v10339_v20, %v10343_v55  ;;  %v10331_v10 = vld [vmem:[%s24308_s16 + $0x558] sm:$0xff]  ;;  %v16178_v17 = vcombine.low %v10467_v57, %v10471_v2 }
 0x8e0   :  { %13796 = vmatprep.subr.bf16.mxu1 %v15971_v24 }
 0x8e2   :  { %13756 = vmatpush2.bf16.msra.mxu0 %v16352_v40  ;;  %v16179_v40 = vcombine.high %v10467_v57, %v10471_v2 }
 0x8e3   :  { %13797 = vmatpush2.bf16.msra.mxu1 %v15970_v42  ;;  %13757 = vmatprep.subr.bf16.mxu0 %v16345_v61  ;;  %v16050_v42 = vcombine.low %v10339_v20, %v10343_v55  ;;  %v10427_v20 = vld [vmem:[%s24308_s16 + $0x858] sm:$0xff] }
 0x8e4   :  { %13798 = vmatprep.subr.bf16.mxu1 %v15963_v53  ;;  %v16043_v53 = vcombine.high %v10331_v10, %v10335_v49  ;;  %v10431_v55 = vld [vmem:[%s24308_s16 + $0x878] sm:$0xff] }
 0x8e6   :  { %13758 = vmatpush2.bf16.msra.mxu0 %v16344_v52  ;;  %v16171_v52 = vcombine.high %v10459_v60, %v10463_v47 }
 0x8e7   :  { %13799 = vmatpush2.bf16.msra.mxu1 %v15962_v7  ;;  %13759 = vmatprep.subr.bf16.mxu0 %v16337_v44  ;;  %v10451_v7 = vld [vmem:[%s24308_s16 + $0x918] sm:$0xff]  ;;  %v16042_v44 = vcombine.low %v10331_v10, %v10335_v49 }
 0x8e8   :  { %13800 = vmatprep.subr.bf16.mxu1 %v15955_v16  ;;  %v16170_v16 = vcombine.low %v10459_v60, %v10463_v47  ;;  %v10295_v10 = vld [vmem:[%s24308_s16 + $0x438] sm:$0xff]  ;;  %v16138_v47 = vcombine.low %v10427_v20, %v10431_v55 }
 0x8e9   :  { %v10419_v49 = vld [vmem:[%s24308_s16 + $0x818] sm:$0xff] }
 0x8ea   :  { %13760 = vmatpush2.bf16.msra.mxu0 %v16336_v6 }
 0x8eb   :  { %13801 = vmatpush2.bf16.msra.mxu1 %v15954_v13  ;;  %13761 = vmatprep.subr.bf16.mxu0 %v16329_v35  ;;  %v10319_v13 = vld [vmem:[%s24308_s16 + $0x4f8] sm:$0xff] }
 0x8ec   :  { %13802 = vmatprep.subr.bf16.mxu1 %v15947_v56  ;;  %v10443_v35 = vld [vmem:[%s24308_s16 + $0x8d8] sm:$0xff]  ;;  %v16026_v62 = vcombine.low %v10315_v50, %v10319_v13 }
 0x8ed   :  { %v16155_v12 = vcombine.high %v10443_v35, %v10447_v54 }
 0x8ee   :  { %13762 = vmatpush2.bf16.msra.mxu0 %v16328_v21  ;;  %v16027_v21 = vcombine.high %v10315_v50, %v10319_v13 }
 0x8ef   :  { %13803 = vmatpush2.bf16.msra.mxu1 %v15946_v15  ;;  %13763 = vmatprep.subr.bf16.mxu0 %v16321_v34  ;;  %v10311_v15 = vld [vmem:[%s24308_s16 + $0x4b8] sm:$0xff] }
 0x8f0   :  { %13804 = vmatprep.subr.bf16.mxu1 %v15939_v63  ;;  %v10435_v34 = vld [vmem:[%s24308_s16 + $0x898] sm:$0xff]  ;;  %v16154_v63 = vcombine.low %v10443_v35, %v10447_v54 }
 0x8f1   :  { %v16146_v57 = vcombine.low %v10435_v34, %v10439_v29  ;;  %v10395_v35 = vld [vmem:[%s24308_s16 + $0x758] sm:$0xff] }
 0x8f2   :  { %13764 = vmatpush2.bf16.msra.mxu0 %v16320_v27  ;;  %v16019_v27 = vcombine.high %v10307_v37, %v10311_v15  ;;  %v10399_v54 = vld [vmem:[%s24308_s16 + $0x778] sm:$0xff] }
 0x8f3   :  { %13805 = vmatpush2.bf16.msra.mxu1 %v15938_v32  ;;  %13815 = vmatprep.subr.bf16.mxu0 %v16059_v39  ;;  %v16147_v32 = vcombine.high %v10435_v34, %v10439_v29  ;;  %v10299_v39 = vld [vmem:[%s24308_s16 + $0x458] sm:$0xff] }
 0x8f4   :  { %13856 = vmatprep.subr.bf16.mxu1 %v16187_v23  ;;  %v10303_v23 = vld [vmem:[%s24308_s16 + $0x478] sm:$0xff] }
 0x8f5   :  { %v23748_v30 = vpop.f32.mrf.mxu0  ;;  %v23750_v24 = vpop.f32.mrf.mxu1  ;;  %13766 = vmatmul.mubr.bf16.vlgmr.msra.gmra.mxu0 %v22915_v11  ;;  %v16011_v2 = vcombine.high %v10299_v39, %v10303_v23  ;;  %v16010_v60 = vcombine.low %v10299_v39, %v10303_v23  ;;  %v10387_v34 = vld [vmem:[%s24308_s16 + $0x718] sm:$0xff] }
 0x8f6   :  { %13807 = vmatmul.mubr.bf16.vlgmr.msra.gmra.mxu1 %v22469_v18  ;;  %13816 = vmatpush1.bf16.msra.mxu0 %v16058_v22  ;;  %v10327_v18 = vld [vmem:[%s24308_s16 + $0x538] sm:$0xff]  ;;  %v16018_v22 = vcombine.low %v10307_v37, %v10311_v15  ;;  %v16107_v37 = vcombine.high %v10395_v35, %v10399_v54 }
 0x8f7   :  { %13847 = vmatprep.mubr.bf16.mxu0 %v22662_v58  ;;  %13857 = vmatpush1.bf16.msra.mxu1 %v16186_v45  ;;  %v23761_v61 = vpop.f32.mrf.mxu0  ;;  %v23763_v8 = vpop.f32.mrf.mxu1  ;;  %v16035_v6 = vcombine.high %v10323_v33, %v10327_v18  ;;  %v16034_v31 = vcombine.low %v10323_v33, %v10327_v18  ;;  %v16139_v45 = vcombine.high %v10427_v20, %v10431_v55  ;;  %v10539_v33 = vld [vmem:[%s24308_s16 + $0xbd8] sm:$0xff] }
 0x8f8   :  { %13888 = vmatprep.mubr.bf16.mxu1 %v22790_v3  ;;  %13817 = vmatprep.subr.bf16.mxu0 %v16051_v1  ;;  %v10455_v3 = vld [vmem:[%s24308_s16 + $0x938] sm:$0xff] }
 0x8f9   :  { %v13525_v58 = vpop.f32.mrf.mxu0  ;;  %v13566_v51 = vpop.f32.mrf.mxu1  ;;  %13858 = vmatprep.subr.bf16.mxu1 %v16179_v40  ;;  %v16163_v36 = vcombine.high %v10451_v7, %v10455_v3  ;;  %v16162_v56 = vcombine.low %v10451_v7, %v10455_v3  ;;  %v10291_v1 = vld [vmem:[%s24308_s16 + $0x418] sm:$0xff] }
 0x8fa   :  { %13818 = vmatpush1.bf16.msra.mxu0 %v16050_v42  ;;  %v10423_v40 = vld [vmem:[%s24308_s16 + $0x838] sm:$0xff]  ;;  %v16003_v42 = vcombine.high %v10291_v1, %v10295_v10  ;;  %v16002_v58 = vcombine.low %v10291_v1, %v10295_v10 }
 0x8fb   :  { %13859 = vmatpush1.bf16.msra.mxu1 %v16178_v17  ;;  %v13526_v9 = vpop.f32.mrf.mxu0  ;;  %v13567_v46 = vpop.f32.mrf.mxu1  ;;  %13819 = vmatprep.subr.bf16.mxu0 %v16043_v53  ;;  %v16131_v17 = vcombine.high %v10419_v49, %v10423_v40  ;;  %v10411_v53 = vld [vmem:[%s24308_s16 + $0x7d8] sm:$0xff]  ;;  %v16130_v51 = vcombine.low %v10419_v49, %v10423_v40 }
 0x8fc   :  { %13860 = vmatprep.subr.bf16.mxu1 %v16171_v52  ;;  %v10415_v52 = vld [vmem:[%s24308_s16 + $0x7f8] sm:$0xff] }
 0x8fd   :  { %v10543_v18 = vld [vmem:[%s24308_s16 + $0xbf8] sm:$0xff]  ;;  %v16123_v7 = vcombine.high %v10411_v53, %v10415_v52 }
 0x8fe   :  { %13820 = vmatpush1.bf16.msra.mxu0 %v16042_v44  ;;  %v16251_v3 = vcombine.high %v10539_v33, %v10543_v18  ;;  %v10403_v44 = vld [vmem:[%s24308_s16 + $0x798] sm:$0xff] }
 0x8ff   :  { %13861 = vmatpush1.bf16.msra.mxu1 %v16170_v16  ;;  %13821 = vmatprep.subr.bf16.mxu0 %v16035_v6  ;;  %v10407_v9 = vld [vmem:[%s24308_s16 + $0x7b8] sm:$0xff]  ;;  %v16122_v6 = vcombine.low %v10411_v53, %v10415_v52 }
 0x900   :  { %13862 = vmatprep.subr.bf16.mxu1 %v16163_v36  ;;  %v10531_v46 = vld [vmem:[%s24308_s16 + $0xb98] sm:$0xff]  ;;  %v16250_v36 = vcombine.low %v10539_v33, %v10543_v18  ;;  %v16115_v50 = vcombine.high %v10403_v44, %v10407_v9 }
 0x901   :  { %v10535_v16 = vld [vmem:[%s24308_s16 + $0xbb8] sm:$0xff] }
 0x902   :  { %13822 = vmatpush1.bf16.msra.mxu0 %v16034_v31  ;;  %v16243_v13 = vcombine.high %v10531_v46, %v10535_v16  ;;  %v10523_v31 = vld [vmem:[%s24308_s16 + $0xb58] sm:$0xff] }
 0x903   :  { %13863 = vmatpush1.bf16.msra.mxu1 %v16162_v56  ;;  %13823 = vmatprep.subr.bf16.mxu0 %v16027_v21  ;;  %v10527_v56 = vld [vmem:[%s24308_s16 + $0xb78] sm:$0xff]  ;;  %v16114_v21 = vcombine.low %v10403_v44, %v10407_v9 }
 0x904   :  { %13864 = vmatprep.subr.bf16.mxu1 %v16155_v12  ;;  %v16242_v12 = vcombine.low %v10531_v46, %v10535_v16  ;;  %v16235_v15 = vcombine.high %v10523_v31, %v10527_v56  ;;  %v10391_v29 = vld [vmem:[%s24308_s16 + $0x738] sm:$0xff] }
 0x905   :  { %v16099_v39 = vcombine.high %v10387_v34, %v10391_v29  ;;  %v10379_v20 = vld [vmem:[%s24308_s16 + $0x6d8] sm:$0xff] }
 0x906   :  { %13824 = vmatpush1.bf16.msra.mxu0 %v16026_v62  ;;  %v10515_v62 = vld [vmem:[%s24308_s16 + $0xb18] sm:$0xff] }
 0x907   :  { %13865 = vmatpush1.bf16.msra.mxu1 %v16154_v63  ;;  %13825 = vmatprep.subr.bf16.mxu0 %v16019_v27  ;;  %v10519_v63 = vld [vmem:[%s24308_s16 + $0xb38] sm:$0xff]  ;;  %v16106_v27 = vcombine.low %v10395_v35, %v10399_v54 }
 0x908   :  { %13866 = vmatprep.subr.bf16.mxu1 %v16147_v32  ;;  %v16234_v32 = vcombine.low %v10523_v31, %v10527_v56  ;;  %v16227_v23 = vcombine.high %v10515_v62, %v10519_v63  ;;  %v10383_v55 = vld [vmem:[%s24308_s16 + $0x6f8] sm:$0xff] }
 0x909   :  { %v16091_v1 = vcombine.high %v10379_v20, %v10383_v55  ;;  %v10371_v49 = vld [vmem:[%s24308_s16 + $0x698] sm:$0xff] }
 0x90a   :  { %13826 = vmatpush1.bf16.msra.mxu0 %v16018_v22  ;;  %v10507_v22 = vld [vmem:[%s24308_s16 + $0xad8] sm:$0xff] }
 0x90b   :  { %13867 = vmatpush1.bf16.msra.mxu1 %v16146_v57  ;;  %13827 = vmatprep.subr.bf16.mxu0 %v16011_v2  ;;  %v10511_v57 = vld [vmem:[%s24308_s16 + $0xaf8] sm:$0xff]  ;;  %v16098_v2 = vcombine.low %v10387_v34, %v10391_v29 }
 0x90c   :  { %13868 = vmatprep.subr.bf16.mxu1 %v16139_v45  ;;  %v16226_v45 = vcombine.low %v10515_v62, %v10519_v63  ;;  %v16219_v10 = vcombine.high %v10507_v22, %v10511_v57  ;;  %v10375_v40 = vld [vmem:[%s24308_s16 + $0x6b8] sm:$0xff] }
 0x90d   :  { %v16083_v53 = vcombine.high %v10371_v49, %v10375_v40  ;;  %v10363_v33 = vld [vmem:[%s24308_s16 + $0x658] sm:$0xff] }
 0x90e   :  { %13828 = vmatpush1.bf16.msra.mxu0 %v16010_v60  ;;  %v10499_v60 = vld [vmem:[%s24308_s16 + $0xa98] sm:$0xff] }
 0x90f   :  { %13869 = vmatpush1.bf16.msra.mxu1 %v16138_v47  ;;  %13829 = vmatprep.subr.bf16.mxu0 %v16003_v42  ;;  %v10503_v47 = vld [vmem:[%s24308_s16 + $0xab8] sm:$0xff]  ;;  %v16090_v42 = vcombine.low %v10379_v20, %v10383_v55 }
 0x910   :  { %13870 = vmatprep.subr.bf16.mxu1 %v16131_v17  ;;  %v16218_v17 = vcombine.low %v10507_v22, %v10511_v57  ;;  %v16211_v52 = vcombine.high %v10499_v60, %v10503_v47  ;;  %v10367_v18 = vld [vmem:[%s24308_s16 + $0x678] sm:$0xff]  ;;  %v17944_v57 = vld [vmem:[%s24311_s18 + $0x70] sm:$0xff]  }
 0x911   :  { %v16075_v44 = vcombine.high %v10363_v33, %v10367_v18  ;;  %v10355_v46 = vld [vmem:[%s24308_s16 + $0x618] sm:$0xff]  ;;  %v16074_v35 = vcombine.low %v10363_v33, %v10367_v18  ;;  %v17947_v18 = vld [vmem:[%s24311_s18 + $0x28] sm:$0xff]  }
 0x912   :  { %13830 = vmatpush1.bf16.msra.mxu0 %v16002_v58  ;;  %v10491_v58 = vld [vmem:[%s24308_s16 + $0xa58] sm:$0xff] }
 0x913   :  { %13871 = vmatpush1.bf16.msra.mxu1 %v16130_v51  ;;  %13831 = vmatprep.subr.bf16.mxu0 %v16123_v7  ;;  %v10495_v51 = vld [vmem:[%s24308_s16 + $0xa78] sm:$0xff]  ;;  %v16082_v7 = vcombine.low %v10371_v49, %v10375_v40 }
 0x914   :  { %13872 = vmatprep.subr.bf16.mxu1 %v16251_v3  ;;  %v16210_v3 = vcombine.low %v10499_v60, %v10503_v47  ;;  %v16203_v9 = vcombine.high %v10491_v58, %v10495_v51  ;;  %v10359_v16 = vld [vmem:[%s24308_s16 + $0x638] sm:$0xff]  ;;  %v16202_v54 = vcombine.low %v10491_v58, %v10495_v51 }
 0x915   :  { %v16067_v31 = vcombine.high %v10355_v46, %v10359_v16  ;;  %v17942_v63 = vld [vmem:[%s24311_s18 + $0x78] sm:$0xff]  }
 0x916   :  { %13832 = vmatpush2.bf16.msra.mxu0 %v16122_v6  ;;  %v10483_v6 = vld [vmem:[%s24308_s16 + $0xa18] sm:$0xff] }
 0x917   :  { %13873 = vmatpush2.bf16.msra.mxu1 %v16250_v36  ;;  %13833 = vmatprep.subr.bf16.mxu0 %v16115_v50  ;;  %v10487_v36 = vld [vmem:[%s24308_s16 + $0xa38] sm:$0xff]  ;;  %v23925_v50 = vld [vmem:[%s24310_s17] sm:$0xff] }
 0x918   :  { %13874 = vmatprep.subr.bf16.mxu1 %v16243_v13  ;;  %v10693_v13 = vrot.slane %v23925_v50, %v20405_v5  ;;  %v10697_v56 = vrot.slane %v23925_v50, %v21513_v43  ;;  %v16194_v34 = vcombine.low %v10483_v6, %v10487_v36  ;;  %v10587_v20 = vld [vmem:[%s24308_s16 + $0xd58] sm:$0xff] }
 0x91a   :  { %13834 = vmatpush2.bf16.msra.mxu0 %v16114_v21  ;;  %v16195_v21 = vcombine.high %v10483_v6, %v10487_v36  ;;  %v13481_v5 = vadd.f32 %v23539_v48, %v10693_v13  ;;  %v13483_v43 = vadd.f32 %v23549_v14, %v10697_v56  ;;  %v10599_v48 = vld [vmem:[%s24308_s16 + $0xdb8] sm:$0xff] }
 0x91b   :  { %13875 = vmatpush2.bf16.msra.mxu1 %v16242_v12  ;;  %13835 = vmatprep.subr.bf16.mxu0 %v16107_v37  ;;  %v10603_v12 = vld [vmem:[%s24308_s16 + $0xdd8] sm:$0xff] }
 0x91c   :  { %13876 = vmatprep.subr.bf16.mxu1 %v16235_v15  ;;  %v10607_v37 = vld [vmem:[%s24308_s16 + $0xdf8] sm:$0xff]  ;;  %v16066_v15 = vcombine.low %v10355_v46, %v10359_v16  ;;  %v13522_v62 = vadd.f32 %v23748_v30, %v13481_v5  ;;  %v17949_v16 = vld [vmem:[%s24311_s18 + $0x20] sm:$0xff]  }
 0x91d   :  { %v16315_v29 = vcombine.high %v10603_v12, %v10607_v37  ;;  %v17943_v14 = vld [vmem:[%s24311_s18 + $0x38] sm:$0xff]  }
 0x91e   :  { %13836 = vmatpush2.bf16.msra.mxu0 %v16106_v27  ;;  %v10595_v27 = vld [vmem:[%s24308_s16 + $0xd98] sm:$0xff]  ;;  %v13563_v30 = vadd.f32 %v23750_v24, %v13522_v62 }
 0x91f   :  { %13877 = vmatpush2.bf16.msra.mxu1 %v16234_v32  ;;  %13837 = vmatprep.subr.bf16.mxu0 %v16099_v39  ;;  %v13524_v32 = vadd.f32 %v23761_v61, %v13483_v43  ;;  %v16314_v39 = vcombine.low %v10603_v12, %v10607_v37  ;;  %v10591_v61 = vld [vmem:[%s24308_s16 + $0xd78] sm:$0xff]  ;;  %v16306_v22 = vcombine.low %v10595_v27, %v10599_v48 }
 0x920   :  { %13878 = vmatprep.subr.bf16.mxu1 %v16227_v23  ;;  %v16307_v23 = vcombine.high %v10595_v27, %v10599_v48  ;;  %v16299_v49 = vcombine.high %v10587_v20, %v10591_v61  ;;  %v17950_v36 = vld [vmem:[%s24311_s18 + $0x58] sm:$0xff]   ;;  %v17955_v27 = vld [vmem:[%s24311_s18 + $0x8] sm:$0xff]  }
 0x921   :  { %v13565_v24 = vadd.f32 %v23763_v8, %v13524_v32  ;;  %v10563_v13 = vld [vmem:[%s24308_s16 + $0xc98] sm:$0xff]  ;;  %v17956_v32 = vld [vmem:[%s24311_s18 + $0x40] sm:$0xff]  }
 0x922   :  { %13838 = vmatpush2.bf16.msra.mxu0 %v16098_v2  ;;  %v10555_v12 = vld [vmem:[%s24308_s16 + $0xc58] sm:$0xff] }
 0x923   :  { %13879 = vmatpush2.bf16.msra.mxu1 %v16226_v45  ;;  %13839 = vmatprep.subr.bf16.mxu0 %v16091_v1  ;;  %v14091_v1 = vpack.c.bf16 %v23580_v41, %v23580_v41  ;;  %v10583_v41 = vld [vmem:[%s24308_s16 + $0xd38] sm:$0xff] }
 0x924   :  { %13880 = vmatprep.subr.bf16.mxu1 %v16219_v10  ;;  %v17945_v10 = vld [vmem:[%s24311_s18 + $0x30] sm:$0xff]   ;;  %v10559_v37 = vld [vmem:[%s24308_s16 + $0xc78] sm:$0xff] }
 0x925   :  { %v10547_v43 = vld [vmem:[%s24308_s16 + $0xc18] sm:$0xff] }
 0x926   :  { %13840 = vmatpush2.bf16.msra.mxu0 %v16090_v42  ;;  %v10551_v62 = vld [vmem:[%s24308_s16 + $0xc38] sm:$0xff] }
 0x927   :  { %13881 = vmatpush2.bf16.msra.mxu1 %v16218_v17  ;;  %13841 = vmatprep.subr.bf16.mxu0 %v16083_v53  ;;  %v16259_v48 = vcombine.high %v10547_v43, %v10551_v62 }
 0x928   :  { %13882 = vmatprep.subr.bf16.mxu1 %v16211_v52  ;;  %v16298_v52 = vcombine.low %v10587_v20, %v10591_v61  ;;  %v10659_v61 = vld [vmem:[%s24308_s16 + $0xf98] sm:$0xff] }
 0x92a   :  { %13842 = vmatpush2.bf16.msra.mxu0 %v16082_v7  ;;  %v17948_v7 = vld [vmem:[%s24311_s18 + $0x60] sm:$0xff]  }
 0x92b   :  { %13883 = vmatpush2.bf16.msra.mxu1 %v16210_v3  ;;  %13843 = vmatprep.subr.bf16.mxu0 %v16075_v44  ;;  %v10571_v3 = vld [vmem:[%s24308_s16 + $0xcd8] sm:$0xff] }
 0x92c   :  { %13884 = vmatprep.subr.bf16.mxu1 %v16203_v9  ;;  %v10575_v44 = vld [vmem:[%s24308_s16 + $0xcf8] sm:$0xff] }
 0x92d   :  { %v16283_v6 = vcombine.high %v10571_v3, %v10575_v44 }
 0x92e   :  { %13844 = vmatpush2.bf16.msra.mxu0 %v16074_v35  ;;  %v10567_v35 = vld [vmem:[%s24308_s16 + $0xcb8] sm:$0xff] }
 0x92f   :  { %13885 = vmatpush2.bf16.msra.mxu1 %v16202_v54  ;;  %13845 = vmatprep.subr.bf16.mxu0 %v16067_v31  ;;  %v16282_v54 = vcombine.low %v10571_v3, %v10575_v44  ;;  %v17951_v31 = vld [vmem:[%s24311_s18 + $0x18] sm:$0xff]   ;;  %v16275_v56 = vcombine.high %v10563_v13, %v10567_v35  ;;  %v16274_v5 = vcombine.low %v10563_v13, %v10567_v35  ;;  %v17981_v44 = vld [vmem:[%s24311_s18 + $0x120] sm:$0xff]  }
 0x930   :  { %13886 = vmatprep.subr.bf16.mxu1 %v16195_v21  ;;  %v17952_v21 = vld [vmem:[%s24311_s18 + $0x50] sm:$0xff]   ;;  %v17983_v35 = vld [vmem:[%s24311_s18 + $0x118] sm:$0xff]  }
 0x932   :  { %13846 = vmatpush2.bf16.msra.mxu0 %v16066_v15  ;;  %v17953_v15 = vld [vmem:[%s24311_s18 + $0x10] sm:$0xff]  }
 0x933   :  { %13887 = vmatpush2.bf16.msra.mxu1 %v16194_v34  ;;  %13897 = vmatprep.subr.bf16.mxu0 %v16315_v29  ;;  %v16267_v34 = vcombine.high %v10555_v12, %v10559_v37  ;;  %v17954_v29 = vld [vmem:[%s24311_s18 + $0x48] sm:$0xff]  }
 0x934   :  { %16845 = vmatprep.subr.bf16.mxu1 %v17942_v63  ;;  %v16266_v63 = vcombine.low %v10555_v12, %v10559_v37  ;;  %v17985_v37 = vld [vmem:[%s24311_s18 + $0x110] sm:$0xff]  }
 0x935   :  { %v13603_v55 = vpop.f32.mrf.mxu0  ;;  %13848 = vmatmul.mubr.bf16.vlgmr.msra.gmra.mxu0 %v22676_v59 }
 0x936   :  { %v13604_v2 = vadd.f32 %v13603_v55, %v13563_v30  ;;  %v23965_v45 = vpop.f32.mrf.mxu1  ;;  %13889 = vmatmul.mubr.bf16.vlgmr.msra.gmra.mxu1 %v22792_v25  ;;  %13898 = vmatpush1.bf16.msra.mxu0 %v16314_v39  ;;  %v17946_v25 = vld [vmem:[%s24311_s18 + $0x68] sm:$0xff]   ;;  %v10667_v39 = vld [vmem:[%s24308_s16 + $0xfd8] sm:$0xff]  ;;  %v16258_v30 = vcombine.low %v10547_v43, %v10551_v62 }
 0x937   :  { %13929 = vmatprep.mubr.bf16.mxu0 %v22913_v0  ;;  %16846 = vmatpush3.bf16.msra.mxu1 %v17943_v14  ;;  %v13605_v59 = vpop.f32.mrf.mxu0  ;;  %v10579_v0 = vld [vmem:[%s24308_s16 + $0xd18] sm:$0xff]  ;;  %v17987_v62 = vld [vmem:[%s24311_s18 + $0x108] sm:$0xff]  }
 0x938   :  { %vm13940_vm8 = vcmp.ge.f32.partialorder %v13604_v2, 0.0  ;;  %v13948_v8 = vmul.f32 0.01, %v13604_v2  ;;  %14521 = vmatprep.mubr.bf16.mxu1 %v14091_v1  ;;  %v13606_v40 = vadd.f32 %v13605_v59, %v13565_v24  ;;  %v23974_v60 = vpop.f32.mrf.mxu1  ;;  %13899 = vmatprep.subr.bf16.mxu0 %v16307_v23  ;;  %v16291_v58 = vcombine.high %v10579_v0, %v10583_v41  ;;  %v10671_v14 = vld [vmem:[%s24308_s16 + $0xff8] sm:$0xff]  ;;  %v17957_v23 = vld [vmem:[%s24311_s18] sm:$0xff]  }
 0x939   :  { %v13607_v47 = vpop.f32.mrf.mxu0  ;;  %16847 = vmatprep.subr.bf16.mxu1 %v17944_v57  ;;  %v16290_v46 = vcombine.low %v10579_v0, %v10583_v41  ;;  %v16379_v20 = vcombine.high %v10667_v39, %v10671_v14  ;;  %v10663_v55 = vld [vmem:[%s24308_s16 + $0xfb8] sm:$0xff]  ;;  %v16378_v57 = vcombine.low %v10667_v39, %v10671_v14  ;;  %v18009_v1 = vld [vmem:[%s24312_s21] sm:$0xff]  ;;  %v17977_v0 = vld [vmem:[%s24311_s18 + $0x130] sm:$0xff]  }
 0x93a   :  { %v23985_v42 = vsel %vm13940_vm8, %v13604_v2, %v13948_v8  ;;  %vm13941_vm9 = vcmp.ge.f32.partialorder %v13606_v40, 0.0  ;;  %v13949_v17 = vmul.f32 0.01, %v13606_v40  ;;  %v13648_v53 = vpop.f32.mrf.mxu1  ;;  %13900 = vmatpush1.bf16.msra.mxu0 %v16306_v22  ;;  %v17974_v22 = vld [vmem:[%s24311_s18 + $0x178] sm:$0xff]   ;;  %v16371_v24 = vcombine.high %v10659_v61, %v10663_v55  ;;  %v17976_v8 = vld [vmem:[%s24311_s18 + $0x170] sm:$0xff]  }
 0x93b   :  { %14651 = vst [vmem:[%s24312_s21 + $0x10] sm:$0xff] %v23985_v42  ;;  %16848 = vmatpush3.bf16.msra.mxu1 %v17945_v10  ;;  %v13608_v33 = vpop.f32.mrf.mxu0  ;;  %13901 = vmatprep.subr.bf16.mxu0 %v16299_v49  ;;  %v17975_v2 = vld [vmem:[%s24311_s18 + $0x138] sm:$0xff]   ;;  %v14090_v59 = vpack.c.bf16 %v18009_v1, %v18009_v1  ;;  %v17960_v14 = vld [vmem:[%s24311_s18 + $0xf0] sm:$0xff]   ;;  %v17964_v1 = vld [vmem:[%s24311_s18 + $0xe0] sm:$0xff]  }
 0x93c   :  { %v13649_v51 = vpop.f32.mrf.mxu1  ;;  %16849 = vmatprep.subr.bf16.mxu1 %v17946_v25  ;;  %v24004_v9 = vsel %vm13941_vm9, %v13606_v40, %v13949_v17  ;;  %v10651_v10 = vld [vmem:[%s24308_s16 + $0xf58] sm:$0xff]  ;;  %v16370_v40 = vcombine.low %v10659_v61, %v10663_v55  ;;  %v17978_v17 = vld [vmem:[%s24311_s18 + $0x168] sm:$0xff]   ;;  %v17961_v61 = vld [vmem:[%s24311_s18 + $0xb0] sm:$0xff]  }
 0x93d   :  { %14652 = vst [vmem:[%s24312_s21 + $0x18] sm:$0xff] %v24004_v9  ;;  %v10655_v49 = vld [vmem:[%s24308_s16 + $0xf78] sm:$0xff]  ;;  %v17979_v33 = vld [vmem:[%s24311_s18 + $0x128] sm:$0xff]   ;;  %v17980_v51 = vld [vmem:[%s24311_s18 + $0x160] sm:$0xff]  }
 0x93e   :  { %13902 = vmatpush1.bf16.msra.mxu0 %v16298_v52  ;;  %v16363_v25 = vcombine.high %v10651_v10, %v10655_v49  ;;  %v10643_v41 = vld [vmem:[%s24308_s16 + $0xf18] sm:$0xff]  ;;  %v16362_v53 = vcombine.low %v10651_v10, %v10655_v49  ;;  %v17965_v10 = vld [vmem:[%s24311_s18 + $0xa0] sm:$0xff]  }
 0x93f   :  { %16850 = vmatpush3.bf16.msra.mxu1 %v17947_v18  ;;  %13903 = vmatprep.subr.bf16.mxu0 %v16291_v58  ;;  %v10647_v47 = vld [vmem:[%s24308_s16 + $0xf38] sm:$0xff] }
 0x940   :  { %16851 = vmatprep.subr.bf16.mxu1 %v17948_v7  ;;  %v16355_v52 = vcombine.high %v10643_v41, %v10647_v47  ;;  %v10635_v18 = vld [vmem:[%s24308_s16 + $0xed8] sm:$0xff]  ;;  %v16354_v7 = vcombine.low %v10643_v41, %v10647_v47  ;;  %v17971_v41 = vld [vmem:[%s24311_s18 + $0x88] sm:$0xff]   ;;  %v17972_v47 = vld [vmem:[%s24311_s18 + $0xc0] sm:$0xff]  }
 0x941   :  { %v10639_v58 = vld [vmem:[%s24308_s16 + $0xef8] sm:$0xff] }
 0x942   :  { %13904 = vmatpush1.bf16.msra.mxu0 %v16290_v46  ;;  %v16347_v3 = vcombine.high %v10635_v18, %v10639_v58  ;;  %v10627_v46 = vld [vmem:[%s24308_s16 + $0xe98] sm:$0xff] }
 0x943   :  { %16852 = vmatpush3.bf16.msra.mxu1 %v17949_v16  ;;  %13905 = vmatprep.subr.bf16.mxu0 %v16283_v6  ;;  %v10631_v16 = vld [vmem:[%s24308_s16 + $0xeb8] sm:$0xff] }
 0x944   :  { %16853 = vmatprep.subr.bf16.mxu1 %v17950_v36  ;;  %v17982_v6 = vld [vmem:[%s24311_s18 + $0x158] sm:$0xff]   ;;  %v16346_v36 = vcombine.low %v10635_v18, %v10639_v58  ;;  %v16339_v13 = vcombine.high %v10627_v46, %v10631_v16  ;;  %v17992_v18 = vld [vmem:[%s24311_s18 + $0x1f0] sm:$0xff]  }
 0x945   :  { %v17959_v39 = vld [vmem:[%s24311_s18 + $0xb8] sm:$0xff]   ;;  %v17993_v58 = vld [vmem:[%s24311_s18 + $0x1b0] sm:$0xff]  }
 0x946   :  { %13906 = vmatpush1.bf16.msra.mxu0 %v16282_v54  ;;  %v10619_v54 = vld [vmem:[%s24308_s16 + $0xe58] sm:$0xff] }
 0x947   :  { %16854 = vmatpush3.bf16.msra.mxu1 %v17951_v31  ;;  %13907 = vmatprep.subr.bf16.mxu0 %v16275_v56  ;;  %v10623_v31 = vld [vmem:[%s24308_s16 + $0xe78] sm:$0xff]  ;;  %v17984_v56 = vld [vmem:[%s24311_s18 + $0x150] sm:$0xff]  }
 0x948   :  { %16855 = vmatprep.subr.bf16.mxu1 %v17952_v21  ;;  %v16338_v21 = vcombine.low %v10627_v46, %v10631_v16  ;;  %v16331_v12 = vcombine.high %v10619_v54, %v10623_v31  ;;  %v17966_v49 = vld [vmem:[%s24311_s18 + $0xd8] sm:$0xff]   ;;  %v10701_v46 = vrot.slane %v23925_v50, %v10106_v4 }
 0x949   :  { %v17999_v16 = vld [vmem:[%s24311_s18 + $0x198] sm:$0xff]  }
 0x94a   :  { %13908 = vmatpush1.bf16.msra.mxu0 %v16274_v5  ;;  %v10611_v5 = vld [vmem:[%s24308_s16 + $0xe18] sm:$0xff] }
 0x94b   :  { %16856 = vmatpush3.bf16.msra.mxu1 %v17953_v15  ;;  %13909 = vmatprep.subr.bf16.mxu0 %v16267_v34  ;;  %v10615_v15 = vld [vmem:[%s24308_s16 + $0xe38] sm:$0xff]  ;;  %v17986_v34 = vld [vmem:[%s24311_s18 + $0x148] sm:$0xff]  }
 0x94c   :  { %16857 = vmatprep.subr.bf16.mxu1 %v17954_v29  ;;  %v16330_v29 = vcombine.low %v10619_v54, %v10623_v31  ;;  %v16323_v43 = vcombine.high %v10611_v5, %v10615_v15 }
 0x94e   :  { %13910 = vmatpush1.bf16.msra.mxu0 %v16266_v63  ;;  %v17988_v63 = vld [vmem:[%s24311_s18 + $0x140] sm:$0xff]  }
 0x94f   :  { %16858 = vmatpush3.bf16.msra.mxu1 %v17955_v27  ;;  %13911 = vmatprep.subr.bf16.mxu0 %v16259_v48  ;;  %v16322_v27 = vcombine.low %v10611_v5, %v10615_v15  ;;  %v17958_v48 = vld [vmem:[%s24311_s18 + $0xf8] sm:$0xff]  }
 0x950   :  { %16859 = vmatprep.subr.bf16.mxu1 %v17956_v32  ;;  %v17989_v32 = vld [vmem:[%s24311_s18 + $0x100] sm:$0xff]  }
 0x952   :  { %13912 = vmatpush1.bf16.msra.mxu0 %v16258_v30  ;;  %v14093_v30 = vpack.c.bf16 %v24004_v9, %v24004_v9 }
 0x953   :  { %16860 = vmatpush3.bf16.msra.mxu1 %v17957_v23  ;;  %13913 = vmatprep.subr.bf16.mxu0 %v16379_v20 }
 0x954   :  { %16889 = vmatprep.subr.bf16.mxu1 %v17974_v22  ;;  %v17962_v22 = vld [vmem:[%s24311_s18 + $0xe8] sm:$0xff]  }
 0x956   :  { %14522 = vmatmul.mubr.bf16.vlgmr.msra.gmra.mxu1 %v14090_v59  ;;  %13914 = vmatpush2.bf16.msra.mxu0 %v16378_v57 }
 0x957   :  { %13915 = vmatprep.subr.bf16.mxu0 %v16371_v24  ;;  %16890 = vmatpush3.bf16.msra.mxu1 %v17975_v2 }
 0x958   :  { %16891 = vmatprep.subr.bf16.mxu1 %v17976_v8  ;;  %v17967_v8 = vld [vmem:[%s24311_s18 + $0x98] sm:$0xff]  }
 0x95a   :  { %13916 = vmatpush2.bf16.msra.mxu0 %v16370_v40  ;;  %v17968_v40 = vld [vmem:[%s24311_s18 + $0xd0] sm:$0xff]  }
 0x95b   :  { %13917 = vmatprep.subr.bf16.mxu0 %v16363_v25  ;;  %16892 = vmatpush3.bf16.msra.mxu1 %v17977_v0  ;;  %v17969_v25 = vld [vmem:[%s24311_s18 + $0x90] sm:$0xff]   ;;  %v17970_v0 = vld [vmem:[%s24311_s18 + $0xc8] sm:$0xff]  }
 0x95c   :  { %16893 = vmatprep.subr.bf16.mxu1 %v17978_v17  ;;  %v17973_v17 = vld [vmem:[%s24311_s18 + $0x80] sm:$0xff]  }
 0x95e   :  { %13918 = vmatpush2.bf16.msra.mxu0 %v16362_v53  ;;  %v14092_v53 = vpack.c.bf16 %v23985_v42, %v23985_v42  ;;  %v17994_v42 = vld [vmem:[%s24311_s18 + $0x1e8] sm:$0xff]  }
 0x95f   :  { %13919 = vmatprep.subr.bf16.mxu0 %v16355_v52  ;;  %16894 = vmatpush3.bf16.msra.mxu1 %v17979_v33  ;;  %v17990_v52 = vld [vmem:[%s24311_s18 + $0x1f8] sm:$0xff]  }
 0x960   :  { %16895 = vmatprep.subr.bf16.mxu1 %v17980_v51  ;;  %v17991_v33 = vld [vmem:[%s24311_s18 + $0x1b8] sm:$0xff]   ;;  %v17995_v51 = vld [vmem:[%s24311_s18 + $0x1a8] sm:$0xff]  }
 0x962   :  { %13920 = vmatpush2.bf16.msra.mxu0 %v16354_v7  ;;  %v17996_v7 = vld [vmem:[%s24311_s18 + $0x1e0] sm:$0xff]  }
 0x963   :  { %13921 = vmatprep.subr.bf16.mxu0 %v16347_v3  ;;  %16896 = vmatpush3.bf16.msra.mxu1 %v17981_v44  ;;  %v17997_v3 = vld [vmem:[%s24311_s18 + $0x1a0] sm:$0xff]   ;;  %v17998_v44 = vld [vmem:[%s24311_s18 + $0x1d8] sm:$0xff]  }
 0x964   :  { %16897 = vmatprep.subr.bf16.mxu1 %v17982_v6  ;;  %v10705_v6 = vrot.slane %v23925_v50, %v10110_v26  ;;  %v18001_v26 = vld [vmem:[%s24311_s18 + $0x190] sm:$0xff]  }
 0x966   :  { %13922 = vmatpush2.bf16.msra.mxu0 %v16346_v36  ;;  %v18000_v36 = vld [vmem:[%s24311_s18 + $0x1d0] sm:$0xff]  }
 0x967   :  { %13923 = vmatprep.subr.bf16.mxu0 %v16339_v13  ;;  %16898 = vmatpush3.bf16.msra.mxu1 %v17983_v35  ;;  %v13645_v13 = vadd.f32 %v23965_v45, %v10701_v46  ;;  %v13647_v35 = vadd.f32 %v23974_v60, %v10705_v6  ;;  %v16380_v46 = vld [vmem:[%s24313_s19] ss:$0 sm:$0xff] }
 0x968   :  { %16899 = vmatprep.subr.bf16.mxu1 %v17984_v56 }
 0x96a   :  { %13924 = vmatpush2.bf16.msra.mxu0 %v16338_v21 }
 0x96b   :  { %13925 = vmatprep.subr.bf16.mxu0 %v16331_v12  ;;  %16900 = vmatpush3.bf16.msra.mxu1 %v17985_v37 }
 0x96c   :  { %16901 = vmatprep.subr.bf16.mxu1 %v17986_v34  ;;  %v18002_v34 = vld [vmem:[%s24311_s18 + $0x1c8] sm:$0xff]  }
 0x96e   :  { %13926 = vmatpush2.bf16.msra.mxu0 %v16330_v29 }
 0x96f   :  { %13927 = vmatprep.subr.bf16.mxu0 %v16323_v43  ;;  %16902 = vmatpush3.bf16.msra.mxu1 %v17987_v62  ;;  %v18003_v43 = vld [vmem:[%s24311_s18 + $0x188] sm:$0xff]  }
 0x970   :  { %16903 = vmatprep.subr.bf16.mxu1 %v17988_v63 }
 0x972   :  { %13928 = vmatpush2.bf16.msra.mxu0 %v16322_v27 }
 0x973   :  { %16867 = vmatprep.subr.bf16.mxu0 %v17958_v48  ;;  %16904 = vmatpush3.bf16.msra.mxu1 %v17989_v32  ;;  %v18004_v32 = vld [vmem:[%s24311_s18 + $0x1c0] sm:$0xff]  }
 0x975   :  { %v24165_v23 = vpop.f32.mrf.mxu0  ;;  %13930 = vmatmul.mubr.bf16.vlgmr.msra.gmra.mxu0 %v22915_v11  ;;  %v17963_v11 = vld [vmem:[%s24311_s18 + $0xa8] sm:$0xff]  }
 0x976   :  { %v24168_v20 = vpop.f32.mrf.mxu1  ;;  %16868 = vmatpush3.bf16.msra.mxu0 %v17959_v39  ;;  %14561 = vmatprep.mubr.bf16.mxu0 %v14093_v30  ;;  %v13686_v4 = vadd.f32 %v24165_v23, %v13645_v13  ;;  %v18005_v39 = vld [vmem:[%s24311_s18 + $0x180] sm:$0xff]  }
 0x977   :  { %v13687_v55 = vpop.f32.mrf.mxu0  ;;  %16869 = vmatprep.subr.bf16.mxu0 %v17960_v14 }
 0x978   :  { %v13728_v57 = vpop.f32.mrf.mxu1  ;;  %v13688_v54 = vadd.f32 %v13687_v55, %v13647_v35  ;;  %v13727_v31 = vadd.f32 %v24168_v20, %v13686_v4 }
 0x979   :  { %v13689_v9 = vpop.f32.mrf.mxu0 }
 0x97a   :  { %v13730_v24 = vpop.f32.mrf.mxu1  ;;  %16870 = vmatpush3.bf16.msra.mxu0 %v17961_v61  ;;  %v13729_v21 = vadd.f32 %v13728_v57, %v13688_v54 }
 0x97b   :  { %v13690_v2 = vpop.f32.mrf.mxu0  ;;  %16871 = vmatprep.subr.bf16.mxu0 %v17962_v22 }
 0x97c   :  { %v13731_v59 = vpop.f32.mrf.mxu1 }
 0x97e   :  { %16872 = vmatpush3.bf16.msra.mxu0 %v17963_v11 }
 0x97f   :  { %16873 = vmatprep.subr.bf16.mxu0 %v17964_v1 }
 0x982   :  { %16874 = vmatpush3.bf16.msra.mxu0 %v17965_v10 }
 0x983   :  { %16875 = vmatprep.subr.bf16.mxu0 %v17966_v49 }
 0x986   :  { %16876 = vmatpush3.bf16.msra.mxu0 %v17967_v8 }
 0x987   :  { %16877 = vmatprep.subr.bf16.mxu0 %v17968_v40  ;;  %v10709_v40 = vrot.slane %v23925_v50, %v10114_v19 }
 0x98a   :  { %16878 = vmatpush3.bf16.msra.mxu0 %v17969_v25  ;;  %v10713_v25 = vrot.slane %v23925_v50, %v10118_v28 }
 0x98b   :  { %16879 = vmatprep.subr.bf16.mxu0 %v17970_v0 }
 0x98e   :  { %16880 = vmatpush3.bf16.msra.mxu0 %v17971_v41 }
 0x98f   :  { %16881 = vmatprep.subr.bf16.mxu0 %v17972_v47 }
 0x992   :  { %16882 = vmatpush3.bf16.msra.mxu0 %v17973_v17 }
 0x993   :  { %16911 = vmatprep.subr.bf16.mxu0 %v17990_v52 }
 0x995   :  { %14562 = vmatmul.mubr.bf16.vlgmr.msra.gmra.mxu0 %v14092_v53 }
 0x996   :  { %16912 = vmatpush3.bf16.msra.mxu0 %v17991_v33 }
 0x997   :  { %16913 = vmatprep.subr.bf16.mxu0 %v17992_v18 }
 0x99a   :  { %16914 = vmatpush3.bf16.msra.mxu0 %v17993_v58 }
 0x99b   :  { %16915 = vmatprep.subr.bf16.mxu0 %v17994_v42 }
 0x99e   :  { %16916 = vmatpush3.bf16.msra.mxu0 %v17995_v51 }
 0x99f   :  { %16917 = vmatprep.subr.bf16.mxu0 %v17996_v7 }
 0x9a2   :  { %16918 = vmatpush3.bf16.msra.mxu0 %v17997_v3 }
 0x9a3   :  { %16919 = vmatprep.subr.bf16.mxu0 %v17998_v44 }
 0x9a6   :  { %16920 = vmatpush3.bf16.msra.mxu0 %v17999_v16 }
 0x9a7   :  { %16921 = vmatprep.subr.bf16.mxu0 %v18000_v36 }
 0x9aa   :  { %16922 = vmatpush3.bf16.msra.mxu0 %v18001_v26 }
 0x9ab   :  { %16923 = vmatprep.subr.bf16.mxu0 %v18002_v34 }
 0x9ae   :  { %16924 = vmatpush3.bf16.msra.mxu0 %v18003_v43 }
 0x9af   :  { %16925 = vmatprep.subr.bf16.mxu0 %v18004_v32 }
 0x9b2   :  { %16926 = vmatpush3.bf16.msra.mxu0 %v18005_v39 }
 0x9b5   :  { %v13767_v56 = vpop.f32.mrf.mxu0 }
 0x9b6   :  { %v13768_v12 = vadd.f32 %v13767_v56, %v13727_v31  ;;  %v13808_v37 = vpop.f32.mrf.mxu1 }
 0x9b7   :  { %v13769_v5 = vpop.f32.mrf.mxu0  ;;  %v13809_v0 = vadd.f32 %v13808_v37, %v10709_v40 }
 0x9b8   :  { %vm13942_vm10 = vcmp.ge.f32.partialorder %v13768_v12, 0.0  ;;  %v13950_v45 = vmul.f32 0.01, %v13768_v12  ;;  %v13770_v15 = vadd.f32 %v13769_v5, %v13729_v21  ;;  %v13810_v60 = vpop.f32.mrf.mxu1 }
 0x9b9   :  { %v13771_v29 = vpop.f32.mrf.mxu0  ;;  %v13811_v41 = vadd.f32 %v13810_v60, %v10713_v25 }
 0x9ba   :  { %v13958_v62 = vsel %vm13942_vm10, %v13768_v12, %v13950_v45  ;;  %vm13943_vm11 = vcmp.ge.f32.partialorder %v13770_v15, 0.0  ;;  %v13951_v63 = vmul.f32 0.01, %v13770_v15  ;;  %v13812_v27 = vpop.f32.mrf.mxu1 }
 0x9bb   :  { %14653 = vst [vmem:[%s24312_s21 + $0x20] sm:$0xff] %v13958_v62  ;;  %v13772_v48 = vpop.f32.mrf.mxu0  ;;  %v14094_v20 = vpack.c.bf16 %v13958_v62, %v13958_v62 }
 0x9bc   :  { %v13813_v14 = vpop.f32.mrf.mxu1  ;;  %v13959_v30 = vsel %vm13943_vm11, %v13770_v15, %v13951_v63 }
 0x9bd   :  { %v14095_v23 = vpack.c.bf16 %v13959_v30, %v13959_v30  ;;  %14654 = vst [vmem:[%s24312_s21 + $0x28] sm:$0xff] %v13959_v30 }
 0x9bf   :  { %14601 = vmatprep.mubr.bf16.mxu1 %v14095_v23 }
 0x9c0   :  { %14602 = vmatmul.mubr.bf16.vlgmr.msra.gmra.mxu1 %v14094_v20 }
 0x9f5   :  { %v13849_v61 = vpop.f32.mrf.mxu0 }
 0x9f6   :  { %v13890_v55 = vpop.f32.mrf.mxu1  ;;  %v13850_v47 = vadd.f32 %v13849_v61, %v13809_v0 }
 0x9f7   :  { %v13851_v22 = vpop.f32.mrf.mxu0 }
 0x9f8   :  { %v13892_v57 = vpop.f32.mrf.mxu1  ;;  %v13852_v17 = vadd.f32 %v13851_v22, %v13811_v41  ;;  %v13891_v53 = vadd.f32 %v13890_v55, %v13850_v47 }
 0x9f9   :  { %v13853_v9 = vpop.f32.mrf.mxu0 }
 0x9fa   :  { %v13894_v24 = vpop.f32.mrf.mxu1  ;;  %v13893_v33 = vadd.f32 %v13892_v57, %v13852_v17 }
 0x9fb   :  { %v13854_v11 = vpop.f32.mrf.mxu0 }
 0x9fc   :  { %v13895_v2 = vpop.f32.mrf.mxu1 }
 0xa16   :  { %v16861_v1 = vpop.f32.mrf.mxu1 }
 0xa18   :  { %v16862_v59 = vpop.f32.mrf.mxu1 }
 0xa19   :  { %v16863_v10 = vadd.f32 %v16862_v59, %v16861_v1 }
 0xa1a   :  { %v16864_v49 = vpop.f32.mrf.mxu1 }
 0xa1b   :  { %v14524_v36 = vadd.f32 %v16863_v10, %v16380_v46 }
 0xa1c   :  { %v16865_v8 = vpop.f32.mrf.mxu1 }
 0xa35   :  { %v13931_v52 = vpop.f32.mrf.mxu0 }
 0xa36   :  { %v13932_v18 = vadd.f32 %v13931_v52, %v13891_v53 }
 0xa37   :  { %v13933_v58 = vpop.f32.mrf.mxu0 }
 0xa38   :  { %vm13944_vm12 = vcmp.ge.f32.partialorder %v13932_v18, 0.0  ;;  %v13952_v42 = vmul.f32 0.01, %v13932_v18  ;;  %v13934_v51 = vadd.f32 %v13933_v58, %v13893_v33 }
 0xa39   :  { %v13935_v7 = vpop.f32.mrf.mxu0 }
 0xa3a   :  { %v13960_v3 = vsel %vm13944_vm12, %v13932_v18, %v13952_v42  ;;  %vm13945_vm13 = vcmp.ge.f32.partialorder %v13934_v51, 0.0  ;;  %v13953_v19 = vmul.f32 0.01, %v13934_v51 }
 0xa3b   :  { %14655 = vst [vmem:[%s24312_s21 + $0x30] sm:$0xff] %v13960_v3  ;;  %v13936_v38 = vpop.f32.mrf.mxu0  ;;  %v14096_v44 = vpack.c.bf16 %v13960_v3, %v13960_v3 }
 0xa3c   :  { %v13961_v28 = vsel %vm13945_vm13, %v13934_v51, %v13953_v19 }
 0xa3d   :  { %v14097_v50 = vpack.c.bf16 %v13961_v28, %v13961_v28  ;;  %14656 = vst [vmem:[%s24312_s21 + $0x38] sm:$0xff] %v13961_v28 }
 0xa3f   :  { %14641 = vmatprep.mubr.bf16.mxu0 %v14097_v50 }
 0xa40   :  { %14642 = vmatmul.mubr.bf16.vlgmr.msra.gmra.mxu0 %v14096_v44 }
 0xa55   :  { %v16883_v16 = vpop.f32.mrf.mxu0 }
 0xa57   :  { %v16884_v6 = vpop.f32.mrf.mxu0 }
 0xa58   :  { %v16885_v13 = vadd.f32 %v16884_v6, %v16883_v16 }
 0xa59   :  { %v16886_v35 = vpop.f32.mrf.mxu0 }
 0xa5a   :  { %v14564_v4 = vadd.f32 %v16885_v13, %v14524_v36 }
 0xa5b   :  { %v16887_v54 = vpop.f32.mrf.mxu0 }
 0xa80   :  { %v16905_v31 = vpop.f32.mrf.mxu1 }
 0xa82   :  { %v16906_v56 = vpop.f32.mrf.mxu1 }
 0xa83   :  { %v16907_v26 = vadd.f32 %v16906_v56, %v16905_v31 }
 0xa84   :  { %v16908_v21 = vpop.f32.mrf.mxu1 }
 0xa85   :  { %v14604_v12 = vadd.f32 %v16907_v26, %v14564_v4 }
 0xa86   :  { %v16909_v37 = vpop.f32.mrf.mxu1 }
 0xb00   :  { %v16927_v5 = vpop.f32.mrf.mxu0 }
 0xb02   :  { %v16928_v45 = vpop.f32.mrf.mxu0 }
 0xb03   :  { %v16929_v15 = vadd.f32 %v16928_v45, %v16927_v5 }
 0xb04   :  { %v16930_v60 = vpop.f32.mrf.mxu0 }
 0xb05   :  { %v14644_v34 = vadd.f32 %v16929_v15, %v14604_v12 }
 0xb06   :  { %v16931_v29 = vpop.f32.mrf.mxu0 }
 0xb07   :  { %14657 = vst [vmem:[%s24314_s20] sm:$0xff] %v14644_v34 }

</bundles_post_ra>
